<compile_context>
chip_gen: v7x
topology: tpu7x:2x2x1
jax: 0.10.0
libtpu: 0.0.40
codegen_flags: <defaults>
</compile_context>

<pallas_src>
import functools

import jax
import jax.numpy as jnp
import numpy as np
from jax.experimental import pallas as pl
from jax.experimental.pallas import tpu as pltpu

_BIG = np.int32(1 << 30)  # min-accumulator identity (never added to, so no overflow)


# -----------------------------------------------------------------------------
# Phase 1: per-row 1-D squared distances along the column axis (both masks
# fused), via a log-doubling min-plus scan on full row strips.
# -----------------------------------------------------------------------------
def _phase1_kernel(x_ref, g2_fg_ref, g2_bg_ref, *, inf):
    th, w = x_ref.shape
    is_bg = x_ref[...] == 0
    # sources for edt(x): background pixels; sources for edt(x==0): foreground.
    gf = jnp.where(is_bg, 0, inf).astype(jnp.int32)
    gb = jnp.where(is_bg, inf, 0).astype(jnp.int32)
    col = jax.lax.broadcasted_iota(jnp.int32, (th, w), 1)

    # forward (left -> right) doubling passes: after all passes
    #   gf[j] = min_{c <= j} gf0[c] + (j - c)
    k = 1
    while k < w:
        sf = pltpu.roll(gf, shift=k, axis=1)          # sf[j] = gf[j - k] (wraps j < k)
        sb = pltpu.roll(gb, shift=k, axis=1)
        valid = col >= k
        gf = jnp.minimum(gf, jnp.where(valid, sf + k, inf))
        gb = jnp.minimum(gb, jnp.where(valid, sb + k, inf))
        k *= 2
    # backward (right -> left) doubling passes over the forward result gives
    # the exact bidirectional 1-D distance.
    k = 1
    while k < w:
        sf = pltpu.roll(gf, shift=w - k, axis=1)      # sf[j] = gf[j + k] (wraps j >= w-k)
        sb = pltpu.roll(gb, shift=w - k, axis=1)
        valid = col < (w - k)
        gf = jnp.minimum(gf, jnp.where(valid, sf + k, inf))
        gb = jnp.minimum(gb, jnp.where(valid, sb + k, inf))
        k *= 2

    # Square (stays exact in int32; sentinel inf = h + w).
    g2_fg_ref[...] = gf * gf
    g2_bg_ref[...] = gb * gb


# -----------------------------------------------------------------------------
# Phase 2: min-plus reduction over source rows r, accumulators carried in vregs.
#   out[i, j] = tanh((sqrt(min_r((i-r)^2 + g2_fg[r, j]))
#                     - sqrt(min_r((i-r)^2 + g2_bg[r, j]))) / sigma)
# -----------------------------------------------------------------------------
def _phase2_kernel(g2_fg_ref, g2_bg_ref, out_ref, *, group, inv_sigma):
    h = g2_fg_ref.shape[0]
    ti, w = out_ref.shape
    # Global output-row coordinates of this tile, laid down the sublane axis.
    i_coord = pl.program_id(0) * ti + jax.lax.broadcasted_iota(jnp.int32, (ti, 1), 0)

    def body(g, carry):
        acc_fg, acc_bg = carry
        base = pl.multiple_of(g * group, group)
        rows_fg = g2_fg_ref[pl.ds(base, group), :]    # one aligned (group, w) load
        rows_bg = g2_bg_ref[pl.ds(base, group), :]
        for l in range(group):                        # unrolled; d2 shared by both EDTs
            d = i_coord - (base + l)
            d2 = d * d                                # [ti, 1] int32
            acc_fg = jnp.minimum(acc_fg, d2 + rows_fg[l:l + 1, :])
            acc_bg = jnp.minimum(acc_bg, d2 + rows_bg[l:l + 1, :])
        return acc_fg, acc_bg

    init = jnp.full((ti, w), _BIG, jnp.int32)
    acc_fg, acc_bg = jax.lax.fori_loop(0, h // group, body, (init, init))

    dist = (jnp.sqrt(acc_fg.astype(jnp.float32))
            - jnp.sqrt(acc_bg.astype(jnp.float32)))
    out_ref[...] = jnp.tanh(dist * inv_sigma)


def _pick_rows(n, cap):
    """Largest multiple of 8 that divides n and is <= cap (n itself if n % 8 != 0)."""
    if n % 8 != 0:
        return n
    t = min(n, max(8, (cap // 8) * 8))
    while n % t:
        t -= 8
    return t


@functools.partial(jax.jit, static_argnames=("sigma", "tile_i", "tile_h"))
def signed_distance_transform(x, sigma=10.0, tile_i=None, tile_h=None):
    """tanh((edt(x) - edt(x == 0)) / sigma) for a 2-D label mask x."""
    h, w = x.shape
    if (h + w) ** 2 + (h - 1) ** 2 >= 2 ** 31:
        raise ValueError("image too large for exact int32 squared distances")
    # 1-D sentinel: inf^2 > (h-1)^2 + (w-1)^2 (no-source rows/images saturate to +/-1
    # after tanh rather than scipy's convention).
    inf = h + w

    # ---- phase 1: row strips, both 1-D EDTs fused, lane-axis log-doubling scan.
    th = _pick_rows(h, 256) if tile_h is None else tile_h
    if h % th:
        raise ValueError(f"tile_h={th} must divide H={h}")
    item = jnp.dtype(x.dtype).itemsize
    p1_vmem = int(2 * th * w * item + 10 * th * w * 4 + (4 << 20))
    g2_fg, g2_bg = pl.pallas_call(
        functools.partial(_phase1_kernel, inf=inf),
        out_shape=(jax.ShapeDtypeStruct((h, w), jnp.int32),
                   jax.ShapeDtypeStruct((h, w), jnp.int32)),
        grid_spec=pltpu.PrefetchScalarGridSpec(
            num_scalar_prefetch=0,
            grid=(h // th,),
            in_specs=[pl.BlockSpec((th, w), lambda i: (i, 0))],
            out_specs=[pl.BlockSpec((th, w), lambda i: (i, 0)),
                       pl.BlockSpec((th, w), lambda i: (i, 0))],
        ),
        compiler_params=pltpu.CompilerParams(
            dimension_semantics=("parallel",),
            vmem_limit_bytes=min(max(p1_vmem, 32 << 20), 127 << 20)),
    )(x)

    # ---- phase 2: resident g2 inputs, output-row tiles, accumulators in vregs.
    # Tile so both int32 accumulators stay register-resident (~32 of 64 vregs).
    ti = _pick_rows(h, max(8, 16384 // max(w, 1))) if tile_i is None else tile_i
    if h % ti:
        raise ValueError(f"tile_i={ti} must divide H={h}")
    group = next(u for u in (8, 4, 2, 1) if h % u == 0)
    p2_vmem = int(4 * h * w * 4 + 8 * ti * w * 4 + 2 * group * w * 4 + (4 << 20))
    out = pl.pallas_call(
        functools.partial(_phase2_kernel, group=group, inv_sigma=float(1.0 / sigma)),
        out_shape=jax.ShapeDtypeStruct((h, w), jnp.float32),
        grid_spec=pltpu.PrefetchScalarGridSpec(
            num_scalar_prefetch=0,
            grid=(h // ti,),
            in_specs=[pl.BlockSpec((h, w), lambda i: (0, 0)),   # fully resident
                      pl.BlockSpec((h, w), lambda i: (0, 0))],
            out_specs=pl.BlockSpec((ti, w), lambda i: (i, 0)),
        ),
        compiler_params=pltpu.CompilerParams(
            dimension_semantics=("parallel",),
            vmem_limit_bytes=min(max(p2_vmem, 32 << 20), 127 << 20)),
    )(g2_fg, g2_bg)
    return out


# -----------------------------------------------------------------------------
# Pure-JAX brute-force reference (independent of the separable algorithm).
# -----------------------------------------------------------------------------
def sdt_reference(x, sigma):
    h, w = x.shape
    rows = jnp.repeat(jnp.arange(h, dtype=jnp.int32), w)
    cols = jnp.tile(jnp.arange(w, dtype=jnp.int32), h)
    d2 = (rows[:, None] - rows[None, :]) ** 2 + (cols[:, None] - cols[None, :]) ** 2
    is_bg = x.reshape(-1) == 0
    d2_fg = jnp.min(jnp.where(is_bg[None, :], d2, _BIG), axis=1)   # dist^2 to nearest zero
    d2_bg = jnp.min(jnp.where(~is_bg[None, :], d2, _BIG), axis=1)  # dist^2 to nearest nonzero
    sd = jnp.sqrt(d2_fg.astype(jnp.float32)) - jnp.sqrt(d2_bg.astype(jnp.float32))
    return jnp.tanh(sd / sigma).reshape(h, w)


if __name__ == "__main__":
    key = jax.random.PRNGKey(0)
    sigma = 10.0
    cases = [
        ((128, 32), dict()),                      # default tiling, single tile
        ((48, 36), dict()),                       # odd / lane-unaligned width
        ((64, 48), dict(tile_i=16, tile_h=16)),   # multi-step grids in both phases
    ]
    for shape, kw in cases:
        key, sub = jax.random.split(key)
        x = jax.random.randint(sub, shape, 0, 3, dtype=jnp.int32)  # labels, 0 = background
        out = jax.block_until_ready(signed_distance_transform(x, sigma=sigma, **kw))
        ref = jax.block_until_ready(sdt_reference(x, sigma))
        assert out.shape == shape and out.dtype == jnp.float32
        err = float(jnp.max(jnp.abs(out - ref)))
        assert err < 1e-4, f"max abs error {err} at shape {shape}"
    print("KERNEL_OK")
</pallas_src>

<mosaic_0001>
module attributes {stable_mosaic.version = 11 : i64} {
  func.func @_phase2_kernel(%arg0: i32, %arg1: memref<128x32xi32, #tpu.memory_space<vmem>>, %arg2: memref<128x32xi32, #tpu.memory_space<vmem>>, %arg3: memref<128x32xf32, #tpu.memory_space<vmem>>) attributes {dimension_semantics = [#tpu.dimension_semantics<parallel>], iteration_bounds = array<i64: 1>, scalar_prefetch = 0 : i64, scratch_operands = 0 : i64, tpu.core_type = #tpu.core_type<tc>, window_params = [{pipeline_mode = #tpu.pipeline_mode<synchronous>, transform_indices = @transform_0, window_bounds = array<i64: 128, 32>}, {pipeline_mode = #tpu.pipeline_mode<synchronous>, transform_indices = @transform_1, window_bounds = array<i64: 128, 32>}, {transform_indices = @transform_2, window_bounds = array<i64: 128, 32>}]} {
    %c128_i32 = arith.constant 128 : i32
    %0 = arith.muli %arg0, %c128_i32 : i32
    %1 = tpu.iota {dimensions = array<i32: 0>} : vector<128x1xi32>
    %2 = vector.broadcast %0 : i32 to vector<128x1xi32>
    %3 = arith.addi %2, %1 : vector<128x1xi32>
    %c1073741824_i32 = arith.constant 1073741824 : i32
    %4 = vector.broadcast %c1073741824_i32 : i32 to vector<128x32xi32>
    %c0_i32 = arith.constant 0 : i32
    %c16_i32 = arith.constant 16 : i32
    %5 = arith.addi %c0_i32, %c16_i32 : i32
    %c1_i32 = arith.constant 1 : i32
    %6:2 = scf.for %arg4 = %c0_i32 to %5 step %c1_i32 iter_args(%arg5 = %4, %arg6 = %4) -> (vector<128x32xi32>, vector<128x32xi32>)  : i32 {
      %c8_i32 = arith.constant 8 : i32
      %16 = arith.muli %arg4, %c8_i32 : i32
      %17 = tpu.assume_multiple %16, 8 : i32
      %18 = arith.index_cast %17 : i32 to index
      %c0_2 = arith.constant 0 : index
      %19 = vector.load %arg1[%18, %c0_2] : memref<128x32xi32, #tpu.memory_space<vmem>>, vector<8x32xi32>
      %20 = arith.index_cast %17 : i32 to index
      %c0_3 = arith.constant 0 : index
      %21 = vector.load %arg2[%20, %c0_3] : memref<128x32xi32, #tpu.memory_space<vmem>>, vector<8x32xi32>
      %c0_i32_4 = arith.constant 0 : i32
      %22 = arith.addi %17, %c0_i32_4 : i32
      %23 = vector.broadcast %22 : i32 to vector<128x1xi32>
      %24 = arith.subi %3, %23 : vector<128x1xi32>
      %25 = arith.muli %24, %24 : vector<128x1xi32>
      %26 = vector.extract_strided_slice %19 {offsets = [0, 0], sizes = [1, 32], strides = [1, 1]} : vector<8x32xi32> to vector<1x32xi32>
      %27 = vector.broadcast %25 : vector<128x1xi32> to vector<128x32xi32>
      %28 = vector.broadcast %26 : vector<1x32xi32> to vector<128x32xi32>
      %29 = arith.addi %27, %28 : vector<128x32xi32>
      %30 = arith.minsi %arg5, %29 : vector<128x32xi32>
      %31 = vector.extract_strided_slice %21 {offsets = [0, 0], sizes = [1, 32], strides = [1, 1]} : vector<8x32xi32> to vector<1x32xi32>
      %32 = vector.broadcast %25 : vector<128x1xi32> to vector<128x32xi32>
      %33 = vector.broadcast %31 : vector<1x32xi32> to vector<128x32xi32>
      %34 = arith.addi %32, %33 : vector<128x32xi32>
      %35 = arith.minsi %arg6, %34 : vector<128x32xi32>
      %c1_i32_5 = arith.constant 1 : i32
      %36 = arith.addi %17, %c1_i32_5 : i32
      %37 = vector.broadcast %36 : i32 to vector<128x1xi32>
      %38 = arith.subi %3, %37 : vector<128x1xi32>
      %39 = arith.muli %38, %38 : vector<128x1xi32>
      %40 = vector.extract_strided_slice %19 {offsets = [1, 0], sizes = [1, 32], strides = [1, 1]} : vector<8x32xi32> to vector<1x32xi32>
      %41 = vector.broadcast %39 : vector<128x1xi32> to vector<128x32xi32>
      %42 = vector.broadcast %40 : vector<1x32xi32> to vector<128x32xi32>
      %43 = arith.addi %41, %42 : vector<128x32xi32>
      %44 = arith.minsi %30, %43 : vector<128x32xi32>
      %45 = vector.extract_strided_slice %21 {offsets = [1, 0], sizes = [1, 32], strides = [1, 1]} : vector<8x32xi32> to vector<1x32xi32>
      %46 = vector.broadcast %39 : vector<128x1xi32> to vector<128x32xi32>
      %47 = vector.broadcast %45 : vector<1x32xi32> to vector<128x32xi32>
      %48 = arith.addi %46, %47 : vector<128x32xi32>
      %49 = arith.minsi %35, %48 : vector<128x32xi32>
      %c2_i32 = arith.constant 2 : i32
      %50 = arith.addi %17, %c2_i32 : i32
      %51 = vector.broadcast %50 : i32 to vector<128x1xi32>
      %52 = arith.subi %3, %51 : vector<128x1xi32>
      %53 = arith.muli %52, %52 : vector<128x1xi32>
      %54 = vector.extract_strided_slice %19 {offsets = [2, 0], sizes = [1, 32], strides = [1, 1]} : vector<8x32xi32> to vector<1x32xi32>
      %55 = vector.broadcast %53 : vector<128x1xi32> to vector<128x32xi32>
      %56 = vector.broadcast %54 : vector<1x32xi32> to vector<128x32xi32>
      %57 = arith.addi %55, %56 : vector<128x32xi32>
      %58 = arith.minsi %44, %57 : vector<128x32xi32>
      %59 = vector.extract_strided_slice %21 {offsets = [2, 0], sizes = [1, 32], strides = [1, 1]} : vector<8x32xi32> to vector<1x32xi32>
      %60 = vector.broadcast %53 : vector<128x1xi32> to vector<128x32xi32>
      %61 = vector.broadcast %59 : vector<1x32xi32> to vector<128x32xi32>
      %62 = arith.addi %60, %61 : vector<128x32xi32>
      %63 = arith.minsi %49, %62 : vector<128x32xi32>
      %c3_i32 = arith.constant 3 : i32
      %64 = arith.addi %17, %c3_i32 : i32
      %65 = vector.broadcast %64 : i32 to vector<128x1xi32>
      %66 = arith.subi %3, %65 : vector<128x1xi32>
      %67 = arith.muli %66, %66 : vector<128x1xi32>
      %68 = vector.extract_strided_slice %19 {offsets = [3, 0], sizes = [1, 32], strides = [1, 1]} : vector<8x32xi32> to vector<1x32xi32>
      %69 = vector.broadcast %67 : vector<128x1xi32> to vector<128x32xi32>
      %70 = vector.broadcast %68 : vector<1x32xi32> to vector<128x32xi32>
      %71 = arith.addi %69, %70 : vector<128x32xi32>
      %72 = arith.minsi %58, %71 : vector<128x32xi32>
      %73 = vector.extract_strided_slice %21 {offsets = [3, 0], sizes = [1, 32], strides = [1, 1]} : vector<8x32xi32> to vector<1x32xi32>
      %74 = vector.broadcast %67 : vector<128x1xi32> to vector<128x32xi32>
      %75 = vector.broadcast %73 : vector<1x32xi32> to vector<128x32xi32>
      %76 = arith.addi %74, %75 : vector<128x32xi32>
      %77 = arith.minsi %63, %76 : vector<128x32xi32>
      %c4_i32 = arith.constant 4 : i32
      %78 = arith.addi %17, %c4_i32 : i32
      %79 = vector.broadcast %78 : i32 to vector<128x1xi32>
      %80 = arith.subi %3, %79 : vector<128x1xi32>
      %81 = arith.muli %80, %80 : vector<128x1xi32>
      %82 = vector.extract_strided_slice %19 {offsets = [4, 0], sizes = [1, 32], strides = [1, 1]} : vector<8x32xi32> to vector<1x32xi32>
      %83 = vector.broadcast %81 : vector<128x1xi32> to vector<128x32xi32>
      %84 = vector.broadcast %82 : vector<1x32xi32> to vector<128x32xi32>
      %85 = arith.addi %83, %84 : vector<128x32xi32>
      %86 = arith.minsi %72, %85 : vector<128x32xi32>
      %87 = vector.extract_strided_slice %21 {offsets = [4, 0], sizes = [1, 32], strides = [1, 1]} : vector<8x32xi32> to vector<1x32xi32>
      %88 = vector.broadcast %81 : vector<128x1xi32> to vector<128x32xi32>
      %89 = vector.broadcast %87 : vector<1x32xi32> to vector<128x32xi32>
      %90 = arith.addi %88, %89 : vector<128x32xi32>
      %91 = arith.minsi %77, %90 : vector<128x32xi32>
      %c5_i32 = arith.constant 5 : i32
      %92 = arith.addi %17, %c5_i32 : i32
      %93 = vector.broadcast %92 : i32 to vector<128x1xi32>
      %94 = arith.subi %3, %93 : vector<128x1xi32>
      %95 = arith.muli %94, %94 : vector<128x1xi32>
      %96 = vector.extract_strided_slice %19 {offsets = [5, 0], sizes = [1, 32], strides = [1, 1]} : vector<8x32xi32> to vector<1x32xi32>
      %97 = vector.broadcast %95 : vector<128x1xi32> to vector<128x32xi32>
      %98 = vector.broadcast %96 : vector<1x32xi32> to vector<128x32xi32>
      %99 = arith.addi %97, %98 : vector<128x32xi32>
      %100 = arith.minsi %86, %99 : vector<128x32xi32>
      %101 = vector.extract_strided_slice %21 {offsets = [5, 0], sizes = [1, 32], strides = [1, 1]} : vector<8x32xi32> to vector<1x32xi32>
      %102 = vector.broadcast %95 : vector<128x1xi32> to vector<128x32xi32>
      %103 = vector.broadcast %101 : vector<1x32xi32> to vector<128x32xi32>
      %104 = arith.addi %102, %103 : vector<128x32xi32>
      %105 = arith.minsi %91, %104 : vector<128x32xi32>
      %c6_i32 = arith.constant 6 : i32
      %106 = arith.addi %17, %c6_i32 : i32
      %107 = vector.broadcast %106 : i32 to vector<128x1xi32>
      %108 = arith.subi %3, %107 : vector<128x1xi32>
      %109 = arith.muli %108, %108 : vector<128x1xi32>
      %110 = vector.extract_strided_slice %19 {offsets = [6, 0], sizes = [1, 32], strides = [1, 1]} : vector<8x32xi32> to vector<1x32xi32>
      %111 = vector.broadcast %109 : vector<128x1xi32> to vector<128x32xi32>
      %112 = vector.broadcast %110 : vector<1x32xi32> to vector<128x32xi32>
      %113 = arith.addi %111, %112 : vector<128x32xi32>
      %114 = arith.minsi %100, %113 : vector<128x32xi32>
      %115 = vector.extract_strided_slice %21 {offsets = [6, 0], sizes = [1, 32], strides = [1, 1]} : vector<8x32xi32> to vector<1x32xi32>
      %116 = vector.broadcast %109 : vector<128x1xi32> to vector<128x32xi32>
      %117 = vector.broadcast %115 : vector<1x32xi32> to vector<128x32xi32>
      %118 = arith.addi %116, %117 : vector<128x32xi32>
      %119 = arith.minsi %105, %118 : vector<128x32xi32>
      %c7_i32 = arith.constant 7 : i32
      %120 = arith.addi %17, %c7_i32 : i32
      %121 = vector.broadcast %120 : i32 to vector<128x1xi32>
      %122 = arith.subi %3, %121 : vector<128x1xi32>
      %123 = arith.muli %122, %122 : vector<128x1xi32>
      %124 = vector.extract_strided_slice %19 {offsets = [7, 0], sizes = [1, 32], strides = [1, 1]} : vector<8x32xi32> to vector<1x32xi32>
      %125 = vector.broadcast %123 : vector<128x1xi32> to vector<128x32xi32>
      %126 = vector.broadcast %124 : vector<1x32xi32> to vector<128x32xi32>
      %127 = arith.addi %125, %126 : vector<128x32xi32>
      %128 = arith.minsi %114, %127 : vector<128x32xi32>
      %129 = vector.extract_strided_slice %21 {offsets = [7, 0], sizes = [1, 32], strides = [1, 1]} : vector<8x32xi32> to vector<1x32xi32>
      %130 = vector.broadcast %123 : vector<128x1xi32> to vector<128x32xi32>
      %131 = vector.broadcast %129 : vector<1x32xi32> to vector<128x32xi32>
      %132 = arith.addi %130, %131 : vector<128x32xi32>
      %133 = arith.minsi %119, %132 : vector<128x32xi32>
      scf.yield %128, %133 : vector<128x32xi32>, vector<128x32xi32>
    }
    %c16_i32_0 = arith.constant 16 : i32
    %7 = arith.sitofp %6#0 : vector<128x32xi32> to vector<128x32xf32>
    %8 = math.sqrt %7 : vector<128x32xf32>
    %9 = arith.sitofp %6#1 : vector<128x32xi32> to vector<128x32xf32>
    %10 = math.sqrt %9 : vector<128x32xf32>
    %11 = arith.subf %8, %10 : vector<128x32xf32>
    %cst = arith.constant 1.000000e-01 : f32
    %12 = vector.broadcast %cst : f32 to vector<128x32xf32>
    %13 = arith.mulf %11, %12 : vector<128x32xf32>
    %14 = math.tanh %13 : vector<128x32xf32>
    %c0 = arith.constant 0 : index
    %c0_1 = arith.constant 0 : index
    %15 = vector.load %arg3[%c0, %c0_1] : memref<128x32xf32, #tpu.memory_space<vmem>>, vector<128x32xf32>
    tpu.vector_store %arg3[%c0, %c0_1], %14 {strides = array<i32>} : memref<128x32xf32, #tpu.memory_space<vmem>>, vector<128x32xf32>,
    return
  }
  func.func @transform_0(%arg0: i32) -> (i32, i32) {
    %c0_i32 = arith.constant 0 : i32
    %c0_i32_0 = arith.constant 0 : i32
    %c0_i32_1 = arith.constant 0 : i32
    return %c0_i32, %c0_i32_0 : i32, i32
  }
  func.func @transform_1(%arg0: i32) -> (i32, i32) {
    %c0_i32 = arith.constant 0 : i32
    %c0_i32_0 = arith.constant 0 : i32
    %c0_i32_1 = arith.constant 0 : i32
    return %c0_i32, %c0_i32_0 : i32, i32
  }
  func.func @transform_2(%arg0: i32) -> (i32, i32) {
    %c0_i32 = arith.constant 0 : i32
    %c0_i32_0 = arith.constant 0 : i32
    return %arg0, %c0_i32 : i32, i32
  }
}

module attributes {stable_mosaic.version = 11 : i64} {
  func.func @_phase1_kernel(%arg0: i32, %arg1: memref<128x32xi32, #tpu.memory_space<vmem>>, %arg2: memref<128x32xi32, #tpu.memory_space<vmem>>, %arg3: memref<128x32xi32, #tpu.memory_space<vmem>>) attributes {dimension_semantics = [#tpu.dimension_semantics<parallel>], iteration_bounds = array<i64: 1>, scalar_prefetch = 0 : i64, scratch_operands = 0 : i64, tpu.core_type = #tpu.core_type<tc>, window_params = [{transform_indices = @transform_0, window_bounds = array<i64: 128, 32>}, {transform_indices = @transform_1, window_bounds = array<i64: 128, 32>}, {transform_indices = @transform_2, window_bounds = array<i64: 128, 32>}]} {
    %c0 = arith.constant 0 : index
    %c0_0 = arith.constant 0 : index
    %0 = vector.load %arg1[%c0, %c0_0] : memref<128x32xi32, #tpu.memory_space<vmem>>, vector<128x32xi32>
    %c0_i32 = arith.constant 0 : i32
    %1 = vector.broadcast %c0_i32 : i32 to vector<128x32xi32>
    %2 = arith.cmpi eq, %0, %1 : vector<128x32xi32>
    %c0_i32_1 = arith.constant 0 : i32
    %c160_i32 = arith.constant 160 : i32
    %3 = vector.broadcast %c0_i32_1 : i32 to vector<128x32xi32>
    %4 = vector.broadcast %c160_i32 : i32 to vector<128x32xi32>
    %5 = arith.select %2, %3, %4 : vector<128x32xi1>, vector<128x32xi32>
    %c160_i32_2 = arith.constant 160 : i32
    %c0_i32_3 = arith.constant 0 : i32
    %6 = vector.broadcast %c160_i32_2 : i32 to vector<128x32xi32>
    %7 = vector.broadcast %c0_i32_3 : i32 to vector<128x32xi32>
    %8 = arith.select %2, %6, %7 : vector<128x32xi1>, vector<128x32xi32>
    %9 = tpu.iota {dimensions = array<i32: 1>} : vector<128x32xi32>
    %c1_i32 = arith.constant 1 : i32
    %10 = tpu.dynamic_rotate %5 by %c1_i32 dim 1 : vector<128x32xi32>, i32 -> vector<128x32xi32>
    %c1_i32_4 = arith.constant 1 : i32
    %11 = tpu.dynamic_rotate %8 by %c1_i32_4 dim 1 : vector<128x32xi32>, i32 -> vector<128x32xi32>
    %c1_i32_5 = arith.constant 1 : i32
    %12 = vector.broadcast %c1_i32_5 : i32 to vector<128x32xi32>
    %13 = arith.cmpi sge, %9, %12 : vector<128x32xi32>
    %c1_i32_6 = arith.constant 1 : i32
    %14 = vector.broadcast %c1_i32_6 : i32 to vector<128x32xi32>
    %15 = arith.addi %10, %14 : vector<128x32xi32>
    %c160_i32_7 = arith.constant 160 : i32
    %16 = vector.broadcast %c160_i32_7 : i32 to vector<128x32xi32>
    %17 = arith.select %13, %15, %16 : vector<128x32xi1>, vector<128x32xi32>
    %18 = arith.minsi %5, %17 : vector<128x32xi32>
    %c1_i32_8 = arith.constant 1 : i32
    %19 = vector.broadcast %c1_i32_8 : i32 to vector<128x32xi32>
    %20 = arith.addi %11, %19 : vector<128x32xi32>
    %c160_i32_9 = arith.constant 160 : i32
    %21 = vector.broadcast %c160_i32_9 : i32 to vector<128x32xi32>
    %22 = arith.select %13, %20, %21 : vector<128x32xi1>, vector<128x32xi32>
    %23 = arith.minsi %8, %22 : vector<128x32xi32>
    %c2_i32 = arith.constant 2 : i32
    %24 = tpu.dynamic_rotate %18 by %c2_i32 dim 1 : vector<128x32xi32>, i32 -> vector<128x32xi32>
    %c2_i32_10 = arith.constant 2 : i32
    %25 = tpu.dynamic_rotate %23 by %c2_i32_10 dim 1 : vector<128x32xi32>, i32 -> vector<128x32xi32>
    %c2_i32_11 = arith.constant 2 : i32
    %26 = vector.broadcast %c2_i32_11 : i32 to vector<128x32xi32>
    %27 = arith.cmpi sge, %9, %26 : vector<128x32xi32>
    %c2_i32_12 = arith.constant 2 : i32
    %28 = vector.broadcast %c2_i32_12 : i32 to vector<128x32xi32>
    %29 = arith.addi %24, %28 : vector<128x32xi32>
    %c160_i32_13 = arith.constant 160 : i32
    %30 = vector.broadcast %c160_i32_13 : i32 to vector<128x32xi32>
    %31 = arith.select %27, %29, %30 : vector<128x32xi1>, vector<128x32xi32>
    %32 = arith.minsi %18, %31 : vector<128x32xi32>
    %c2_i32_14 = arith.constant 2 : i32
    %33 = vector.broadcast %c2_i32_14 : i32 to vector<128x32xi32>
    %34 = arith.addi %25, %33 : vector<128x32xi32>
    %c160_i32_15 = arith.constant 160 : i32
    %35 = vector.broadcast %c160_i32_15 : i32 to vector<128x32xi32>
    %36 = arith.select %27, %34, %35 : vector<128x32xi1>, vector<128x32xi32>
    %37 = arith.minsi %23, %36 : vector<128x32xi32>
    %c4_i32 = arith.constant 4 : i32
    %38 = tpu.dynamic_rotate %32 by %c4_i32 dim 1 : vector<128x32xi32>, i32 -> vector<128x32xi32>
    %c4_i32_16 = arith.constant 4 : i32
    %39 = tpu.dynamic_rotate %37 by %c4_i32_16 dim 1 : vector<128x32xi32>, i32 -> vector<128x32xi32>
    %c4_i32_17 = arith.constant 4 : i32
    %40 = vector.broadcast %c4_i32_17 : i32 to vector<128x32xi32>
    %41 = arith.cmpi sge, %9, %40 : vector<128x32xi32>
    %c4_i32_18 = arith.constant 4 : i32
    %42 = vector.broadcast %c4_i32_18 : i32 to vector<128x32xi32>
    %43 = arith.addi %38, %42 : vector<128x32xi32>
    %c160_i32_19 = arith.constant 160 : i32
    %44 = vector.broadcast %c160_i32_19 : i32 to vector<128x32xi32>
    %45 = arith.select %41, %43, %44 : vector<128x32xi1>, vector<128x32xi32>
    %46 = arith.minsi %32, %45 : vector<128x32xi32>
    %c4_i32_20 = arith.constant 4 : i32
    %47 = vector.broadcast %c4_i32_20 : i32 to vector<128x32xi32>
    %48 = arith.addi %39, %47 : vector<128x32xi32>
    %c160_i32_21 = arith.constant 160 : i32
    %49 = vector.broadcast %c160_i32_21 : i32 to vector<128x32xi32>
    %50 = arith.select %41, %48, %49 : vector<128x32xi1>, vector<128x32xi32>
    %51 = arith.minsi %37, %50 : vector<128x32xi32>
    %c8_i32 = arith.constant 8 : i32
    %52 = tpu.dynamic_rotate %46 by %c8_i32 dim 1 : vector<128x32xi32>, i32 -> vector<128x32xi32>
    %c8_i32_22 = arith.constant 8 : i32
    %53 = tpu.dynamic_rotate %51 by %c8_i32_22 dim 1 : vector<128x32xi32>, i32 -> vector<128x32xi32>
    %c8_i32_23 = arith.constant 8 : i32
    %54 = vector.broadcast %c8_i32_23 : i32 to vector<128x32xi32>
    %55 = arith.cmpi sge, %9, %54 : vector<128x32xi32>
    %c8_i32_24 = arith.constant 8 : i32
    %56 = vector.broadcast %c8_i32_24 : i32 to vector<128x32xi32>
    %57 = arith.addi %52, %56 : vector<128x32xi32>
    %c160_i32_25 = arith.constant 160 : i32
    %58 = vector.broadcast %c160_i32_25 : i32 to vector<128x32xi32>
    %59 = arith.select %55, %57, %58 : vector<128x32xi1>, vector<128x32xi32>
    %60 = arith.minsi %46, %59 : vector<128x32xi32>
    %c8_i32_26 = arith.constant 8 : i32
    %61 = vector.broadcast %c8_i32_26 : i32 to vector<128x32xi32>
    %62 = arith.addi %53, %61 : vector<128x32xi32>
    %c160_i32_27 = arith.constant 160 : i32
    %63 = vector.broadcast %c160_i32_27 : i32 to vector<128x32xi32>
    %64 = arith.select %55, %62, %63 : vector<128x32xi1>, vector<128x32xi32>
    %65 = arith.minsi %51, %64 : vector<128x32xi32>
    %c16_i32 = arith.constant 16 : i32
    %66 = tpu.dynamic_rotate %60 by %c16_i32 dim 1 : vector<128x32xi32>, i32 -> vector<128x32xi32>
    %c16_i32_28 = arith.constant 16 : i32
    %67 = tpu.dynamic_rotate %65 by %c16_i32_28 dim 1 : vector<128x32xi32>, i32 -> vector<128x32xi32>
    %c16_i32_29 = arith.constant 16 : i32
    %68 = vector.broadcast %c16_i32_29 : i32 to vector<128x32xi32>
    %69 = arith.cmpi sge, %9, %68 : vector<128x32xi32>
    %c16_i32_30 = arith.constant 16 : i32
    %70 = vector.broadcast %c16_i32_30 : i32 to vector<128x32xi32>
    %71 = arith.addi %66, %70 : vector<128x32xi32>
    %c160_i32_31 = arith.constant 160 : i32
    %72 = vector.broadcast %c160_i32_31 : i32 to vector<128x32xi32>
    %73 = arith.select %69, %71, %72 : vector<128x32xi1>, vector<128x32xi32>
    %74 = arith.minsi %60, %73 : vector<128x32xi32>
    %c16_i32_32 = arith.constant 16 : i32
    %75 = vector.broadcast %c16_i32_32 : i32 to vector<128x32xi32>
    %76 = arith.addi %67, %75 : vector<128x32xi32>
    %c160_i32_33 = arith.constant 160 : i32
    %77 = vector.broadcast %c160_i32_33 : i32 to vector<128x32xi32>
    %78 = arith.select %69, %76, %77 : vector<128x32xi1>, vector<128x32xi32>
    %79 = arith.minsi %65, %78 : vector<128x32xi32>
    %c31_i32 = arith.constant 31 : i32
    %80 = tpu.dynamic_rotate %74 by %c31_i32 dim 1 : vector<128x32xi32>, i32 -> vector<128x32xi32>
    %c31_i32_34 = arith.constant 31 : i32
    %81 = tpu.dynamic_rotate %79 by %c31_i32_34 dim 1 : vector<128x32xi32>, i32 -> vector<128x32xi32>
    %c31_i32_35 = arith.constant 31 : i32
    %82 = vector.broadcast %c31_i32_35 : i32 to vector<128x32xi32>
    %83 = arith.cmpi slt, %9, %82 : vector<128x32xi32>
    %c1_i32_36 = arith.constant 1 : i32
    %84 = vector.broadcast %c1_i32_36 : i32 to vector<128x32xi32>
    %85 = arith.addi %80, %84 : vector<128x32xi32>
    %c160_i32_37 = arith.constant 160 : i32
    %86 = vector.broadcast %c160_i32_37 : i32 to vector<128x32xi32>
    %87 = arith.select %83, %85, %86 : vector<128x32xi1>, vector<128x32xi32>
    %88 = arith.minsi %74, %87 : vector<128x32xi32>
    %c1_i32_38 = arith.constant 1 : i32
    %89 = vector.broadcast %c1_i32_38 : i32 to vector<128x32xi32>
    %90 = arith.addi %81, %89 : vector<128x32xi32>
    %c160_i32_39 = arith.constant 160 : i32
    %91 = vector.broadcast %c160_i32_39 : i32 to vector<128x32xi32>
    %92 = arith.select %83, %90, %91 : vector<128x32xi1>, vector<128x32xi32>
    %93 = arith.minsi %79, %92 : vector<128x32xi32>
    %c30_i32 = arith.constant 30 : i32
    %94 = tpu.dynamic_rotate %88 by %c30_i32 dim 1 : vector<128x32xi32>, i32 -> vector<128x32xi32>
    %c30_i32_40 = arith.constant 30 : i32
    %95 = tpu.dynamic_rotate %93 by %c30_i32_40 dim 1 : vector<128x32xi32>, i32 -> vector<128x32xi32>
    %c30_i32_41 = arith.constant 30 : i32
    %96 = vector.broadcast %c30_i32_41 : i32 to vector<128x32xi32>
    %97 = arith.cmpi slt, %9, %96 : vector<128x32xi32>
    %c2_i32_42 = arith.constant 2 : i32
    %98 = vector.broadcast %c2_i32_42 : i32 to vector<128x32xi32>
    %99 = arith.addi %94, %98 : vector<128x32xi32>
    %c160_i32_43 = arith.constant 160 : i32
    %100 = vector.broadcast %c160_i32_43 : i32 to vector<128x32xi32>
    %101 = arith.select %97, %99, %100 : vector<128x32xi1>, vector<128x32xi32>
    %102 = arith.minsi %88, %101 : vector<128x32xi32>
    %c2_i32_44 = arith.constant 2 : i32
    %103 = vector.broadcast %c2_i32_44 : i32 to vector<128x32xi32>
    %104 = arith.addi %95, %103 : vector<128x32xi32>
    %c160_i32_45 = arith.constant 160 : i32
    %105 = vector.broadcast %c160_i32_45 : i32 to vector<128x32xi32>
    %106 = arith.select %97, %104, %105 : vector<128x32xi1>, vector<128x32xi32>
    %107 = arith.minsi %93, %106 : vector<128x32xi32>
    %c28_i32 = arith.constant 28 : i32
    %108 = tpu.dynamic_rotate %102 by %c28_i32 dim 1 : vector<128x32xi32>, i32 -> vector<128x32xi32>
    %c28_i32_46 = arith.constant 28 : i32
    %109 = tpu.dynamic_rotate %107 by %c28_i32_46 dim 1 : vector<128x32xi32>, i32 -> vector<128x32xi32>
    %c28_i32_47 = arith.constant 28 : i32
    %110 = vector.broadcast %c28_i32_47 : i32 to vector<128x32xi32>
    %111 = arith.cmpi slt, %9, %110 : vector<128x32xi32>
    %c4_i32_48 = arith.constant 4 : i32
    %112 = vector.broadcast %c4_i32_48 : i32 to vector<128x32xi32>
    %113 = arith.addi %108, %112 : vector<128x32xi32>
    %c160_i32_49 = arith.constant 160 : i32
    %114 = vector.broadcast %c160_i32_49 : i32 to vector<128x32xi32>
    %115 = arith.select %111, %113, %114 : vector<128x32xi1>, vector<128x32xi32>
    %116 = arith.minsi %102, %115 : vector<128x32xi32>
    %c4_i32_50 = arith.constant 4 : i32
    %117 = vector.broadcast %c4_i32_50 : i32 to vector<128x32xi32>
    %118 = arith.addi %109, %117 : vector<128x32xi32>
    %c160_i32_51 = arith.constant 160 : i32
    %119 = vector.broadcast %c160_i32_51 : i32 to vector<128x32xi32>
    %120 = arith.select %111, %118, %119 : vector<128x32xi1>, vector<128x32xi32>
    %121 = arith.minsi %107, %120 : vector<128x32xi32>
    %c24_i32 = arith.constant 24 : i32
    %122 = tpu.dynamic_rotate %116 by %c24_i32 dim 1 : vector<128x32xi32>, i32 -> vector<128x32xi32>
    %c24_i32_52 = arith.constant 24 : i32
    %123 = tpu.dynamic_rotate %121 by %c24_i32_52 dim 1 : vector<128x32xi32>, i32 -> vector<128x32xi32>
    %c24_i32_53 = arith.constant 24 : i32
    %124 = vector.broadcast %c24_i32_53 : i32 to vector<128x32xi32>
    %125 = arith.cmpi slt, %9, %124 : vector<128x32xi32>
    %c8_i32_54 = arith.constant 8 : i32
    %126 = vector.broadcast %c8_i32_54 : i32 to vector<128x32xi32>
    %127 = arith.addi %122, %126 : vector<128x32xi32>
    %c160_i32_55 = arith.constant 160 : i32
    %128 = vector.broadcast %c160_i32_55 : i32 to vector<128x32xi32>
    %129 = arith.select %125, %127, %128 : vector<128x32xi1>, vector<128x32xi32>
    %130 = arith.minsi %116, %129 : vector<128x32xi32>
    %c8_i32_56 = arith.constant 8 : i32
    %131 = vector.broadcast %c8_i32_56 : i32 to vector<128x32xi32>
    %132 = arith.addi %123, %131 : vector<128x32xi32>
    %c160_i32_57 = arith.constant 160 : i32
    %133 = vector.broadcast %c160_i32_57 : i32 to vector<128x32xi32>
    %134 = arith.select %125, %132, %133 : vector<128x32xi1>, vector<128x32xi32>
    %135 = arith.minsi %121, %134 : vector<128x32xi32>
    %c16_i32_58 = arith.constant 16 : i32
    %136 = tpu.dynamic_rotate %130 by %c16_i32_58 dim 1 : vector<128x32xi32>, i32 -> vector<128x32xi32>
    %c16_i32_59 = arith.constant 16 : i32
    %137 = tpu.dynamic_rotate %135 by %c16_i32_59 dim 1 : vector<128x32xi32>, i32 -> vector<128x32xi32>
    %c16_i32_60 = arith.constant 16 : i32
    %138 = vector.broadcast %c16_i32_60 : i32 to vector<128x32xi32>
    %139 = arith.cmpi slt, %9, %138 : vector<128x32xi32>
    %c16_i32_61 = arith.constant 16 : i32
    %140 = vector.broadcast %c16_i32_61 : i32 to vector<128x32xi32>
    %141 = arith.addi %136, %140 : vector<128x32xi32>
    %c160_i32_62 = arith.constant 160 : i32
    %142 = vector.broadcast %c160_i32_62 : i32 to vector<128x32xi32>
    %143 = arith.select %139, %141, %142 : vector<128x32xi1>, vector<128x32xi32>
    %144 = arith.minsi %130, %143 : vector<128x32xi32>
    %c16_i32_63 = arith.constant 16 : i32
    %145 = vector.broadcast %c16_i32_63 : i32 to vector<128x32xi32>
    %146 = arith.addi %137, %145 : vector<128x32xi32>
    %c160_i32_64 = arith.constant 160 : i32
    %147 = vector.broadcast %c160_i32_64 : i32 to vector<128x32xi32>
    %148 = arith.select %139, %146, %147 : vector<128x32xi1>, vector<128x32xi32>
    %149 = arith.minsi %135, %148 : vector<128x32xi32>
    %150 = arith.muli %144, %144 : vector<128x32xi32>
    %c0_65 = arith.constant 0 : index
    %c0_66 = arith.constant 0 : index
    %151 = vector.load %arg2[%c0_65, %c0_66] : memref<128x32xi32, #tpu.memory_space<vmem>>, vector<128x32xi32>
    tpu.vector_store %arg2[%c0_65, %c0_66], %150 {strides = array<i32>} : memref<128x32xi32, #tpu.memory_space<vmem>>, vector<128x32xi32>,
    %152 = arith.muli %149, %149 : vector<128x32xi32>
    %c0_67 = arith.constant 0 : index
    %c0_68 = arith.constant 0 : index
    %153 = vector.load %arg3[%c0_67, %c0_68] : memref<128x32xi32, #tpu.memory_space<vmem>>, vector<128x32xi32>
    tpu.vector_store %arg3[%c0_67, %c0_68], %152 {strides = array<i32>} : memref<128x32xi32, #tpu.memory_space<vmem>>, vector<128x32xi32>,
    return
  }
  func.func @transform_0(%arg0: i32) -> (i32, i32) {
    %c0_i32 = arith.constant 0 : i32
    %c0_i32_0 = arith.constant 0 : i32
    return %arg0, %c0_i32 : i32, i32
  }
  func.func @transform_1(%arg0: i32) -> (i32, i32) {
    %c0_i32 = arith.constant 0 : i32
    %c0_i32_0 = arith.constant 0 : i32
    return %arg0, %c0_i32 : i32, i32
  }
  func.func @transform_2(%arg0: i32) -> (i32, i32) {
    %c0_i32 = arith.constant 0 : i32
    %c0_i32_0 = arith.constant 0 : i32
    return %arg0, %c0_i32 : i32, i32
  }
}

</mosaic_0001>

<bundles_post_ra>
// kernel: signed_distance_transform.3
= control target key start
LH: loop header
LB: loop body
LE: loop exit
PB: predicated region body
PF: predicated region fallthrough
CT: control target
= control target key end

     0   :  { %v12_v0 = vlaneseq  ;;  %v2311_v17 = vmov 1073741824   ;;  %v2313_v18 = vmov 1073741824   ;;  %v2315_v19 = vmov 1073741824   ;;  %s2375_s9 = smov 0   ;;  %s4868_s0 = inlined_call_operand.vmem [shape: s32[128,32], index: 0, kind: input, shape index: {}]   ;;  %s4869_s1 = inlined_call_operand.vmem [shape: s32[128,32], index: 1, kind: input, shape index: {}]   ;;  %s4870_s2 = inlined_call_operand.vmem [shape: f32[128,32], index: 2, kind: output, shape index: {}]  }
   0x1   :  { %v2317_v20 = vmov 1073741824   ;;  %v2319_v21 = vmov 1073741824   ;;  %v2321_v22 = vmov 1073741824   ;;  %v2323_v23 = vmov 1073741824  }
   0x2   :  { %v2264_v1 = vshrl.u32 %v12_v0, 7  ;;  %v2325_v24 = vmov 1073741824   ;;  %v2327_v25 = vmov 1073741824   ;;  %v2329_v26 = vmov 1073741824  }
   0x3   :  { %v2331_v27 = vmov 1073741824   ;;  %v2333_v28 = vmov 1073741824   ;;  %v2335_v29 = vmov 1073741824   ;;  %v2337_v30 = vmov 1073741824  }
   0x4   :  { %4965 = vst [vmem:[#allocation2_spill] sm:$0xff] %v2264_v1  ;;  %v2267_v2 = vadd.s32 8, %v2264_v1  ;;  %v2270_v3 = vadd.s32 16, %v2264_v1  ;;  %v2273_v4 = vadd.s32 24, %v2264_v1  ;;  %v2276_v5 = vadd.s32 32, %v2264_v1 }
   0x5   :  { %v2279_v6 = vadd.s32 40, %v2264_v1  ;;  %v2282_v7 = vadd.s32 48, %v2264_v1  ;;  %v2285_v8 = vadd.s32 56, %v2264_v1  ;;  %v2288_v9 = vadd.s32 64, %v2264_v1 }
   0x6   :  { %4966 = vst [vmem:[#allocation3_spill] sm:$0xff] %v2267_v2  ;;  %4967 = vst [vmem:[#allocation4_spill] sm:$0xff] %v2270_v3  ;;  %v2291_v10 = vadd.s32 72, %v2264_v1  ;;  %v2294_v11 = vadd.s32 80, %v2264_v1  ;;  %v2297_v12 = vadd.s32 88, %v2264_v1  ;;  %v2300_v13 = vadd.s32 96, %v2264_v1 }
   0x7   :  { %4968 = vst [vmem:[#allocation5_spill] sm:$0xff] %v2273_v4  ;;  %4969 = vst [vmem:[#allocation6_spill] sm:$0xff] %v2276_v5  ;;  %v2303_v14 = vadd.s32 104, %v2264_v1  ;;  %v2306_v15 = vadd.s32 112, %v2264_v1  ;;  %v2309_v16 = vadd.s32 120, %v2264_v1  ;;  %v2339_v31 = vmov 1073741824  }
   0x8   :  { %4970 = vst [vmem:[#allocation7_spill] sm:$0xff] %v2279_v6  ;;  %4971 = vst [vmem:[#allocation8_spill] sm:$0xff] %v2282_v7  ;;  %v2341_v32 = vmov 1073741824   ;;  %v2343_v33 = vmov 1073741824   ;;  %v2345_v34 = vmov 1073741824   ;;  %v2347_v35 = vmov 1073741824  }
   0x9   :  { %4972 = vst [vmem:[#allocation9_spill] sm:$0xff] %v2285_v8  ;;  %4973 = vst [vmem:[#allocation10_spill] sm:$0xff] %v2288_v9  ;;  %v2349_v36 = vmov 1073741824   ;;  %v2351_v37 = vmov 1073741824   ;;  %v2353_v38 = vmov 1073741824   ;;  %v2355_v39 = vmov 1073741824  }
   0xa   :  { %4974 = vst [vmem:[#allocation11_spill] sm:$0xff] %v2291_v10  ;;  %4975 = vst [vmem:[#allocation12_spill] sm:$0xff] %v2294_v11  ;;  %v2357_v40 = vmov 1073741824   ;;  %v2359_v41 = vmov 1073741824   ;;  %v2361_v42 = vmov 1073741824   ;;  %v2363_v43 = vmov 1073741824  }
   0xb   :  { %4976 = vst [vmem:[#allocation13_spill] sm:$0xff] %v2297_v12  ;;  %4977 = vst [vmem:[#allocation14_spill] sm:$0xff] %v2300_v13  ;;  %v2365_v44 = vmov 1073741824   ;;  %v2367_v45 = vmov 1073741824   ;;  %v2369_v46 = vmov 1073741824   ;;  %v2371_v47 = vmov 1073741824  }
   0xc   :  { %4978 = vst [vmem:[#allocation15_spill] sm:$0xff] %v2303_v14  ;;  %4979 = vst [vmem:[#allocation16_spill] sm:$0xff] %v2306_v15  ;;  %v2373_v48 = vmov 1073741824  }
   0xd   :  { %4980 = vst [vmem:[#allocation17_spill] sm:$0xff] %v2309_v16 }
   0xe LB: > { %v4981_v2 = vld [vmem:[#allocation3_spill] sm:$0xff]  ;;  %v4982_v1 = vld [vmem:[#allocation2_spill] sm:$0xff]  ;;  %4983 = vst [vmem:[#allocation18_spill] sm:$0xff] %v2119_v17  ;;  %4984 = vst [vmem:[#allocation19_spill] sm:$0xff] %v2123_v18  ;;  %s2477_s10 = sshll.u32 %s2247_s9, 3  ;;  %s51_s24 = sadd.s32 1, %s2247_s9   ;;  %v2123_v18 = vphi %v2313_v18, %v5286_v18   ;;  %v2119_v17 = vphi %v2311_v17, %v5285_v17   ;;  %s2247_s9 = sphi %s2375_s9, %s5317_s9   ;;  %v2243_v48 = vphi %v2373_v48, %v5316_v48   ;;  %v2239_v47 = vphi %v2371_v47, %v5315_v47   ;;  %v2235_v46 = vphi %v2369_v46, %v5314_v46   ;;  %v2231_v45 = vphi %v2367_v45, %v5313_v45   ;;  %v2227_v44 = vphi %v2365_v44, %v5312_v44   ;;  %v2223_v43 = vphi %v2363_v43, %v5311_v43   ;;  %v2219_v42 = vphi %v2361_v42, %v5310_v42   ;;  %v2215_v41 = vphi %v2359_v41, %v5309_v41   ;;  %v2211_v40 = vphi %v2357_v40, %v5308_v40   ;;  %v2207_v39 = vphi %v2355_v39, %v5307_v39   ;;  %v2203_v38 = vphi %v2353_v38, %v5306_v38   ;;  %v2199_v37 = vphi %v2351_v37, %v5305_v37   ;;  %v2195_v36 = vphi %v2349_v36, %v5304_v36   ;;  %v2191_v35 = vphi %v2347_v35, %v5303_v35   ;;  %v2187_v34 = vphi %v2345_v34, %v5302_v34   ;;  %v2183_v33 = vphi %v2343_v33, %v5301_v33   ;;  %v2179_v32 = vphi %v2341_v32, %v5300_v32   ;;  %v2175_v31 = vphi %v2339_v31, %v5299_v31   ;;  %v2171_v30 = vphi %v2337_v30, %v5298_v30   ;;  %v2167_v29 = vphi %v2335_v29, %v5297_v29   ;;  %v2163_v28 = vphi %v2333_v28, %v5296_v28   ;;  %v2159_v27 = vphi %v2331_v27, %v5295_v27   ;;  %v2155_v26 = vphi %v2329_v26, %v5294_v26   ;;  %v2151_v25 = vphi %v2327_v25, %v5293_v25   ;;  %v2147_v24 = vphi %v2325_v24, %v5292_v24   ;;  %v2143_v23 = vphi %v2323_v23, %v5291_v23   ;;  %v2139_v22 = vphi %v2321_v22, %v5290_v22   ;;  %v2135_v21 = vphi %v2319_v21, %v5289_v21   ;;  %v2131_v20 = vphi %v2317_v20, %v5288_v20   ;;  %v2127_v19 = vphi %v2315_v19, %v5287_v19  }
   0xf   : > { %4985 = vst [vmem:[#allocation20_spill] sm:$0xff] %v2127_v19  ;;  %4986 = vst [vmem:[#allocation21_spill] sm:$0xff] %v2131_v20  ;;  %s226_s11 = sadd.s32 1, %s2477_s10  ;;  %s2484_s14 = scalar_lea.vmem %s4868_s0, %s2477_s10  ;;  %v89_v49 = vstv %s2477_s10  ;;  %v124_v50 = vsub.s32 0, %v4982_v1  ;;  %v4991_v3 = vld [vmem:[#allocation4_spill] sm:$0xff]  ;;  %v4992_v4 = vld [vmem:[#allocation5_spill] sm:$0xff] }
  0x10   : > { %4987 = vst [vmem:[#allocation22_spill] sm:$0xff] %v2135_v21  ;;  %4988 = vst [vmem:[#allocation23_spill] sm:$0xff] %v2139_v22  ;;  %s2490_s17 = scalar_lea.vmem %s4869_s1, %s2477_s10  ;;  %v90_v51 = vsub.s32 %v4982_v1, %v89_v49  ;;  %v91_v52 = vsub.s32 %v4981_v2, %v89_v49  ;;  %v2496_v53 = vstv %s226_s11  ;;  %v2500_v55 = vld [vmem:[%s2484_s14] sm:$0xff]  ;;  %v92_v56 = vsub.s32 %v4991_v3, %v89_v49  ;;  %v4994_v6 = vld [vmem:[#allocation7_spill] sm:$0xff]  ;;  %s364_s18 = sadd.s32 2, %s2477_s10 }
  0x11   : > { %4989 = vst [vmem:[#allocation24_spill] sm:$0xff] %v2496_v53  ;;  %4990 = vst [vmem:[#allocation25_spill] sm:$0xff] %v2500_v55  ;;  %v93_v57 = vsub.s32 %v4992_v4, %v89_v49  ;;  %v4993_v5 = vld [vmem:[#allocation6_spill] sm:$0xff]  ;;  %v95_v59 = vsub.s32 %v4994_v6, %v89_v49  ;;  %v4996_v7 = vld [vmem:[#allocation8_spill] sm:$0xff]  ;;  %s502_s19 = sadd.s32 3, %s2477_s10  ;;  %s640_s20 = sadd.s32 4, %s2477_s10 }
  0x12   : > { %v94_v58 = vsub.s32 %v4993_v5, %v89_v49  ;;  %v2507_v60 = vld [vmem:[%s2490_s17] sm:$0xff]  ;;  %v96_v61 = vsub.s32 %v4996_v7, %v89_v49  ;;  %v4997_v8 = vld [vmem:[#allocation9_spill] sm:$0xff]  ;;  %v4999_v10 = vld [vmem:[#allocation11_spill] sm:$0xff]  ;;  %v2518_v17 = vmul.u32 %v90_v51, %v90_v51  ;;  %v2520_v18 = vmul.u32 %v91_v52, %v91_v52  ;;  %s778_s21 = sadd.s32 5, %s2477_s10  ;;  %s916_s22 = sadd.s32 6, %s2477_s10 }
  0x13   : > { %4995 = vst [vmem:[#allocation26_spill] sm:$0xff] %v2507_v60  ;;  %v97_v62 = vsub.s32 %v4997_v8, %v89_v49  ;;  %v4998_v9 = vld [vmem:[#allocation10_spill] sm:$0xff]  ;;  %v99_v0 = vsub.s32 %v4999_v10, %v89_v49  ;;  %v5000_v11 = vld [vmem:[#allocation12_spill] sm:$0xff]  ;;  %v5001_v12 = vld [vmem:[#allocation13_spill] sm:$0xff]  ;;  %v125_v8 = vrot.slane %v2500_v55, %v124_v50  ;;  %v2524_v7 = vmul.u32 %v92_v56, %v92_v56  ;;  %s1054_s23 = sadd.s32 7, %s2477_s10  ;;  %p4300_p0 = scmp.ge.s32.totalorder %s51_s24, 16  }
  0x14   : > { %v98_v63 = vsub.s32 %v4998_v9, %v89_v49  ;;  %v100_v54 = vsub.s32 %v5000_v11, %v89_v49  ;;  %v101_v3 = vsub.s32 %v5001_v12, %v89_v49  ;;  %v5002_v13 = vld [vmem:[#allocation14_spill] sm:$0xff]  ;;  %v5003_v14 = vld [vmem:[#allocation15_spill] sm:$0xff]  ;;  %v5004_v15 = vld [vmem:[#allocation16_spill] sm:$0xff]  ;;  %v2526_v10 = vmul.u32 %v93_v57, %v93_v57  ;;  %s5317_s9 = smov %s51_s24 }
  0x15   : > { %v102_v4 = vsub.s32 %v5002_v13, %v89_v49  ;;  %v103_v5 = vsub.s32 %v5003_v14, %v89_v49  ;;  %v104_v6 = vsub.s32 %v5004_v15, %v89_v49  ;;  %v5005_v16 = vld [vmem:[#allocation17_spill] sm:$0xff]  ;;  %v2529_v12 = vrot.slane %v2507_v60, %v124_v50 }
  0x16   : > { %v105_v9 = vsub.s32 %v5005_v16, %v89_v49  ;;  %v2531_v13 = vmul.u32 %v94_v58, %v94_v58  ;;  %v2533_v14 = vmul.u32 %v95_v59, %v95_v59  ;;  %v2537_v51 = vsub.s32 %v4982_v1, %v2496_v53 }
  0x17   : > { %v2541_v52 = vsub.s32 %v4981_v2, %v2496_v53  ;;  %v2543_v49 = vmul.u32 %v96_v61, %v96_v61  ;;  %v2545_v56 = vmul.u32 %v97_v62, %v97_v62  ;;  %v126_v57 = vadd.s32 %v125_v8, %v2518_v17 }
  0x18   : > { %5006 = vst [vmem:[#allocation27_spill] sm:$0xff] %v2537_v51  ;;  %v127_v50 = vadd.s32 %v125_v8, %v2520_v18  ;;  %v114_v58 = vmul.u32 %v98_v63, %v98_v63  ;;  %v115_v60 = vmul.u32 %v99_v0, %v99_v0  ;;  %v128_v59 = vadd.s32 %v125_v8, %v2524_v7 }
  0x19   : > { %5007 = vst [vmem:[#allocation28_spill] sm:$0xff] %v2541_v52  ;;  %v129_v16 = vadd.s32 %v125_v8, %v2526_v10  ;;  %v116_v55 = vmul.u32 %v100_v54, %v100_v54  ;;  %v117_v1 = vmul.u32 %v101_v3, %v101_v3  ;;  %v130_v15 = vadd.s32 %v125_v8, %v2531_v13 }
  0x1a   : > { %v131_v2 = vadd.s32 %v125_v8, %v2533_v14  ;;  %v118_v61 = vmul.u32 %v102_v4, %v102_v4  ;;  %v119_v52 = vmul.u32 %v103_v5, %v103_v5  ;;  %v132_v62 = vadd.s32 %v125_v8, %v2543_v49 }
  0x1b   : > { %v133_v51 = vadd.s32 %v125_v8, %v2545_v56  ;;  %v120_v11 = vmul.u32 %v104_v6, %v104_v6  ;;  %v121_v53 = vmul.u32 %v105_v9, %v105_v9  ;;  %v134_v63 = vadd.s32 %v125_v8, %v114_v58 }
  0x1c   : > { %v135_v0 = vadd.s32 %v125_v8, %v115_v60  ;;  %v136_v19 = vadd.s32 %v125_v8, %v116_v55  ;;  %v137_v20 = vadd.s32 %v125_v8, %v117_v1  ;;  %vm142_vm0 = vcmp.lt.s32.totalorder %v2243_v48, %v126_v57 }
  0x1d   : > { %vm144_vm1 = vcmp.lt.s32.totalorder %v2239_v47, %v127_v50  ;;  %v138_v3 = vadd.s32 %v125_v8, %v118_v61  ;;  %v139_v54 = vadd.s32 %v125_v8, %v119_v52  ;;  %v140_v21 = vadd.s32 %v125_v8, %v120_v11 }
  0x1e   : > { %v141_v22 = vadd.s32 %v125_v8, %v121_v53  ;;  %vm146_vm2 = vcmp.lt.s32.totalorder %v2235_v46, %v128_v59  ;;  %vm148_vm3 = vcmp.lt.s32.totalorder %v2231_v45, %v129_v16  ;;  %vm150_vm4 = vcmp.lt.s32.totalorder %v2227_v44, %v130_v15 }
  0x1f   : > { %vm152_vm5 = vcmp.lt.s32.totalorder %v2223_v43, %v131_v2  ;;  %v2562_v4 = vsel %vm142_vm0, %v2243_v48, %v126_v57  ;;  %v2565_v5 = vsel %vm144_vm1, %v2239_v47, %v127_v50  ;;  %v2568_v6 = vsel %vm146_vm2, %v2235_v46, %v128_v59  ;;  %v5020_v57 = vld [vmem:[#allocation24_spill] sm:$0xff]  ;;  %v5021_v50 = vld [vmem:[#allocation4_spill] sm:$0xff] }
  0x20   : > { %v2571_v9 = vsel %vm148_vm3, %v2231_v45, %v129_v16  ;;  %vm154_vm6 = vcmp.lt.s32.totalorder %v2219_v42, %v132_v62  ;;  %vm156_vm7 = vcmp.lt.s32.totalorder %v2215_v41, %v133_v51  ;;  %vm158_vm8 = vcmp.lt.s32.totalorder %v2211_v40, %v134_v63  ;;  %v5022_v59 = vld [vmem:[#allocation5_spill] sm:$0xff] }
  0x21   : > { %vm160_vm9 = vcmp.lt.s32.totalorder %v2207_v39, %v135_v0  ;;  %v2578_v8 = vsel %vm150_vm4, %v2227_v44, %v130_v15  ;;  %v2581_v47 = vsel %vm152_vm5, %v2223_v43, %v131_v2  ;;  %v2584_v46 = vsel %vm154_vm6, %v2219_v42, %v132_v62  ;;  %v5023_v62 = vld [vmem:[#allocation6_spill] sm:$0xff] }
  0x22   : > { %v2587_v16 = vsel %vm156_vm7, %v2215_v41, %v133_v51  ;;  %vm162_vm10 = vcmp.lt.s32.totalorder %v2203_v38, %v136_v19  ;;  %vm164_vm11 = vcmp.lt.s32.totalorder %v2199_v37, %v137_v20  ;;  %vm166_vm12 = vcmp.lt.s32.totalorder %v2195_v36, %v138_v3  ;;  %v5012_v51 = vld [vmem:[#allocation19_spill] sm:$0xff] }
  0x23   : > { %vm168_vm13 = vcmp.lt.s32.totalorder %v2191_v35, %v139_v54  ;;  %v2594_v15 = vsel %vm158_vm8, %v2211_v40, %v134_v63  ;;  %v2597_v2 = vsel %vm160_vm9, %v2207_v39, %v135_v0  ;;  %v2600_v42 = vsel %vm162_vm10, %v2203_v38, %v136_v19  ;;  %v5024_v0 = vld [vmem:[#allocation7_spill] sm:$0xff] }
  0x24   : > { %v2603_v41 = vsel %vm164_vm11, %v2199_v37, %v137_v20  ;;  %v2606_v43 = vsel %vm166_vm12, %v2195_v36, %v138_v3  ;;  %v2609_v44 = vsel %vm168_vm13, %v2191_v35, %v139_v54  ;;  %vm170_vm14 = vcmp.lt.s32.totalorder %v2187_v34, %v140_v21  ;;  %v5025_v54 = vld [vmem:[#allocation8_spill] sm:$0xff] }
  0x25   : > { %vm172_vm15 = vcmp.lt.s32.totalorder %v2183_v33, %v141_v22  ;;  %v178_v39 = vadd.s32 %v2529_v12, %v2518_v17  ;;  %v179_v19 = vadd.s32 %v2529_v12, %v2520_v18  ;;  %v180_v20 = vadd.s32 %v2529_v12, %v2524_v7 }
  0x26   : > { %v181_v36 = vadd.s32 %v2529_v12, %v2526_v10  ;;  %v2622_v37 = vsel %vm170_vm14, %v2187_v34, %v140_v21  ;;  %v2625_v35 = vsel %vm172_vm15, %v2183_v33, %v141_v22  ;;  %v182_v38 = vadd.s32 %v2529_v12, %v2531_v13 }
  0x27   : > { %v183_v17 = vadd.s32 %v2529_v12, %v2533_v14  ;;  %v184_v18 = vadd.s32 %v2529_v12, %v2543_v49  ;;  %v185_v7 = vadd.s32 %v2529_v12, %v2545_v56  ;;  %v186_v10 = vadd.s32 %v2529_v12, %v114_v58 }
  0x28   : > { %v187_v21 = vadd.s32 %v2529_v12, %v115_v60  ;;  %v188_v34 = vadd.s32 %v2529_v12, %v116_v55  ;;  %v189_v22 = vadd.s32 %v2529_v12, %v117_v1  ;;  %v190_v33 = vadd.s32 %v2529_v12, %v118_v61  ;;  %v5010_v55 = vld [vmem:[#allocation21_spill] sm:$0xff]  ;;  %v5011_v60 = vld [vmem:[#allocation20_spill] sm:$0xff] }
  0x29   : > { %v191_v13 = vadd.s32 %v2529_v12, %v119_v52  ;;  %vm194_vm0 = vcmp.lt.s32.totalorder %v2179_v32, %v178_v39  ;;  %vm196_vm1 = vcmp.lt.s32.totalorder %v2175_v31, %v179_v19  ;;  %vm198_vm2 = vcmp.lt.s32.totalorder %v2171_v30, %v180_v20  ;;  %v5013_v52 = vld [vmem:[#allocation18_spill] sm:$0xff] }
  0x2a   : > { %vm200_vm3 = vcmp.lt.s32.totalorder %v2167_v29, %v181_v36  ;;  %v192_v14 = vadd.s32 %v2529_v12, %v120_v11  ;;  %v193_v40 = vadd.s32 %v2529_v12, %v121_v53  ;;  %v2648_v45 = vsel %vm194_vm0, %v2179_v32, %v178_v39  ;;  %v5008_v32 = vld [vmem:[#allocation23_spill] sm:$0xff]  ;;  %v5009_v53 = vld [vmem:[#allocation22_spill] sm:$0xff] }
  0x2b   : > { %v2651_v1 = vsel %vm196_vm1, %v2175_v31, %v179_v19  ;;  %vm202_vm4 = vcmp.lt.s32.totalorder %v2163_v28, %v182_v38  ;;  %vm204_vm5 = vcmp.lt.s32.totalorder %v2159_v27, %v183_v17  ;;  %vm206_vm6 = vcmp.lt.s32.totalorder %v2155_v26, %v184_v18  ;;  %v5026_v19 = vld [vmem:[#allocation9_spill] sm:$0xff] }
  0x2c   : > { %vm208_vm7 = vcmp.lt.s32.totalorder %v2151_v25, %v185_v7  ;;  %v2658_v48 = vsel %vm198_vm2, %v2171_v30, %v180_v20  ;;  %v2661_v11 = vsel %vm200_vm3, %v2167_v29, %v181_v36  ;;  %v2664_v12 = vsel %vm202_vm4, %v2163_v28, %v182_v38  ;;  %v5027_v36 = vld [vmem:[#allocation10_spill] sm:$0xff] }
  0x2d   : > { %v2667_v31 = vsel %vm204_vm5, %v2159_v27, %v183_v17  ;;  %vm210_vm8 = vcmp.lt.s32.totalorder %v2147_v24, %v186_v10  ;;  %vm212_vm9 = vcmp.lt.s32.totalorder %v2143_v23, %v187_v21  ;;  %vm214_vm10 = vcmp.lt.s32.totalorder %v5008_v32, %v188_v34  ;;  %v5028_v17 = vld [vmem:[#allocation11_spill] sm:$0xff] }
  0x2e   : > { %vm216_vm11 = vcmp.lt.s32.totalorder %v5009_v53, %v189_v22  ;;  %v2674_v30 = vsel %vm206_vm6, %v2155_v26, %v184_v18  ;;  %v2677_v29 = vsel %vm208_vm7, %v2151_v25, %v185_v7  ;;  %v2680_v28 = vsel %vm210_vm8, %v2147_v24, %v186_v10  ;;  %v5029_v7 = vld [vmem:[#allocation12_spill] sm:$0xff] }
  0x2f   : > { %v2683_v27 = vsel %vm212_vm9, %v2143_v23, %v187_v21  ;;  %vm218_vm12 = vcmp.lt.s32.totalorder %v5010_v55, %v190_v33  ;;  %vm220_vm13 = vcmp.lt.s32.totalorder %v5011_v60, %v191_v13  ;;  %vm222_vm14 = vcmp.lt.s32.totalorder %v5012_v51, %v192_v14  ;;  %v5030_v21 = vld [vmem:[#allocation13_spill] sm:$0xff] }
  0x30   : > { %vm224_vm15 = vcmp.lt.s32.totalorder %v5013_v52, %v193_v40  ;;  %v2690_v26 = vsel %vm214_vm10, %v5008_v32, %v188_v34  ;;  %v2693_v25 = vsel %vm216_vm11, %v5009_v53, %v189_v22  ;;  %v2696_v24 = vsel %vm218_vm12, %v5010_v55, %v190_v33  ;;  %v5031_v22 = vld [vmem:[#allocation14_spill] sm:$0xff]  ;;  %v5034_v53 = vld [vmem:[#allocation28_spill] sm:$0xff] }
  0x31   : > { %5014 = vst [vmem:[#allocation23_spill] sm:$0xff] %v2690_v26  ;;  %5015 = vst [vmem:[#allocation22_spill] sm:$0xff] %v2693_v25  ;;  %v2699_v23 = vsel %vm220_vm13, %v5011_v60, %v191_v13  ;;  %v2702_v49 = vsel %vm222_vm14, %v5012_v51, %v192_v14  ;;  %v2705_v56 = vsel %vm224_vm15, %v5013_v52, %v193_v40  ;;  %v5032_v13 = vld [vmem:[#allocation15_spill] sm:$0xff]  ;;  %v5033_v40 = vld [vmem:[#allocation27_spill] sm:$0xff] }
  0x32   : > { %5016 = vst [vmem:[#allocation21_spill] sm:$0xff] %v2696_v24  ;;  %5017 = vst [vmem:[#allocation20_spill] sm:$0xff] %v2699_v23  ;;  %v230_v58 = vsub.s32 %v5021_v50, %v5020_v57  ;;  %v231_v61 = vsub.s32 %v5022_v59, %v5020_v57  ;;  %v232_v63 = vsub.s32 %v5023_v62, %v5020_v57  ;;  %v5035_v60 = vld [vmem:[#allocation16_spill] sm:$0xff] }
  0x33   : > { %5018 = vst [vmem:[#allocation19_spill] sm:$0xff] %v2702_v49  ;;  %5019 = vst [vmem:[#allocation18_spill] sm:$0xff] %v2705_v56  ;;  %v233_v3 = vsub.s32 %v5024_v0, %v5020_v57  ;;  %v234_v39 = vsub.s32 %v5025_v54, %v5020_v57  ;;  %v235_v20 = vsub.s32 %v5026_v19, %v5020_v57  ;;  %v5041_v0 = vld [vmem:[#allocation26_spill] sm:$0xff] }
  0x34   : > { %v236_v38 = vsub.s32 %v5027_v36, %v5020_v57  ;;  %v237_v18 = vsub.s32 %v5028_v17, %v5020_v57  ;;  %v238_v10 = vsub.s32 %v5029_v7, %v5020_v57  ;;  %v239_v34 = vsub.s32 %v5030_v21, %v5020_v57  ;;  %v5038_v17 = vld [vmem:[#allocation25_spill] sm:$0xff]  ;;  %v5039_v36 = vld [vmem:[#allocation17_spill] sm:$0xff] }
  0x35   : > { %v240_v33 = vsub.s32 %v5031_v22, %v5020_v57  ;;  %v241_v14 = vsub.s32 %v5032_v13, %v5020_v57  ;;  %v2733_v32 = vmul.u32 %v5033_v40, %v5033_v40  ;;  %v2737_v55 = vmul.u32 %v5034_v53, %v5034_v53  ;;  %v5036_v22 = vld [vmem:[#allocation2_spill] sm:$0xff] }
  0x36   : > { %v242_v51 = vsub.s32 %v5035_v60, %v5020_v57  ;;  %v2742_v52 = vmul.u32 %v230_v58, %v230_v58  ;;  %v2744_v21 = vmul.u32 %v231_v61, %v231_v61  ;;  %v5037_v7 = vsub.s32 1, %v5036_v22 }
  0x37   : > { %v243_v40 = vsub.s32 %v5039_v36, %v5020_v57  ;;  %v2751_v19 = vmul.u32 %v232_v63, %v232_v63  ;;  %v2753_v54 = vmul.u32 %v233_v3, %v233_v3  ;;  %v2764_v60 = vstv %s364_s18 }
  0x38   : > { %v263_v13 = vrot.slane %v5038_v17, %v5037_v7  ;;  %v5040_v53 = vmov %v5037_v7  ;;  %v2760_v58 = vmul.u32 %v234_v39, %v234_v39  ;;  %v2762_v61 = vmul.u32 %v235_v20, %v235_v20  ;;  %5042 = vst [vmem:[#allocation24_spill] sm:$0xff] %v2764_v60 }
  0x39   : > { %v2758_v62 = vrot.slane %v5041_v0, %v5040_v53  ;;  %v2767_v17 = vmul.u32 %v236_v38, %v236_v38  ;;  %v2769_v57 = vmul.u32 %v237_v18, %v237_v18 }
  0x3a   : > { %v264_v63 = vadd.s32 %v263_v13, %v2733_v32  ;;  %v265_v3 = vadd.s32 %v263_v13, %v2737_v55  ;;  %v254_v36 = vmul.u32 %v238_v10, %v238_v10  ;;  %v255_v59 = vmul.u32 %v239_v34, %v239_v34 }
  0x3b   : > { %v266_v53 = vadd.s32 %v263_v13, %v2742_v52  ;;  %v267_v39 = vadd.s32 %v263_v13, %v2744_v21  ;;  %v256_v20 = vmul.u32 %v240_v33, %v240_v33  ;;  %v257_v0 = vmul.u32 %v241_v14, %v241_v14 }
  0x3c   : > { %v268_v50 = vadd.s32 %v263_v13, %v2751_v19  ;;  %v269_v7 = vadd.s32 %v263_v13, %v2753_v54  ;;  %v258_v38 = vmul.u32 %v242_v51, %v242_v51  ;;  %v259_v22 = vmul.u32 %v243_v40, %v243_v40 }
  0x3d   : > { %v270_v18 = vadd.s32 %v263_v13, %v2760_v58  ;;  %v271_v60 = vadd.s32 %v263_v13, %v2762_v61  ;;  %v272_v56 = vadd.s32 %v263_v13, %v2767_v17  ;;  %v273_v10 = vadd.s32 %v263_v13, %v2769_v57 }
  0x3e   : > { %v274_v34 = vadd.s32 %v263_v13, %v254_v36  ;;  %v275_v49 = vadd.s32 %v263_v13, %v255_v59  ;;  %v276_v23 = vadd.s32 %v263_v13, %v256_v20  ;;  %v277_v24 = vadd.s32 %v263_v13, %v257_v0 }
  0x3f   : > { %vm280_vm0 = vcmp.lt.s32.totalorder %v2562_v4, %v264_v63  ;;  %vm282_vm1 = vcmp.lt.s32.totalorder %v2565_v5, %v265_v3  ;;  %v278_v33 = vadd.s32 %v263_v13, %v258_v38  ;;  %v279_v14 = vadd.s32 %v263_v13, %v259_v22 }
  0x40   : > { %vm284_vm2 = vcmp.lt.s32.totalorder %v2568_v6, %v266_v53  ;;  %vm286_vm3 = vcmp.lt.s32.totalorder %v2571_v9, %v267_v39  ;;  %v2786_v51 = vsel %vm280_vm0, %v2562_v4, %v264_v63  ;;  %v2789_v40 = vsel %vm282_vm1, %v2565_v5, %v265_v3  ;;  %v5054_v63 = vld [vmem:[#allocation2_spill] sm:$0xff] }
  0x41   : > { %vm288_vm4 = vcmp.lt.s32.totalorder %v2578_v8, %v268_v50  ;;  %vm290_vm5 = vcmp.lt.s32.totalorder %v2581_v47, %v269_v7  ;;  %v2794_v25 = vsel %vm284_vm2, %v2568_v6, %v266_v53  ;;  %v2797_v26 = vsel %vm286_vm3, %v2571_v9, %v267_v39  ;;  %v5055_v53 = vld [vmem:[#allocation3_spill] sm:$0xff] }
  0x42   : > { %vm292_vm6 = vcmp.lt.s32.totalorder %v2584_v46, %v270_v18  ;;  %vm294_vm7 = vcmp.lt.s32.totalorder %v2587_v16, %v271_v60  ;;  %v2802_v4 = vsel %vm288_vm4, %v2578_v8, %v268_v50  ;;  %v2805_v5 = vsel %vm290_vm5, %v2581_v47, %v269_v7  ;;  %v5050_v7 = vld [vmem:[#allocation18_spill] sm:$0xff] }
  0x43   : > { %vm296_vm8 = vcmp.lt.s32.totalorder %v2594_v15, %v272_v56  ;;  %vm298_vm9 = vcmp.lt.s32.totalorder %v2597_v2, %v273_v10  ;;  %v2810_v6 = vsel %vm292_vm6, %v2584_v46, %v270_v18  ;;  %v2813_v9 = vsel %vm294_vm7, %v2587_v16, %v271_v60  ;;  %v5058_v18 = vld [vmem:[#allocation4_spill] sm:$0xff] }
  0x44   : > { %vm300_vm10 = vcmp.lt.s32.totalorder %v2600_v42, %v274_v34  ;;  %vm302_vm11 = vcmp.lt.s32.totalorder %v2603_v41, %v275_v49  ;;  %v2818_v8 = vsel %vm296_vm8, %v2594_v15, %v272_v56  ;;  %v2821_v47 = vsel %vm298_vm9, %v2597_v2, %v273_v10 }
  0x45   : > { %vm304_vm12 = vcmp.lt.s32.totalorder %v2606_v43, %v276_v23  ;;  %vm306_vm13 = vcmp.lt.s32.totalorder %v2609_v44, %v277_v24  ;;  %v2826_v46 = vsel %vm300_vm10, %v2600_v42, %v274_v34  ;;  %v2829_v16 = vsel %vm302_vm11, %v2603_v41, %v275_v49  ;;  %v5059_v34 = vld [vmem:[#allocation5_spill] sm:$0xff] }
  0x46   : > { %vm308_vm14 = vcmp.lt.s32.totalorder %v2622_v37, %v278_v33  ;;  %vm310_vm15 = vcmp.lt.s32.totalorder %v2625_v35, %v279_v14  ;;  %v2834_v15 = vsel %vm304_vm12, %v2606_v43, %v276_v23  ;;  %v2837_v2 = vsel %vm306_vm13, %v2609_v44, %v277_v24 }
  0x47   : > { %v316_v56 = vadd.s32 %v2758_v62, %v2733_v32  ;;  %v317_v42 = vadd.s32 %v2758_v62, %v2737_v55  ;;  %v2844_v50 = vsel %vm308_vm14, %v2622_v37, %v278_v33  ;;  %v2847_v41 = vsel %vm310_vm15, %v2625_v35, %v279_v14  ;;  %v5060_v14 = vld [vmem:[#allocation6_spill] sm:$0xff] }
  0x48   : > { %v318_v49 = vadd.s32 %v2758_v62, %v2742_v52  ;;  %v319_v43 = vadd.s32 %v2758_v62, %v2744_v21  ;;  %v320_v44 = vadd.s32 %v2758_v62, %v2751_v19  ;;  %v321_v24 = vadd.s32 %v2758_v62, %v2753_v54  ;;  %v5045_v52 = vld [vmem:[#allocation21_spill] sm:$0xff] }
  0x49   : > { %v322_v23 = vadd.s32 %v2758_v62, %v2760_v58  ;;  %v323_v37 = vadd.s32 %v2758_v62, %v2762_v61  ;;  %v324_v35 = vadd.s32 %v2758_v62, %v2767_v17  ;;  %v325_v13 = vadd.s32 %v2758_v62, %v2769_v57  ;;  %v5046_v58 = vld [vmem:[#allocation20_spill] sm:$0xff]  ;;  %v5049_v61 = vld [vmem:[#allocation19_spill] sm:$0xff] }
  0x4a   : > { %v326_v21 = vadd.s32 %v2758_v62, %v254_v36  ;;  %v327_v32 = vadd.s32 %v2758_v62, %v255_v59  ;;  %v328_v19 = vadd.s32 %v2758_v62, %v256_v20  ;;  %v329_v54 = vadd.s32 %v2758_v62, %v257_v0  ;;  %v5053_v57 = vld [vmem:[#allocation24_spill] sm:$0xff] }
  0x4b   : > { %vm332_vm0 = vcmp.lt.s32.totalorder %v2648_v45, %v316_v56  ;;  %vm334_vm1 = vcmp.lt.s32.totalorder %v2651_v1, %v317_v42  ;;  %v330_v55 = vadd.s32 %v2758_v62, %v258_v38  ;;  %v331_v60 = vadd.s32 %v2758_v62, %v259_v22  ;;  %v5043_v62 = vld [vmem:[#allocation23_spill] sm:$0xff]  ;;  %v5044_v22 = vld [vmem:[#allocation22_spill] sm:$0xff] }
  0x4c   : > { %vm336_vm2 = vcmp.lt.s32.totalorder %v2658_v48, %v318_v49  ;;  %vm338_vm3 = vcmp.lt.s32.totalorder %v2661_v11, %v319_v43  ;;  %v2876_v36 = vsel %vm332_vm0, %v2648_v45, %v316_v56  ;;  %v2879_v59 = vsel %vm334_vm1, %v2651_v1, %v317_v42  ;;  %v5061_v42 = vld [vmem:[#allocation7_spill] sm:$0xff] }
  0x4d   : > { %vm340_vm4 = vcmp.lt.s32.totalorder %v2664_v12, %v320_v44  ;;  %vm342_vm5 = vcmp.lt.s32.totalorder %v2667_v31, %v321_v24  ;;  %v2884_v0 = vsel %vm336_vm2, %v2658_v48, %v318_v49  ;;  %v2887_v17 = vsel %vm338_vm3, %v2661_v11, %v319_v43  ;;  %v5062_v43 = vld [vmem:[#allocation8_spill] sm:$0xff] }
  0x4e   : > { %vm344_vm6 = vcmp.lt.s32.totalorder %v2674_v30, %v322_v23  ;;  %vm346_vm7 = vcmp.lt.s32.totalorder %v2677_v29, %v323_v37  ;;  %v2892_v45 = vsel %vm340_vm4, %v2664_v12, %v320_v44  ;;  %v2895_v1 = vsel %vm342_vm5, %v2667_v31, %v321_v24  ;;  %v5063_v24 = vld [vmem:[#allocation9_spill] sm:$0xff] }
  0x4f   : > { %vm348_vm8 = vcmp.lt.s32.totalorder %v2680_v28, %v324_v35  ;;  %vm350_vm9 = vcmp.lt.s32.totalorder %v2683_v27, %v325_v13  ;;  %v2900_v48 = vsel %vm344_vm6, %v2674_v30, %v322_v23  ;;  %v2903_v11 = vsel %vm346_vm7, %v2677_v29, %v323_v37  ;;  %v5064_v37 = vld [vmem:[#allocation10_spill] sm:$0xff] }
  0x50   : > { %vm352_vm10 = vcmp.lt.s32.totalorder %v5043_v62, %v326_v21  ;;  %vm354_vm11 = vcmp.lt.s32.totalorder %v5044_v22, %v327_v32  ;;  %v2908_v12 = vsel %vm348_vm8, %v2680_v28, %v324_v35  ;;  %v2911_v31 = vsel %vm350_vm9, %v2683_v27, %v325_v13  ;;  %v5065_v13 = vld [vmem:[#allocation11_spill] sm:$0xff] }
  0x51   : > { %vm356_vm12 = vcmp.lt.s32.totalorder %v5045_v52, %v328_v19  ;;  %vm358_vm13 = vcmp.lt.s32.totalorder %v5046_v58, %v329_v54  ;;  %v2916_v30 = vsel %vm352_vm10, %v5043_v62, %v326_v21  ;;  %v2919_v29 = vsel %vm354_vm11, %v5044_v22, %v327_v32  ;;  %v5066_v32 = vld [vmem:[#allocation12_spill] sm:$0xff]  ;;  %v5069_v22 = vld [vmem:[#allocation15_spill] sm:$0xff] }
  0x52   : > { %5047 = vst [vmem:[#allocation27_spill] sm:$0xff] %v2916_v30  ;;  %5048 = vst [vmem:[#allocation28_spill] sm:$0xff] %v2919_v29  ;;  %vm360_vm14 = vcmp.lt.s32.totalorder %v5049_v61, %v330_v55  ;;  %vm362_vm15 = vcmp.lt.s32.totalorder %v5050_v7, %v331_v60  ;;  %v2924_v28 = vsel %vm356_vm12, %v5045_v52, %v328_v19 }
  0x53   : > { %5051 = vst [vmem:[#allocation23_spill] sm:$0xff] %v2924_v28  ;;  %v2927_v27 = vsel %vm358_vm13, %v5046_v58, %v329_v54  ;;  %v366_v3 = vsub.s32 %v5054_v63, %v5053_v57  ;;  %v367_v39 = vsub.s32 %v5055_v53, %v5053_v57  ;;  %v2934_v20 = vsel %vm360_vm14, %v5049_v61, %v330_v55  ;;  %v5067_v54 = vld [vmem:[#allocation13_spill] sm:$0xff] }
  0x54   : > { %5052 = vst [vmem:[#allocation22_spill] sm:$0xff] %v2927_v27  ;;  %5056 = vst [vmem:[#allocation21_spill] sm:$0xff] %v2934_v20  ;;  %v2937_v38 = vsel %vm362_vm15, %v5050_v7, %v331_v60  ;;  %v368_v10 = vsub.s32 %v5058_v18, %v5053_v57  ;;  %v369_v33 = vsub.s32 %v5059_v34, %v5053_v57  ;;  %v5068_v60 = vld [vmem:[#allocation14_spill] sm:$0xff]  ;;  %v5070_v7 = vld [vmem:[#allocation16_spill] sm:$0xff] }
  0x55   : > { %5057 = vst [vmem:[#allocation20_spill] sm:$0xff] %v2937_v38  ;;  %v370_v56 = vsub.s32 %v5060_v14, %v5053_v57  ;;  %v371_v49 = vsub.s32 %v5061_v42, %v5053_v57  ;;  %v372_v44 = vsub.s32 %v5062_v43, %v5053_v57  ;;  %v373_v23 = vsub.s32 %v5063_v24, %v5053_v57  ;;  %v5072_v24 = vld [vmem:[#allocation25_spill] sm:$0xff]  ;;  %v5075_v14 = vld [vmem:[#allocation26_spill] sm:$0xff] }
  0x56   : > { %v374_v35 = vsub.s32 %v5064_v37, %v5053_v57  ;;  %v375_v21 = vsub.s32 %v5065_v13, %v5053_v57  ;;  %v376_v19 = vsub.s32 %v5066_v32, %v5053_v57  ;;  %v377_v55 = vsub.s32 %v5067_v54, %v5053_v57 }
  0x57   : > { %v378_v62 = vsub.s32 %v5068_v60, %v5053_v57  ;;  %v379_v52 = vsub.s32 %v5069_v22, %v5053_v57  ;;  %v2963_v58 = vmul.u32 %v366_v3, %v366_v3  ;;  %v2965_v61 = vmul.u32 %v367_v39, %v367_v39  ;;  %v5073_v60 = vld [vmem:[#allocation17_spill] sm:$0xff] }
  0x58   : > { %v380_v13 = vsub.s32 %v5070_v7, %v5053_v57  ;;  %v2970_v37 = vmul.u32 %v368_v10, %v368_v10  ;;  %v2972_v32 = vmul.u32 %v369_v33, %v369_v33  ;;  %v5071_v54 = vsub.s32 2, %v5054_v63 }
  0x59   : > { %v381_v42 = vsub.s32 %v5073_v60, %v5053_v57  ;;  %v2979_v22 = vmul.u32 %v370_v56, %v370_v56  ;;  %v2981_v3 = vmul.u32 %v371_v49, %v371_v49  ;;  %v2992_v7 = vstv %s502_s19 }
  0x5a   : > { %v401_v43 = vrot.slane %v5072_v24, %v5071_v54  ;;  %v5074_v39 = vmov %v5071_v54  ;;  %v2988_v10 = vmul.u32 %v372_v44, %v372_v44  ;;  %v2990_v33 = vmul.u32 %v373_v23, %v373_v23  ;;  %5076 = vst [vmem:[#allocation19_spill] sm:$0xff] %v2992_v7 }
  0x5b   : > { %v2986_v34 = vrot.slane %v5075_v14, %v5074_v39  ;;  %v2995_v24 = vmul.u32 %v374_v35, %v374_v35  ;;  %v2997_v57 = vmul.u32 %v375_v21, %v375_v21 }
  0x5c   : > { %v402_v56 = vadd.s32 %v401_v43, %v2963_v58  ;;  %v403_v49 = vadd.s32 %v401_v43, %v2965_v61  ;;  %v392_v60 = vmul.u32 %v376_v19, %v376_v19  ;;  %v393_v18 = vmul.u32 %v377_v55, %v377_v55 }
  0x5d   : > { %v404_v39 = vadd.s32 %v401_v43, %v2970_v37  ;;  %v405_v44 = vadd.s32 %v401_v43, %v2972_v32  ;;  %v394_v23 = vmul.u32 %v378_v62, %v378_v62  ;;  %v395_v14 = vmul.u32 %v379_v52, %v379_v52 }
  0x5e   : > { %v406_v53 = vadd.s32 %v401_v43, %v2979_v22  ;;  %v407_v54 = vadd.s32 %v401_v43, %v2981_v3  ;;  %v396_v35 = vmul.u32 %v380_v13, %v380_v13  ;;  %v397_v63 = vmul.u32 %v381_v42, %v381_v42 }
  0x5f   : > { %v408_v21 = vadd.s32 %v401_v43, %v2988_v10  ;;  %v409_v7 = vadd.s32 %v401_v43, %v2990_v33  ;;  %v410_v38 = vadd.s32 %v401_v43, %v2995_v24  ;;  %v411_v19 = vadd.s32 %v401_v43, %v2997_v57 }
  0x60   : > { %v412_v55 = vadd.s32 %v401_v43, %v392_v60  ;;  %v413_v20 = vadd.s32 %v401_v43, %v393_v18  ;;  %v414_v27 = vadd.s32 %v401_v43, %v394_v23  ;;  %v415_v28 = vadd.s32 %v401_v43, %v395_v14 }
  0x61   : > { %vm418_vm0 = vcmp.lt.s32.totalorder %v2786_v51, %v402_v56  ;;  %vm420_vm1 = vcmp.lt.s32.totalorder %v2789_v40, %v403_v49  ;;  %v416_v62 = vadd.s32 %v401_v43, %v396_v35  ;;  %v417_v52 = vadd.s32 %v401_v43, %v397_v63 }
  0x62   : > { %vm422_vm2 = vcmp.lt.s32.totalorder %v2794_v25, %v404_v39  ;;  %vm424_vm3 = vcmp.lt.s32.totalorder %v2797_v26, %v405_v44  ;;  %v3014_v42 = vsel %vm418_vm0, %v2786_v51, %v402_v56  ;;  %v3017_v13 = vsel %vm420_vm1, %v2789_v40, %v403_v49  ;;  %v5088_v56 = vld [vmem:[#allocation2_spill] sm:$0xff] }
  0x63   : > { %vm426_vm4 = vcmp.lt.s32.totalorder %v2802_v4, %v406_v53  ;;  %vm428_vm5 = vcmp.lt.s32.totalorder %v2805_v5, %v407_v54  ;;  %v3022_v29 = vsel %vm422_vm2, %v2794_v25, %v404_v39  ;;  %v3025_v30 = vsel %vm424_vm3, %v2797_v26, %v405_v44  ;;  %v5089_v39 = vld [vmem:[#allocation3_spill] sm:$0xff] }
  0x64   : > { %vm430_vm6 = vcmp.lt.s32.totalorder %v2810_v6, %v408_v21  ;;  %vm432_vm7 = vcmp.lt.s32.totalorder %v2813_v9, %v409_v7  ;;  %v3030_v51 = vsel %vm426_vm4, %v2802_v4, %v406_v53  ;;  %v3033_v40 = vsel %vm428_vm5, %v2805_v5, %v407_v54  ;;  %v5084_v54 = vld [vmem:[#allocation20_spill] sm:$0xff] }
  0x65   : > { %vm434_vm8 = vcmp.lt.s32.totalorder %v2818_v8, %v410_v38  ;;  %vm436_vm9 = vcmp.lt.s32.totalorder %v2821_v47, %v411_v19  ;;  %v3038_v25 = vsel %vm430_vm6, %v2810_v6, %v408_v21  ;;  %v3041_v26 = vsel %vm432_vm7, %v2813_v9, %v409_v7  ;;  %v5092_v21 = vld [vmem:[#allocation4_spill] sm:$0xff] }
  0x66   : > { %vm438_vm10 = vcmp.lt.s32.totalorder %v2826_v46, %v412_v55  ;;  %vm440_vm11 = vcmp.lt.s32.totalorder %v2829_v16, %v413_v20  ;;  %v3046_v4 = vsel %vm434_vm8, %v2818_v8, %v410_v38  ;;  %v3049_v5 = vsel %vm436_vm9, %v2821_v47, %v411_v19 }
  0x67   : > { %vm442_vm12 = vcmp.lt.s32.totalorder %v2834_v15, %v414_v27  ;;  %vm444_vm13 = vcmp.lt.s32.totalorder %v2837_v2, %v415_v28  ;;  %v3054_v6 = vsel %vm438_vm10, %v2826_v46, %v412_v55  ;;  %v3057_v9 = vsel %vm440_vm11, %v2829_v16, %v413_v20  ;;  %v5093_v55 = vld [vmem:[#allocation5_spill] sm:$0xff] }
  0x68   : > { %vm446_vm14 = vcmp.lt.s32.totalorder %v2844_v50, %v416_v62  ;;  %vm448_vm15 = vcmp.lt.s32.totalorder %v2847_v41, %v417_v52  ;;  %v3062_v8 = vsel %vm442_vm12, %v2834_v15, %v414_v27  ;;  %v3065_v47 = vsel %vm444_vm13, %v2837_v2, %v415_v28 }
  0x69   : > { %v454_v53 = vadd.s32 %v2986_v34, %v2963_v58  ;;  %v455_v46 = vadd.s32 %v2986_v34, %v2965_v61  ;;  %v3072_v38 = vsel %vm446_vm14, %v2844_v50, %v416_v62  ;;  %v3075_v16 = vsel %vm448_vm15, %v2847_v41, %v417_v52  ;;  %v5094_v52 = vld [vmem:[#allocation6_spill] sm:$0xff] }
  0x6a   : > { %v456_v20 = vadd.s32 %v2986_v34, %v2970_v37  ;;  %v457_v15 = vadd.s32 %v2986_v34, %v2972_v32  ;;  %v458_v2 = vadd.s32 %v2986_v34, %v2979_v22  ;;  %v459_v28 = vadd.s32 %v2986_v34, %v2981_v3  ;;  %v5079_v3 = vld [vmem:[#allocation23_spill] sm:$0xff] }
  0x6b   : > { %v460_v27 = vadd.s32 %v2986_v34, %v2988_v10  ;;  %v461_v50 = vadd.s32 %v2986_v34, %v2990_v33  ;;  %v462_v41 = vadd.s32 %v2986_v34, %v2995_v24  ;;  %v463_v43 = vadd.s32 %v2986_v34, %v2997_v57  ;;  %v5080_v10 = vld [vmem:[#allocation22_spill] sm:$0xff]  ;;  %v5083_v33 = vld [vmem:[#allocation21_spill] sm:$0xff]  ;;  %v5087_v57 = vld [vmem:[#allocation19_spill] sm:$0xff] }
  0x6c   : > { %v464_v37 = vadd.s32 %v2986_v34, %v392_v60  ;;  %v465_v32 = vadd.s32 %v2986_v34, %v393_v18  ;;  %v466_v22 = vadd.s32 %v2986_v34, %v394_v23  ;;  %v467_v58 = vadd.s32 %v2986_v34, %v395_v14 }
  0x6d   : > { %vm470_vm0 = vcmp.lt.s32.totalorder %v2876_v36, %v454_v53  ;;  %vm472_vm1 = vcmp.lt.s32.totalorder %v2879_v59, %v455_v46  ;;  %v468_v61 = vadd.s32 %v2986_v34, %v396_v35  ;;  %v469_v7 = vadd.s32 %v2986_v34, %v397_v63  ;;  %v5077_v63 = vld [vmem:[#allocation27_spill] sm:$0xff]  ;;  %v5078_v34 = vld [vmem:[#allocation28_spill] sm:$0xff] }
  0x6e   : > { %vm474_vm2 = vcmp.lt.s32.totalorder %v2884_v0, %v456_v20  ;;  %vm476_vm3 = vcmp.lt.s32.totalorder %v2887_v17, %v457_v15  ;;  %v3104_v24 = vsel %vm470_vm0, %v2876_v36, %v454_v53  ;;  %v3107_v18 = vsel %vm472_vm1, %v2879_v59, %v455_v46  ;;  %v5095_v46 = vld [vmem:[#allocation7_spill] sm:$0xff] }
  0x6f   : > { %vm478_vm4 = vcmp.lt.s32.totalorder %v2892_v45, %v458_v2  ;;  %vm480_vm5 = vcmp.lt.s32.totalorder %v2895_v1, %v459_v28  ;;  %v3112_v14 = vsel %vm474_vm2, %v2884_v0, %v456_v20  ;;  %v3115_v60 = vsel %vm476_vm3, %v2887_v17, %v457_v15  ;;  %v5096_v15 = vld [vmem:[#allocation8_spill] sm:$0xff] }
  0x70   : > { %vm482_vm6 = vcmp.lt.s32.totalorder %v2900_v48, %v460_v27  ;;  %vm484_vm7 = vcmp.lt.s32.totalorder %v2903_v11, %v461_v50  ;;  %v3120_v36 = vsel %vm478_vm4, %v2892_v45, %v458_v2  ;;  %v3123_v59 = vsel %vm480_vm5, %v2895_v1, %v459_v28  ;;  %v5097_v28 = vld [vmem:[#allocation9_spill] sm:$0xff] }
  0x71   : > { %vm486_vm8 = vcmp.lt.s32.totalorder %v2908_v12, %v462_v41  ;;  %vm488_vm9 = vcmp.lt.s32.totalorder %v2911_v31, %v463_v43  ;;  %v3128_v0 = vsel %vm482_vm6, %v2900_v48, %v460_v27  ;;  %v3131_v17 = vsel %vm484_vm7, %v2903_v11, %v461_v50  ;;  %v5098_v50 = vld [vmem:[#allocation10_spill] sm:$0xff] }
  0x72   : > { %vm490_vm10 = vcmp.lt.s32.totalorder %v5077_v63, %v464_v37  ;;  %vm492_vm11 = vcmp.lt.s32.totalorder %v5078_v34, %v465_v32  ;;  %v3136_v45 = vsel %vm486_vm8, %v2908_v12, %v462_v41  ;;  %v3139_v1 = vsel %vm488_vm9, %v2911_v31, %v463_v43  ;;  %v5099_v43 = vld [vmem:[#allocation11_spill] sm:$0xff] }
  0x73   : > { %vm494_vm12 = vcmp.lt.s32.totalorder %v5079_v3, %v466_v22  ;;  %vm496_vm13 = vcmp.lt.s32.totalorder %v5080_v10, %v467_v58  ;;  %v3144_v48 = vsel %vm490_vm10, %v5077_v63, %v464_v37  ;;  %v3147_v11 = vsel %vm492_vm11, %v5078_v34, %v465_v32  ;;  %v5100_v32 = vld [vmem:[#allocation12_spill] sm:$0xff]  ;;  %v5103_v34 = vld [vmem:[#allocation15_spill] sm:$0xff] }
  0x74   : > { %5081 = vst [vmem:[#allocation18_spill] sm:$0xff] %v3144_v48  ;;  %5082 = vst [vmem:[#allocation24_spill] sm:$0xff] %v3147_v11  ;;  %vm498_vm14 = vcmp.lt.s32.totalorder %v5083_v33, %v468_v61  ;;  %vm500_vm15 = vcmp.lt.s32.totalorder %v5084_v54, %v469_v7  ;;  %v3152_v12 = vsel %vm494_vm12, %v5079_v3, %v466_v22 }
  0x75   : > { %5085 = vst [vmem:[#allocation27_spill] sm:$0xff] %v3152_v12  ;;  %v3155_v31 = vsel %vm496_vm13, %v5080_v10, %v467_v58  ;;  %v504_v49 = vsub.s32 %v5088_v56, %v5087_v57  ;;  %v505_v44 = vsub.s32 %v5089_v39, %v5087_v57  ;;  %v3162_v23 = vsel %vm498_vm14, %v5083_v33, %v468_v61  ;;  %v5101_v58 = vld [vmem:[#allocation13_spill] sm:$0xff] }
  0x76   : > { %5086 = vst [vmem:[#allocation28_spill] sm:$0xff] %v3155_v31  ;;  %5090 = vst [vmem:[#allocation23_spill] sm:$0xff] %v3162_v23  ;;  %v3165_v35 = vsel %vm500_vm15, %v5084_v54, %v469_v7  ;;  %v506_v19 = vsub.s32 %v5092_v21, %v5087_v57  ;;  %v507_v62 = vsub.s32 %v5093_v55, %v5087_v57  ;;  %v5102_v7 = vld [vmem:[#allocation14_spill] sm:$0xff]  ;;  %v5104_v54 = vld [vmem:[#allocation16_spill] sm:$0xff] }
  0x77   : > { %5091 = vst [vmem:[#allocation22_spill] sm:$0xff] %v3165_v35  ;;  %v508_v53 = vsub.s32 %v5094_v52, %v5087_v57  ;;  %v509_v20 = vsub.s32 %v5095_v46, %v5087_v57  ;;  %v510_v2 = vsub.s32 %v5096_v15, %v5087_v57  ;;  %v511_v27 = vsub.s32 %v5097_v28, %v5087_v57  ;;  %v5106_v28 = vld [vmem:[#allocation25_spill] sm:$0xff]  ;;  %v5109_v52 = vld [vmem:[#allocation26_spill] sm:$0xff] }
  0x78   : > { %v512_v41 = vsub.s32 %v5098_v50, %v5087_v57  ;;  %v513_v37 = vsub.s32 %v5099_v43, %v5087_v57  ;;  %v514_v22 = vsub.s32 %v5100_v32, %v5087_v57  ;;  %v515_v61 = vsub.s32 %v5101_v58, %v5087_v57 }
  0x79   : > { %v516_v63 = vsub.s32 %v5102_v7, %v5087_v57  ;;  %v517_v3 = vsub.s32 %v5103_v34, %v5087_v57  ;;  %v3191_v10 = vmul.u32 %v504_v49, %v504_v49  ;;  %v3193_v33 = vmul.u32 %v505_v44, %v505_v44  ;;  %v5107_v7 = vld [vmem:[#allocation17_spill] sm:$0xff] }
  0x7a   : > { %v518_v43 = vsub.s32 %v5104_v54, %v5087_v57  ;;  %v3198_v50 = vmul.u32 %v506_v19, %v506_v19  ;;  %v3200_v32 = vmul.u32 %v507_v62, %v507_v62  ;;  %v5105_v58 = vsub.s32 3, %v5088_v56 }
  0x7b   : > { %v519_v46 = vsub.s32 %v5107_v7, %v5087_v57  ;;  %v3207_v34 = vmul.u32 %v508_v53, %v508_v53  ;;  %v3209_v49 = vmul.u32 %v509_v20, %v509_v20  ;;  %v3220_v54 = vstv %s640_s20 }
  0x7c   : > { %v539_v15 = vrot.slane %v5106_v28, %v5105_v58  ;;  %v5108_v44 = vmov %v5105_v58  ;;  %v3216_v19 = vmul.u32 %v510_v2, %v510_v2  ;;  %v3218_v62 = vmul.u32 %v511_v27, %v511_v27  ;;  %5110 = vst [vmem:[#allocation21_spill] sm:$0xff] %v3220_v54 }
  0x7d   : > { %v3214_v55 = vrot.slane %v5109_v52, %v5108_v44  ;;  %v3223_v58 = vmul.u32 %v512_v41, %v512_v41  ;;  %v3225_v57 = vmul.u32 %v513_v37, %v513_v37 }
  0x7e   : > { %v540_v53 = vadd.s32 %v539_v15, %v3191_v10  ;;  %v541_v20 = vadd.s32 %v539_v15, %v3193_v33  ;;  %v530_v7 = vmul.u32 %v514_v22, %v514_v22  ;;  %v531_v21 = vmul.u32 %v515_v61, %v515_v61 }
  0x7f   : > { %v542_v52 = vadd.s32 %v539_v15, %v3198_v50  ;;  %v543_v2 = vadd.s32 %v539_v15, %v3200_v32  ;;  %v532_v27 = vmul.u32 %v516_v63, %v516_v63  ;;  %v533_v44 = vmul.u32 %v517_v3, %v517_v3 }
  0x80   : > { %v544_v39 = vadd.s32 %v539_v15, %v3207_v34  ;;  %v545_v28 = vadd.s32 %v539_v15, %v3209_v49  ;;  %v534_v41 = vmul.u32 %v518_v43, %v518_v43  ;;  %v535_v56 = vmul.u32 %v519_v46, %v519_v46 }
  0x81   : > { %v546_v37 = vadd.s32 %v539_v15, %v3216_v19  ;;  %v547_v54 = vadd.s32 %v539_v15, %v3218_v62  ;;  %v548_v35 = vadd.s32 %v539_v15, %v3223_v58  ;;  %v549_v22 = vadd.s32 %v539_v15, %v3225_v57 }
  0x82   : > { %v550_v61 = vadd.s32 %v539_v15, %v530_v7  ;;  %v551_v23 = vadd.s32 %v539_v15, %v531_v21  ;;  %v552_v31 = vadd.s32 %v539_v15, %v532_v27  ;;  %v553_v12 = vadd.s32 %v539_v15, %v533_v44 }
  0x83   : > { %vm556_vm0 = vcmp.lt.s32.totalorder %v3014_v42, %v540_v53  ;;  %vm558_vm1 = vcmp.lt.s32.totalorder %v3017_v13, %v541_v20  ;;  %v554_v63 = vadd.s32 %v539_v15, %v534_v41  ;;  %v555_v3 = vadd.s32 %v539_v15, %v535_v56 }
  0x84   : > { %vm560_vm2 = vcmp.lt.s32.totalorder %v3022_v29, %v542_v52  ;;  %vm562_vm3 = vcmp.lt.s32.totalorder %v3025_v30, %v543_v2  ;;  %v3242_v46 = vsel %vm556_vm0, %v3014_v42, %v540_v53  ;;  %v3245_v43 = vsel %vm558_vm1, %v3017_v13, %v541_v20  ;;  %v5121_v53 = vld [vmem:[#allocation21_spill] sm:$0xff] }
  0x85   : > { %vm564_vm4 = vcmp.lt.s32.totalorder %v3030_v51, %v544_v39  ;;  %vm566_vm5 = vcmp.lt.s32.totalorder %v3033_v40, %v545_v28  ;;  %v3250_v11 = vsel %vm560_vm2, %v3022_v29, %v542_v52  ;;  %v3253_v48 = vsel %vm562_vm3, %v3025_v30, %v543_v2  ;;  %v5122_v20 = vld [vmem:[#allocation2_spill] sm:$0xff]  ;;  %v5123_v2 = vld [vmem:[#allocation3_spill] sm:$0xff] }
  0x86   : > { %vm568_vm6 = vcmp.lt.s32.totalorder %v3038_v25, %v546_v37  ;;  %vm570_vm7 = vcmp.lt.s32.totalorder %v3041_v26, %v547_v54  ;;  %v3258_v42 = vsel %vm564_vm4, %v3030_v51, %v544_v39  ;;  %v3261_v13 = vsel %vm566_vm5, %v3033_v40, %v545_v28  ;;  %v5114_v28 = vld [vmem:[#allocation28_spill] sm:$0xff] }
  0x87   : > { %vm572_vm8 = vcmp.lt.s32.totalorder %v3046_v4, %v548_v35  ;;  %vm574_vm9 = vcmp.lt.s32.totalorder %v3049_v5, %v549_v22  ;;  %v3266_v29 = vsel %vm568_vm6, %v3038_v25, %v546_v37  ;;  %v3269_v30 = vsel %vm570_vm7, %v3041_v26, %v547_v54  ;;  %v5126_v37 = vld [vmem:[#allocation4_spill] sm:$0xff] }
  0x88   : > { %vm576_vm10 = vcmp.lt.s32.totalorder %v3054_v6, %v550_v61  ;;  %vm578_vm11 = vcmp.lt.s32.totalorder %v3057_v9, %v551_v23  ;;  %v3274_v51 = vsel %vm572_vm8, %v3046_v4, %v548_v35  ;;  %v3277_v40 = vsel %vm574_vm9, %v3049_v5, %v549_v22 }
  0x89   : > { %vm580_vm12 = vcmp.lt.s32.totalorder %v3062_v8, %v552_v31  ;;  %vm582_vm13 = vcmp.lt.s32.totalorder %v3065_v47, %v553_v12  ;;  %v3282_v25 = vsel %vm576_vm10, %v3054_v6, %v550_v61  ;;  %v3285_v26 = vsel %vm578_vm11, %v3057_v9, %v551_v23  ;;  %v5127_v61 = vld [vmem:[#allocation5_spill] sm:$0xff] }
  0x8a   : > { %vm584_vm14 = vcmp.lt.s32.totalorder %v3072_v38, %v554_v63  ;;  %vm586_vm15 = vcmp.lt.s32.totalorder %v3075_v16, %v555_v3  ;;  %v3290_v4 = vsel %vm580_vm12, %v3062_v8, %v552_v31  ;;  %v3293_v5 = vsel %vm582_vm13, %v3065_v47, %v553_v12 }
  0x8b   : > { %v592_v39 = vadd.s32 %v3214_v55, %v3191_v10  ;;  %v593_v6 = vadd.s32 %v3214_v55, %v3193_v33  ;;  %v3300_v35 = vsel %vm584_vm14, %v3072_v38, %v554_v63  ;;  %v3303_v9 = vsel %vm586_vm15, %v3075_v16, %v555_v3  ;;  %v5128_v3 = vld [vmem:[#allocation6_spill] sm:$0xff] }
  0x8c   : > { %v594_v23 = vadd.s32 %v3214_v55, %v3198_v50  ;;  %v595_v8 = vadd.s32 %v3214_v55, %v3200_v32  ;;  %v596_v47 = vadd.s32 %v3214_v55, %v3207_v34  ;;  %v597_v12 = vadd.s32 %v3214_v55, %v3209_v49 }
  0x8d   : > { %v598_v31 = vadd.s32 %v3214_v55, %v3216_v19  ;;  %v599_v38 = vadd.s32 %v3214_v55, %v3218_v62  ;;  %v600_v16 = vadd.s32 %v3214_v55, %v3223_v58  ;;  %v601_v15 = vadd.s32 %v3214_v55, %v3225_v57  ;;  %v5113_v62 = vld [vmem:[#allocation27_spill] sm:$0xff]  ;;  %v5118_v57 = vld [vmem:[#allocation22_spill] sm:$0xff] }
  0x8e   : > { %v602_v50 = vadd.s32 %v3214_v55, %v530_v7  ;;  %v603_v32 = vadd.s32 %v3214_v55, %v531_v21  ;;  %v604_v34 = vadd.s32 %v3214_v55, %v532_v27  ;;  %v605_v10 = vadd.s32 %v3214_v55, %v533_v44  ;;  %v5117_v58 = vld [vmem:[#allocation23_spill] sm:$0xff] }
  0x8f   : > { %vm608_vm0 = vcmp.lt.s32.totalorder %v3104_v24, %v592_v39  ;;  %vm610_vm1 = vcmp.lt.s32.totalorder %v3107_v18, %v593_v6  ;;  %v606_v33 = vadd.s32 %v3214_v55, %v534_v41  ;;  %v607_v54 = vadd.s32 %v3214_v55, %v535_v56  ;;  %v5111_v56 = vld [vmem:[#allocation18_spill] sm:$0xff]  ;;  %v5112_v55 = vld [vmem:[#allocation24_spill] sm:$0xff] }
  0x90   : > { %vm612_vm2 = vcmp.lt.s32.totalorder %v3112_v14, %v594_v23  ;;  %vm614_vm3 = vcmp.lt.s32.totalorder %v3115_v60, %v595_v8  ;;  %v3332_v7 = vsel %vm608_vm0, %v3104_v24, %v592_v39  ;;  %v3335_v21 = vsel %vm610_vm1, %v3107_v18, %v593_v6  ;;  %v5129_v6 = vld [vmem:[#allocation7_spill] sm:$0xff] }
  0x91   : > { %vm616_vm4 = vcmp.lt.s32.totalorder %v3120_v36, %v596_v47  ;;  %vm618_vm5 = vcmp.lt.s32.totalorder %v3123_v59, %v597_v12  ;;  %v3340_v49 = vsel %vm612_vm2, %v3112_v14, %v594_v23  ;;  %v3343_v19 = vsel %vm614_vm3, %v3115_v60, %v595_v8  ;;  %v5130_v8 = vld [vmem:[#allocation8_spill] sm:$0xff] }
  0x92   : > { %vm620_vm6 = vcmp.lt.s32.totalorder %v3128_v0, %v598_v31  ;;  %vm622_vm7 = vcmp.lt.s32.totalorder %v3131_v17, %v599_v38  ;;  %v3348_v24 = vsel %vm616_vm4, %v3120_v36, %v596_v47  ;;  %v3351_v18 = vsel %vm618_vm5, %v3123_v59, %v597_v12  ;;  %v5131_v12 = vld [vmem:[#allocation9_spill] sm:$0xff] }
  0x93   : > { %vm624_vm8 = vcmp.lt.s32.totalorder %v3136_v45, %v600_v16  ;;  %vm626_vm9 = vcmp.lt.s32.totalorder %v3139_v1, %v601_v15  ;;  %v3356_v14 = vsel %vm620_vm6, %v3128_v0, %v598_v31  ;;  %v3359_v60 = vsel %vm622_vm7, %v3131_v17, %v599_v38  ;;  %v5132_v38 = vld [vmem:[#allocation10_spill] sm:$0xff] }
  0x94   : > { %vm628_vm10 = vcmp.lt.s32.totalorder %v5111_v56, %v602_v50  ;;  %vm630_vm11 = vcmp.lt.s32.totalorder %v5112_v55, %v603_v32  ;;  %v3364_v36 = vsel %vm624_vm8, %v3136_v45, %v600_v16  ;;  %v3367_v59 = vsel %vm626_vm9, %v3139_v1, %v601_v15  ;;  %v5133_v15 = vld [vmem:[#allocation11_spill] sm:$0xff] }
  0x95   : > { %vm632_vm12 = vcmp.lt.s32.totalorder %v5113_v62, %v604_v34  ;;  %vm634_vm13 = vcmp.lt.s32.totalorder %v5114_v28, %v605_v10  ;;  %v3372_v0 = vsel %vm628_vm10, %v5111_v56, %v602_v50  ;;  %v3375_v17 = vsel %vm630_vm11, %v5112_v55, %v603_v32  ;;  %v5134_v32 = vld [vmem:[#allocation12_spill] sm:$0xff]  ;;  %v5137_v55 = vld [vmem:[#allocation15_spill] sm:$0xff] }
  0x96   : > { %5115 = vst [vmem:[#allocation20_spill] sm:$0xff] %v3372_v0  ;;  %5116 = vst [vmem:[#allocation19_spill] sm:$0xff] %v3375_v17  ;;  %vm636_vm14 = vcmp.lt.s32.totalorder %v5117_v58, %v606_v33  ;;  %vm638_vm15 = vcmp.lt.s32.totalorder %v5118_v57, %v607_v54  ;;  %v3380_v45 = vsel %vm632_vm12, %v5113_v62, %v604_v34 }
  0x97   : > { %5119 = vst [vmem:[#allocation25_spill] sm:$0xff] %v3380_v45  ;;  %v3383_v1 = vsel %vm634_vm13, %v5114_v28, %v605_v10  ;;  %v642_v52 = vsub.s32 %v5122_v20, %v5121_v53  ;;  %v643_v27 = vsub.s32 %v5123_v2, %v5121_v53  ;;  %v3390_v44 = vsel %vm636_vm14, %v5117_v58, %v606_v33  ;;  %v5135_v10 = vld [vmem:[#allocation13_spill] sm:$0xff] }
  0x98   : > { %5120 = vst [vmem:[#allocation26_spill] sm:$0xff] %v3383_v1  ;;  %5124 = vst [vmem:[#allocation18_spill] sm:$0xff] %v3390_v44  ;;  %v3393_v41 = vsel %vm638_vm15, %v5118_v57, %v607_v54  ;;  %v644_v22 = vsub.s32 %v5126_v37, %v5121_v53  ;;  %v645_v63 = vsub.s32 %v5127_v61, %v5121_v53  ;;  %v5136_v54 = vld [vmem:[#allocation14_spill] sm:$0xff]  ;;  %v5138_v57 = vld [vmem:[#allocation16_spill] sm:$0xff]  ;;  %v3454_v61 = vstv %s778_s21 }
  0x99   : > { %5125 = vst [vmem:[#allocation24_spill] sm:$0xff] %v3393_v41  ;;  %v646_v39 = vsub.s32 %v5128_v3, %v5121_v53  ;;  %v647_v23 = vsub.s32 %v5129_v6, %v5121_v53  ;;  %v648_v47 = vsub.s32 %v5130_v8, %v5121_v53  ;;  %v649_v31 = vsub.s32 %v5131_v12, %v5121_v53  ;;  %v3431_v12 = vld [vmem:[%s2484_s14] sm:$0xff] }
  0x9a   : > { %v650_v16 = vsub.s32 %v5132_v38, %v5121_v53  ;;  %v651_v50 = vsub.s32 %v5133_v15, %v5121_v53  ;;  %v652_v34 = vsub.s32 %v5134_v32, %v5121_v53  ;;  %v653_v33 = vsub.s32 %v5135_v10, %v5121_v53  ;;  %5139 = vst [vmem:[#allocation27_spill] sm:$0xff] %v3431_v12  ;;  %v3443_v6 = vld [vmem:[%s2490_s17] sm:$0xff] }
  0x9b   : > { %v654_v56 = vsub.s32 %v5136_v54, %v5121_v53  ;;  %v655_v62 = vsub.s32 %v5137_v55, %v5121_v53  ;;  %v3419_v28 = vmul.u32 %v642_v52, %v642_v52  ;;  %v3421_v58 = vmul.u32 %v643_v27, %v643_v27  ;;  %v5141_v55 = vld [vmem:[#allocation17_spill] sm:$0xff]  ;;  %5142 = vst [vmem:[#allocation28_spill] sm:$0xff] %v3443_v6 }
  0x9c   : > { %v656_v15 = vsub.s32 %v5138_v57, %v5121_v53  ;;  %v3426_v38 = vmul.u32 %v644_v22, %v644_v22  ;;  %v3428_v32 = vmul.u32 %v645_v63, %v645_v63  ;;  %v5140_v10 = vsub.s32 4, %v5122_v20  ;;  %5144 = vst [vmem:[#allocation23_spill] sm:$0xff] %v3454_v61 }
  0x9d   : > { %v657_v52 = vsub.s32 %v5141_v55, %v5121_v53  ;;  %v3438_v8 = vmul.u32 %v646_v39, %v646_v39  ;;  %v3440_v27 = vmul.u32 %v647_v23, %v647_v23 }
  0x9e   : > { %v677_v54 = vrot.slane %v3431_v12, %v5140_v10  ;;  %v5143_v22 = vmov %v5140_v10  ;;  %v3450_v57 = vmul.u32 %v648_v47, %v648_v47  ;;  %v3452_v3 = vmul.u32 %v649_v31, %v649_v31 }
  0x9f   : > { %v3448_v63 = vrot.slane %v3443_v6, %v5143_v22  ;;  %v3457_v53 = vmul.u32 %v650_v16, %v650_v16  ;;  %v3459_v39 = vmul.u32 %v651_v50, %v651_v50 }
  0xa0   : > { %v678_v23 = vadd.s32 %v677_v54, %v3419_v28  ;;  %v679_v55 = vadd.s32 %v677_v54, %v3421_v58  ;;  %v668_v12 = vmul.u32 %v652_v34, %v652_v34  ;;  %v669_v37 = vmul.u32 %v653_v33, %v653_v33 }
  0xa1   : > { %v680_v22 = vadd.s32 %v677_v54, %v3426_v38  ;;  %v681_v47 = vadd.s32 %v677_v54, %v3428_v32  ;;  %v670_v31 = vmul.u32 %v654_v56, %v654_v56  ;;  %v671_v6 = vmul.u32 %v655_v62, %v655_v62 }
  0xa2   : > { %v682_v2 = vadd.s32 %v677_v54, %v3438_v8  ;;  %v683_v10 = vadd.s32 %v677_v54, %v3440_v27  ;;  %v672_v16 = vmul.u32 %v656_v15, %v656_v15  ;;  %v673_v20 = vmul.u32 %v657_v52, %v657_v52 }
  0xa3   : > { %v684_v50 = vadd.s32 %v677_v54, %v3450_v57  ;;  %v685_v61 = vadd.s32 %v677_v54, %v3452_v3  ;;  %v686_v41 = vadd.s32 %v677_v54, %v3457_v53  ;;  %v687_v34 = vadd.s32 %v677_v54, %v3459_v39 }
  0xa4   : > { %v688_v33 = vadd.s32 %v677_v54, %v668_v12  ;;  %v689_v44 = vadd.s32 %v677_v54, %v669_v37  ;;  %v690_v1 = vadd.s32 %v677_v54, %v670_v31  ;;  %v691_v45 = vadd.s32 %v677_v54, %v671_v6 }
  0xa5   : > { %vm694_vm0 = vcmp.lt.s32.totalorder %v3242_v46, %v678_v23  ;;  %vm696_vm1 = vcmp.lt.s32.totalorder %v3245_v43, %v679_v55  ;;  %v692_v56 = vadd.s32 %v677_v54, %v672_v16  ;;  %v693_v62 = vadd.s32 %v677_v54, %v673_v20 }
  0xa6   : > { %vm698_vm2 = vcmp.lt.s32.totalorder %v3250_v11, %v680_v22  ;;  %vm700_vm3 = vcmp.lt.s32.totalorder %v3253_v48, %v681_v47  ;;  %v3476_v15 = vsel %vm694_vm0, %v3242_v46, %v678_v23  ;;  %v3479_v52 = vsel %vm696_vm1, %v3245_v43, %v679_v55 }
  0xa7   : > { %vm702_vm4 = vcmp.lt.s32.totalorder %v3258_v42, %v682_v2  ;;  %vm704_vm5 = vcmp.lt.s32.totalorder %v3261_v13, %v683_v10  ;;  %v3484_v17 = vsel %vm698_vm2, %v3250_v11, %v680_v22  ;;  %v3487_v0 = vsel %vm700_vm3, %v3253_v48, %v681_v47  ;;  %v5157_v22 = vld [vmem:[#allocation3_spill] sm:$0xff] }
  0xa8   : > { %vm706_vm6 = vcmp.lt.s32.totalorder %v3266_v29, %v684_v50  ;;  %vm708_vm7 = vcmp.lt.s32.totalorder %v3269_v30, %v685_v61  ;;  %v3492_v46 = vsel %vm702_vm4, %v3258_v42, %v682_v2  ;;  %v3495_v43 = vsel %vm704_vm5, %v3261_v13, %v683_v10  ;;  %v5152_v10 = vld [vmem:[#allocation24_spill] sm:$0xff] }
  0xa9   : > { %vm710_vm8 = vcmp.lt.s32.totalorder %v3274_v51, %v686_v41  ;;  %vm712_vm9 = vcmp.lt.s32.totalorder %v3277_v40, %v687_v34  ;;  %v3500_v11 = vsel %vm706_vm6, %v3266_v29, %v684_v50  ;;  %v3503_v48 = vsel %vm708_vm7, %v3269_v30, %v685_v61  ;;  %v5160_v50 = vld [vmem:[#allocation4_spill] sm:$0xff] }
  0xaa   : > { %vm714_vm10 = vcmp.lt.s32.totalorder %v3282_v25, %v688_v33  ;;  %vm716_vm11 = vcmp.lt.s32.totalorder %v3285_v26, %v689_v44  ;;  %v3508_v42 = vsel %vm710_vm8, %v3274_v51, %v686_v41  ;;  %v3511_v13 = vsel %vm712_vm9, %v3277_v40, %v687_v34 }
  0xab   : > { %vm718_vm12 = vcmp.lt.s32.totalorder %v3290_v4, %v690_v1  ;;  %vm720_vm13 = vcmp.lt.s32.totalorder %v3293_v5, %v691_v45  ;;  %v3516_v29 = vsel %vm714_vm10, %v3282_v25, %v688_v33  ;;  %v3519_v30 = vsel %vm716_vm11, %v3285_v26, %v689_v44  ;;  %v5161_v33 = vld [vmem:[#allocation5_spill] sm:$0xff] }
  0xac   : > { %vm722_vm14 = vcmp.lt.s32.totalorder %v3300_v35, %v692_v56  ;;  %vm724_vm15 = vcmp.lt.s32.totalorder %v3303_v9, %v693_v62  ;;  %v3524_v51 = vsel %vm718_vm12, %v3290_v4, %v690_v1  ;;  %v3527_v40 = vsel %vm720_vm13, %v3293_v5, %v691_v45 }
  0xad   : > { %v730_v2 = vadd.s32 %v3448_v63, %v3419_v28  ;;  %v731_v25 = vadd.s32 %v3448_v63, %v3421_v58  ;;  %v3534_v41 = vsel %vm722_vm14, %v3300_v35, %v692_v56  ;;  %v3537_v26 = vsel %vm724_vm15, %v3303_v9, %v693_v62  ;;  %v5146_v58 = vld [vmem:[#allocation19_spill] sm:$0xff]  ;;  %v5162_v62 = vld [vmem:[#allocation6_spill] sm:$0xff] }
  0xae   : > { %v732_v44 = vadd.s32 %v3448_v63, %v3426_v38  ;;  %v733_v4 = vadd.s32 %v3448_v63, %v3428_v32  ;;  %v734_v5 = vadd.s32 %v3448_v63, %v3438_v8  ;;  %v735_v45 = vadd.s32 %v3448_v63, %v3440_v27  ;;  %v5148_v27 = vld [vmem:[#allocation26_spill] sm:$0xff] }
  0xaf   : > { %v736_v1 = vadd.s32 %v3448_v63, %v3450_v57  ;;  %v737_v35 = vadd.s32 %v3448_v63, %v3452_v3  ;;  %v738_v9 = vadd.s32 %v3448_v63, %v3457_v53  ;;  %v739_v61 = vadd.s32 %v3448_v63, %v3459_v39  ;;  %v5147_v57 = vld [vmem:[#allocation25_spill] sm:$0xff]  ;;  %v5155_v53 = vld [vmem:[#allocation23_spill] sm:$0xff] }
  0xb0   : > { %v740_v38 = vadd.s32 %v3448_v63, %v668_v12  ;;  %v741_v32 = vadd.s32 %v3448_v63, %v669_v37  ;;  %v742_v8 = vadd.s32 %v3448_v63, %v670_v31  ;;  %v743_v54 = vadd.s32 %v3448_v63, %v671_v6  ;;  %v5156_v39 = vld [vmem:[#allocation2_spill] sm:$0xff] }
  0xb1   : > { %vm746_vm0 = vcmp.lt.s32.totalorder %v3332_v7, %v730_v2  ;;  %vm748_vm1 = vcmp.lt.s32.totalorder %v3335_v21, %v731_v25  ;;  %v744_v3 = vadd.s32 %v3448_v63, %v672_v16  ;;  %v745_v55 = vadd.s32 %v3448_v63, %v673_v20  ;;  %v5145_v20 = vld [vmem:[#allocation20_spill] sm:$0xff]  ;;  %v5151_v63 = vld [vmem:[#allocation18_spill] sm:$0xff] }
  0xb2   : > { %vm750_vm2 = vcmp.lt.s32.totalorder %v3340_v49, %v732_v44  ;;  %vm752_vm3 = vcmp.lt.s32.totalorder %v3343_v19, %v733_v4  ;;  %v3566_v12 = vsel %vm746_vm0, %v3332_v7, %v730_v2  ;;  %v3569_v37 = vsel %vm748_vm1, %v3335_v21, %v731_v25  ;;  %v5163_v25 = vld [vmem:[#allocation7_spill] sm:$0xff] }
  0xb3   : > { %vm754_vm4 = vcmp.lt.s32.totalorder %v3348_v24, %v734_v5  ;;  %vm756_vm5 = vcmp.lt.s32.totalorder %v3351_v18, %v735_v45  ;;  %v3574_v6 = vsel %vm750_vm2, %v3340_v49, %v732_v44  ;;  %v3577_v28 = vsel %vm752_vm3, %v3343_v19, %v733_v4  ;;  %v5164_v4 = vld [vmem:[#allocation8_spill] sm:$0xff] }
  0xb4   : > { %vm758_vm6 = vcmp.lt.s32.totalorder %v3356_v14, %v736_v1  ;;  %vm760_vm7 = vcmp.lt.s32.totalorder %v3359_v60, %v737_v35  ;;  %v3582_v7 = vsel %vm754_vm4, %v3348_v24, %v734_v5  ;;  %v3585_v21 = vsel %vm756_vm5, %v3351_v18, %v735_v45  ;;  %v5165_v45 = vld [vmem:[#allocation9_spill] sm:$0xff] }
  0xb5   : > { %vm762_vm8 = vcmp.lt.s32.totalorder %v3364_v36, %v738_v9  ;;  %vm764_vm9 = vcmp.lt.s32.totalorder %v3367_v59, %v739_v61  ;;  %v3590_v49 = vsel %vm758_vm6, %v3356_v14, %v736_v1  ;;  %v3593_v19 = vsel %vm760_vm7, %v3359_v60, %v737_v35  ;;  %v5166_v35 = vld [vmem:[#allocation10_spill] sm:$0xff] }
  0xb6   : > { %vm766_vm10 = vcmp.lt.s32.totalorder %v5145_v20, %v740_v38  ;;  %vm768_vm11 = vcmp.lt.s32.totalorder %v5146_v58, %v741_v32  ;;  %v3598_v24 = vsel %vm762_vm8, %v3364_v36, %v738_v9  ;;  %v3601_v18 = vsel %vm764_vm9, %v3367_v59, %v739_v61  ;;  %v5167_v61 = vld [vmem:[#allocation11_spill] sm:$0xff] }
  0xb7   : > { %vm770_vm12 = vcmp.lt.s32.totalorder %v5147_v57, %v742_v8  ;;  %vm772_vm13 = vcmp.lt.s32.totalorder %v5148_v27, %v743_v54  ;;  %v3606_v14 = vsel %vm766_vm10, %v5145_v20, %v740_v38  ;;  %v3609_v60 = vsel %vm768_vm11, %v5146_v58, %v741_v32  ;;  %v5168_v32 = vld [vmem:[#allocation12_spill] sm:$0xff]  ;;  %v5171_v58 = vld [vmem:[#allocation15_spill] sm:$0xff] }
  0xb8   : > { %5149 = vst [vmem:[#allocation22_spill] sm:$0xff] %v3606_v14  ;;  %5150 = vst [vmem:[#allocation21_spill] sm:$0xff] %v3609_v60  ;;  %vm774_vm14 = vcmp.lt.s32.totalorder %v5151_v63, %v744_v3  ;;  %vm776_vm15 = vcmp.lt.s32.totalorder %v5152_v10, %v745_v55  ;;  %v3614_v36 = vsel %vm770_vm12, %v5147_v57, %v742_v8 }
  0xb9   : > { %5153 = vst [vmem:[#allocation20_spill] sm:$0xff] %v3614_v36  ;;  %v3617_v59 = vsel %vm772_vm13, %v5148_v27, %v743_v54  ;;  %v780_v23 = vsub.s32 %v5156_v39, %v5155_v53  ;;  %v781_v47 = vsub.s32 %v5157_v22, %v5155_v53  ;;  %v3624_v31 = vsel %vm774_vm14, %v5151_v63, %v744_v3  ;;  %v5169_v54 = vld [vmem:[#allocation13_spill] sm:$0xff] }
  0xba   : > { %5154 = vst [vmem:[#allocation19_spill] sm:$0xff] %v3617_v59  ;;  %5158 = vst [vmem:[#allocation25_spill] sm:$0xff] %v3624_v31  ;;  %v3627_v16 = vsel %vm776_vm15, %v5152_v10, %v745_v55  ;;  %v782_v34 = vsub.s32 %v5160_v50, %v5155_v53  ;;  %v783_v56 = vsub.s32 %v5161_v33, %v5155_v53  ;;  %v5170_v55 = vld [vmem:[#allocation14_spill] sm:$0xff]  ;;  %v5172_v10 = vld [vmem:[#allocation16_spill] sm:$0xff] }
  0xbb   : > { %5159 = vst [vmem:[#allocation26_spill] sm:$0xff] %v3627_v16  ;;  %v784_v2 = vsub.s32 %v5162_v62, %v5155_v53  ;;  %v785_v44 = vsub.s32 %v5163_v25, %v5155_v53  ;;  %v786_v5 = vsub.s32 %v5164_v4, %v5155_v53  ;;  %v787_v1 = vsub.s32 %v5165_v45, %v5155_v53  ;;  %v5174_v45 = vld [vmem:[#allocation27_spill] sm:$0xff]  ;;  %v5177_v62 = vld [vmem:[#allocation28_spill] sm:$0xff] }
  0xbc   : > { %v788_v9 = vsub.s32 %v5166_v35, %v5155_v53  ;;  %v789_v38 = vsub.s32 %v5167_v61, %v5155_v53  ;;  %v790_v8 = vsub.s32 %v5168_v32, %v5155_v53  ;;  %v791_v3 = vsub.s32 %v5169_v54, %v5155_v53 }
  0xbd   : > { %v792_v20 = vsub.s32 %v5170_v55, %v5155_v53  ;;  %v793_v57 = vsub.s32 %v5171_v58, %v5155_v53  ;;  %v3653_v27 = vmul.u32 %v780_v23, %v780_v23  ;;  %v3655_v63 = vmul.u32 %v781_v47, %v781_v47  ;;  %v5175_v55 = vld [vmem:[#allocation17_spill] sm:$0xff] }
  0xbe   : > { %v794_v61 = vsub.s32 %v5172_v10, %v5155_v53  ;;  %v3660_v35 = vmul.u32 %v782_v34, %v782_v34  ;;  %v3662_v32 = vmul.u32 %v783_v56, %v783_v56  ;;  %v5173_v54 = vsub.s32 5, %v5156_v39 }
  0xbf   : > { %v795_v25 = vsub.s32 %v5175_v55, %v5155_v53  ;;  %v3669_v58 = vmul.u32 %v784_v2, %v784_v2  ;;  %v3671_v23 = vmul.u32 %v785_v44, %v785_v44  ;;  %v3682_v10 = vstv %s916_s22 }
  0xc0   : > { %v815_v4 = vrot.slane %v5174_v45, %v5173_v54  ;;  %v5176_v47 = vmov %v5173_v54  ;;  %v3678_v34 = vmul.u32 %v786_v5, %v786_v5  ;;  %v3680_v56 = vmul.u32 %v787_v1, %v787_v1  ;;  %5178 = vst [vmem:[#allocation18_spill] sm:$0xff] %v3682_v10 }
  0xc1   : > { %v3676_v33 = vrot.slane %v5177_v62, %v5176_v47  ;;  %v3685_v45 = vmul.u32 %v788_v9, %v788_v9  ;;  %v3687_v53 = vmul.u32 %v789_v38, %v789_v38 }
  0xc2   : > { %v816_v2 = vadd.s32 %v815_v4, %v3653_v27  ;;  %v817_v44 = vadd.s32 %v815_v4, %v3655_v63  ;;  %v806_v55 = vmul.u32 %v790_v8, %v790_v8  ;;  %v807_v50 = vmul.u32 %v791_v3, %v791_v3 }
  0xc3   : > { %v818_v47 = vadd.s32 %v815_v4, %v3660_v35  ;;  %v819_v5 = vadd.s32 %v815_v4, %v3662_v32  ;;  %v808_v1 = vmul.u32 %v792_v20, %v792_v20  ;;  %v809_v62 = vmul.u32 %v793_v57, %v793_v57 }
  0xc4   : > { %v820_v22 = vadd.s32 %v815_v4, %v3669_v58  ;;  %v821_v54 = vadd.s32 %v815_v4, %v3671_v23  ;;  %v810_v9 = vmul.u32 %v794_v61, %v794_v61  ;;  %v811_v39 = vmul.u32 %v795_v25, %v795_v25 }
  0xc5   : > { %v822_v38 = vadd.s32 %v815_v4, %v3678_v34  ;;  %v823_v10 = vadd.s32 %v815_v4, %v3680_v56  ;;  %v824_v16 = vadd.s32 %v815_v4, %v3685_v45  ;;  %v825_v8 = vadd.s32 %v815_v4, %v3687_v53 }
  0xc6   : > { %v826_v3 = vadd.s32 %v815_v4, %v806_v55  ;;  %v827_v31 = vadd.s32 %v815_v4, %v807_v50  ;;  %v828_v59 = vadd.s32 %v815_v4, %v808_v1  ;;  %v829_v36 = vadd.s32 %v815_v4, %v809_v62 }
  0xc7   : > { %vm832_vm0 = vcmp.lt.s32.totalorder %v3476_v15, %v816_v2  ;;  %vm834_vm1 = vcmp.lt.s32.totalorder %v3479_v52, %v817_v44  ;;  %v830_v20 = vadd.s32 %v815_v4, %v810_v9  ;;  %v831_v57 = vadd.s32 %v815_v4, %v811_v39 }
  0xc8   : > { %vm836_vm2 = vcmp.lt.s32.totalorder %v3484_v17, %v818_v47  ;;  %vm838_vm3 = vcmp.lt.s32.totalorder %v3487_v0, %v819_v5  ;;  %v3704_v25 = vsel %vm832_vm0, %v3476_v15, %v816_v2  ;;  %v3707_v61 = vsel %vm834_vm1, %v3479_v52, %v817_v44  ;;  %v5190_v2 = vld [vmem:[#allocation2_spill] sm:$0xff] }
  0xc9   : > { %vm840_vm4 = vcmp.lt.s32.totalorder %v3492_v46, %v820_v22  ;;  %vm842_vm5 = vcmp.lt.s32.totalorder %v3495_v43, %v821_v54  ;;  %v3712_v60 = vsel %vm836_vm2, %v3484_v17, %v818_v47  ;;  %v3715_v14 = vsel %vm838_vm3, %v3487_v0, %v819_v5  ;;  %v5191_v47 = vld [vmem:[#allocation3_spill] sm:$0xff] }
  0xca   : > { %vm844_vm6 = vcmp.lt.s32.totalorder %v3500_v11, %v822_v38  ;;  %vm846_vm7 = vcmp.lt.s32.totalorder %v3503_v48, %v823_v10  ;;  %v3720_v15 = vsel %vm840_vm4, %v3492_v46, %v820_v22  ;;  %v3723_v52 = vsel %vm842_vm5, %v3495_v43, %v821_v54  ;;  %v5186_v54 = vld [vmem:[#allocation26_spill] sm:$0xff] }
  0xcb   : > { %vm848_vm8 = vcmp.lt.s32.totalorder %v3508_v42, %v824_v16  ;;  %vm850_vm9 = vcmp.lt.s32.totalorder %v3511_v13, %v825_v8  ;;  %v3728_v17 = vsel %vm844_vm6, %v3500_v11, %v822_v38  ;;  %v3731_v0 = vsel %vm846_vm7, %v3503_v48, %v823_v10  ;;  %v5194_v38 = vld [vmem:[#allocation4_spill] sm:$0xff] }
  0xcc   : > { %vm852_vm10 = vcmp.lt.s32.totalorder %v3516_v29, %v826_v3  ;;  %vm854_vm11 = vcmp.lt.s32.totalorder %v3519_v30, %v827_v31  ;;  %v3736_v46 = vsel %vm848_vm8, %v3508_v42, %v824_v16  ;;  %v3739_v43 = vsel %vm850_vm9, %v3511_v13, %v825_v8 }
  0xcd   : > { %vm856_vm12 = vcmp.lt.s32.totalorder %v3524_v51, %v828_v59  ;;  %vm858_vm13 = vcmp.lt.s32.totalorder %v3527_v40, %v829_v36  ;;  %v3744_v11 = vsel %vm852_vm10, %v3516_v29, %v826_v3  ;;  %v3747_v48 = vsel %vm854_vm11, %v3519_v30, %v827_v31  ;;  %v5195_v3 = vld [vmem:[#allocation5_spill] sm:$0xff] }
  0xce   : > { %vm860_vm14 = vcmp.lt.s32.totalorder %v3534_v41, %v830_v20  ;;  %vm862_vm15 = vcmp.lt.s32.totalorder %v3537_v26, %v831_v57  ;;  %v3752_v42 = vsel %vm856_vm12, %v3524_v51, %v828_v59  ;;  %v3755_v13 = vsel %vm858_vm13, %v3527_v40, %v829_v36 }
  0xcf   : > { %v868_v22 = vadd.s32 %v3676_v33, %v3653_v27  ;;  %v869_v29 = vadd.s32 %v3676_v33, %v3655_v63  ;;  %v3762_v16 = vsel %vm860_vm14, %v3534_v41, %v830_v20  ;;  %v3765_v30 = vsel %vm862_vm15, %v3537_v26, %v831_v57  ;;  %v5196_v57 = vld [vmem:[#allocation6_spill] sm:$0xff] }
  0xd0   : > { %v870_v31 = vadd.s32 %v3676_v33, %v3660_v35  ;;  %v871_v51 = vadd.s32 %v3676_v33, %v3662_v32  ;;  %v872_v40 = vadd.s32 %v3676_v33, %v3669_v58  ;;  %v873_v36 = vadd.s32 %v3676_v33, %v3671_v23  ;;  %v5181_v23 = vld [vmem:[#allocation20_spill] sm:$0xff] }
  0xd1   : > { %v874_v59 = vadd.s32 %v3676_v33, %v3678_v34  ;;  %v875_v41 = vadd.s32 %v3676_v33, %v3680_v56  ;;  %v876_v26 = vadd.s32 %v3676_v33, %v3685_v45  ;;  %v877_v4 = vadd.s32 %v3676_v33, %v3687_v53  ;;  %v5182_v34 = vld [vmem:[#allocation19_spill] sm:$0xff]  ;;  %v5185_v56 = vld [vmem:[#allocation25_spill] sm:$0xff]  ;;  %v5189_v53 = vld [vmem:[#allocation18_spill] sm:$0xff] }
  0xd2   : > { %v878_v35 = vadd.s32 %v3676_v33, %v806_v55  ;;  %v879_v32 = vadd.s32 %v3676_v33, %v807_v50  ;;  %v880_v58 = vadd.s32 %v3676_v33, %v808_v1  ;;  %v881_v27 = vadd.s32 %v3676_v33, %v809_v62 }
  0xd3   : > { %vm884_vm0 = vcmp.lt.s32.totalorder %v3566_v12, %v868_v22  ;;  %vm886_vm1 = vcmp.lt.s32.totalorder %v3569_v37, %v869_v29  ;;  %v882_v63 = vadd.s32 %v3676_v33, %v810_v9  ;;  %v883_v10 = vadd.s32 %v3676_v33, %v811_v39  ;;  %v5179_v39 = vld [vmem:[#allocation22_spill] sm:$0xff]  ;;  %v5180_v33 = vld [vmem:[#allocation21_spill] sm:$0xff] }
  0xd4   : > { %vm888_vm2 = vcmp.lt.s32.totalorder %v3574_v6, %v870_v31  ;;  %vm890_vm3 = vcmp.lt.s32.totalorder %v3577_v28, %v871_v51  ;;  %v3794_v45 = vsel %vm884_vm0, %v3566_v12, %v868_v22  ;;  %v3797_v50 = vsel %vm886_vm1, %v3569_v37, %v869_v29  ;;  %v5197_v29 = vld [vmem:[#allocation7_spill] sm:$0xff] }
  0xd5   : > { %vm892_vm4 = vcmp.lt.s32.totalorder %v3582_v7, %v872_v40  ;;  %vm894_vm5 = vcmp.lt.s32.totalorder %v3585_v21, %v873_v36  ;;  %v3802_v62 = vsel %vm888_vm2, %v3574_v6, %v870_v31  ;;  %v3805_v55 = vsel %vm890_vm3, %v3577_v28, %v871_v51  ;;  %v5198_v51 = vld [vmem:[#allocation8_spill] sm:$0xff] }
  0xd6   : > { %vm896_vm6 = vcmp.lt.s32.totalorder %v3590_v49, %v874_v59  ;;  %vm898_vm7 = vcmp.lt.s32.totalorder %v3593_v19, %v875_v41  ;;  %v3810_v12 = vsel %vm892_vm4, %v3582_v7, %v872_v40  ;;  %v3813_v37 = vsel %vm894_vm5, %v3585_v21, %v873_v36  ;;  %v5199_v36 = vld [vmem:[#allocation9_spill] sm:$0xff] }
  0xd7   : > { %vm900_vm8 = vcmp.lt.s32.totalorder %v3598_v24, %v876_v26  ;;  %vm902_vm9 = vcmp.lt.s32.totalorder %v3601_v18, %v877_v4  ;;  %v3818_v6 = vsel %vm896_vm6, %v3590_v49, %v874_v59  ;;  %v3821_v28 = vsel %vm898_vm7, %v3593_v19, %v875_v41  ;;  %v5200_v41 = vld [vmem:[#allocation10_spill] sm:$0xff] }
  0xd8   : > { %vm904_vm10 = vcmp.lt.s32.totalorder %v5179_v39, %v878_v35  ;;  %vm906_vm11 = vcmp.lt.s32.totalorder %v5180_v33, %v879_v32  ;;  %v3826_v7 = vsel %vm900_vm8, %v3598_v24, %v876_v26  ;;  %v3829_v21 = vsel %vm902_vm9, %v3601_v18, %v877_v4  ;;  %v5201_v4 = vld [vmem:[#allocation11_spill] sm:$0xff] }
  0xd9   : > { %vm908_vm12 = vcmp.lt.s32.totalorder %v5181_v23, %v880_v58  ;;  %vm910_vm13 = vcmp.lt.s32.totalorder %v5182_v34, %v881_v27  ;;  %v3834_v49 = vsel %vm904_vm10, %v5179_v39, %v878_v35  ;;  %v3837_v19 = vsel %vm906_vm11, %v5180_v33, %v879_v32  ;;  %v5202_v32 = vld [vmem:[#allocation12_spill] sm:$0xff]  ;;  %v5205_v33 = vld [vmem:[#allocation15_spill] sm:$0xff] }
  0xda   : > { %5183 = vst [vmem:[#allocation24_spill] sm:$0xff] %v3834_v49  ;;  %5184 = vst [vmem:[#allocation23_spill] sm:$0xff] %v3837_v19  ;;  %vm912_vm14 = vcmp.lt.s32.totalorder %v5185_v56, %v882_v63  ;;  %vm914_vm15 = vcmp.lt.s32.totalorder %v5186_v54, %v883_v10  ;;  %v3842_v24 = vsel %vm908_vm12, %v5181_v23, %v880_v58 }
  0xdb   : > { %5187 = vst [vmem:[#allocation22_spill] sm:$0xff] %v3842_v24  ;;  %v3845_v18 = vsel %vm910_vm13, %v5182_v34, %v881_v27  ;;  %v918_v44 = vsub.s32 %v5190_v2, %v5189_v53  ;;  %v919_v5 = vsub.s32 %v5191_v47, %v5189_v53  ;;  %v3852_v1 = vsel %vm912_vm14, %v5185_v56, %v882_v63  ;;  %v5203_v27 = vld [vmem:[#allocation13_spill] sm:$0xff] }
  0xdc   : > { %5188 = vst [vmem:[#allocation21_spill] sm:$0xff] %v3845_v18  ;;  %5192 = vst [vmem:[#allocation20_spill] sm:$0xff] %v3852_v1  ;;  %v3855_v9 = vsel %vm914_vm15, %v5186_v54, %v883_v10  ;;  %v920_v8 = vsub.s32 %v5194_v38, %v5189_v53  ;;  %v921_v20 = vsub.s32 %v5195_v3, %v5189_v53  ;;  %v5204_v10 = vld [vmem:[#allocation14_spill] sm:$0xff]  ;;  %v5206_v54 = vld [vmem:[#allocation16_spill] sm:$0xff] }
  0xdd   : > { %5193 = vst [vmem:[#allocation19_spill] sm:$0xff] %v3855_v9  ;;  %v922_v22 = vsub.s32 %v5196_v57, %v5189_v53  ;;  %v923_v31 = vsub.s32 %v5197_v29, %v5189_v53  ;;  %v924_v40 = vsub.s32 %v5198_v51, %v5189_v53  ;;  %v925_v59 = vsub.s32 %v5199_v36, %v5189_v53  ;;  %v5208_v36 = vld [vmem:[#allocation27_spill] sm:$0xff]  ;;  %v5211_v57 = vld [vmem:[#allocation28_spill] sm:$0xff] }
  0xde   : > { %v926_v26 = vsub.s32 %v5200_v41, %v5189_v53  ;;  %v927_v35 = vsub.s32 %v5201_v4, %v5189_v53  ;;  %v928_v58 = vsub.s32 %v5202_v32, %v5189_v53  ;;  %v929_v63 = vsub.s32 %v5203_v27, %v5189_v53 }
  0xdf   : > { %v930_v39 = vsub.s32 %v5204_v10, %v5189_v53  ;;  %v931_v23 = vsub.s32 %v5205_v33, %v5189_v53  ;;  %v3881_v34 = vmul.u32 %v918_v44, %v918_v44  ;;  %v3883_v56 = vmul.u32 %v919_v5, %v919_v5  ;;  %v5209_v10 = vld [vmem:[#allocation17_spill] sm:$0xff] }
  0xe0   : > { %v932_v4 = vsub.s32 %v5206_v54, %v5189_v53  ;;  %v3888_v41 = vmul.u32 %v920_v8, %v920_v8  ;;  %v3890_v32 = vmul.u32 %v921_v20, %v921_v20  ;;  %v5207_v27 = vsub.s32 6, %v5190_v2 }
  0xe1   : > { %v933_v29 = vsub.s32 %v5209_v10, %v5189_v53  ;;  %v3897_v33 = vmul.u32 %v922_v22, %v922_v22  ;;  %v3899_v44 = vmul.u32 %v923_v31, %v923_v31  ;;  %v3910_v54 = vstv %s1054_s23 }
  0xe2   : > { %v953_v51 = vrot.slane %v5208_v36, %v5207_v27  ;;  %v5210_v5 = vmov %v5207_v27  ;;  %v3906_v8 = vmul.u32 %v924_v40, %v924_v40  ;;  %v3908_v20 = vmul.u32 %v925_v59, %v925_v59  ;;  %5212 = vst [vmem:[#allocation25_spill] sm:$0xff] %v3910_v54 }
  0xe3   : > { %v3904_v3 = vrot.slane %v5211_v57, %v5210_v5  ;;  %v3913_v36 = vmul.u32 %v926_v26, %v926_v26  ;;  %v3915_v53 = vmul.u32 %v927_v35, %v927_v35 }
  0xe4   : > { %v954_v22 = vadd.s32 %v953_v51, %v3881_v34  ;;  %v955_v31 = vadd.s32 %v953_v51, %v3883_v56  ;;  %v944_v10 = vmul.u32 %v928_v58, %v928_v58  ;;  %v945_v38 = vmul.u32 %v929_v63, %v929_v63 }
  0xe5   : > { %v956_v5 = vadd.s32 %v953_v51, %v3888_v41  ;;  %v957_v40 = vadd.s32 %v953_v51, %v3890_v32  ;;  %v946_v59 = vmul.u32 %v930_v39, %v930_v39  ;;  %v947_v57 = vmul.u32 %v931_v23, %v931_v23 }
  0xe6   : > { %v958_v47 = vadd.s32 %v953_v51, %v3897_v33  ;;  %v959_v27 = vadd.s32 %v953_v51, %v3899_v44  ;;  %v948_v26 = vmul.u32 %v932_v4, %v932_v4  ;;  %v949_v2 = vmul.u32 %v933_v29, %v933_v29 }
  0xe7   : > { %v960_v35 = vadd.s32 %v953_v51, %v3906_v8  ;;  %v961_v54 = vadd.s32 %v953_v51, %v3908_v20  ;;  %v962_v9 = vadd.s32 %v953_v51, %v3913_v36  ;;  %v963_v58 = vadd.s32 %v953_v51, %v3915_v53 }
  0xe8   : > { %v964_v63 = vadd.s32 %v953_v51, %v944_v10  ;;  %v965_v1 = vadd.s32 %v953_v51, %v945_v38  ;;  %v966_v18 = vadd.s32 %v953_v51, %v946_v59  ;;  %v967_v24 = vadd.s32 %v953_v51, %v947_v57 }
  0xe9   : > { %vm970_vm0 = vcmp.lt.s32.totalorder %v3704_v25, %v954_v22  ;;  %vm972_vm1 = vcmp.lt.s32.totalorder %v3707_v61, %v955_v31  ;;  %v968_v39 = vadd.s32 %v953_v51, %v948_v26  ;;  %v969_v23 = vadd.s32 %v953_v51, %v949_v2 }
  0xea   : > { %vm974_vm2 = vcmp.lt.s32.totalorder %v3712_v60, %v956_v5  ;;  %vm976_vm3 = vcmp.lt.s32.totalorder %v3715_v14, %v957_v40  ;;  %v3932_v29 = vsel %vm970_vm0, %v3704_v25, %v954_v22  ;;  %v3935_v4 = vsel %vm972_vm1, %v3707_v61, %v955_v31  ;;  %v5225_v22 = vld [vmem:[#allocation2_spill] sm:$0xff] }
  0xeb   : > { %vm978_vm4 = vcmp.lt.s32.totalorder %v3720_v15, %v958_v47  ;;  %vm980_vm5 = vcmp.lt.s32.totalorder %v3723_v52, %v959_v27  ;;  %v3940_v19 = vsel %vm974_vm2, %v3712_v60, %v956_v5  ;;  %v3943_v49 = vsel %vm976_vm3, %v3715_v14, %v957_v40  ;;  %v5226_v5 = vld [vmem:[#allocation3_spill] sm:$0xff] }
  0xec   : > { %vm982_vm6 = vcmp.lt.s32.totalorder %v3728_v17, %v960_v35  ;;  %vm984_vm7 = vcmp.lt.s32.totalorder %v3731_v0, %v961_v54  ;;  %v3948_v25 = vsel %vm978_vm4, %v3720_v15, %v958_v47  ;;  %v3951_v61 = vsel %vm980_vm5, %v3723_v52, %v959_v27  ;;  %v5221_v27 = vld [vmem:[#allocation19_spill] sm:$0xff] }
  0xed   : > { %vm986_vm8 = vcmp.lt.s32.totalorder %v3736_v46, %v962_v9  ;;  %vm988_vm9 = vcmp.lt.s32.totalorder %v3739_v43, %v963_v58  ;;  %v3956_v60 = vsel %vm982_vm6, %v3728_v17, %v960_v35  ;;  %v3959_v14 = vsel %vm984_vm7, %v3731_v0, %v961_v54  ;;  %v5229_v35 = vld [vmem:[#allocation4_spill] sm:$0xff] }
  0xee   : > { %vm990_vm10 = vcmp.lt.s32.totalorder %v3744_v11, %v964_v63  ;;  %vm992_vm11 = vcmp.lt.s32.totalorder %v3747_v48, %v965_v1  ;;  %v3964_v15 = vsel %vm986_vm8, %v3736_v46, %v962_v9  ;;  %v3967_v52 = vsel %vm988_vm9, %v3739_v43, %v963_v58 }
  0xef   : > { %vm994_vm12 = vcmp.lt.s32.totalorder %v3752_v42, %v966_v18  ;;  %vm996_vm13 = vcmp.lt.s32.totalorder %v3755_v13, %v967_v24  ;;  %v3972_v17 = vsel %vm990_vm10, %v3744_v11, %v964_v63  ;;  %v3975_v0 = vsel %vm992_vm11, %v3747_v48, %v965_v1  ;;  %v5230_v63 = vld [vmem:[#allocation5_spill] sm:$0xff] }
  0xf0   : > { %vm998_vm14 = vcmp.lt.s32.totalorder %v3762_v16, %v968_v39  ;;  %vm1000_vm15 = vcmp.lt.s32.totalorder %v3765_v30, %v969_v23  ;;  %v3980_v46 = vsel %vm994_vm12, %v3752_v42, %v966_v18  ;;  %v3983_v43 = vsel %vm996_vm13, %v3755_v13, %v967_v24 }
  0xf1   : > { %v1006_v47 = vadd.s32 %v3904_v3, %v3881_v34  ;;  %v1007_v11 = vadd.s32 %v3904_v3, %v3883_v56  ;;  %v3990_v9 = vsel %vm998_vm14, %v3762_v16, %v968_v39  ;;  %v3993_v48 = vsel %vm1000_vm15, %v3765_v30, %v969_v23  ;;  %v5231_v23 = vld [vmem:[#allocation6_spill] sm:$0xff] }
  0xf2   : > { %v1008_v1 = vadd.s32 %v3904_v3, %v3888_v41  ;;  %v1009_v42 = vadd.s32 %v3904_v3, %v3890_v32  ;;  %v1010_v13 = vadd.s32 %v3904_v3, %v3897_v33  ;;  %v1011_v24 = vadd.s32 %v3904_v3, %v3899_v44  ;;  %v5216_v44 = vld [vmem:[#allocation22_spill] sm:$0xff] }
  0xf3   : > { %v1012_v18 = vadd.s32 %v3904_v3, %v3906_v8  ;;  %v1013_v16 = vadd.s32 %v3904_v3, %v3908_v20  ;;  %v1014_v30 = vadd.s32 %v3904_v3, %v3913_v36  ;;  %v1015_v51 = vadd.s32 %v3904_v3, %v3915_v53  ;;  %v5217_v8 = vld [vmem:[#allocation21_spill] sm:$0xff]  ;;  %v5220_v20 = vld [vmem:[#allocation20_spill] sm:$0xff] }
  0xf4   : > { %v1016_v41 = vadd.s32 %v3904_v3, %v944_v10  ;;  %v1017_v32 = vadd.s32 %v3904_v3, %v945_v38  ;;  %v1018_v33 = vadd.s32 %v3904_v3, %v946_v59  ;;  %v1019_v34 = vadd.s32 %v3904_v3, %v947_v57  ;;  %v5224_v53 = vld [vmem:[#allocation25_spill] sm:$0xff] }
  0xf5   : > { %vm1022_vm0 = vcmp.lt.s32.totalorder %v3794_v45, %v1006_v47  ;;  %vm1024_vm1 = vcmp.lt.s32.totalorder %v3797_v50, %v1007_v11  ;;  %v1020_v56 = vadd.s32 %v3904_v3, %v948_v26  ;;  %v1021_v54 = vadd.s32 %v3904_v3, %v949_v2  ;;  %v5213_v2 = vld [vmem:[#allocation24_spill] sm:$0xff]  ;;  %v5214_v3 = vld [vmem:[#allocation23_spill] sm:$0xff] }
  0xf6   : > { %vm1026_vm2 = vcmp.lt.s32.totalorder %v3802_v62, %v1008_v1  ;;  %vm1028_vm3 = vcmp.lt.s32.totalorder %v3805_v55, %v1009_v42  ;;  %v4022_v36 = vsel %vm1022_vm0, %v3794_v45, %v1006_v47  ;;  %v4025_v38 = vsel %vm1024_vm1, %v3797_v50, %v1007_v11  ;;  %v5232_v11 = vld [vmem:[#allocation7_spill] sm:$0xff] }
  0xf7   : > { %vm1030_vm4 = vcmp.lt.s32.totalorder %v3810_v12, %v1010_v13  ;;  %vm1032_vm5 = vcmp.lt.s32.totalorder %v3813_v37, %v1011_v24  ;;  %v4030_v57 = vsel %vm1026_vm2, %v3802_v62, %v1008_v1  ;;  %v4033_v10 = vsel %vm1028_vm3, %v3805_v55, %v1009_v42  ;;  %v5233_v42 = vld [vmem:[#allocation8_spill] sm:$0xff] }
  0xf8   : > { %vm1034_vm6 = vcmp.lt.s32.totalorder %v3818_v6, %v1012_v18  ;;  %vm1036_vm7 = vcmp.lt.s32.totalorder %v3821_v28, %v1013_v16  ;;  %v4038_v45 = vsel %vm1030_vm4, %v3810_v12, %v1010_v13  ;;  %v4041_v50 = vsel %vm1032_vm5, %v3813_v37, %v1011_v24  ;;  %v5234_v24 = vld [vmem:[#allocation9_spill] sm:$0xff] }
  0xf9   : > { %vm1038_vm8 = vcmp.lt.s32.totalorder %v3826_v7, %v1014_v30  ;;  %vm1040_vm9 = vcmp.lt.s32.totalorder %v3829_v21, %v1015_v51  ;;  %v4046_v62 = vsel %vm1034_vm6, %v3818_v6, %v1012_v18  ;;  %v4049_v55 = vsel %vm1036_vm7, %v3821_v28, %v1013_v16  ;;  %v5235_v16 = vld [vmem:[#allocation10_spill] sm:$0xff] }
  0xfa   : > { %vm1042_vm10 = vcmp.lt.s32.totalorder %v5213_v2, %v1016_v41  ;;  %vm1044_vm11 = vcmp.lt.s32.totalorder %v5214_v3, %v1017_v32  ;;  %v4054_v12 = vsel %vm1038_vm8, %v3826_v7, %v1014_v30  ;;  %v4057_v37 = vsel %vm1040_vm9, %v3829_v21, %v1015_v51  ;;  %v5236_v51 = vld [vmem:[#allocation11_spill] sm:$0xff] }
  0xfb   : > { %5215 = vst [vmem:[#allocation26_spill] sm:$0xff] %v4054_v12  ;;  %vm1046_vm12 = vcmp.lt.s32.totalorder %v5216_v44, %v1018_v33  ;;  %vm1048_vm13 = vcmp.lt.s32.totalorder %v5217_v8, %v1019_v34  ;;  %v4062_v6 = vsel %vm1042_vm10, %v5213_v2, %v1016_v41  ;;  %v4065_v28 = vsel %vm1044_vm11, %v5214_v3, %v1017_v32  ;;  %v5237_v32 = vld [vmem:[#allocation12_spill] sm:$0xff]  ;;  %v5240_v3 = vld [vmem:[#allocation15_spill] sm:$0xff] }
  0xfc   : > { %5218 = vst [vmem:[#allocation18_spill] sm:$0xff] %v4062_v6  ;;  %5219 = vst [vmem:[#allocation24_spill] sm:$0xff] %v4065_v28  ;;  %vm1050_vm14 = vcmp.lt.s32.totalorder %v5220_v20, %v1020_v56  ;;  %vm1052_vm15 = vcmp.lt.s32.totalorder %v5221_v27, %v1021_v54  ;;  %v4070_v7 = vsel %vm1046_vm12, %v5216_v44, %v1018_v33 }
  0xfd   : > { %5222 = vst [vmem:[#allocation23_spill] sm:$0xff] %v4070_v7  ;;  %v4073_v21 = vsel %vm1048_vm13, %v5217_v8, %v1019_v34  ;;  %v1056_v31 = vsub.s32 %v5225_v22, %v5224_v53  ;;  %v1057_v40 = vsub.s32 %v5226_v5, %v5224_v53  ;;  %v4080_v59 = vsel %vm1050_vm14, %v5220_v20, %v1020_v56  ;;  %v5238_v34 = vld [vmem:[#allocation13_spill] sm:$0xff] }
  0xfe   : > { %5223 = vst [vmem:[#allocation22_spill] sm:$0xff] %v4073_v21  ;;  %5227 = vst [vmem:[#allocation21_spill] sm:$0xff] %v4080_v59  ;;  %v4083_v26 = vsel %vm1052_vm15, %v5221_v27, %v1021_v54  ;;  %v1058_v58 = vsub.s32 %v5229_v35, %v5224_v53  ;;  %v1059_v39 = vsub.s32 %v5230_v63, %v5224_v53  ;;  %v5239_v54 = vld [vmem:[#allocation14_spill] sm:$0xff]  ;;  %v5241_v27 = vld [vmem:[#allocation16_spill] sm:$0xff] }
  0xff   : > { %5228 = vst [vmem:[#allocation20_spill] sm:$0xff] %v4083_v26  ;;  %v1060_v47 = vsub.s32 %v5231_v23, %v5224_v53  ;;  %v1061_v1 = vsub.s32 %v5232_v11, %v5224_v53  ;;  %v1062_v13 = vsub.s32 %v5233_v42, %v5224_v53  ;;  %v1063_v18 = vsub.s32 %v5234_v24, %v5224_v53  ;;  %v5243_v11 = vld [vmem:[#allocation27_spill] sm:$0xff]  ;;  %v5244_v24 = vld [vmem:[#allocation17_spill] sm:$0xff] }
 0x100   : > { %v1064_v30 = vsub.s32 %v5235_v16, %v5224_v53  ;;  %v1065_v41 = vsub.s32 %v5236_v51, %v5224_v53  ;;  %v1066_v33 = vsub.s32 %v5237_v32, %v5224_v53  ;;  %v1067_v56 = vsub.s32 %v5238_v34, %v5224_v53  ;;  %v5246_v32 = vld [vmem:[#allocation28_spill] sm:$0xff] }
 0x101   : > { %v1068_v2 = vsub.s32 %v5239_v54, %v5224_v53  ;;  %v1069_v44 = vsub.s32 %v5240_v3, %v5224_v53  ;;  %v4109_v8 = vmul.u32 %v1056_v31, %v1056_v31  ;;  %v4111_v20 = vmul.u32 %v1057_v40, %v1057_v40 }
 0x102   : > { %v1070_v5 = vsub.s32 %v5241_v27, %v5224_v53  ;;  %v4115_v35 = vmul.u32 %v1058_v58, %v1058_v58  ;;  %v4117_v63 = vmul.u32 %v1059_v39, %v1059_v39  ;;  %v5242_v23 = vsub.s32 7, %v5225_v22 }
 0x103   : > { %v1071_v16 = vsub.s32 %v5244_v24, %v5224_v53  ;;  %v4124_v51 = vmul.u32 %v1060_v47, %v1060_v47  ;;  %v4126_v31 = vmul.u32 %v1061_v1, %v1061_v1 }
 0x104   : > { %v1091_v42 = vrot.slane %v5243_v11, %v5242_v23  ;;  %v5245_v40 = vmov %v5242_v23  ;;  %v4133_v58 = vmul.u32 %v1062_v13, %v1062_v13  ;;  %v4135_v39 = vmul.u32 %v1063_v18, %v1063_v18 }
 0x105   : > { %v4131_v34 = vrot.slane %v5246_v32, %v5245_v40  ;;  %v1080_v27 = vmul.u32 %v1064_v30, %v1064_v30  ;;  %v1081_v23 = vmul.u32 %v1065_v41, %v1065_v41 }
 0x106   : > { %v1092_v54 = vadd.s32 %v1091_v42, %v4109_v8  ;;  %v1093_v3 = vadd.s32 %v1091_v42, %v4111_v20  ;;  %v1094_v53 = vadd.s32 %v1091_v42, %v4115_v35  ;;  %v1095_v47 = vadd.s32 %v1091_v42, %v4117_v63 }
 0x107   : > { %v1082_v1 = vmul.u32 %v1066_v33, %v1066_v33  ;;  %v1083_v11 = vmul.u32 %v1067_v56, %v1067_v56  ;;  %v1096_v22 = vadd.s32 %v1091_v42, %v4124_v51  ;;  %v1097_v24 = vadd.s32 %v1091_v42, %v4126_v31 }
 0x108   : > { %v1084_v13 = vmul.u32 %v1068_v2, %v1068_v2  ;;  %v1085_v40 = vmul.u32 %v1069_v44, %v1069_v44  ;;  %v1098_v18 = vadd.s32 %v1091_v42, %v4133_v58  ;;  %v1099_v32 = vadd.s32 %v1091_v42, %v4135_v39 }
 0x109   : > { %v1086_v26 = vmul.u32 %v1070_v5, %v1070_v5  ;;  %v1087_v59 = vmul.u32 %v1071_v16, %v1071_v16  ;;  %v1100_v30 = vadd.s32 %v1091_v42, %v1080_v27  ;;  %v1101_v41 = vadd.s32 %v1091_v42, %v1081_v23 }
 0x10a   : > { %v1102_v21 = vadd.s32 %v1091_v42, %v1082_v1  ;;  %v1103_v7 = vadd.s32 %v1091_v42, %v1083_v11  ;;  %v1104_v28 = vadd.s32 %v1091_v42, %v1084_v13  ;;  %v1105_v6 = vadd.s32 %v1091_v42, %v1085_v40 }
 0x10b   : > { %v1106_v33 = vadd.s32 %v1091_v42, %v1086_v26  ;;  %v1107_v56 = vadd.s32 %v1091_v42, %v1087_v59  ;;  %vm1108_vm0 = vcmp.lt.s32.totalorder %v3932_v29, %v1092_v54  ;;  %vm1110_vm1 = vcmp.lt.s32.totalorder %v3935_v4, %v1093_v3 }
 0x10c   : > { %v4148_v2 = vsel %vm1108_vm0, %v3932_v29, %v1092_v54   ;;  %v4151_v44 = vsel %vm1110_vm1, %v3935_v4, %v1093_v3   ;;  %vm1112_vm2 = vcmp.lt.s32.totalorder %v3940_v19, %v1094_v53  ;;  %vm1114_vm3 = vcmp.lt.s32.totalorder %v3943_v49, %v1095_v47 }
 0x10d   : > { %5247 = vst [vmem:[#allocation29_spill] sm:$0xff] %v4148_v2  ;;  %v5248_v12 = vmov %v4151_v44  ;;  %v4156_v5 = vsel %vm1112_vm2, %v3940_v19, %v1094_v53   ;;  %v4159_v16 = vsel %vm1114_vm3, %v3943_v49, %v1095_v47   ;;  %vm1116_vm4 = vcmp.lt.s32.totalorder %v3948_v25, %v1096_v22 }
 0x10e   : > { %vm1118_vm5 = vcmp.lt.s32.totalorder %v3951_v61, %v1097_v24  ;;  %v4164_v44 = vsel %vm1116_vm4, %v3948_v25, %v1096_v22   ;;  %vm1120_vm6 = vcmp.lt.s32.totalorder %v3956_v60, %v1098_v18  ;;  %vm1122_vm7 = vcmp.lt.s32.totalorder %v3959_v14, %v1099_v32 }
 0x10f   : > { %v5249_v54 = vmov %v4164_v44  ;;  %v4167_v29 = vsel %vm1118_vm5, %v3951_v61, %v1097_v24   ;;  %v4172_v42 = vsel %vm1120_vm6, %v3956_v60, %v1098_v18   ;;  %v4175_v49 = vsel %vm1122_vm7, %v3959_v14, %v1099_v32  }
 0x110   : > { %v5250_v4 = vmov %v4167_v29  ;;  %v5251_v3 = vmov %v4172_v42  ;;  %vm1124_vm8 = vcmp.lt.s32.totalorder %v3964_v15, %v1100_v30  ;;  %vm1126_vm9 = vcmp.lt.s32.totalorder %v3967_v52, %v1101_v41 }
 0x111   : > { %v4180_v19 = vsel %vm1124_vm8, %v3964_v15, %v1100_v30   ;;  %v4183_v25 = vsel %vm1126_vm9, %v3967_v52, %v1101_v41   ;;  %vm1128_vm10 = vcmp.lt.s32.totalorder %v3972_v17, %v1102_v21  ;;  %vm1130_vm11 = vcmp.lt.s32.totalorder %v3975_v0, %v1103_v7 }
 0x112   : > { %v5252_v53 = vmov %v4180_v19  ;;  %v5253_v61 = vmov %v4183_v25  ;;  %v4188_v60 = vsel %vm1128_vm10, %v3972_v17, %v1102_v21   ;;  %v4191_v14 = vsel %vm1130_vm11, %v3975_v0, %v1103_v7  }
 0x113   : > { %vm1132_vm12 = vcmp.lt.s32.totalorder %v3980_v46, %v1104_v28  ;;  %vm1134_vm13 = vcmp.lt.s32.totalorder %v3983_v43, %v1105_v6  ;;  %vm1136_vm14 = vcmp.lt.s32.totalorder %v3990_v9, %v1106_v33  ;;  %vm1138_vm15 = vcmp.lt.s32.totalorder %v3993_v48, %v1107_v56 }
 0x114   : > { %v4196_v15 = vsel %vm1132_vm12, %v3980_v46, %v1104_v28   ;;  %v4199_v52 = vsel %vm1134_vm13, %v3983_v43, %v1105_v6   ;;  %v4204_v17 = vsel %vm1136_vm14, %v3990_v9, %v1106_v33   ;;  %v4207_v33 = vsel %vm1138_vm15, %v3993_v48, %v1107_v56  }
 0x115   : > { %5254 = vst [vmem:[#allocation30_spill] sm:$0xff] %v4204_v17  ;;  %v5255_v2 = vmov %v4204_v17  ;;  %5256 = vst [vmem:[#allocation31_spill] sm:$0xff] %v4207_v33  ;;  %v5257_v0 = vmov %v4207_v33  ;;  %v1144_v7 = vadd.s32 %v4131_v34, %v4109_v8  ;;  %v1145_v46 = vadd.s32 %v4131_v34, %v4111_v20 }
 0x116   : > { %v1146_v43 = vadd.s32 %v4131_v34, %v4115_v35  ;;  %v1147_v6 = vadd.s32 %v4131_v34, %v4117_v63  ;;  %v1148_v28 = vadd.s32 %v4131_v34, %v4124_v51  ;;  %v1149_v9 = vadd.s32 %v4131_v34, %v4126_v31 }
 0x117   : > { %v1150_v48 = vadd.s32 %v4131_v34, %v4133_v58  ;;  %v1151_v21 = vadd.s32 %v4131_v34, %v4135_v39  ;;  %v1152_v8 = vadd.s32 %v4131_v34, %v1080_v27  ;;  %v1153_v20 = vadd.s32 %v4131_v34, %v1081_v23 }
 0x118   : > { %v1154_v35 = vadd.s32 %v4131_v34, %v1082_v1  ;;  %v1155_v63 = vadd.s32 %v4131_v34, %v1083_v11  ;;  %v1156_v42 = vadd.s32 %v4131_v34, %v1084_v13  ;;  %v1157_v51 = vadd.s32 %v4131_v34, %v1085_v40 }
 0x119   : > { %v1158_v31 = vadd.s32 %v4131_v34, %v1086_v26  ;;  %v1159_v47 = vadd.s32 %v4131_v34, %v1087_v59  ;;  %vm1160_vm0 = vcmp.lt.s32.totalorder %v4022_v36, %v1144_v7  ;;  %vm1162_vm1 = vcmp.lt.s32.totalorder %v4025_v38, %v1145_v46  ;;  %v5274_v34 = vld [vmem:[#allocation22_spill] sm:$0xff] }
 0x11a   : > { %v4236_v32 = vsel %vm1160_vm0, %v4022_v36, %v1144_v7   ;;  %v4239_v39 = vsel %vm1162_vm1, %v4025_v38, %v1145_v46   ;;  %vm1164_vm2 = vcmp.lt.s32.totalorder %v4030_v57, %v1146_v43  ;;  %vm1166_vm3 = vcmp.lt.s32.totalorder %v4033_v10, %v1147_v6  ;;  %v5266_v36 = vld [vmem:[#allocation26_spill] sm:$0xff] }
 0x11b   : > { %v5258_v58 = vmov %v4236_v32  ;;  %v5259_v1 = vmov %v4239_v39  ;;  %v4244_v30 = vsel %vm1164_vm2, %v4030_v57, %v1146_v43   ;;  %v4247_v29 = vsel %vm1166_vm3, %v4033_v10, %v1147_v6   ;;  %v5269_v38 = vld [vmem:[#allocation18_spill] sm:$0xff] }
 0x11c   : > { %v5260_v11 = vmov %v4244_v30  ;;  %v5261_v59 = vmov %v4247_v29  ;;  %vm1168_vm4 = vcmp.lt.s32.totalorder %v4038_v45, %v1148_v28  ;;  %vm1170_vm5 = vcmp.lt.s32.totalorder %v4041_v50, %v1149_v9 }
 0x11d   : > { %v4252_v28 = vsel %vm1168_vm4, %v4038_v45, %v1148_v28   ;;  %v4255_v27 = vsel %vm1170_vm5, %v4041_v50, %v1149_v9   ;;  %vm1172_vm6 = vcmp.lt.s32.totalorder %v4046_v62, %v1150_v48  ;;  %vm1174_vm7 = vcmp.lt.s32.totalorder %v4049_v55, %v1151_v21  ;;  %v5270_v45 = vld [vmem:[#allocation24_spill] sm:$0xff] }
 0x11e   : > { %v5262_v13 = vmov %v4252_v28  ;;  %v5263_v56 = vmov %v4255_v27  ;;  %v4260_v26 = vsel %vm1172_vm6, %v4046_v62, %v1150_v48   ;;  %v4263_v25 = vsel %vm1174_vm7, %v4049_v55, %v1151_v21   ;;  %v5278_v27 = vld [vmem:[#allocation20_spill] sm:$0xff]  ;;  %v5316_v48 = vld [vmem:[#allocation29_spill] sm:$0xff] }
 0x11f   : > { %v5264_v57 = vmov %v4260_v26  ;;  %v5265_v10 = vmov %v4263_v25  ;;  %vm1176_vm8 = vcmp.lt.s32.totalorder %v5266_v36, %v1152_v8  ;;  %vm1178_vm9 = vcmp.lt.s32.totalorder %v4057_v37, %v1153_v20  ;;  %v5273_v26 = vld [vmem:[#allocation23_spill] sm:$0xff] }
 0x120   : > { %v4268_v24 = vsel %vm1176_vm8, %v5266_v36, %v1152_v8   ;;  %v4271_v23 = vsel %vm1178_vm9, %v4057_v37, %v1153_v20   ;;  %vm1180_vm10 = vcmp.lt.s32.totalorder %v5269_v38, %v1154_v35  ;;  %vm1182_vm11 = vcmp.lt.s32.totalorder %v5270_v45, %v1155_v63  ;;  %v5277_v37 = vld [vmem:[#allocation21_spill] sm:$0xff] }
 0x121   : > { %v5267_v7 = vmov %v4268_v24  ;;  %v5268_v50 = vmov %v4271_v23  ;;  %v4276_v22 = vsel %vm1180_vm10, %v5269_v38, %v1154_v35   ;;  %v4279_v21 = vsel %vm1182_vm11, %v5270_v45, %v1155_v63  }
 0x122   : > { %v5271_v62 = vmov %v4276_v22  ;;  %v5272_v55 = vmov %v4279_v21  ;;  %vm1184_vm12 = vcmp.lt.s32.totalorder %v5273_v26, %v1156_v42  ;;  %vm1186_vm13 = vcmp.lt.s32.totalorder %v5274_v34, %v1157_v51 }
 0x123   : > { %v4284_v20 = vsel %vm1184_vm12, %v5273_v26, %v1156_v42   ;;  %v4287_v19 = vsel %vm1186_vm13, %v5274_v34, %v1157_v51   ;;  %vm1188_vm14 = vcmp.lt.s32.totalorder %v5277_v37, %v1158_v31  ;;  %vm1190_vm15 = vcmp.lt.s32.totalorder %v5278_v27, %v1159_v47  ;;  %v5318_v51 = vld [vmem:[#allocation29_spill] sm:$0xff] (%p4300_p0) }
 0x124   : > { %v5275_v6 = vmov %v4284_v20  ;;  %v5276_v9 = vmov %v4287_v19  ;;  %v4292_v18 = vsel %vm1188_vm14, %v5277_v37, %v1158_v31   ;;  %v4295_v17 = vsel %vm1190_vm15, %v5278_v27, %v1159_v47  }
 0x125   : > { %5279 = vst [vmem:[#allocation32_spill] sm:$0xff] %v4292_v18  ;;  %v5280_v8 = vmov %v4292_v18  ;;  %5281 = vst [vmem:[#allocation33_spill] sm:$0xff] %v4295_v17  ;;  %v5284_v63 = vmov %v4295_v17  ;;  %v5287_v19 = vmov %v5276_v9  ;;  %v5288_v20 = vmov %v5275_v6 }
 0x126   : > { %v5285_v17 = vmov %v5284_v63  ;;  %v5286_v18 = vmov %v5280_v8  ;;  %v5289_v21 = vmov %v5272_v55  ;;  %v5290_v22 = vmov %v5271_v62 }
 0x127   : > { %v5291_v23 = vmov %v5268_v50  ;;  %v5292_v24 = vmov %v5267_v7  ;;  %v5293_v25 = vmov %v5265_v10  ;;  %v5294_v26 = vmov %v5264_v57  ;;  %50 = sbr.rel (!%p4300_p0) target bundleno = 14 (0xe), region = 37 }
 0x128   : > { %v5295_v27 = vmov %v5263_v56  ;;  %v5296_v28 = vmov %v5262_v13  ;;  %v5297_v29 = vmov %v5261_v59  ;;  %v5298_v30 = vmov %v5260_v11 }
 0x129   : > { %v5299_v31 = vmov %v5259_v1  ;;  %v5300_v32 = vmov %v5258_v58  ;;  %v5301_v33 = vmov %v5257_v0  ;;  %v5302_v34 = vmov %v5255_v2 }
 0x12a   : > { %v5303_v35 = vmov %v4199_v52  ;;  %v5304_v36 = vmov %v4196_v15  ;;  %v5305_v37 = vmov %v4191_v14  ;;  %v5306_v38 = vmov %v4188_v60 }
 0x12b   : > { %v5307_v39 = vmov %v5253_v61  ;;  %v5308_v40 = vmov %v5252_v53  ;;  %v5309_v41 = vmov %v4175_v49  ;;  %v5310_v42 = vmov %v5251_v3 }
 0x12c   : > { %v5311_v43 = vmov %v5250_v4  ;;  %v5312_v44 = vmov %v5249_v54  ;;  %v5313_v45 = vmov %v4159_v16  ;;  %v5314_v46 = vmov %v4156_v5 }
 0x12d   : > { %v5315_v47 = vmov %v5248_v12  ;;  %v4407_v63 = vcvt.s32.f32 (%p4300_p0), %v5318_v51  ;;  %v4410_v0 = vcvt.s32.f32 (%p4300_p0), %v5258_v58  ;;  %v4413_v8 = vcvt.s32.f32 (%p4300_p0), %v5248_v12 }
 0x12e   :  { %v4416_v2 = vcvt.s32.f32 %v5259_v1  ;;  %v4420_v48 = vcvt.s32.f32 %v4156_v5  ;;  %v4424_v23 = vcvt.s32.f32 %v5260_v11  ;;  %v4429_v12 = vcvt.s32.f32 %v4159_v16 }
 0x12f   :  { %1889 = vrsqrt.f32 %v4407_v63  ;;  %vm1210_vm0 = vcmp.eq.f32.partialorder %v4407_v63, inf  ;;  %vm1212_vm1 = vcmp.eq.f32.partialorder %v4407_v63, 0.0  ;;  %v1213_v22 = vand.u32 2147483648, %v4407_v63 }
 0x130   :  { %1891 = vrsqrt.f32 %v4410_v0  ;;  %vm1338_vm2 = vcmp.eq.f32.partialorder %v4410_v0, inf  ;;  %vm1340_vm3 = vcmp.eq.f32.partialorder %v4410_v0, 0.0  ;;  %v1341_v24 = vand.u32 2147483648, %v4410_v0 }
 0x131   :  { %1893 = vrsqrt.f32 %v4413_v8  ;;  %vm1217_vm4 = vcmp.eq.f32.partialorder %v4413_v8, inf  ;;  %vm1219_vm5 = vcmp.eq.f32.partialorder %v4413_v8, 0.0  ;;  %v1220_v40 = vand.u32 2147483648, %v4413_v8 }
 0x132   :  { %1895 = vrsqrt.f32 %v4416_v2  ;;  %vm1345_vm6 = vcmp.eq.f32.partialorder %v4416_v2, inf  ;;  %vm1347_vm7 = vcmp.eq.f32.partialorder %v4416_v2, 0.0  ;;  %v1348_v18 = vand.u32 2147483648, %v4416_v2 }
 0x133   :  { %1897 = vrsqrt.f32 %v4420_v48  ;;  %vm1224_vm8 = vcmp.eq.f32.partialorder %v4420_v48, inf  ;;  %vm1226_vm9 = vcmp.eq.f32.partialorder %v4420_v48, 0.0  ;;  %v4449_v32 = vcvt.s32.f32 %v5261_v59 }
 0x134   :  { %1899 = vrsqrt.f32 %v4424_v23  ;;  %v4452_v30 = vcvt.s32.f32 %v5249_v54  ;;  %v4455_v41 = vcvt.s32.f32 %v5262_v13  ;;  %v1227_v33 = vand.u32 2147483648, %v4420_v48 }
 0x135   :  { %1901 = vrsqrt.f32 %v4429_v12  ;;  %vm1352_vm10 = vcmp.eq.f32.partialorder %v4424_v23, inf  ;;  %v4461_v44 = vcvt.s32.f32 %v5250_v4  ;;  %v1355_v5 = vand.u32 2147483648, %v4424_v23 }
 0x136   :  { %v1234_v16 = vand.u32 2147483648, %v4429_v12  ;;  %1903 = vrsqrt.f32 %v4449_v32  ;;  %v4469_v29 = vcvt.s32.f32 %v5263_v56  ;;  %v4472_v19 = vcvt.s32.f32 %v5251_v3 }
 0x137   :  { %1905 = vrsqrt.f32 %v4452_v30  ;;  %v4475_v4 = vcvt.s32.f32 %v5264_v57  ;;  %v1362_v46 = vand.u32 2147483648, %v4449_v32  ;;  %v4482_v43 = vcvt.s32.f32 %v4175_v49 }
 0x138   :  { %1907 = vrsqrt.f32 %v4455_v41  ;;  %vm1359_vm14 = vcmp.eq.f32.partialorder %v4449_v32, inf  ;;  %vm1238_vm15 = vcmp.eq.f32.partialorder %v4452_v30, inf  ;;  %v1241_v3 = vand.u32 2147483648, %v4452_v30 }
 0x139   :  { %v1890_v54 = vpop.eup %1889  ;;  %1909 = vrsqrt.f32 %v4461_v44  ;;  %vm1361_vm13 = vcmp.eq.f32.partialorder %v4449_v32, 0.0  ;;  %vm1240_vm12 = vcmp.eq.f32.partialorder %v4452_v30, 0.0  ;;  %vm1366_vm11 = vcmp.eq.f32.partialorder %v4455_v41, inf }
 0x13a   :  { %v1892_v25 = vpop.eup %1891  ;;  %v1209_v17 = vmul.f32 %v1890_v54, %v4407_v63  ;;  %v1369_v49 = vand.u32 2147483648, %v4455_v41  ;;  %1911 = vrsqrt.f32 %v4469_v29 }
 0x13b   :  { %v1894_v28 = vpop.eup %1893  ;;  %v1337_v21 = vmul.f32 %v1892_v25, %v4410_v0  ;;  %1913 = vrsqrt.f32 %v4472_v19 }
 0x13c   :  { %v1896_v20 = vpop.eup %1895  ;;  %v1211_v35 = vsel %vm1210_vm0, %v4407_v63, %v1209_v17  ;;  %v1216_v42 = vmul.f32 %v1894_v28, %v4413_v8  ;;  %vm1368_vm0 = vcmp.eq.f32.partialorder %v4455_v41, 0.0 }
 0x13d   :  { %v1898_v31 = vpop.eup %1897  ;;  %v1214_v47 = vsel %vm1212_vm1, %v1213_v22, %v1211_v35  ;;  %v1339_v58 = vsel %vm1338_vm2, %v4410_v0, %v1337_v21  ;;  %v1344_v39 = vmul.f32 %v1896_v20, %v4416_v2  ;;  %vm1245_vm1 = vcmp.eq.f32.partialorder %v4461_v44, inf }
 0x13e   :  { %v1900_v1 = vpop.eup %1899  ;;  %v1342_v11 = vsel %vm1340_vm3, %v1341_v24, %v1339_v58  ;;  %v1218_v59 = vsel %vm1217_vm4, %v4413_v8, %v1216_v42  ;;  %v1223_v13 = vmul.f32 %v1898_v31, %v4420_v48  ;;  %vm1247_vm2 = vcmp.eq.f32.partialorder %v4461_v44, 0.0 }
 0x13f   :  { %v1902_v56 = vpop.eup %1901  ;;  %v1448_v57 = vsub.f32 %v1214_v47, %v1342_v11  ;;  %v1221_v36 = vsel %vm1219_vm5, %v1220_v40, %v1218_v59  ;;  %v1346_v38 = vsel %vm1345_vm6, %v4416_v2, %v1344_v39  ;;  %v1351_v0 = vmul.f32 %v1900_v1, %v4424_v23 }
 0x140   :  { %v1349_v45 = vsel %vm1347_vm7, %v1348_v18, %v1346_v38  ;;  %v1225_v26 = vsel %vm1224_vm8, %v4420_v48, %v1223_v13  ;;  %v1230_v34 = vmul.f32 %v1902_v56, %v4429_v12  ;;  %v1904_v51 = vpop.eup %1903  ;;  %vm5319_vm3 = vcmp.eq.f32.partialorder %v4424_v23, 0.0 }
 0x141   :  { %v1464_v37 = vmul.f32 0.1, %v1448_v57  ;;  %v1449_v27 = vsub.f32 %v1221_v36, %v1349_v45  ;;  %v1228_v8 = vsel %vm1226_vm9, %v1227_v33, %v1225_v26  ;;  %v1353_v63 = vsel %vm1352_vm10, %v4424_v23, %v1351_v0  ;;  %v1906_v40 = vpop.eup %1905 }
 0x142   :  { %v1356_v2 = vsel %vm5319_vm3, %v1355_v5, %v1353_v63  ;;  %vm5320_vm4 = vcmp.eq.f32.partialorder %v4429_v12, inf  ;;  %v1248_v24 = vand.u32 2147483648, %v4461_v44  ;;  %vm1373_vm5 = vcmp.eq.f32.partialorder %v4469_v29, inf  ;;  %v1908_v33 = vpop.eup %1907 }
 0x143   :  { %v1232_v22 = vsel %vm5320_vm4, %v4429_v12, %v1230_v34  ;;  %1915 = vtanh.f32 %v1464_v37  ;;  %v1465_v48 = vmul.f32 0.1, %v1449_v27  ;;  %v1450_v18 = vsub.f32 %v1228_v8, %v1356_v2  ;;  %v1910_v25 = vpop.eup %1909 }
 0x144   :  { %v1358_v54 = vmul.f32 %v1904_v51, %v4449_v32  ;;  %v1237_v23 = vmul.f32 %v1906_v40, %v4452_v30  ;;  %vm1375_vm6 = vcmp.eq.f32.partialorder %v4469_v29, 0.0  ;;  %v1376_v5 = vand.u32 2147483648, %v4469_v29  ;;  %v1912_v31 = vpop.eup %1911 }
 0x145   :  { %1917 = vtanh.f32 %v1465_v48  ;;  %v1466_v17 = vmul.f32 0.1, %v1450_v18  ;;  %vm5321_vm7 = vcmp.eq.f32.partialorder %v4429_v12, 0.0  ;;  %v1365_v21 = vmul.f32 %v1908_v33, %v4455_v41 }
 0x146   :  { %v1235_v28 = vsel %vm5321_vm7, %v1234_v16, %v1232_v22  ;;  %v1360_v20 = vsel %vm1359_vm14, %v4449_v32, %v1358_v54  ;;  %v1239_v35 = vsel %vm1238_vm15, %v4452_v30, %v1237_v23  ;;  %v1244_v42 = vmul.f32 %v1910_v25, %v4461_v44 }
 0x147   :  { %1919 = vrsqrt.f32 %v4475_v4  ;;  %v1363_v12 = vsel %vm1361_vm13, %v1362_v46, %v1360_v20  ;;  %v1242_v16 = vsel %vm1240_vm12, %v1241_v3, %v1239_v35  ;;  %v1367_v47 = vsel %vm1366_vm11, %v4455_v41, %v1365_v21 }
 0x148   :  { %1921 = vtanh.f32 %v1466_v17  ;;  %v1451_v58 = vsub.f32 %v1235_v28, %v1363_v12  ;;  %v1370_v39 = vsel %vm1368_vm0, %v1369_v49, %v1367_v47  ;;  %v1246_v1 = vsel %vm1245_vm1, %v4461_v44, %v1244_v42  ;;  %v1914_v49 = vpop.eup %1913 }
 0x149   :  { %v1372_v11 = vmul.f32 %v1912_v31, %v4469_v29  ;;  %v1452_v59 = vsub.f32 %v1242_v16, %v1370_v39  ;;  %v1249_v32 = vsel %vm1247_vm2, %v1248_v24, %v1246_v1  ;;  %1923 = vrsqrt.f32 %v4482_v43 }
 0x14a   :  { %v1467_v30 = vmul.f32 0.1, %v1451_v58  ;;  %vm1496_vm8 = vcmask 261120   ;;  %vm1252_vm9 = vcmp.eq.f32.partialorder %v4472_v19, inf  ;;  %vm1254_vm10 = vcmp.eq.f32.partialorder %v4472_v19, 0.0 }
 0x14b   :  { %v1374_v46 = vsel %vm1373_vm5, %v4469_v29, %v1372_v11  ;;  %v1468_v41 = vmul.f32 0.1, %v1452_v59  ;;  %v4581_v44 = vcvt.s32.f32 %v5265_v10  ;;  %v1251_v57 = vmul.f32 %v1914_v49, %v4472_v19 }
 0x14c   :  { %v1377_v3 = vsel %vm1375_vm6, %v1376_v5, %v1374_v46  ;;  %1925 = vtanh.f32 %v1467_v30  ;;  %v4585_v36 = vcvt.s32.f32 %v5252_v53  ;;  %v4588_v29 = vcvt.s32.f32 %v5267_v7 }
 0x14d   :  { %v1453_v13 = vsub.f32 %v1249_v32, %v1377_v3  ;;  %v1916_v56 = vpop.eup %1915  ;;  %1927 = vtanh.f32 %v1468_v41  ;;  %v1255_v0 = vand.u32 2147483648, %v4472_v19  ;;  %vm1380_vm11 = vcmp.eq.f32.partialorder %v4475_v4, inf }
 0x14e   :  { %1497 = vst.msk [vmem:[%s4870_s2] sm:$0xff] %vm1496_vm8, %v1916_v56  ;;  %1929 = vrsqrt.f32 %v4581_v44  ;;  %v1253_v53 = vsel %vm1252_vm9, %v4472_v19, %v1251_v57  ;;  %vm1382_vm12 = vcmp.eq.f32.partialorder %v4475_v4, 0.0  ;;  %v1383_v7 = vand.u32 2147483648, %v4475_v4 }
 0x14f   :  { %v1469_v38 = vmul.f32 0.1, %v1453_v13  ;;  %v1918_v10 = vpop.eup %1917  ;;  %1931 = vrsqrt.f32 %v4585_v36  ;;  %vm1259_vm13 = vcmp.eq.f32.partialorder %v4482_v43, inf  ;;  %vm1261_vm14 = vcmp.eq.f32.partialorder %v4482_v43, 0.0 }
 0x150   :  { %1498 = vst.msk [vmem:[%s4870_s2 + $0x8] sm:$0xff] %vm1496_vm8, %v1918_v10  ;;  %v1262_v26 = vand.u32 2147483648, %v4482_v43  ;;  %vm1387_vm15 = vcmp.eq.f32.partialorder %v4581_v44, inf  ;;  %vm1389_vm0 = vcmp.eq.f32.partialorder %v4581_v44, 0.0  ;;  %v1256_v27 = vsel %vm1254_vm10, %v1255_v0, %v1253_v53 }
 0x151   :  { %v1920_v45 = vpop.eup %1919  ;;  %1933 = vtanh.f32 %v1469_v38  ;;  %v4621_v8 = vcvt.s32.f32 %v5253_v61  ;;  %v4624_v63 = vcvt.s32.f32 %v5268_v50  ;;  %v4627_v51 = vcvt.s32.f32 %v4188_v60 }
 0x152   :  { %v1922_v34 = vpop.eup %1921  ;;  %v1379_v37 = vmul.f32 %v1920_v45, %v4475_v4  ;;  %1935 = vrsqrt.f32 %v4588_v29  ;;  %v1390_v22 = vand.u32 2147483648, %v4581_v44  ;;  %vm1266_vm1 = vcmp.eq.f32.partialorder %v4585_v36, inf }
 0x153   :  { %1499 = vst.msk [vmem:[%s4870_s2 + $0x10] sm:$0xff] %vm1496_vm8, %v1922_v34  ;;  %vm1268_vm2 = vcmp.eq.f32.partialorder %v4585_v36, 0.0  ;;  %v1924_v19 = vpop.eup %1923  ;;  %v1269_v50 = vand.u32 2147483648, %v4585_v36  ;;  %1937 = vrsqrt.f32 %v4621_v8  ;;  %v4640_v60 = vcvt.s32.f32 %v5271_v62 }
 0x154   :  { %v1381_v2 = vsel %vm1380_vm11, %v4475_v4, %v1379_v37  ;;  %v1258_v40 = vmul.f32 %v1924_v19, %v4482_v43  ;;  %vm1394_vm3 = vcmp.eq.f32.partialorder %v4588_v29, inf  ;;  %1939 = vrsqrt.f32 %v4624_v63 }
 0x155   :  { %v1384_v61 = vsel %vm1382_vm12, %v1383_v7, %v1381_v2  ;;  %vm1396_vm4 = vcmp.eq.f32.partialorder %v4588_v29, 0.0  ;;  %v1397_v4 = vand.u32 2147483648, %v4588_v29  ;;  %1941 = vrsqrt.f32 %v4627_v51 }
 0x156   :  { %v1454_v24 = vsub.f32 %v1256_v27, %v1384_v61  ;;  %v1926_v48 = vpop.eup %1925  ;;  %v4649_v18 = vcvt.s32.f32 %v4191_v14  ;;  %v1260_v54 = vsel %vm1259_vm13, %v4482_v43, %v1258_v40  ;;  %vm1273_vm5 = vcmp.eq.f32.partialorder %v4621_v8, inf }
 0x157   :  { %v1928_v33 = vpop.eup %1927  ;;  %1500 = vst.msk [vmem:[%s4870_s2 + $0x18] sm:$0xff] %vm1496_vm8, %v1926_v48  ;;  %v4660_v23 = vcvt.s32.f32 %v5272_v55  ;;  %vm1275_vm6 = vcmp.eq.f32.partialorder %v4621_v8, 0.0  ;;  %v1276_v14 = vand.u32 2147483648, %v4621_v8  ;;  %vm1401_vm7 = vcmp.eq.f32.partialorder %v4624_v63, inf }
 0x158   :  { %v1470_v62 = vmul.f32 0.1, %v1454_v24  ;;  %v1930_v5 = vpop.eup %1929  ;;  %1501 = vst.msk [vmem:[%s4870_s2 + $0x20] sm:$0xff] %vm1496_vm8, %v1928_v33  ;;  %1943 = vrsqrt.f32 %v4640_v60  ;;  %vm1403_vm9 = vcmp.eq.f32.partialorder %v4624_v63, 0.0  ;;  %v1404_v55 = vand.u32 2147483648, %v4624_v63 }
 0x159   :  { %v1932_v25 = vpop.eup %1931  ;;  %v1386_v17 = vmul.f32 %v1930_v5, %v4581_v44  ;;  %v1263_v21 = vsel %vm1261_vm14, %v1262_v26, %v1260_v54  ;;  %vm1280_vm10 = vcmp.eq.f32.partialorder %v4627_v51, inf  ;;  %vm1282_vm11 = vcmp.eq.f32.partialorder %v4627_v51, 0.0 }
 0x15a   :  { %1945 = vtanh.f32 %v1470_v62  ;;  %v1265_v20 = vmul.f32 %v1932_v25, %v4585_v36  ;;  %v1283_v43 = vand.u32 2147483648, %v4627_v51  ;;  %vm1408_vm12 = vcmp.eq.f32.partialorder %v4640_v60, inf }
 0x15b   :  { %v1934_v28 = vpop.eup %1933  ;;  %1947 = vrsqrt.f32 %v4649_v18  ;;  %v1388_v42 = vsel %vm1387_vm15, %v4581_v44, %v1386_v17  ;;  %vm1410_vm13 = vcmp.eq.f32.partialorder %v4640_v60, 0.0  ;;  %v4699_v39 = vcvt.s32.f32 %v4196_v15 }
 0x15c   :  { %v1936_v35 = vpop.eup %1935  ;;  %1502 = vst.msk [vmem:[%s4870_s2 + $0x28] sm:$0xff] %vm1496_vm8, %v1934_v28  ;;  %1949 = vrsqrt.f32 %v4660_v23  ;;  %v1391_v31 = vsel %vm1389_vm0, %v1390_v22, %v1388_v42  ;;  %v1267_v12 = vsel %vm1266_vm1, %v4585_v36, %v1265_v20  ;;  %v1411_v59 = vand.u32 2147483648, %v4640_v60  ;;  %v5325_v42 = vld [vmem:[#allocation33_spill] sm:$0xff] }
 0x15d   :  { %v1393_v16 = vmul.f32 %v1936_v35, %v4588_v29  ;;  %v1455_v47 = vsub.f32 %v1263_v21, %v1391_v31  ;;  %v1270_v58 = vsel %vm1268_vm2, %v1269_v50, %v1267_v12  ;;  %v1938_v1 = vpop.eup %1937  ;;  %vm1287_vm14 = vcmp.eq.f32.partialorder %v4649_v18, inf  ;;  %v5324_v21 = vld [vmem:[#allocation31_spill] sm:$0xff] }
 0x15e   :  { %v4707_v32 = vcvt.s32.f32 %v5275_v6  ;;  %v1940_v30 = vpop.eup %1939  ;;  %v1272_v15 = vmul.f32 %v1938_v1, %v4621_v8  ;;  %1951 = vrsqrt.f32 %v4699_v39  ;;  %vm1289_vm15 = vcmp.eq.f32.partialorder %v4649_v18, 0.0 }
 0x15f   :  { %v1395_v11 = vsel %vm1394_vm3, %v4588_v29, %v1393_v16  ;;  %v1471_v46 = vmul.f32 0.1, %v1455_v47  ;;  %v1942_v3 = vpop.eup %1941  ;;  %v1400_v13 = vmul.f32 %v1940_v30, %v4624_v63  ;;  %v1290_v44 = vand.u32 2147483648, %v4649_v18 }
 0x160   :  { %v1398_v41 = vsel %vm1396_vm4, %v1397_v4, %v1395_v11  ;;  %v1274_v6 = vsel %vm1273_vm5, %v4621_v8, %v1272_v15  ;;  %v1279_v56 = vmul.f32 %v1942_v3, %v4627_v51  ;;  %v4721_v57 = vcvt.s32.f32 %v4199_v52 }
 0x161   :  { %v1456_v49 = vsub.f32 %v1270_v58, %v1398_v41  ;;  %1953 = vtanh.f32 %v1471_v46  ;;  %v1277_v38 = vsel %vm1275_vm6, %v1276_v14, %v1274_v6  ;;  %v1402_v0 = vsel %vm1401_vm7, %v4624_v63, %v1400_v13  ;;  %v5323_v14 = vld [vmem:[#allocation32_spill] sm:$0xff] }
 0x162   :  { %v1944_v36 = vpop.eup %1943  ;;  %1955 = vrsqrt.f32 %v4707_v32  ;;  %v1405_v53 = vsel %vm1403_vm9, %v1404_v55, %v1402_v0  ;;  %v1281_v52 = vsel %vm1280_vm10, %v4627_v51, %v1279_v56  ;;  %vm1415_vm0 = vcmp.eq.f32.partialorder %v4660_v23, inf }
 0x163   :  { %v1472_v29 = vmul.f32 0.1, %v1456_v49  ;;  %v1407_v7 = vmul.f32 %v1944_v36, %v4640_v60  ;;  %v1457_v26 = vsub.f32 %v1277_v38, %v1405_v53  ;;  %v1284_v34 = vsel %vm1282_vm11, %v1283_v43, %v1281_v52 }
 0x164   :  { %v1946_v10 = vpop.eup %1945  ;;  %v1418_v37 = vand.u32 2147483648, %v4660_v23  ;;  %v4749_v2 = vcvt.s32.f32 %v5276_v9  ;;  %vm1417_vm1 = vcmp.eq.f32.partialorder %v4660_v23, 0.0  ;;  %vm1294_vm2 = vcmp.eq.f32.partialorder %v4699_v39, inf }
 0x165   :  { %v1948_v45 = vpop.eup %1947  ;;  %1503 = vst.msk [vmem:[%s4870_s2 + $0x30] sm:$0xff] %vm1496_vm8, %v1946_v10  ;;  %1957 = vtanh.f32 %v1472_v29  ;;  %v1409_v8 = vsel %vm1408_vm12, %v4640_v60, %v1407_v7  ;;  %v1473_v22 = vmul.f32 0.1, %v1457_v26  ;;  %vm1296_vm3 = vcmp.eq.f32.partialorder %v4699_v39, 0.0 }
 0x166   :  { %v1950_v27 = vpop.eup %1949  ;;  %v1286_v63 = vmul.f32 %v1948_v45, %v4649_v18  ;;  %1959 = vrsqrt.f32 %v4721_v57  ;;  %v1412_v19 = vsel %vm1410_vm13, %v1411_v59, %v1409_v8  ;;  %v1297_v62 = vand.u32 2147483648, %v4699_v39 }
 0x167   :  { %v1414_v51 = vmul.f32 %v1950_v27, %v4660_v23  ;;  %v1458_v61 = vsub.f32 %v1284_v34, %v1412_v19  ;;  %1961 = vtanh.f32 %v1473_v22  ;;  %vm1422_vm4 = vcmp.eq.f32.partialorder %v4707_v32, inf }
 0x168   :  { %v1288_v50 = vsel %vm1287_vm14, %v4649_v18, %v1286_v63  ;;  %v1952_v60 = vpop.eup %1951  ;;  %1963 = vrsqrt.f32 %v4749_v2  ;;  %v5322_v18 = vld [vmem:[#allocation30_spill] sm:$0xff]  ;;  %v4774_v25 = vcvt.s32.f32 %v5323_v14  ;;  %v4785_v20 = vcvt.s32.f32 %v5324_v21 }
 0x169   :  { %v1291_v24 = vsel %vm1289_vm15, %v1290_v44, %v1288_v50  ;;  %v1416_v9 = vsel %vm1415_vm0, %v4660_v23, %v1414_v51  ;;  %v1474_v40 = vmul.f32 0.1, %v1458_v61  ;;  %v1293_v33 = vmul.f32 %v1952_v60, %v4699_v39 }
 0x16a   :  { %v1419_v48 = vsel %vm1417_vm1, %v1418_v37, %v1416_v9  ;;  %v4769_v54 = vcvt.s32.f32 %v5322_v18  ;;  %v1425_v23 = vand.u32 2147483648, %v4707_v32  ;;  %vm1424_vm5 = vcmp.eq.f32.partialorder %v4707_v32, 0.0 }
 0x16b   :  { %v1459_v4 = vsub.f32 %v1291_v24, %v1419_v48  ;;  %v1954_v5 = vpop.eup %1953  ;;  %1965 = vtanh.f32 %v1474_v40  ;;  %v1295_v28 = vsel %vm1294_vm2, %v4699_v39, %v1293_v33  ;;  %v4790_v43 = vcvt.s32.f32 %v5325_v42 }
 0x16c   :  { %v1956_v17 = vpop.eup %1955  ;;  %1504 = vst.msk [vmem:[%s4870_s2 + $0x38] sm:$0xff] %vm1496_vm8, %v1954_v5  ;;  %1967 = vrsqrt.f32 %v4769_v54  ;;  %v1298_v12 = vsel %vm1296_vm3, %v1297_v62, %v1295_v28  ;;  %vm1301_vm6 = vcmp.eq.f32.partialorder %v4721_v57, inf  ;;  %v1304_v11 = vand.u32 2147483648, %v4721_v57 }
 0x16d   :  { %v1475_v55 = vmul.f32 0.1, %v1459_v4  ;;  %v1421_v35 = vmul.f32 %v1956_v17, %v4707_v32  ;;  %vm1303_vm7 = vcmp.eq.f32.partialorder %v4721_v57, 0.0  ;;  %vm1429_vm9 = vcmp.eq.f32.partialorder %v4749_v2, inf }
 0x16e   :  { %v1432_v41 = vand.u32 2147483648, %v4749_v2  ;;  %vm1431_vm10 = vcmp.eq.f32.partialorder %v4749_v2, 0.0  ;;  %vm1308_vm11 = vcmp.eq.f32.partialorder %v4769_v54, inf  ;;  %vm1310_vm12 = vcmp.eq.f32.partialorder %v4769_v54, 0.0 }
 0x16f   :  { %v1958_v31 = vpop.eup %1957  ;;  %1969 = vtanh.f32 %v1475_v55  ;;  %v1423_v47 = vsel %vm1422_vm4, %v4707_v32, %v1421_v35  ;;  %vm1436_vm13 = vcmp.eq.f32.partialorder %v4774_v25, inf  ;;  %vm1438_vm14 = vcmp.eq.f32.partialorder %v4774_v25, 0.0 }
 0x170   :  { %v1960_v16 = vpop.eup %1959  ;;  %1505 = vst.msk [vmem:[%s4870_s2 + $0x40] sm:$0xff] %vm1496_vm8, %v1958_v31  ;;  %1971 = vrsqrt.f32 %v4774_v25  ;;  %v1426_v58 = vsel %vm1424_vm5, %v1425_v23, %v1423_v47  ;;  %v1439_v10 = vand.u32 2147483648, %v4774_v25  ;;  %vm1315_vm15 = vcmp.eq.f32.partialorder %v4785_v20, inf }
 0x171   :  { %v1300_v1 = vmul.f32 %v1960_v16, %v4721_v57  ;;  %1973 = vrsqrt.f32 %v4785_v20  ;;  %v1460_v39 = vsub.f32 %v1298_v12, %v1426_v58  ;;  %v1962_v59 = vpop.eup %1961  ;;  %vm1317_vm0 = vcmp.eq.f32.partialorder %v4785_v20, 0.0 }
 0x172   :  { %1975 = vrsqrt.f32 %v4790_v43  ;;  %v1964_v32 = vpop.eup %1963  ;;  %1506 = vst.msk [vmem:[%s4870_s2 + $0x48] sm:$0xff] %vm1496_vm8, %v1962_v59  ;;  %v1318_v45 = vand.u32 2147483648, %v4785_v20  ;;  %vm1443_vm1 = vcmp.eq.f32.partialorder %v4790_v43, inf  ;;  %v1446_v27 = vand.u32 2147483648, %v4790_v43 }
 0x173   :  { %v1302_v30 = vsel %vm1301_vm6, %v4721_v57, %v1300_v1  ;;  %v1476_v46 = vmul.f32 0.1, %v1460_v39  ;;  %v1428_v15 = vmul.f32 %v1964_v32, %v4749_v2  ;;  %v1311_v57 = vand.u32 2147483648, %v4769_v54 }
 0x174   :  { %v1305_v49 = vsel %vm1303_vm7, %v1304_v11, %v1302_v30  ;;  %vm1445_vm2 = vcmp.eq.f32.partialorder %v4790_v43, 0.0 }
 0x175   :  { %v1966_v3 = vpop.eup %1965  ;;  %1977 = vtanh.f32 %v1476_v46  ;;  %v1430_v44 = vsel %vm1429_vm9, %v4749_v2, %v1428_v15 }
 0x176   :  { %v1968_v13 = vpop.eup %1967  ;;  %1507 = vst.msk [vmem:[%s4870_s2 + $0x50] sm:$0xff] %vm1496_vm8, %v1966_v3  ;;  %v1433_v6 = vsel %vm1431_vm10, %v1432_v41, %v1430_v44 }
 0x177   :  { %v1307_v56 = vmul.f32 %v1968_v13, %v4769_v54  ;;  %v1461_v29 = vsub.f32 %v1305_v49, %v1433_v6 }
 0x179   :  { %v1970_v36 = vpop.eup %1969  ;;  %v1309_v0 = vsel %vm1308_vm11, %v4769_v54, %v1307_v56  ;;  %v1477_v52 = vmul.f32 0.1, %v1461_v29 }
 0x17a   :  { %v1972_v38 = vpop.eup %1971  ;;  %1508 = vst.msk [vmem:[%s4870_s2 + $0x58] sm:$0xff] %vm1496_vm8, %v1970_v36  ;;  %v1312_v34 = vsel %vm1310_vm12, %v1311_v57, %v1309_v0 }
 0x17b   :  { %v1974_v53 = vpop.eup %1973  ;;  %v1435_v7 = vmul.f32 %v1972_v38, %v4774_v25  ;;  %1979 = vtanh.f32 %v1477_v52 }
 0x17c   :  { %v1976_v26 = vpop.eup %1975  ;;  %v1314_v37 = vmul.f32 %v1974_v53, %v4785_v20 }
 0x17d   :  { %v1437_v8 = vsel %vm1436_vm13, %v4774_v25, %v1435_v7  ;;  %v1442_v63 = vmul.f32 %v1976_v26, %v4790_v43 }
 0x17e   :  { %v1440_v2 = vsel %vm1438_vm14, %v1439_v10, %v1437_v8  ;;  %v1316_v22 = vsel %vm1315_vm15, %v4785_v20, %v1314_v37 }
 0x17f   :  { %v1462_v19 = vsub.f32 %v1312_v34, %v1440_v2  ;;  %v1319_v51 = vsel %vm1317_vm0, %v1318_v45, %v1316_v22  ;;  %v1444_v61 = vsel %vm1443_vm1, %v4790_v43, %v1442_v63  ;;  %v1978_v50 = vpop.eup %1977 }
 0x180   :  { %v1447_v24 = vsel %vm1445_vm2, %v1446_v27, %v1444_v61  ;;  %1509 = vst.msk [vmem:[%s4870_s2 + $0x60] sm:$0xff] %vm1496_vm8, %v1978_v50 }
 0x181   :  { %v1478_v9 = vmul.f32 0.1, %v1462_v19  ;;  %v1463_v60 = vsub.f32 %v1319_v51, %v1447_v24 }
 0x183   :  { %1981 = vtanh.f32 %v1478_v9  ;;  %v1479_v40 = vmul.f32 0.1, %v1463_v60 }
 0x185   :  { %1983 = vtanh.f32 %v1479_v40  ;;  %v1980_v48 = vpop.eup %1979 }
 0x186   :  { %1510 = vst.msk [vmem:[%s4870_s2 + $0x68] sm:$0xff] %vm1496_vm8, %v1980_v48 }
 0x18d   :  { %v1982_v4 = vpop.eup %1981 }
 0x18e   :  { %1511 = vst.msk [vmem:[%s4870_s2 + $0x70] sm:$0xff] %vm1496_vm8, %v1982_v4 }
 0x18f   :  { %v1984_v33 = vpop.eup %1983 }
 0x190   :  { %1512 = vst.msk [vmem:[%s4870_s2 + $0x78] sm:$0xff] %vm1496_vm8, %v1984_v33 }

// kernel: signed_distance_transform.2
= control target key start
LH: loop header
LB: loop body
LE: loop exit
PB: predicated region body
PF: predicated region fallthrough
CT: control target
= control target key end

     0   :  { %v4012_v4 = vmov 160   ;;  %s4013_s21 = smov 32   ;;  %v4014_v33 = vmov 0   ;;  %s4016_s14 = smov 98   ;;  %s8769_s0 = inlined_call_operand.vmem [shape: s32[128,32], index: 0, kind: input, shape index: {}]   ;;  %s8770_s1 = inlined_call_operand.vmem [shape: s32[128,32], index: 1, kind: output, shape index: {0}]   ;;  %s8771_s2 = inlined_call_operand.vmem [shape: s32[128,32], index: 2, kind: output, shape index: {1}]  }
   0x1   :  { %v4042_v0 = vld [vmem:[%s8769_s0] sm:$0xff]  ;;  %v4047_v1 = vld [vmem:[%s8769_s0 + $0x10] sm:$0xff]  ;;  %v4052_v2 = vld [vmem:[%s8769_s0 + $0x8] sm:$0xff]  ;;  %s4017_s15 = smov 100   ;;  %s4018_s16 = smov 104  }
   0x2   :  { %vm26_vm0 = vcmp.eq.s32.totalorder %v4042_v0, 0  ;;  %vm28_vm1 = vcmp.eq.s32.totalorder %v4047_v1, 0  ;;  %vm27_vm2 = vcmp.eq.s32.totalorder %v4052_v2, 0  ;;  %v4060_v3 = vld [vmem:[%s8769_s0 + $0x18] sm:$0xff]  ;;  %v4074_v7 = vld [vmem:[%s8769_s0 + $0x20] sm:$0xff]  ;;  %v4079_v8 = vld [vmem:[%s8769_s0 + $0x28] sm:$0xff] }
   0x3   :  { %v4064_v5 = vsel %vm26_vm0, 0, %v4012_v4  ;;  %v4068_v6 = vsel %vm28_vm1, 0, %v4012_v4  ;;  %vm29_vm3 = vcmp.eq.s32.totalorder %v4060_v3, 0  ;;  %v4087_v9 = vsel %vm27_vm2, 0, %v4012_v4  ;;  %v16_v11 = vld [vmem:[%s8769_s0 + $0x30] sm:$0xff]  ;;  %v17_v12 = vld [vmem:[%s8769_s0 + $0x38] sm:$0xff] }
   0x4   :  { %77 = vrot.lane.b32.xlu0 %v4064_v5, %s4013_s21  ;;  %83 = vrot.lane.b32.xlu1 %v4068_v6, %s4013_s21  ;;  %v4091_v10 = vsel %vm29_vm3, 0, %v4012_v4  ;;  %vm30_vm4 = vcmp.eq.s32.totalorder %v4074_v7, 0  ;;  %vm31_vm5 = vcmp.eq.s32.totalorder %v4079_v8, 0  ;;  %vm32_vm6 = vcmp.eq.s32.totalorder %v16_v11, 0  ;;  %v18_v15 = vld [vmem:[%s8769_s0 + $0x40] sm:$0xff]  ;;  %v19_v16 = vld [vmem:[%s8769_s0 + $0x48] sm:$0xff] }
   0x5   :  { %v4107_v13 = vsel %vm30_vm4, 0, %v4012_v4  ;;  %v4111_v14 = vsel %vm31_vm5, 0, %v4012_v4  ;;  %vm33_vm7 = vcmp.eq.s32.totalorder %v17_v12, 0  ;;  %v4124_v17 = vsel %vm32_vm6, 0, %v4012_v4  ;;  %v20_v19 = vld [vmem:[%s8769_s0 + $0x50] sm:$0xff]  ;;  %v21_v20 = vld [vmem:[%s8769_s0 + $0x58] sm:$0xff] }
   0x6   :  { %v4127_v18 = vsel %vm33_vm7, 0, %v4012_v4  ;;  %vm34_vm8 = vcmp.eq.s32.totalorder %v18_v15, 0  ;;  %vm35_vm9 = vcmp.eq.s32.totalorder %v19_v16, 0  ;;  %vm36_vm10 = vcmp.eq.s32.totalorder %v20_v19, 0  ;;  %v22_v23 = vld [vmem:[%s8769_s0 + $0x60] sm:$0xff]  ;;  %v23_v24 = vld [vmem:[%s8769_s0 + $0x68] sm:$0xff] }
   0x7   :  { %v4140_v21 = vsel %vm34_vm8, 0, %v4012_v4  ;;  %v4143_v22 = vsel %vm35_vm9, 0, %v4012_v4  ;;  %vm37_vm11 = vcmp.eq.s32.totalorder %v21_v20, 0  ;;  %v4156_v25 = vsel %vm36_vm10, 0, %v4012_v4  ;;  %v24_v27 = vld [vmem:[%s8769_s0 + $0x70] sm:$0xff]  ;;  %v25_v28 = vld [vmem:[%s8769_s0 + $0x78] sm:$0xff] }
   0x8   :  { %80 = vrot.lane.b32.xlu0 %v4087_v9, %s4013_s21  ;;  %86 = vrot.lane.b32.xlu1 %v4091_v10, %s4013_s21  ;;  %v4159_v26 = vsel %vm37_vm11, 0, %v4012_v4  ;;  %vm38_vm12 = vcmp.eq.s32.totalorder %v22_v23, 0  ;;  %vm39_vm13 = vcmp.eq.s32.totalorder %v23_v24, 0  ;;  %vm40_vm14 = vcmp.eq.s32.totalorder %v24_v27, 0  ;;  %s4015_s0 = smov 97   ;;  %s4019_s17 = smov 112  }
   0x9   :  { %v4172_v29 = vsel %vm38_vm12, 0, %v4012_v4  ;;  %v4175_v30 = vsel %vm39_vm13, 0, %v4012_v4  ;;  %vm41_vm15 = vcmp.eq.s32.totalorder %v25_v28, 0  ;;  %v4182_v31 = vsel %vm40_vm14, 0, %v4012_v4  ;;  %s4020_s18 = smov 127   ;;  %s4021_s19 = smov 126  }
   0xa   :  { %v4185_v32 = vsel %vm41_vm15, 0, %v4012_v4  ;;  %v4193_v34 = vsel %vm26_vm0, 160, %v4014_v33  ;;  %v4197_v35 = vsel %vm27_vm2, 160, %v4014_v33  ;;  %v4205_v36 = vsel %vm28_vm1, 160, %v4014_v33  ;;  %s4022_s20 = smov 124   ;;  %s4023_s22 = smov 120  }
   0xb   :  { %v4209_v37 = vsel %vm29_vm3, 160, %v4014_v33  ;;  %v4217_v38 = vsel %vm30_vm4, 160, %v4014_v33  ;;  %v4221_v39 = vsel %vm31_vm5, 160, %v4014_v33  ;;  %v4228_v40 = vsel %vm32_vm6, 160, %v4014_v33 }
   0xc   :  { %89 = vrot.lane.b32.xlu0 %v4107_v13, %s4013_s21  ;;  %92 = vrot.lane.b32.xlu1 %v4111_v14, %s4013_s21  ;;  %v4231_v41 = vsel %vm33_vm7, 160, %v4014_v33  ;;  %v4238_v42 = vsel %vm34_vm8, 160, %v4014_v33  ;;  %v4241_v43 = vsel %vm35_vm9, 160, %v4014_v33  ;;  %v4248_v44 = vsel %vm36_vm10, 160, %v4014_v33 }
   0xd   :  { %v4251_v45 = vsel %vm37_vm11, 160, %v4014_v33  ;;  %v4258_v46 = vsel %vm38_vm12, 160, %v4014_v33  ;;  %v4261_v47 = vsel %vm39_vm13, 160, %v4014_v33  ;;  %v4268_v48 = vsel %vm40_vm14, 160, %v4014_v33 }
   0xe   :  { %v4271_v49 = vsel %vm41_vm15, 160, %v4014_v33  ;;  %vm76_vm0 = vcmask 1047808  }
  0x10   :  { %95 = vrot.lane.b32.xlu0 %v4124_v17, %s4013_s21  ;;  %98 = vrot.lane.b32.xlu1 %v4127_v18, %s4013_s21 }
  0x14   :  { %101 = vrot.lane.b32.xlu0 %v4140_v21, %s4013_s21  ;;  %104 = vrot.lane.b32.xlu1 %v4143_v22, %s4013_s21 }
  0x18   :  { %107 = vrot.lane.b32.xlu0 %v4156_v25, %s4013_s21  ;;  %110 = vrot.lane.b32.xlu1 %v4159_v26, %s4013_s21 }
  0x1c   :  { %113 = vrot.lane.b32.xlu0 %v4172_v29, %s4013_s21  ;;  %116 = vrot.lane.b32.xlu1 %v4175_v30, %s4013_s21 }
  0x20   :  { %119 = vrot.lane.b32.xlu0 %v4182_v31, %s4013_s21  ;;  %122 = vrot.lane.b32.xlu1 %v4185_v32, %s4013_s21 }
  0x24   :  { %173 = vrot.lane.b32.xlu0 %v4193_v34, %s4013_s21  ;;  %176 = vrot.lane.b32.xlu1 %v4197_v35, %s4013_s21 }
  0x28   :  { %179 = vrot.lane.b32.xlu0 %v4205_v36, %s4013_s21  ;;  %182 = vrot.lane.b32.xlu1 %v4209_v37, %s4013_s21 }
  0x2c   :  { %185 = vrot.lane.b32.xlu0 %v4217_v38, %s4013_s21  ;;  %188 = vrot.lane.b32.xlu1 %v4221_v39, %s4013_s21 }
  0x30   :  { %191 = vrot.lane.b32.xlu0 %v4228_v40, %s4013_s21  ;;  %194 = vrot.lane.b32.xlu1 %v4231_v41, %s4013_s21 }
  0x34   :  { %197 = vrot.lane.b32.xlu0 %v4238_v42, %s4013_s21  ;;  %200 = vrot.lane.b32.xlu1 %v4241_v43, %s4013_s21 }
  0x38   :  { %203 = vrot.lane.b32.xlu0 %v4248_v44, %s4013_s21  ;;  %206 = vrot.lane.b32.xlu1 %v4251_v45, %s4013_s21 }
  0x3c   :  { %209 = vrot.lane.b32.xlu0 %v4258_v46, %s4013_s21  ;;  %212 = vrot.lane.b32.xlu1 %v4261_v47, %s4013_s21 }
  0x40   :  { %215 = vrot.lane.b32.xlu0 %v4268_v48, %s4013_s21  ;;  %218 = vrot.lane.b32.xlu1 %v4271_v49, %s4013_s21 }
  0x76   :  { %v78_v50 = vpop.permute.xlu0 %77  ;;  %v84_v51 = vpop.permute.xlu1 %83 }
  0x77   :  { %v79_v52 = vsel %vm76_vm0, %v78_v50, %v4064_v5  ;;  %v85_v53 = vsel %vm76_vm0, %v84_v51, %v4068_v6 }
  0x78   :  { %125 = vrot.lane.b32.xlu0 %v79_v52, %s4013_s21 }
  0x7a   :  { %v81_v54 = vpop.permute.xlu0 %80  ;;  %v87_v55 = vpop.permute.xlu1 %86 }
  0x7b   :  { %v82_v56 = vsel %vm76_vm0, %v81_v54, %v4087_v9  ;;  %v88_v57 = vsel %vm76_vm0, %v87_v55, %v4091_v10 }
  0x7c   :  { %129 = vrot.lane.b32.xlu0 %v85_v53, %s4013_s21  ;;  %127 = vrot.lane.b32.xlu1 %v82_v56, %s4013_s21 }
  0x7e   :  { %v90_v58 = vpop.permute.xlu0 %89  ;;  %v93_v59 = vpop.permute.xlu1 %92 }
  0x7f   :  { %v91_v60 = vsel %vm76_vm0, %v90_v58, %v4107_v13  ;;  %v94_v61 = vsel %vm76_vm0, %v93_v59, %v4111_v14 }
  0x80   :  { %131 = vrot.lane.b32.xlu1 %v88_v57, %s4013_s21  ;;  %133 = vrot.lane.b32.xlu0 %v91_v60, %s4013_s21 }
  0x82   :  { %v96_v62 = vpop.permute.xlu0 %95  ;;  %v99_v63 = vpop.permute.xlu1 %98 }
  0x83   :  { %v97_v0 = vsel %vm76_vm0, %v96_v62, %v4124_v17  ;;  %v100_v1 = vsel %vm76_vm0, %v99_v63, %v4127_v18 }
  0x84   :  { %135 = vrot.lane.b32.xlu1 %v94_v61, %s4013_s21  ;;  %137 = vrot.lane.b32.xlu0 %v97_v0, %s4013_s21 }
  0x86   :  { %v102_v2 = vpop.permute.xlu0 %101  ;;  %v105_v3 = vpop.permute.xlu1 %104 }
  0x87   :  { %v103_v4 = vsel %vm76_vm0, %v102_v2, %v4140_v21  ;;  %v106_v7 = vsel %vm76_vm0, %v105_v3, %v4143_v22 }
  0x88   :  { %139 = vrot.lane.b32.xlu1 %v100_v1, %s4013_s21  ;;  %141 = vrot.lane.b32.xlu0 %v103_v4, %s4013_s21 }
  0x8a   :  { %v108_v8 = vpop.permute.xlu0 %107  ;;  %v111_v11 = vpop.permute.xlu1 %110 }
  0x8b   :  { %v109_v12 = vsel %vm76_vm0, %v108_v8, %v4156_v25  ;;  %v112_v15 = vsel %vm76_vm0, %v111_v11, %v4159_v26 }
  0x8c   :  { %143 = vrot.lane.b32.xlu1 %v106_v7, %s4013_s21  ;;  %145 = vrot.lane.b32.xlu0 %v109_v12, %s4013_s21 }
  0x8e   :  { %v114_v16 = vpop.permute.xlu0 %113  ;;  %v117_v19 = vpop.permute.xlu1 %116 }
  0x8f   :  { %v115_v20 = vsel %vm76_vm0, %v114_v16, %v4172_v29  ;;  %v118_v23 = vsel %vm76_vm0, %v117_v19, %v4175_v30 }
  0x90   :  { %147 = vrot.lane.b32.xlu1 %v112_v15, %s4013_s21  ;;  %149 = vrot.lane.b32.xlu0 %v115_v20, %s4013_s21 }
  0x92   :  { %v120_v24 = vpop.permute.xlu0 %119  ;;  %v123_v27 = vpop.permute.xlu1 %122 }
  0x93   :  { %v121_v28 = vsel %vm76_vm0, %v120_v24, %v4182_v31  ;;  %v124_v33 = vsel %vm76_vm0, %v123_v27, %v4185_v32 }
  0x94   :  { %151 = vrot.lane.b32.xlu1 %v118_v23, %s4013_s21  ;;  %153 = vrot.lane.b32.xlu0 %v121_v28, %s4013_s21 }
  0x96   :  { %v174_v50 = vpop.permute.xlu0 %173  ;;  %v177_v51 = vpop.permute.xlu1 %176 }
  0x97   :  { %v175_v52 = vsel %vm76_vm0, %v174_v50, %v4193_v34  ;;  %v178_v53 = vsel %vm76_vm0, %v177_v51, %v4197_v35 }
  0x98   :  { %155 = vrot.lane.b32.xlu1 %v124_v33, %s4013_s21  ;;  %221 = vrot.lane.b32.xlu0 %v175_v52, %s4013_s21 }
  0x9a   :  { %v180_v54 = vpop.permute.xlu0 %179  ;;  %v183_v55 = vpop.permute.xlu1 %182 }
  0x9b   :  { %v181_v56 = vsel %vm76_vm0, %v180_v54, %v4205_v36  ;;  %v184_v57 = vsel %vm76_vm0, %v183_v55, %v4209_v37 }
  0x9c   :  { %223 = vrot.lane.b32.xlu1 %v178_v53, %s4013_s21  ;;  %225 = vrot.lane.b32.xlu0 %v181_v56, %s4013_s21 }
  0x9e   :  { %v186_v58 = vpop.permute.xlu0 %185  ;;  %v189_v59 = vpop.permute.xlu1 %188 }
  0x9f   :  { %v187_v60 = vsel %vm76_vm0, %v186_v58, %v4217_v38  ;;  %v190_v61 = vsel %vm76_vm0, %v189_v59, %v4221_v39 }
  0xa0   :  { %227 = vrot.lane.b32.xlu1 %v184_v57, %s4013_s21  ;;  %229 = vrot.lane.b32.xlu0 %v187_v60, %s4013_s21 }
  0xa2   :  { %v192_v62 = vpop.permute.xlu0 %191  ;;  %v195_v63 = vpop.permute.xlu1 %194 }
  0xa3   :  { %v193_v0 = vsel %vm76_vm0, %v192_v62, %v4228_v40  ;;  %v196_v1 = vsel %vm76_vm0, %v195_v63, %v4231_v41 }
  0xa4   :  { %231 = vrot.lane.b32.xlu1 %v190_v61, %s4013_s21  ;;  %233 = vrot.lane.b32.xlu0 %v193_v0, %s4013_s21 }
  0xa6   :  { %v198_v2 = vpop.permute.xlu0 %197  ;;  %v201_v3 = vpop.permute.xlu1 %200 }
  0xa7   :  { %v199_v4 = vsel %vm76_vm0, %v198_v2, %v4238_v42  ;;  %v202_v7 = vsel %vm76_vm0, %v201_v3, %v4241_v43 }
  0xa8   :  { %235 = vrot.lane.b32.xlu1 %v196_v1, %s4013_s21  ;;  %237 = vrot.lane.b32.xlu0 %v199_v4, %s4013_s21 }
  0xaa   :  { %v204_v8 = vpop.permute.xlu0 %203  ;;  %v207_v11 = vpop.permute.xlu1 %206 }
  0xab   :  { %v205_v12 = vsel %vm76_vm0, %v204_v8, %v4248_v44  ;;  %v208_v15 = vsel %vm76_vm0, %v207_v11, %v4251_v45 }
  0xac   :  { %239 = vrot.lane.b32.xlu1 %v202_v7, %s4013_s21  ;;  %241 = vrot.lane.b32.xlu0 %v205_v12, %s4013_s21 }
  0xae   :  { %v210_v16 = vpop.permute.xlu0 %209  ;;  %v213_v19 = vpop.permute.xlu1 %212 }
  0xaf   :  { %v211_v20 = vsel %vm76_vm0, %v210_v16, %v4258_v46  ;;  %v214_v23 = vsel %vm76_vm0, %v213_v19, %v4261_v47 }
  0xb0   :  { %243 = vrot.lane.b32.xlu1 %v208_v15, %s4013_s21  ;;  %245 = vrot.lane.b32.xlu0 %v211_v20, %s4013_s21 }
  0xb2   :  { %v216_v24 = vpop.permute.xlu0 %215  ;;  %v219_v27 = vpop.permute.xlu1 %218 }
  0xb3   :  { %v217_v28 = vsel %vm76_vm0, %v216_v24, %v4268_v48  ;;  %v220_v33 = vsel %vm76_vm0, %v219_v27, %v4271_v49 }
  0xb4   :  { %247 = vrot.lane.b32.xlu1 %v214_v23, %s4013_s21  ;;  %249 = vrot.lane.b32.xlu0 %v217_v28, %s4013_s21 }
  0xb8   :  { %251 = vrot.lane.b32.xlu1 %v220_v33, %s4013_s21 }
  0xea   :  { %v126_v50 = vpop.permute.xlu0 %125 }
  0xeb   :  { %v157_v51 = vsel %vm76_vm0, %v126_v50, %v4064_v5 }
  0xec   :  { %v270_v52 = vadd.s32 1, %v157_v51 }
  0xee   :  { %v128_v53 = vpop.permute.xlu1 %127  ;;  %286 = vrot.lane.b32.xlu0 %v270_v52, %s4015_s0  ;;  %v130_v54 = vpop.permute.xlu0 %129 }
  0xef   :  { %v158_v55 = vsel %vm76_vm0, %v128_v53, %v4087_v9  ;;  %v159_v56 = vsel %vm76_vm0, %v130_v54, %v4068_v6 }
  0xf0   :  { %v271_v57 = vadd.s32 1, %v158_v55  ;;  %v272_v58 = vadd.s32 1, %v159_v56 }
  0xf2   :  { %288 = vrot.lane.b32.xlu1 %v271_v57, %s4015_s0  ;;  %v132_v59 = vpop.permute.xlu1 %131  ;;  %290 = vrot.lane.b32.xlu0 %v272_v58, %s4015_s0  ;;  %v134_v60 = vpop.permute.xlu0 %133 }
  0xf3   :  { %v160_v61 = vsel %vm76_vm0, %v132_v59, %v4091_v10  ;;  %v161_v62 = vsel %vm76_vm0, %v134_v60, %v4107_v13 }
  0xf4   :  { %v273_v63 = vadd.s32 1, %v160_v61  ;;  %v274_v0 = vadd.s32 1, %v161_v62 }
  0xf6   :  { %292 = vrot.lane.b32.xlu1 %v273_v63, %s4015_s0  ;;  %v136_v1 = vpop.permute.xlu1 %135  ;;  %294 = vrot.lane.b32.xlu0 %v274_v0, %s4015_s0  ;;  %v138_v2 = vpop.permute.xlu0 %137 }
  0xf7   :  { %v162_v3 = vsel %vm76_vm0, %v136_v1, %v4111_v14  ;;  %v163_v4 = vsel %vm76_vm0, %v138_v2, %v4124_v17 }
  0xf8   :  { %v275_v7 = vadd.s32 1, %v162_v3  ;;  %v276_v8 = vadd.s32 1, %v163_v4 }
  0xfa   :  { %296 = vrot.lane.b32.xlu1 %v275_v7, %s4015_s0  ;;  %v140_v11 = vpop.permute.xlu1 %139  ;;  %298 = vrot.lane.b32.xlu0 %v276_v8, %s4015_s0  ;;  %v142_v12 = vpop.permute.xlu0 %141 }
  0xfb   :  { %v164_v15 = vsel %vm76_vm0, %v140_v11, %v4127_v18  ;;  %v165_v16 = vsel %vm76_vm0, %v142_v12, %v4140_v21 }
  0xfc   :  { %v277_v19 = vadd.s32 1, %v164_v15  ;;  %v278_v20 = vadd.s32 1, %v165_v16 }
  0xfe   :  { %300 = vrot.lane.b32.xlu1 %v277_v19, %s4015_s0  ;;  %v144_v23 = vpop.permute.xlu1 %143  ;;  %302 = vrot.lane.b32.xlu0 %v278_v20, %s4015_s0  ;;  %v146_v24 = vpop.permute.xlu0 %145 }
  0xff   :  { %v166_v27 = vsel %vm76_vm0, %v144_v23, %v4143_v22  ;;  %v167_v28 = vsel %vm76_vm0, %v146_v24, %v4156_v25 }
 0x100   :  { %v279_v33 = vadd.s32 1, %v166_v27  ;;  %v280_v50 = vadd.s32 1, %v167_v28 }
 0x102   :  { %304 = vrot.lane.b32.xlu1 %v279_v33, %s4015_s0  ;;  %v148_v51 = vpop.permute.xlu1 %147  ;;  %306 = vrot.lane.b32.xlu0 %v280_v50, %s4015_s0  ;;  %v150_v52 = vpop.permute.xlu0 %149 }
 0x103   :  { %v168_v53 = vsel %vm76_vm0, %v148_v51, %v4159_v26  ;;  %v169_v54 = vsel %vm76_vm0, %v150_v52, %v4172_v29 }
 0x104   :  { %v281_v55 = vadd.s32 1, %v168_v53  ;;  %v282_v56 = vadd.s32 1, %v169_v54 }
 0x106   :  { %308 = vrot.lane.b32.xlu1 %v281_v55, %s4015_s0  ;;  %v152_v57 = vpop.permute.xlu1 %151  ;;  %310 = vrot.lane.b32.xlu0 %v282_v56, %s4015_s0  ;;  %v154_v58 = vpop.permute.xlu0 %153 }
 0x107   :  { %v170_v59 = vsel %vm76_vm0, %v152_v57, %v4175_v30  ;;  %v171_v60 = vsel %vm76_vm0, %v154_v58, %v4182_v31 }
 0x108   :  { %v283_v61 = vadd.s32 1, %v170_v59  ;;  %v284_v62 = vadd.s32 1, %v171_v60 }
 0x10a   :  { %312 = vrot.lane.b32.xlu1 %v283_v61, %s4015_s0  ;;  %v156_v63 = vpop.permute.xlu1 %155  ;;  %314 = vrot.lane.b32.xlu0 %v284_v62, %s4015_s0  ;;  %v222_v0 = vpop.permute.xlu0 %221 }
 0x10b   :  { %v172_v1 = vsel %vm76_vm0, %v156_v63, %v4185_v32  ;;  %v253_v2 = vsel %vm76_vm0, %v222_v0, %v4193_v34 }
 0x10c   :  { %v285_v3 = vadd.s32 1, %v172_v1  ;;  %v366_v4 = vadd.s32 1, %v253_v2 }
 0x10e   :  { %316 = vrot.lane.b32.xlu1 %v285_v3, %s4015_s0  ;;  %v224_v7 = vpop.permute.xlu1 %223  ;;  %382 = vrot.lane.b32.xlu0 %v366_v4, %s4015_s0  ;;  %v226_v8 = vpop.permute.xlu0 %225 }
 0x10f   :  { %v254_v11 = vsel %vm76_vm0, %v224_v7, %v4197_v35  ;;  %v255_v12 = vsel %vm76_vm0, %v226_v8, %v4205_v36 }
 0x110   :  { %v367_v15 = vadd.s32 1, %v254_v11  ;;  %v368_v16 = vadd.s32 1, %v255_v12 }
 0x112   :  { %384 = vrot.lane.b32.xlu1 %v367_v15, %s4015_s0  ;;  %v228_v19 = vpop.permute.xlu1 %227  ;;  %386 = vrot.lane.b32.xlu0 %v368_v16, %s4015_s0  ;;  %v230_v20 = vpop.permute.xlu0 %229 }
 0x113   :  { %v256_v23 = vsel %vm76_vm0, %v228_v19, %v4209_v37  ;;  %v257_v24 = vsel %vm76_vm0, %v230_v20, %v4217_v38 }
 0x114   :  { %v369_v27 = vadd.s32 1, %v256_v23  ;;  %v370_v28 = vadd.s32 1, %v257_v24 }
 0x116   :  { %388 = vrot.lane.b32.xlu1 %v369_v27, %s4015_s0  ;;  %v232_v33 = vpop.permute.xlu1 %231  ;;  %390 = vrot.lane.b32.xlu0 %v370_v28, %s4015_s0  ;;  %v234_v50 = vpop.permute.xlu0 %233 }
 0x117   :  { %v258_v51 = vsel %vm76_vm0, %v232_v33, %v4221_v39  ;;  %v259_v52 = vsel %vm76_vm0, %v234_v50, %v4228_v40  ;;  %v74_v50 = vlaneseq }
 0x118   :  { %v371_v53 = vadd.s32 1, %v258_v51  ;;  %v372_v54 = vadd.s32 1, %v259_v52 }
 0x119   :  { %v4469_v51 = vand.u32 127, %v74_v50 }
 0x11a   :  { %392 = vrot.lane.b32.xlu1 %v371_v53, %s4015_s0  ;;  %v236_v55 = vpop.permute.xlu1 %235  ;;  %394 = vrot.lane.b32.xlu0 %v372_v54, %s4015_s0  ;;  %v238_v56 = vpop.permute.xlu0 %237 }
 0x11b   :  { %v260_v57 = vsel %vm76_vm0, %v236_v55, %v4231_v41  ;;  %v261_v58 = vsel %vm76_vm0, %v238_v56, %v4238_v42  ;;  %vm269_vm1 = vcmp.ge.s32.totalorder %v4469_v51, 1 }
 0x11c   :  { %v373_v59 = vadd.s32 1, %v260_v57  ;;  %v374_v60 = vadd.s32 1, %v261_v58 }
 0x11e   :  { %396 = vrot.lane.b32.xlu1 %v373_v59, %s4015_s0  ;;  %v240_v61 = vpop.permute.xlu1 %239  ;;  %398 = vrot.lane.b32.xlu0 %v374_v60, %s4015_s0  ;;  %v242_v62 = vpop.permute.xlu0 %241 }
 0x11f   :  { %v262_v63 = vsel %vm76_vm0, %v240_v61, %v4241_v43  ;;  %v263_v0 = vsel %vm76_vm0, %v242_v62, %v4248_v44 }
 0x120   :  { %v375_v1 = vadd.s32 1, %v262_v63  ;;  %v376_v2 = vadd.s32 1, %v263_v0 }
 0x122   :  { %400 = vrot.lane.b32.xlu1 %v375_v1, %s4015_s0  ;;  %v244_v3 = vpop.permute.xlu1 %243  ;;  %402 = vrot.lane.b32.xlu0 %v376_v2, %s4015_s0  ;;  %v246_v4 = vpop.permute.xlu0 %245 }
 0x123   :  { %v264_v7 = vsel %vm76_vm0, %v244_v3, %v4251_v45  ;;  %v265_v8 = vsel %vm76_vm0, %v246_v4, %v4258_v46 }
 0x124   :  { %v377_v11 = vadd.s32 1, %v264_v7  ;;  %v378_v12 = vadd.s32 1, %v265_v8 }
 0x126   :  { %404 = vrot.lane.b32.xlu1 %v377_v11, %s4015_s0  ;;  %v248_v15 = vpop.permute.xlu1 %247  ;;  %406 = vrot.lane.b32.xlu0 %v378_v12, %s4015_s0  ;;  %v250_v16 = vpop.permute.xlu0 %249 }
 0x127   :  { %v266_v19 = vsel %vm76_vm0, %v248_v15, %v4261_v47  ;;  %v267_v20 = vsel %vm76_vm0, %v250_v16, %v4268_v48 }
 0x128   :  { %v379_v23 = vadd.s32 1, %v266_v19  ;;  %v380_v24 = vadd.s32 1, %v267_v20 }
 0x12a   :  { %408 = vrot.lane.b32.xlu1 %v379_v23, %s4015_s0  ;;  %v252_v27 = vpop.permute.xlu1 %251  ;;  %410 = vrot.lane.b32.xlu0 %v380_v24, %s4015_s0 }
 0x12b   :  { %v268_v28 = vsel %vm76_vm0, %v252_v27, %v4271_v49 }
 0x12c   :  { %v381_v33 = vadd.s32 1, %v268_v28 }
 0x12e   :  { %412 = vrot.lane.b32.xlu1 %v381_v33, %s4015_s0 }
 0x160   :  { %v287_v52 = vpop.permute.xlu0 %286 }
 0x161   :  { %v318_v53 = vsel %vm269_vm1, %v287_v52, 160 }
 0x162   :  { %vm334_vm2 = vcmp.lt.s32.totalorder %v4064_v5, %v318_v53 }
 0x163   :  { %v4476_v54 = vsel %vm334_vm2, %v4064_v5, %v318_v53 }
 0x164   :  { %v289_v55 = vpop.permute.xlu1 %288  ;;  %462 = vrot.lane.b32.xlu0 %v4476_v54, %s4013_s21  ;;  %v291_v56 = vpop.permute.xlu0 %290 }
 0x165   :  { %v319_v57 = vsel %vm269_vm1, %v289_v55, 160  ;;  %v320_v58 = vsel %vm269_vm1, %v291_v56, 160 }
 0x166   :  { %vm336_vm3 = vcmp.lt.s32.totalorder %v4087_v9, %v319_v57  ;;  %vm338_vm4 = vcmp.lt.s32.totalorder %v4068_v6, %v320_v58 }
 0x167   :  { %v4487_v59 = vsel %vm336_vm3, %v4087_v9, %v319_v57  ;;  %v4490_v5 = vsel %vm338_vm4, %v4068_v6, %v320_v58 }
 0x168   :  { %465 = vrot.lane.b32.xlu1 %v4487_v59, %s4013_s21  ;;  %v293_v60 = vpop.permute.xlu1 %292  ;;  %468 = vrot.lane.b32.xlu0 %v4490_v5, %s4013_s21  ;;  %v295_v61 = vpop.permute.xlu0 %294 }
 0x169   :  { %v321_v62 = vsel %vm269_vm1, %v293_v60, 160  ;;  %v322_v63 = vsel %vm269_vm1, %v295_v61, 160 }
 0x16a   :  { %vm340_vm5 = vcmp.lt.s32.totalorder %v4091_v10, %v321_v62  ;;  %vm342_vm6 = vcmp.lt.s32.totalorder %v4107_v13, %v322_v63 }
 0x16b   :  { %v4503_v6 = vsel %vm340_vm5, %v4091_v10, %v321_v62  ;;  %v4506_v9 = vsel %vm342_vm6, %v4107_v13, %v322_v63 }
 0x16c   :  { %471 = vrot.lane.b32.xlu1 %v4503_v6, %s4013_s21  ;;  %v297_v0 = vpop.permute.xlu1 %296  ;;  %474 = vrot.lane.b32.xlu0 %v4506_v9, %s4013_s21  ;;  %v299_v1 = vpop.permute.xlu0 %298 }
 0x16d   :  { %v323_v2 = vsel %vm269_vm1, %v297_v0, 160  ;;  %v324_v3 = vsel %vm269_vm1, %v299_v1, 160 }
 0x16e   :  { %vm344_vm7 = vcmp.lt.s32.totalorder %v4111_v14, %v323_v2  ;;  %vm346_vm8 = vcmp.lt.s32.totalorder %v4124_v17, %v324_v3 }
 0x16f   :  { %v4519_v10 = vsel %vm344_vm7, %v4111_v14, %v323_v2  ;;  %v4522_v13 = vsel %vm346_vm8, %v4124_v17, %v324_v3 }
 0x170   :  { %477 = vrot.lane.b32.xlu1 %v4519_v10, %s4013_s21  ;;  %v301_v4 = vpop.permute.xlu1 %300  ;;  %480 = vrot.lane.b32.xlu0 %v4522_v13, %s4013_s21  ;;  %v303_v7 = vpop.permute.xlu0 %302 }
 0x171   :  { %v325_v8 = vsel %vm269_vm1, %v301_v4, 160  ;;  %v326_v11 = vsel %vm269_vm1, %v303_v7, 160 }
 0x172   :  { %vm348_vm9 = vcmp.lt.s32.totalorder %v4127_v18, %v325_v8  ;;  %vm350_vm10 = vcmp.lt.s32.totalorder %v4140_v21, %v326_v11 }
 0x173   :  { %v4535_v14 = vsel %vm348_vm9, %v4127_v18, %v325_v8  ;;  %v4538_v17 = vsel %vm350_vm10, %v4140_v21, %v326_v11 }
 0x174   :  { %483 = vrot.lane.b32.xlu1 %v4535_v14, %s4013_s21  ;;  %v305_v12 = vpop.permute.xlu1 %304  ;;  %486 = vrot.lane.b32.xlu0 %v4538_v17, %s4013_s21  ;;  %v307_v15 = vpop.permute.xlu0 %306 }
 0x175   :  { %v327_v16 = vsel %vm269_vm1, %v305_v12, 160  ;;  %v328_v19 = vsel %vm269_vm1, %v307_v15, 160 }
 0x176   :  { %vm352_vm11 = vcmp.lt.s32.totalorder %v4143_v22, %v327_v16  ;;  %vm354_vm12 = vcmp.lt.s32.totalorder %v4156_v25, %v328_v19 }
 0x177   :  { %v4551_v18 = vsel %vm352_vm11, %v4143_v22, %v327_v16  ;;  %v4554_v21 = vsel %vm354_vm12, %v4156_v25, %v328_v19 }
 0x178   :  { %489 = vrot.lane.b32.xlu1 %v4551_v18, %s4013_s21  ;;  %v309_v20 = vpop.permute.xlu1 %308  ;;  %492 = vrot.lane.b32.xlu0 %v4554_v21, %s4013_s21  ;;  %v311_v23 = vpop.permute.xlu0 %310 }
 0x179   :  { %v329_v24 = vsel %vm269_vm1, %v309_v20, 160  ;;  %v330_v27 = vsel %vm269_vm1, %v311_v23, 160 }
 0x17a   :  { %vm356_vm13 = vcmp.lt.s32.totalorder %v4159_v26, %v329_v24  ;;  %vm358_vm14 = vcmp.lt.s32.totalorder %v4172_v29, %v330_v27 }
 0x17b   :  { %v4567_v22 = vsel %vm356_vm13, %v4159_v26, %v329_v24  ;;  %v4570_v25 = vsel %vm358_vm14, %v4172_v29, %v330_v27 }
 0x17c   :  { %495 = vrot.lane.b32.xlu1 %v4567_v22, %s4013_s21  ;;  %v313_v28 = vpop.permute.xlu1 %312  ;;  %498 = vrot.lane.b32.xlu0 %v4570_v25, %s4013_s21  ;;  %v315_v33 = vpop.permute.xlu0 %314 }
 0x17d   :  { %v331_v50 = vsel %vm269_vm1, %v313_v28, 160  ;;  %v332_v52 = vsel %vm269_vm1, %v315_v33, 160 }
 0x17e   :  { %vm360_vm15 = vcmp.lt.s32.totalorder %v4175_v30, %v331_v50  ;;  %vm362_vm2 = vcmp.lt.s32.totalorder %v4182_v31, %v332_v52 }
 0x17f   :  { %v4583_v26 = vsel %vm360_vm15, %v4175_v30, %v331_v50  ;;  %v4586_v29 = vsel %vm362_vm2, %v4182_v31, %v332_v52 }
 0x180   :  { %501 = vrot.lane.b32.xlu1 %v4583_v26, %s4013_s21  ;;  %v317_v53 = vpop.permute.xlu1 %316  ;;  %504 = vrot.lane.b32.xlu0 %v4586_v29, %s4013_s21  ;;  %v383_v55 = vpop.permute.xlu0 %382 }
 0x181   :  { %v333_v56 = vsel %vm269_vm1, %v317_v53, 160  ;;  %v414_v57 = vsel %vm269_vm1, %v383_v55, 160 }
 0x182   :  { %vm364_vm3 = vcmp.lt.s32.totalorder %v4185_v32, %v333_v56  ;;  %vm430_vm4 = vcmp.lt.s32.totalorder %v4193_v34, %v414_v57 }
 0x183   :  { %v4599_v30 = vsel %vm364_vm3, %v4185_v32, %v333_v56  ;;  %v4602_v31 = vsel %vm430_vm4, %v4193_v34, %v414_v57 }
 0x184   :  { %507 = vrot.lane.b32.xlu1 %v4599_v30, %s4013_s21  ;;  %v385_v58 = vpop.permute.xlu1 %384  ;;  %558 = vrot.lane.b32.xlu0 %v4602_v31, %s4013_s21  ;;  %v387_v60 = vpop.permute.xlu0 %386 }
 0x185   :  { %v415_v61 = vsel %vm269_vm1, %v385_v58, 160  ;;  %v416_v62 = vsel %vm269_vm1, %v387_v60, 160 }
 0x186   :  { %vm432_vm5 = vcmp.lt.s32.totalorder %v4197_v35, %v415_v61  ;;  %vm434_vm6 = vcmp.lt.s32.totalorder %v4205_v36, %v416_v62 }
 0x187   :  { %v4615_v32 = vsel %vm432_vm5, %v4197_v35, %v415_v61  ;;  %v4618_v34 = vsel %vm434_vm6, %v4205_v36, %v416_v62 }
 0x188   :  { %561 = vrot.lane.b32.xlu1 %v4615_v32, %s4013_s21  ;;  %v389_v63 = vpop.permute.xlu1 %388  ;;  %564 = vrot.lane.b32.xlu0 %v4618_v34, %s4013_s21  ;;  %v391_v0 = vpop.permute.xlu0 %390 }
 0x189   :  { %v417_v1 = vsel %vm269_vm1, %v389_v63, 160  ;;  %v418_v2 = vsel %vm269_vm1, %v391_v0, 160 }
 0x18a   :  { %vm436_vm7 = vcmp.lt.s32.totalorder %v4209_v37, %v417_v1  ;;  %vm438_vm8 = vcmp.lt.s32.totalorder %v4217_v38, %v418_v2 }
 0x18b   :  { %v4631_v35 = vsel %vm436_vm7, %v4209_v37, %v417_v1  ;;  %v4634_v36 = vsel %vm438_vm8, %v4217_v38, %v418_v2 }
 0x18c   :  { %567 = vrot.lane.b32.xlu1 %v4631_v35, %s4013_s21  ;;  %v393_v3 = vpop.permute.xlu1 %392  ;;  %570 = vrot.lane.b32.xlu0 %v4634_v36, %s4013_s21  ;;  %v395_v4 = vpop.permute.xlu0 %394 }
 0x18d   :  { %v419_v7 = vsel %vm269_vm1, %v393_v3, 160  ;;  %v420_v8 = vsel %vm269_vm1, %v395_v4, 160 }
 0x18e   :  { %vm440_vm9 = vcmp.lt.s32.totalorder %v4221_v39, %v419_v7  ;;  %vm442_vm10 = vcmp.lt.s32.totalorder %v4228_v40, %v420_v8 }
 0x18f   :  { %v4647_v37 = vsel %vm440_vm9, %v4221_v39, %v419_v7  ;;  %v4650_v38 = vsel %vm442_vm10, %v4228_v40, %v420_v8 }
 0x190   :  { %573 = vrot.lane.b32.xlu1 %v4647_v37, %s4013_s21  ;;  %v397_v11 = vpop.permute.xlu1 %396  ;;  %576 = vrot.lane.b32.xlu0 %v4650_v38, %s4013_s21  ;;  %v399_v12 = vpop.permute.xlu0 %398 }
 0x191   :  { %v421_v15 = vsel %vm269_vm1, %v397_v11, 160  ;;  %v422_v16 = vsel %vm269_vm1, %v399_v12, 160 }
 0x192   :  { %vm444_vm11 = vcmp.lt.s32.totalorder %v4231_v41, %v421_v15  ;;  %vm446_vm12 = vcmp.lt.s32.totalorder %v4238_v42, %v422_v16 }
 0x193   :  { %v4663_v39 = vsel %vm444_vm11, %v4231_v41, %v421_v15  ;;  %v4666_v40 = vsel %vm446_vm12, %v4238_v42, %v422_v16 }
 0x194   :  { %579 = vrot.lane.b32.xlu1 %v4663_v39, %s4013_s21  ;;  %v401_v19 = vpop.permute.xlu1 %400  ;;  %582 = vrot.lane.b32.xlu0 %v4666_v40, %s4013_s21  ;;  %v403_v20 = vpop.permute.xlu0 %402 }
 0x195   :  { %v423_v23 = vsel %vm269_vm1, %v401_v19, 160  ;;  %v424_v24 = vsel %vm269_vm1, %v403_v20, 160 }
 0x196   :  { %vm448_vm13 = vcmp.lt.s32.totalorder %v4241_v43, %v423_v23  ;;  %vm450_vm14 = vcmp.lt.s32.totalorder %v4248_v44, %v424_v24 }
 0x197   :  { %v4679_v41 = vsel %vm448_vm13, %v4241_v43, %v423_v23  ;;  %v4682_v42 = vsel %vm450_vm14, %v4248_v44, %v424_v24 }
 0x198   :  { %585 = vrot.lane.b32.xlu1 %v4679_v41, %s4013_s21  ;;  %v405_v27 = vpop.permute.xlu1 %404  ;;  %588 = vrot.lane.b32.xlu0 %v4682_v42, %s4013_s21  ;;  %v407_v28 = vpop.permute.xlu0 %406 }
 0x199   :  { %v425_v33 = vsel %vm269_vm1, %v405_v27, 160  ;;  %v426_v50 = vsel %vm269_vm1, %v407_v28, 160 }
 0x19a   :  { %vm452_vm15 = vcmp.lt.s32.totalorder %v4251_v45, %v425_v33  ;;  %vm454_vm2 = vcmp.lt.s32.totalorder %v4258_v46, %v426_v50 }
 0x19b   :  { %v4695_v43 = vsel %vm452_vm15, %v4251_v45, %v425_v33  ;;  %v4698_v44 = vsel %vm454_vm2, %v4258_v46, %v426_v50 }
 0x19c   :  { %591 = vrot.lane.b32.xlu1 %v4695_v43, %s4013_s21  ;;  %v409_v52 = vpop.permute.xlu1 %408  ;;  %594 = vrot.lane.b32.xlu0 %v4698_v44, %s4013_s21  ;;  %v411_v53 = vpop.permute.xlu0 %410 }
 0x19d   :  { %v427_v55 = vsel %vm269_vm1, %v409_v52, 160  ;;  %v428_v56 = vsel %vm269_vm1, %v411_v53, 160 }
 0x19e   :  { %vm456_vm3 = vcmp.lt.s32.totalorder %v4261_v47, %v427_v55  ;;  %vm458_vm4 = vcmp.lt.s32.totalorder %v4268_v48, %v428_v56 }
 0x19f   :  { %v4711_v45 = vsel %vm456_vm3, %v4261_v47, %v427_v55  ;;  %v4714_v46 = vsel %vm458_vm4, %v4268_v48, %v428_v56 }
 0x1a0   :  { %597 = vrot.lane.b32.xlu1 %v4711_v45, %s4013_s21  ;;  %v413_v57 = vpop.permute.xlu1 %412  ;;  %600 = vrot.lane.b32.xlu0 %v4714_v46, %s4013_s21 }
 0x1a1   :  { %v429_v58 = vsel %vm269_vm1, %v413_v57, 160  ;;  %vm654_vm1 = vcmp.ge.s32.totalorder %v4469_v51, 2 }
 0x1a2   :  { %vm460_vm5 = vcmp.lt.s32.totalorder %v4271_v49, %v429_v58 }
 0x1a3   :  { %v4724_v60 = vsel %vm460_vm5, %v4271_v49, %v429_v58 }
 0x1a4   :  { %603 = vrot.lane.b32.xlu1 %v4724_v60, %s4013_s21 }
 0x1d6   :  { %v463_v47 = vpop.permute.xlu0 %462 }
 0x1d7   :  { %v464_v48 = vsel %vm76_vm0, %v463_v47, %v4476_v54 }
 0x1d8   :  { %510 = vrot.lane.b32.xlu0 %v464_v48, %s4013_s21 }
 0x1da   :  { %v466_v61 = vpop.permute.xlu1 %465  ;;  %v469_v62 = vpop.permute.xlu0 %468 }
 0x1db   :  { %v467_v63 = vsel %vm76_vm0, %v466_v61, %v4487_v59  ;;  %v470_v0 = vsel %vm76_vm0, %v469_v62, %v4490_v5 }
 0x1dc   :  { %512 = vrot.lane.b32.xlu1 %v467_v63, %s4013_s21  ;;  %514 = vrot.lane.b32.xlu0 %v470_v0, %s4013_s21 }
 0x1de   :  { %v472_v49 = vpop.permute.xlu1 %471  ;;  %v475_v1 = vpop.permute.xlu0 %474 }
 0x1df   :  { %v473_v2 = vsel %vm76_vm0, %v472_v49, %v4503_v6  ;;  %v476_v3 = vsel %vm76_vm0, %v475_v1, %v4506_v9 }
 0x1e0   :  { %516 = vrot.lane.b32.xlu1 %v473_v2, %s4013_s21  ;;  %518 = vrot.lane.b32.xlu0 %v476_v3, %s4013_s21 }
 0x1e2   :  { %v478_v4 = vpop.permute.xlu1 %477  ;;  %v481_v7 = vpop.permute.xlu0 %480 }
 0x1e3   :  { %v479_v8 = vsel %vm76_vm0, %v478_v4, %v4519_v10  ;;  %v482_v11 = vsel %vm76_vm0, %v481_v7, %v4522_v13 }
 0x1e4   :  { %520 = vrot.lane.b32.xlu1 %v479_v8, %s4013_s21  ;;  %522 = vrot.lane.b32.xlu0 %v482_v11, %s4013_s21 }
 0x1e6   :  { %v484_v12 = vpop.permute.xlu1 %483  ;;  %v487_v15 = vpop.permute.xlu0 %486 }
 0x1e7   :  { %v485_v16 = vsel %vm76_vm0, %v484_v12, %v4535_v14  ;;  %v488_v19 = vsel %vm76_vm0, %v487_v15, %v4538_v17 }
 0x1e8   :  { %524 = vrot.lane.b32.xlu1 %v485_v16, %s4013_s21  ;;  %526 = vrot.lane.b32.xlu0 %v488_v19, %s4013_s21 }
 0x1ea   :  { %v490_v20 = vpop.permute.xlu1 %489  ;;  %v493_v23 = vpop.permute.xlu0 %492 }
 0x1eb   :  { %v491_v24 = vsel %vm76_vm0, %v490_v20, %v4551_v18  ;;  %v494_v27 = vsel %vm76_vm0, %v493_v23, %v4554_v21 }
 0x1ec   :  { %528 = vrot.lane.b32.xlu1 %v491_v24, %s4013_s21  ;;  %530 = vrot.lane.b32.xlu0 %v494_v27, %s4013_s21 }
 0x1ee   :  { %v496_v28 = vpop.permute.xlu1 %495  ;;  %v499_v33 = vpop.permute.xlu0 %498 }
 0x1ef   :  { %v497_v50 = vsel %vm76_vm0, %v496_v28, %v4567_v22  ;;  %v500_v52 = vsel %vm76_vm0, %v499_v33, %v4570_v25 }
 0x1f0   :  { %532 = vrot.lane.b32.xlu1 %v497_v50, %s4013_s21  ;;  %534 = vrot.lane.b32.xlu0 %v500_v52, %s4013_s21 }
 0x1f2   :  { %v502_v53 = vpop.permute.xlu1 %501  ;;  %v505_v55 = vpop.permute.xlu0 %504 }
 0x1f3   :  { %v503_v56 = vsel %vm76_vm0, %v502_v53, %v4583_v26  ;;  %v506_v57 = vsel %vm76_vm0, %v505_v55, %v4586_v29 }
 0x1f4   :  { %536 = vrot.lane.b32.xlu1 %v503_v56, %s4013_s21  ;;  %538 = vrot.lane.b32.xlu0 %v506_v57, %s4013_s21 }
 0x1f6   :  { %v508_v58 = vpop.permute.xlu1 %507  ;;  %v559_v47 = vpop.permute.xlu0 %558 }
 0x1f7   :  { %v509_v48 = vsel %vm76_vm0, %v508_v58, %v4599_v30  ;;  %v560_v61 = vsel %vm76_vm0, %v559_v47, %v4602_v31 }
 0x1f8   :  { %540 = vrot.lane.b32.xlu1 %v509_v48, %s4013_s21  ;;  %606 = vrot.lane.b32.xlu0 %v560_v61, %s4013_s21 }
 0x1fa   :  { %v562_v62 = vpop.permute.xlu1 %561  ;;  %v565_v63 = vpop.permute.xlu0 %564 }
 0x1fb   :  { %v563_v0 = vsel %vm76_vm0, %v562_v62, %v4615_v32  ;;  %v566_v49 = vsel %vm76_vm0, %v565_v63, %v4618_v34 }
 0x1fc   :  { %608 = vrot.lane.b32.xlu1 %v563_v0, %s4013_s21  ;;  %610 = vrot.lane.b32.xlu0 %v566_v49, %s4013_s21 }
 0x1fe   :  { %v568_v1 = vpop.permute.xlu1 %567  ;;  %v571_v2 = vpop.permute.xlu0 %570 }
 0x1ff   :  { %v569_v3 = vsel %vm76_vm0, %v568_v1, %v4631_v35  ;;  %v572_v4 = vsel %vm76_vm0, %v571_v2, %v4634_v36 }
 0x200   :  { %612 = vrot.lane.b32.xlu1 %v569_v3, %s4013_s21  ;;  %614 = vrot.lane.b32.xlu0 %v572_v4, %s4013_s21 }
 0x202   :  { %v574_v7 = vpop.permute.xlu1 %573  ;;  %v577_v8 = vpop.permute.xlu0 %576 }
 0x203   :  { %v575_v11 = vsel %vm76_vm0, %v574_v7, %v4647_v37  ;;  %v578_v12 = vsel %vm76_vm0, %v577_v8, %v4650_v38 }
 0x204   :  { %616 = vrot.lane.b32.xlu1 %v575_v11, %s4013_s21  ;;  %618 = vrot.lane.b32.xlu0 %v578_v12, %s4013_s21 }
 0x206   :  { %v580_v15 = vpop.permute.xlu1 %579  ;;  %v583_v16 = vpop.permute.xlu0 %582 }
 0x207   :  { %v581_v19 = vsel %vm76_vm0, %v580_v15, %v4663_v39  ;;  %v584_v20 = vsel %vm76_vm0, %v583_v16, %v4666_v40 }
 0x208   :  { %620 = vrot.lane.b32.xlu1 %v581_v19, %s4013_s21  ;;  %622 = vrot.lane.b32.xlu0 %v584_v20, %s4013_s21 }
 0x20a   :  { %v586_v23 = vpop.permute.xlu1 %585  ;;  %v589_v24 = vpop.permute.xlu0 %588 }
 0x20b   :  { %v587_v27 = vsel %vm76_vm0, %v586_v23, %v4679_v41  ;;  %v590_v28 = vsel %vm76_vm0, %v589_v24, %v4682_v42 }
 0x20c   :  { %624 = vrot.lane.b32.xlu1 %v587_v27, %s4013_s21  ;;  %626 = vrot.lane.b32.xlu0 %v590_v28, %s4013_s21 }
 0x20e   :  { %v592_v33 = vpop.permute.xlu1 %591  ;;  %v595_v50 = vpop.permute.xlu0 %594 }
 0x20f   :  { %v593_v52 = vsel %vm76_vm0, %v592_v33, %v4695_v43  ;;  %v596_v53 = vsel %vm76_vm0, %v595_v50, %v4698_v44 }
 0x210   :  { %628 = vrot.lane.b32.xlu1 %v593_v52, %s4013_s21  ;;  %630 = vrot.lane.b32.xlu0 %v596_v53, %s4013_s21 }
 0x212   :  { %v598_v55 = vpop.permute.xlu1 %597  ;;  %v601_v56 = vpop.permute.xlu0 %600 }
 0x213   :  { %v599_v57 = vsel %vm76_vm0, %v598_v55, %v4711_v45  ;;  %v602_v58 = vsel %vm76_vm0, %v601_v56, %v4714_v46 }
 0x214   :  { %632 = vrot.lane.b32.xlu1 %v599_v57, %s4013_s21  ;;  %634 = vrot.lane.b32.xlu0 %v602_v58, %s4013_s21 }
 0x216   :  { %v604_v47 = vpop.permute.xlu1 %603 }
 0x217   :  { %v605_v48 = vsel %vm76_vm0, %v604_v47, %v4724_v60 }
 0x218   :  { %636 = vrot.lane.b32.xlu1 %v605_v48, %s4013_s21 }
 0x24a   :  { %v511_v61 = vpop.permute.xlu0 %510 }
 0x24b   :  { %v542_v62 = vsel %vm76_vm0, %v511_v61, %v4476_v54 }
 0x24c   :  { %v655_v63 = vadd.s32 2, %v542_v62 }
 0x24e   :  { %v513_v0 = vpop.permute.xlu1 %512  ;;  %671 = vrot.lane.b32.xlu0 %v655_v63, %s4016_s14  ;;  %v515_v49 = vpop.permute.xlu0 %514 }
 0x24f   :  { %v543_v1 = vsel %vm76_vm0, %v513_v0, %v4487_v59  ;;  %v544_v2 = vsel %vm76_vm0, %v515_v49, %v4490_v5 }
 0x250   :  { %v656_v3 = vadd.s32 2, %v543_v1  ;;  %v657_v4 = vadd.s32 2, %v544_v2 }
 0x252   :  { %673 = vrot.lane.b32.xlu1 %v656_v3, %s4016_s14  ;;  %v517_v7 = vpop.permute.xlu1 %516  ;;  %675 = vrot.lane.b32.xlu0 %v657_v4, %s4016_s14  ;;  %v519_v8 = vpop.permute.xlu0 %518 }
 0x253   :  { %v545_v11 = vsel %vm76_vm0, %v517_v7, %v4503_v6  ;;  %v546_v12 = vsel %vm76_vm0, %v519_v8, %v4506_v9 }
 0x254   :  { %v658_v15 = vadd.s32 2, %v545_v11  ;;  %v659_v16 = vadd.s32 2, %v546_v12 }
 0x256   :  { %677 = vrot.lane.b32.xlu1 %v658_v15, %s4016_s14  ;;  %v521_v19 = vpop.permute.xlu1 %520  ;;  %679 = vrot.lane.b32.xlu0 %v659_v16, %s4016_s14  ;;  %v523_v20 = vpop.permute.xlu0 %522 }
 0x257   :  { %v547_v23 = vsel %vm76_vm0, %v521_v19, %v4519_v10  ;;  %v548_v24 = vsel %vm76_vm0, %v523_v20, %v4522_v13 }
 0x258   :  { %v660_v27 = vadd.s32 2, %v547_v23  ;;  %v661_v28 = vadd.s32 2, %v548_v24 }
 0x25a   :  { %681 = vrot.lane.b32.xlu1 %v660_v27, %s4016_s14  ;;  %v525_v33 = vpop.permute.xlu1 %524  ;;  %683 = vrot.lane.b32.xlu0 %v661_v28, %s4016_s14  ;;  %v527_v50 = vpop.permute.xlu0 %526 }
 0x25b   :  { %v549_v52 = vsel %vm76_vm0, %v525_v33, %v4535_v14  ;;  %v550_v53 = vsel %vm76_vm0, %v527_v50, %v4538_v17 }
 0x25c   :  { %v662_v55 = vadd.s32 2, %v549_v52  ;;  %v663_v56 = vadd.s32 2, %v550_v53 }
 0x25e   :  { %685 = vrot.lane.b32.xlu1 %v662_v55, %s4016_s14  ;;  %v529_v57 = vpop.permute.xlu1 %528  ;;  %687 = vrot.lane.b32.xlu0 %v663_v56, %s4016_s14  ;;  %v531_v58 = vpop.permute.xlu0 %530 }
 0x25f   :  { %v551_v47 = vsel %vm76_vm0, %v529_v57, %v4551_v18  ;;  %v552_v48 = vsel %vm76_vm0, %v531_v58, %v4554_v21 }
 0x260   :  { %v664_v61 = vadd.s32 2, %v551_v47  ;;  %v665_v62 = vadd.s32 2, %v552_v48 }
 0x262   :  { %689 = vrot.lane.b32.xlu1 %v664_v61, %s4016_s14  ;;  %v533_v63 = vpop.permute.xlu1 %532  ;;  %691 = vrot.lane.b32.xlu0 %v665_v62, %s4016_s14  ;;  %v535_v0 = vpop.permute.xlu0 %534 }
 0x263   :  { %v553_v49 = vsel %vm76_vm0, %v533_v63, %v4567_v22  ;;  %v554_v1 = vsel %vm76_vm0, %v535_v0, %v4570_v25 }
 0x264   :  { %v666_v2 = vadd.s32 2, %v553_v49  ;;  %v667_v3 = vadd.s32 2, %v554_v1 }
 0x266   :  { %693 = vrot.lane.b32.xlu1 %v666_v2, %s4016_s14  ;;  %v537_v4 = vpop.permute.xlu1 %536  ;;  %695 = vrot.lane.b32.xlu0 %v667_v3, %s4016_s14  ;;  %v539_v7 = vpop.permute.xlu0 %538 }
 0x267   :  { %v555_v8 = vsel %vm76_vm0, %v537_v4, %v4583_v26  ;;  %v556_v11 = vsel %vm76_vm0, %v539_v7, %v4586_v29 }
 0x268   :  { %v668_v12 = vadd.s32 2, %v555_v8  ;;  %v669_v15 = vadd.s32 2, %v556_v11 }
 0x26a   :  { %697 = vrot.lane.b32.xlu1 %v668_v12, %s4016_s14  ;;  %v541_v16 = vpop.permute.xlu1 %540  ;;  %699 = vrot.lane.b32.xlu0 %v669_v15, %s4016_s14  ;;  %v607_v19 = vpop.permute.xlu0 %606 }
 0x26b   :  { %v557_v20 = vsel %vm76_vm0, %v541_v16, %v4599_v30  ;;  %v638_v23 = vsel %vm76_vm0, %v607_v19, %v4602_v31 }
 0x26c   :  { %v670_v24 = vadd.s32 2, %v557_v20  ;;  %v751_v27 = vadd.s32 2, %v638_v23 }
 0x26e   :  { %701 = vrot.lane.b32.xlu1 %v670_v24, %s4016_s14  ;;  %v609_v28 = vpop.permute.xlu1 %608  ;;  %767 = vrot.lane.b32.xlu0 %v751_v27, %s4016_s14  ;;  %v611_v33 = vpop.permute.xlu0 %610 }
 0x26f   :  { %v639_v50 = vsel %vm76_vm0, %v609_v28, %v4615_v32  ;;  %v640_v52 = vsel %vm76_vm0, %v611_v33, %v4618_v34 }
 0x270   :  { %v752_v53 = vadd.s32 2, %v639_v50  ;;  %v753_v55 = vadd.s32 2, %v640_v52 }
 0x272   :  { %769 = vrot.lane.b32.xlu1 %v752_v53, %s4016_s14  ;;  %v613_v56 = vpop.permute.xlu1 %612  ;;  %771 = vrot.lane.b32.xlu0 %v753_v55, %s4016_s14  ;;  %v615_v57 = vpop.permute.xlu0 %614 }
 0x273   :  { %v641_v58 = vsel %vm76_vm0, %v613_v56, %v4631_v35  ;;  %v642_v47 = vsel %vm76_vm0, %v615_v57, %v4634_v36 }
 0x274   :  { %v754_v48 = vadd.s32 2, %v641_v58  ;;  %v755_v61 = vadd.s32 2, %v642_v47 }
 0x276   :  { %773 = vrot.lane.b32.xlu1 %v754_v48, %s4016_s14  ;;  %v617_v62 = vpop.permute.xlu1 %616  ;;  %775 = vrot.lane.b32.xlu0 %v755_v61, %s4016_s14  ;;  %v619_v63 = vpop.permute.xlu0 %618 }
 0x277   :  { %v643_v0 = vsel %vm76_vm0, %v617_v62, %v4647_v37  ;;  %v644_v49 = vsel %vm76_vm0, %v619_v63, %v4650_v38 }
 0x278   :  { %v756_v1 = vadd.s32 2, %v643_v0  ;;  %v757_v2 = vadd.s32 2, %v644_v49 }
 0x27a   :  { %777 = vrot.lane.b32.xlu1 %v756_v1, %s4016_s14  ;;  %v621_v3 = vpop.permute.xlu1 %620  ;;  %779 = vrot.lane.b32.xlu0 %v757_v2, %s4016_s14  ;;  %v623_v4 = vpop.permute.xlu0 %622 }
 0x27b   :  { %v645_v7 = vsel %vm76_vm0, %v621_v3, %v4663_v39  ;;  %v646_v8 = vsel %vm76_vm0, %v623_v4, %v4666_v40 }
 0x27c   :  { %v758_v11 = vadd.s32 2, %v645_v7  ;;  %v759_v12 = vadd.s32 2, %v646_v8 }
 0x27e   :  { %781 = vrot.lane.b32.xlu1 %v758_v11, %s4016_s14  ;;  %v625_v15 = vpop.permute.xlu1 %624  ;;  %783 = vrot.lane.b32.xlu0 %v759_v12, %s4016_s14  ;;  %v627_v16 = vpop.permute.xlu0 %626 }
 0x27f   :  { %v647_v19 = vsel %vm76_vm0, %v625_v15, %v4679_v41  ;;  %v648_v20 = vsel %vm76_vm0, %v627_v16, %v4682_v42 }
 0x280   :  { %v760_v23 = vadd.s32 2, %v647_v19  ;;  %v761_v24 = vadd.s32 2, %v648_v20 }
 0x282   :  { %785 = vrot.lane.b32.xlu1 %v760_v23, %s4016_s14  ;;  %v629_v27 = vpop.permute.xlu1 %628  ;;  %787 = vrot.lane.b32.xlu0 %v761_v24, %s4016_s14  ;;  %v631_v28 = vpop.permute.xlu0 %630 }
 0x283   :  { %v649_v33 = vsel %vm76_vm0, %v629_v27, %v4695_v43  ;;  %v650_v50 = vsel %vm76_vm0, %v631_v28, %v4698_v44 }
 0x284   :  { %v762_v52 = vadd.s32 2, %v649_v33  ;;  %v763_v53 = vadd.s32 2, %v650_v50 }
 0x286   :  { %789 = vrot.lane.b32.xlu1 %v762_v52, %s4016_s14  ;;  %v633_v55 = vpop.permute.xlu1 %632  ;;  %791 = vrot.lane.b32.xlu0 %v763_v53, %s4016_s14  ;;  %v635_v56 = vpop.permute.xlu0 %634 }
 0x287   :  { %v651_v57 = vsel %vm76_vm0, %v633_v55, %v4711_v45  ;;  %v652_v58 = vsel %vm76_vm0, %v635_v56, %v4714_v46 }
 0x288   :  { %v764_v47 = vadd.s32 2, %v651_v57  ;;  %v765_v48 = vadd.s32 2, %v652_v58 }
 0x28a   :  { %793 = vrot.lane.b32.xlu1 %v764_v47, %s4016_s14  ;;  %v637_v61 = vpop.permute.xlu1 %636  ;;  %795 = vrot.lane.b32.xlu0 %v765_v48, %s4016_s14 }
 0x28b   :  { %v653_v62 = vsel %vm76_vm0, %v637_v61, %v4724_v60 }
 0x28c   :  { %v766_v63 = vadd.s32 2, %v653_v62 }
 0x28e   :  { %797 = vrot.lane.b32.xlu1 %v766_v63, %s4016_s14 }
 0x2c0   :  { %v672_v0 = vpop.permute.xlu0 %671 }
 0x2c1   :  { %v703_v49 = vsel %vm654_vm1, %v672_v0, 160 }
 0x2c2   :  { %vm719_vm6 = vcmp.lt.s32.totalorder %v4476_v54, %v703_v49 }
 0x2c3   :  { %v4925_v1 = vsel %vm719_vm6, %v4476_v54, %v703_v49 }
 0x2c4   :  { %v674_v2 = vpop.permute.xlu1 %673  ;;  %847 = vrot.lane.b32.xlu0 %v4925_v1, %s4013_s21  ;;  %v676_v3 = vpop.permute.xlu0 %675 }
 0x2c5   :  { %v704_v4 = vsel %vm654_vm1, %v674_v2, 160  ;;  %v705_v7 = vsel %vm654_vm1, %v676_v3, 160 }
 0x2c6   :  { %vm721_vm7 = vcmp.lt.s32.totalorder %v4487_v59, %v704_v4  ;;  %vm723_vm8 = vcmp.lt.s32.totalorder %v4490_v5, %v705_v7 }
 0x2c7   :  { %v4936_v8 = vsel %vm721_vm7, %v4487_v59, %v704_v4  ;;  %v4939_v54 = vsel %vm723_vm8, %v4490_v5, %v705_v7 }
 0x2c8   :  { %850 = vrot.lane.b32.xlu1 %v4936_v8, %s4013_s21  ;;  %v678_v11 = vpop.permute.xlu1 %677  ;;  %853 = vrot.lane.b32.xlu0 %v4939_v54, %s4013_s21  ;;  %v680_v12 = vpop.permute.xlu0 %679 }
 0x2c9   :  { %v706_v15 = vsel %vm654_vm1, %v678_v11, 160  ;;  %v707_v16 = vsel %vm654_vm1, %v680_v12, 160 }
 0x2ca   :  { %vm725_vm9 = vcmp.lt.s32.totalorder %v4503_v6, %v706_v15  ;;  %vm727_vm10 = vcmp.lt.s32.totalorder %v4506_v9, %v707_v16 }
 0x2cb   :  { %v4952_v59 = vsel %vm725_vm9, %v4503_v6, %v706_v15  ;;  %v4955_v5 = vsel %vm727_vm10, %v4506_v9, %v707_v16 }
 0x2cc   :  { %856 = vrot.lane.b32.xlu1 %v4952_v59, %s4013_s21  ;;  %v682_v19 = vpop.permute.xlu1 %681  ;;  %859 = vrot.lane.b32.xlu0 %v4955_v5, %s4013_s21  ;;  %v684_v20 = vpop.permute.xlu0 %683 }
 0x2cd   :  { %v708_v23 = vsel %vm654_vm1, %v682_v19, 160  ;;  %v709_v24 = vsel %vm654_vm1, %v684_v20, 160 }
 0x2ce   :  { %vm729_vm11 = vcmp.lt.s32.totalorder %v4519_v10, %v708_v23  ;;  %vm731_vm12 = vcmp.lt.s32.totalorder %v4522_v13, %v709_v24 }
 0x2cf   :  { %v4968_v6 = vsel %vm729_vm11, %v4519_v10, %v708_v23  ;;  %v4971_v9 = vsel %vm731_vm12, %v4522_v13, %v709_v24 }
 0x2d0   :  { %862 = vrot.lane.b32.xlu1 %v4968_v6, %s4013_s21  ;;  %v686_v27 = vpop.permute.xlu1 %685  ;;  %865 = vrot.lane.b32.xlu0 %v4971_v9, %s4013_s21  ;;  %v688_v28 = vpop.permute.xlu0 %687 }
 0x2d1   :  { %v710_v33 = vsel %vm654_vm1, %v686_v27, 160  ;;  %v711_v50 = vsel %vm654_vm1, %v688_v28, 160 }
 0x2d2   :  { %vm733_vm13 = vcmp.lt.s32.totalorder %v4535_v14, %v710_v33  ;;  %vm735_vm14 = vcmp.lt.s32.totalorder %v4538_v17, %v711_v50 }
 0x2d3   :  { %v4984_v10 = vsel %vm733_vm13, %v4535_v14, %v710_v33  ;;  %v4987_v13 = vsel %vm735_vm14, %v4538_v17, %v711_v50 }
 0x2d4   :  { %868 = vrot.lane.b32.xlu1 %v4984_v10, %s4013_s21  ;;  %v690_v52 = vpop.permute.xlu1 %689  ;;  %871 = vrot.lane.b32.xlu0 %v4987_v13, %s4013_s21  ;;  %v692_v53 = vpop.permute.xlu0 %691 }
 0x2d5   :  { %v712_v55 = vsel %vm654_vm1, %v690_v52, 160  ;;  %v713_v56 = vsel %vm654_vm1, %v692_v53, 160 }
 0x2d6   :  { %vm737_vm15 = vcmp.lt.s32.totalorder %v4551_v18, %v712_v55  ;;  %vm739_vm2 = vcmp.lt.s32.totalorder %v4554_v21, %v713_v56 }
 0x2d7   :  { %v5000_v14 = vsel %vm737_vm15, %v4551_v18, %v712_v55  ;;  %v5003_v17 = vsel %vm739_vm2, %v4554_v21, %v713_v56 }
 0x2d8   :  { %874 = vrot.lane.b32.xlu1 %v5000_v14, %s4013_s21  ;;  %v694_v57 = vpop.permute.xlu1 %693  ;;  %877 = vrot.lane.b32.xlu0 %v5003_v17, %s4013_s21  ;;  %v696_v58 = vpop.permute.xlu0 %695 }
 0x2d9   :  { %v714_v47 = vsel %vm654_vm1, %v694_v57, 160  ;;  %v715_v48 = vsel %vm654_vm1, %v696_v58, 160 }
 0x2da   :  { %vm741_vm3 = vcmp.lt.s32.totalorder %v4567_v22, %v714_v47  ;;  %vm743_vm4 = vcmp.lt.s32.totalorder %v4570_v25, %v715_v48 }
 0x2db   :  { %v5016_v18 = vsel %vm741_vm3, %v4567_v22, %v714_v47  ;;  %v5019_v21 = vsel %vm743_vm4, %v4570_v25, %v715_v48 }
 0x2dc   :  { %880 = vrot.lane.b32.xlu1 %v5016_v18, %s4013_s21  ;;  %v698_v61 = vpop.permute.xlu1 %697  ;;  %883 = vrot.lane.b32.xlu0 %v5019_v21, %s4013_s21  ;;  %v700_v62 = vpop.permute.xlu0 %699 }
 0x2dd   :  { %v716_v63 = vsel %vm654_vm1, %v698_v61, 160  ;;  %v717_v0 = vsel %vm654_vm1, %v700_v62, 160 }
 0x2de   :  { %vm745_vm5 = vcmp.lt.s32.totalorder %v4583_v26, %v716_v63  ;;  %vm747_vm6 = vcmp.lt.s32.totalorder %v4586_v29, %v717_v0 }
 0x2df   :  { %v5032_v22 = vsel %vm745_vm5, %v4583_v26, %v716_v63  ;;  %v5035_v25 = vsel %vm747_vm6, %v4586_v29, %v717_v0 }
 0x2e0   :  { %886 = vrot.lane.b32.xlu1 %v5032_v22, %s4013_s21  ;;  %v702_v49 = vpop.permute.xlu1 %701  ;;  %889 = vrot.lane.b32.xlu0 %v5035_v25, %s4013_s21  ;;  %v768_v2 = vpop.permute.xlu0 %767 }
 0x2e1   :  { %v718_v3 = vsel %vm654_vm1, %v702_v49, 160  ;;  %v799_v4 = vsel %vm654_vm1, %v768_v2, 160 }
 0x2e2   :  { %vm749_vm7 = vcmp.lt.s32.totalorder %v4599_v30, %v718_v3  ;;  %vm815_vm8 = vcmp.lt.s32.totalorder %v4602_v31, %v799_v4 }
 0x2e3   :  { %v5048_v26 = vsel %vm749_vm7, %v4599_v30, %v718_v3  ;;  %v5051_v29 = vsel %vm815_vm8, %v4602_v31, %v799_v4 }
 0x2e4   :  { %892 = vrot.lane.b32.xlu1 %v5048_v26, %s4013_s21  ;;  %v770_v7 = vpop.permute.xlu1 %769  ;;  %943 = vrot.lane.b32.xlu0 %v5051_v29, %s4013_s21  ;;  %v772_v11 = vpop.permute.xlu0 %771 }
 0x2e5   :  { %v800_v12 = vsel %vm654_vm1, %v770_v7, 160  ;;  %v801_v15 = vsel %vm654_vm1, %v772_v11, 160 }
 0x2e6   :  { %vm817_vm9 = vcmp.lt.s32.totalorder %v4615_v32, %v800_v12  ;;  %vm819_vm10 = vcmp.lt.s32.totalorder %v4618_v34, %v801_v15 }
 0x2e7   :  { %v5064_v30 = vsel %vm817_vm9, %v4615_v32, %v800_v12  ;;  %v5067_v31 = vsel %vm819_vm10, %v4618_v34, %v801_v15 }
 0x2e8   :  { %946 = vrot.lane.b32.xlu1 %v5064_v30, %s4013_s21  ;;  %v774_v16 = vpop.permute.xlu1 %773  ;;  %949 = vrot.lane.b32.xlu0 %v5067_v31, %s4013_s21  ;;  %v776_v19 = vpop.permute.xlu0 %775 }
 0x2e9   :  { %v802_v20 = vsel %vm654_vm1, %v774_v16, 160  ;;  %v803_v23 = vsel %vm654_vm1, %v776_v19, 160 }
 0x2ea   :  { %vm821_vm11 = vcmp.lt.s32.totalorder %v4631_v35, %v802_v20  ;;  %vm823_vm12 = vcmp.lt.s32.totalorder %v4634_v36, %v803_v23 }
 0x2eb   :  { %v5080_v32 = vsel %vm821_vm11, %v4631_v35, %v802_v20  ;;  %v5083_v34 = vsel %vm823_vm12, %v4634_v36, %v803_v23 }
 0x2ec   :  { %952 = vrot.lane.b32.xlu1 %v5080_v32, %s4013_s21  ;;  %v778_v24 = vpop.permute.xlu1 %777  ;;  %955 = vrot.lane.b32.xlu0 %v5083_v34, %s4013_s21  ;;  %v780_v27 = vpop.permute.xlu0 %779 }
 0x2ed   :  { %v804_v28 = vsel %vm654_vm1, %v778_v24, 160  ;;  %v805_v33 = vsel %vm654_vm1, %v780_v27, 160 }
 0x2ee   :  { %vm825_vm13 = vcmp.lt.s32.totalorder %v4647_v37, %v804_v28  ;;  %vm827_vm14 = vcmp.lt.s32.totalorder %v4650_v38, %v805_v33 }
 0x2ef   :  { %v5096_v35 = vsel %vm825_vm13, %v4647_v37, %v804_v28  ;;  %v5099_v36 = vsel %vm827_vm14, %v4650_v38, %v805_v33 }
 0x2f0   :  { %958 = vrot.lane.b32.xlu1 %v5096_v35, %s4013_s21  ;;  %v782_v50 = vpop.permute.xlu1 %781  ;;  %961 = vrot.lane.b32.xlu0 %v5099_v36, %s4013_s21  ;;  %v784_v52 = vpop.permute.xlu0 %783 }
 0x2f1   :  { %v806_v53 = vsel %vm654_vm1, %v782_v50, 160  ;;  %v807_v55 = vsel %vm654_vm1, %v784_v52, 160 }
 0x2f2   :  { %vm829_vm15 = vcmp.lt.s32.totalorder %v4663_v39, %v806_v53  ;;  %vm831_vm2 = vcmp.lt.s32.totalorder %v4666_v40, %v807_v55 }
 0x2f3   :  { %v5112_v37 = vsel %vm829_vm15, %v4663_v39, %v806_v53  ;;  %v5115_v38 = vsel %vm831_vm2, %v4666_v40, %v807_v55 }
 0x2f4   :  { %964 = vrot.lane.b32.xlu1 %v5112_v37, %s4013_s21  ;;  %v786_v56 = vpop.permute.xlu1 %785  ;;  %967 = vrot.lane.b32.xlu0 %v5115_v38, %s4013_s21  ;;  %v788_v57 = vpop.permute.xlu0 %787 }
 0x2f5   :  { %v808_v58 = vsel %vm654_vm1, %v786_v56, 160  ;;  %v809_v47 = vsel %vm654_vm1, %v788_v57, 160 }
 0x2f6   :  { %vm833_vm3 = vcmp.lt.s32.totalorder %v4679_v41, %v808_v58  ;;  %vm835_vm4 = vcmp.lt.s32.totalorder %v4682_v42, %v809_v47 }
 0x2f7   :  { %v5128_v39 = vsel %vm833_vm3, %v4679_v41, %v808_v58  ;;  %v5131_v40 = vsel %vm835_vm4, %v4682_v42, %v809_v47 }
 0x2f8   :  { %970 = vrot.lane.b32.xlu1 %v5128_v39, %s4013_s21  ;;  %v790_v48 = vpop.permute.xlu1 %789  ;;  %973 = vrot.lane.b32.xlu0 %v5131_v40, %s4013_s21  ;;  %v792_v61 = vpop.permute.xlu0 %791 }
 0x2f9   :  { %v810_v62 = vsel %vm654_vm1, %v790_v48, 160  ;;  %v811_v63 = vsel %vm654_vm1, %v792_v61, 160 }
 0x2fa   :  { %vm837_vm5 = vcmp.lt.s32.totalorder %v4695_v43, %v810_v62  ;;  %vm839_vm6 = vcmp.lt.s32.totalorder %v4698_v44, %v811_v63 }
 0x2fb   :  { %v5144_v41 = vsel %vm837_vm5, %v4695_v43, %v810_v62  ;;  %v5147_v42 = vsel %vm839_vm6, %v4698_v44, %v811_v63 }
 0x2fc   :  { %976 = vrot.lane.b32.xlu1 %v5144_v41, %s4013_s21  ;;  %v794_v0 = vpop.permute.xlu1 %793  ;;  %979 = vrot.lane.b32.xlu0 %v5147_v42, %s4013_s21  ;;  %v796_v49 = vpop.permute.xlu0 %795 }
 0x2fd   :  { %v812_v2 = vsel %vm654_vm1, %v794_v0, 160  ;;  %v813_v3 = vsel %vm654_vm1, %v796_v49, 160 }
 0x2fe   :  { %vm841_vm7 = vcmp.lt.s32.totalorder %v4711_v45, %v812_v2  ;;  %vm843_vm8 = vcmp.lt.s32.totalorder %v4714_v46, %v813_v3 }
 0x2ff   :  { %v5160_v43 = vsel %vm841_vm7, %v4711_v45, %v812_v2  ;;  %v5163_v44 = vsel %vm843_vm8, %v4714_v46, %v813_v3 }
 0x300   :  { %982 = vrot.lane.b32.xlu1 %v5160_v43, %s4013_s21  ;;  %v798_v4 = vpop.permute.xlu1 %797  ;;  %985 = vrot.lane.b32.xlu0 %v5163_v44, %s4013_s21 }
 0x301   :  { %v814_v7 = vsel %vm654_vm1, %v798_v4, 160  ;;  %vm1039_vm1 = vcmp.ge.s32.totalorder %v4469_v51, 4 }
 0x302   :  { %vm845_vm9 = vcmp.lt.s32.totalorder %v4724_v60, %v814_v7 }
 0x303   :  { %v5173_v11 = vsel %vm845_vm9, %v4724_v60, %v814_v7 }
 0x304   :  { %988 = vrot.lane.b32.xlu1 %v5173_v11, %s4013_s21 }
 0x336   :  { %v848_v45 = vpop.permute.xlu0 %847 }
 0x337   :  { %v849_v46 = vsel %vm76_vm0, %v848_v45, %v4925_v1 }
 0x338   :  { %895 = vrot.lane.b32.xlu0 %v849_v46, %s4013_s21 }
 0x33a   :  { %v851_v12 = vpop.permute.xlu1 %850  ;;  %v854_v15 = vpop.permute.xlu0 %853 }
 0x33b   :  { %v852_v16 = vsel %vm76_vm0, %v851_v12, %v4936_v8  ;;  %v855_v19 = vsel %vm76_vm0, %v854_v15, %v4939_v54 }
 0x33c   :  { %897 = vrot.lane.b32.xlu1 %v852_v16, %s4013_s21  ;;  %899 = vrot.lane.b32.xlu0 %v855_v19, %s4013_s21 }
 0x33e   :  { %v857_v60 = vpop.permute.xlu1 %856  ;;  %v860_v20 = vpop.permute.xlu0 %859 }
 0x33f   :  { %v858_v23 = vsel %vm76_vm0, %v857_v60, %v4952_v59  ;;  %v861_v24 = vsel %vm76_vm0, %v860_v20, %v4955_v5 }
 0x340   :  { %901 = vrot.lane.b32.xlu1 %v858_v23, %s4013_s21  ;;  %903 = vrot.lane.b32.xlu0 %v861_v24, %s4013_s21 }
 0x342   :  { %v863_v27 = vpop.permute.xlu1 %862  ;;  %v866_v28 = vpop.permute.xlu0 %865 }
 0x343   :  { %v864_v33 = vsel %vm76_vm0, %v863_v27, %v4968_v6  ;;  %v867_v50 = vsel %vm76_vm0, %v866_v28, %v4971_v9 }
 0x344   :  { %905 = vrot.lane.b32.xlu1 %v864_v33, %s4013_s21  ;;  %907 = vrot.lane.b32.xlu0 %v867_v50, %s4013_s21 }
 0x346   :  { %v869_v52 = vpop.permute.xlu1 %868  ;;  %v872_v53 = vpop.permute.xlu0 %871 }
 0x347   :  { %v870_v55 = vsel %vm76_vm0, %v869_v52, %v4984_v10  ;;  %v873_v56 = vsel %vm76_vm0, %v872_v53, %v4987_v13 }
 0x348   :  { %909 = vrot.lane.b32.xlu1 %v870_v55, %s4013_s21  ;;  %911 = vrot.lane.b32.xlu0 %v873_v56, %s4013_s21 }
 0x34a   :  { %v875_v57 = vpop.permute.xlu1 %874  ;;  %v878_v58 = vpop.permute.xlu0 %877 }
 0x34b   :  { %v876_v47 = vsel %vm76_vm0, %v875_v57, %v5000_v14  ;;  %v879_v48 = vsel %vm76_vm0, %v878_v58, %v5003_v17 }
 0x34c   :  { %913 = vrot.lane.b32.xlu1 %v876_v47, %s4013_s21  ;;  %915 = vrot.lane.b32.xlu0 %v879_v48, %s4013_s21 }
 0x34e   :  { %v881_v61 = vpop.permute.xlu1 %880  ;;  %v884_v62 = vpop.permute.xlu0 %883 }
 0x34f   :  { %v882_v63 = vsel %vm76_vm0, %v881_v61, %v5016_v18  ;;  %v885_v0 = vsel %vm76_vm0, %v884_v62, %v5019_v21 }
 0x350   :  { %917 = vrot.lane.b32.xlu1 %v882_v63, %s4013_s21  ;;  %919 = vrot.lane.b32.xlu0 %v885_v0, %s4013_s21 }
 0x352   :  { %v887_v49 = vpop.permute.xlu1 %886  ;;  %v890_v2 = vpop.permute.xlu0 %889 }
 0x353   :  { %v888_v3 = vsel %vm76_vm0, %v887_v49, %v5032_v22  ;;  %v891_v4 = vsel %vm76_vm0, %v890_v2, %v5035_v25 }
 0x354   :  { %921 = vrot.lane.b32.xlu1 %v888_v3, %s4013_s21  ;;  %923 = vrot.lane.b32.xlu0 %v891_v4, %s4013_s21 }
 0x356   :  { %v893_v7 = vpop.permute.xlu1 %892  ;;  %v944_v45 = vpop.permute.xlu0 %943 }
 0x357   :  { %v894_v46 = vsel %vm76_vm0, %v893_v7, %v5048_v26  ;;  %v945_v12 = vsel %vm76_vm0, %v944_v45, %v5051_v29 }
 0x358   :  { %925 = vrot.lane.b32.xlu1 %v894_v46, %s4013_s21  ;;  %991 = vrot.lane.b32.xlu0 %v945_v12, %s4013_s21 }
 0x35a   :  { %v947_v15 = vpop.permute.xlu1 %946  ;;  %v950_v16 = vpop.permute.xlu0 %949 }
 0x35b   :  { %v948_v19 = vsel %vm76_vm0, %v947_v15, %v5064_v30  ;;  %v951_v60 = vsel %vm76_vm0, %v950_v16, %v5067_v31 }
 0x35c   :  { %993 = vrot.lane.b32.xlu1 %v948_v19, %s4013_s21  ;;  %995 = vrot.lane.b32.xlu0 %v951_v60, %s4013_s21 }
 0x35e   :  { %v953_v20 = vpop.permute.xlu1 %952  ;;  %v956_v23 = vpop.permute.xlu0 %955 }
 0x35f   :  { %v954_v24 = vsel %vm76_vm0, %v953_v20, %v5080_v32  ;;  %v957_v27 = vsel %vm76_vm0, %v956_v23, %v5083_v34 }
 0x360   :  { %997 = vrot.lane.b32.xlu1 %v954_v24, %s4013_s21  ;;  %999 = vrot.lane.b32.xlu0 %v957_v27, %s4013_s21 }
 0x362   :  { %v959_v28 = vpop.permute.xlu1 %958  ;;  %v962_v33 = vpop.permute.xlu0 %961 }
 0x363   :  { %v960_v50 = vsel %vm76_vm0, %v959_v28, %v5096_v35  ;;  %v963_v52 = vsel %vm76_vm0, %v962_v33, %v5099_v36 }
 0x364   :  { %1001 = vrot.lane.b32.xlu1 %v960_v50, %s4013_s21  ;;  %1003 = vrot.lane.b32.xlu0 %v963_v52, %s4013_s21 }
 0x366   :  { %v965_v53 = vpop.permute.xlu1 %964  ;;  %v968_v55 = vpop.permute.xlu0 %967 }
 0x367   :  { %v966_v56 = vsel %vm76_vm0, %v965_v53, %v5112_v37  ;;  %v969_v57 = vsel %vm76_vm0, %v968_v55, %v5115_v38 }
 0x368   :  { %1005 = vrot.lane.b32.xlu1 %v966_v56, %s4013_s21  ;;  %1007 = vrot.lane.b32.xlu0 %v969_v57, %s4013_s21 }
 0x36a   :  { %v971_v58 = vpop.permute.xlu1 %970  ;;  %v974_v47 = vpop.permute.xlu0 %973 }
 0x36b   :  { %v972_v48 = vsel %vm76_vm0, %v971_v58, %v5128_v39  ;;  %v975_v61 = vsel %vm76_vm0, %v974_v47, %v5131_v40 }
 0x36c   :  { %1009 = vrot.lane.b32.xlu1 %v972_v48, %s4013_s21  ;;  %1011 = vrot.lane.b32.xlu0 %v975_v61, %s4013_s21 }
 0x36e   :  { %v977_v62 = vpop.permute.xlu1 %976  ;;  %v980_v63 = vpop.permute.xlu0 %979 }
 0x36f   :  { %v978_v0 = vsel %vm76_vm0, %v977_v62, %v5144_v41  ;;  %v981_v49 = vsel %vm76_vm0, %v980_v63, %v5147_v42 }
 0x370   :  { %1013 = vrot.lane.b32.xlu1 %v978_v0, %s4013_s21  ;;  %1015 = vrot.lane.b32.xlu0 %v981_v49, %s4013_s21 }
 0x372   :  { %v983_v2 = vpop.permute.xlu1 %982  ;;  %v986_v3 = vpop.permute.xlu0 %985 }
 0x373   :  { %v984_v4 = vsel %vm76_vm0, %v983_v2, %v5160_v43  ;;  %v987_v7 = vsel %vm76_vm0, %v986_v3, %v5163_v44 }
 0x374   :  { %1017 = vrot.lane.b32.xlu1 %v984_v4, %s4013_s21  ;;  %1019 = vrot.lane.b32.xlu0 %v987_v7, %s4013_s21 }
 0x376   :  { %v989_v45 = vpop.permute.xlu1 %988 }
 0x377   :  { %v990_v46 = vsel %vm76_vm0, %v989_v45, %v5173_v11 }
 0x378   :  { %1021 = vrot.lane.b32.xlu1 %v990_v46, %s4013_s21 }
 0x3aa   :  { %v896_v12 = vpop.permute.xlu0 %895 }
 0x3ab   :  { %v927_v15 = vsel %vm76_vm0, %v896_v12, %v4925_v1 }
 0x3ac   :  { %v1040_v16 = vadd.s32 4, %v927_v15 }
 0x3ae   :  { %v898_v19 = vpop.permute.xlu1 %897  ;;  %1056 = vrot.lane.b32.xlu0 %v1040_v16, %s4017_s15  ;;  %v900_v60 = vpop.permute.xlu0 %899 }
 0x3af   :  { %v928_v20 = vsel %vm76_vm0, %v898_v19, %v4936_v8  ;;  %v929_v23 = vsel %vm76_vm0, %v900_v60, %v4939_v54 }
 0x3b0   :  { %v1041_v24 = vadd.s32 4, %v928_v20  ;;  %v1042_v27 = vadd.s32 4, %v929_v23 }
 0x3b2   :  { %1058 = vrot.lane.b32.xlu1 %v1041_v24, %s4017_s15  ;;  %v902_v28 = vpop.permute.xlu1 %901  ;;  %1060 = vrot.lane.b32.xlu0 %v1042_v27, %s4017_s15  ;;  %v904_v33 = vpop.permute.xlu0 %903 }
 0x3b3   :  { %v930_v50 = vsel %vm76_vm0, %v902_v28, %v4952_v59  ;;  %v931_v52 = vsel %vm76_vm0, %v904_v33, %v4955_v5 }
 0x3b4   :  { %v1043_v53 = vadd.s32 4, %v930_v50  ;;  %v1044_v55 = vadd.s32 4, %v931_v52 }
 0x3b6   :  { %1062 = vrot.lane.b32.xlu1 %v1043_v53, %s4017_s15  ;;  %v906_v56 = vpop.permute.xlu1 %905  ;;  %1064 = vrot.lane.b32.xlu0 %v1044_v55, %s4017_s15  ;;  %v908_v57 = vpop.permute.xlu0 %907 }
 0x3b7   :  { %v932_v58 = vsel %vm76_vm0, %v906_v56, %v4968_v6  ;;  %v933_v47 = vsel %vm76_vm0, %v908_v57, %v4971_v9 }
 0x3b8   :  { %v1045_v48 = vadd.s32 4, %v932_v58  ;;  %v1046_v61 = vadd.s32 4, %v933_v47 }
 0x3ba   :  { %1066 = vrot.lane.b32.xlu1 %v1045_v48, %s4017_s15  ;;  %v910_v62 = vpop.permute.xlu1 %909  ;;  %1068 = vrot.lane.b32.xlu0 %v1046_v61, %s4017_s15  ;;  %v912_v63 = vpop.permute.xlu0 %911 }
 0x3bb   :  { %v934_v0 = vsel %vm76_vm0, %v910_v62, %v4984_v10  ;;  %v935_v49 = vsel %vm76_vm0, %v912_v63, %v4987_v13 }
 0x3bc   :  { %v1047_v2 = vadd.s32 4, %v934_v0  ;;  %v1048_v3 = vadd.s32 4, %v935_v49 }
 0x3be   :  { %1070 = vrot.lane.b32.xlu1 %v1047_v2, %s4017_s15  ;;  %v914_v4 = vpop.permute.xlu1 %913  ;;  %1072 = vrot.lane.b32.xlu0 %v1048_v3, %s4017_s15  ;;  %v916_v7 = vpop.permute.xlu0 %915 }
 0x3bf   :  { %v936_v45 = vsel %vm76_vm0, %v914_v4, %v5000_v14  ;;  %v937_v46 = vsel %vm76_vm0, %v916_v7, %v5003_v17 }
 0x3c0   :  { %v1049_v12 = vadd.s32 4, %v936_v45  ;;  %v1050_v15 = vadd.s32 4, %v937_v46 }
 0x3c2   :  { %1074 = vrot.lane.b32.xlu1 %v1049_v12, %s4017_s15  ;;  %v918_v16 = vpop.permute.xlu1 %917  ;;  %1076 = vrot.lane.b32.xlu0 %v1050_v15, %s4017_s15  ;;  %v920_v19 = vpop.permute.xlu0 %919 }
 0x3c3   :  { %v938_v60 = vsel %vm76_vm0, %v918_v16, %v5016_v18  ;;  %v939_v20 = vsel %vm76_vm0, %v920_v19, %v5019_v21 }
 0x3c4   :  { %v1051_v23 = vadd.s32 4, %v938_v60  ;;  %v1052_v24 = vadd.s32 4, %v939_v20 }
 0x3c6   :  { %1078 = vrot.lane.b32.xlu1 %v1051_v23, %s4017_s15  ;;  %v922_v27 = vpop.permute.xlu1 %921  ;;  %1080 = vrot.lane.b32.xlu0 %v1052_v24, %s4017_s15  ;;  %v924_v28 = vpop.permute.xlu0 %923 }
 0x3c7   :  { %v940_v33 = vsel %vm76_vm0, %v922_v27, %v5032_v22  ;;  %v941_v50 = vsel %vm76_vm0, %v924_v28, %v5035_v25 }
 0x3c8   :  { %v1053_v52 = vadd.s32 4, %v940_v33  ;;  %v1054_v53 = vadd.s32 4, %v941_v50 }
 0x3ca   :  { %1082 = vrot.lane.b32.xlu1 %v1053_v52, %s4017_s15  ;;  %v926_v55 = vpop.permute.xlu1 %925  ;;  %1084 = vrot.lane.b32.xlu0 %v1054_v53, %s4017_s15  ;;  %v992_v56 = vpop.permute.xlu0 %991 }
 0x3cb   :  { %v942_v57 = vsel %vm76_vm0, %v926_v55, %v5048_v26  ;;  %v1023_v58 = vsel %vm76_vm0, %v992_v56, %v5051_v29 }
 0x3cc   :  { %v1055_v47 = vadd.s32 4, %v942_v57  ;;  %v1136_v48 = vadd.s32 4, %v1023_v58 }
 0x3ce   :  { %1086 = vrot.lane.b32.xlu1 %v1055_v47, %s4017_s15  ;;  %v994_v61 = vpop.permute.xlu1 %993  ;;  %1152 = vrot.lane.b32.xlu0 %v1136_v48, %s4017_s15  ;;  %v996_v62 = vpop.permute.xlu0 %995 }
 0x3cf   :  { %v1024_v63 = vsel %vm76_vm0, %v994_v61, %v5064_v30  ;;  %v1025_v0 = vsel %vm76_vm0, %v996_v62, %v5067_v31 }
 0x3d0   :  { %v1137_v49 = vadd.s32 4, %v1024_v63  ;;  %v1138_v2 = vadd.s32 4, %v1025_v0 }
 0x3d2   :  { %1154 = vrot.lane.b32.xlu1 %v1137_v49, %s4017_s15  ;;  %v998_v3 = vpop.permute.xlu1 %997  ;;  %1156 = vrot.lane.b32.xlu0 %v1138_v2, %s4017_s15  ;;  %v1000_v4 = vpop.permute.xlu0 %999 }
 0x3d3   :  { %v1026_v7 = vsel %vm76_vm0, %v998_v3, %v5080_v32  ;;  %v1027_v45 = vsel %vm76_vm0, %v1000_v4, %v5083_v34 }
 0x3d4   :  { %v1139_v46 = vadd.s32 4, %v1026_v7  ;;  %v1140_v12 = vadd.s32 4, %v1027_v45 }
 0x3d6   :  { %1158 = vrot.lane.b32.xlu1 %v1139_v46, %s4017_s15  ;;  %v1002_v15 = vpop.permute.xlu1 %1001  ;;  %1160 = vrot.lane.b32.xlu0 %v1140_v12, %s4017_s15  ;;  %v1004_v16 = vpop.permute.xlu0 %1003 }
 0x3d7   :  { %v1028_v19 = vsel %vm76_vm0, %v1002_v15, %v5096_v35  ;;  %v1029_v60 = vsel %vm76_vm0, %v1004_v16, %v5099_v36 }
 0x3d8   :  { %v1141_v20 = vadd.s32 4, %v1028_v19  ;;  %v1142_v23 = vadd.s32 4, %v1029_v60 }
 0x3da   :  { %1162 = vrot.lane.b32.xlu1 %v1141_v20, %s4017_s15  ;;  %v1006_v24 = vpop.permute.xlu1 %1005  ;;  %1164 = vrot.lane.b32.xlu0 %v1142_v23, %s4017_s15  ;;  %v1008_v27 = vpop.permute.xlu0 %1007 }
 0x3db   :  { %v1030_v28 = vsel %vm76_vm0, %v1006_v24, %v5112_v37  ;;  %v1031_v33 = vsel %vm76_vm0, %v1008_v27, %v5115_v38 }
 0x3dc   :  { %v1143_v50 = vadd.s32 4, %v1030_v28  ;;  %v1144_v52 = vadd.s32 4, %v1031_v33 }
 0x3de   :  { %1166 = vrot.lane.b32.xlu1 %v1143_v50, %s4017_s15  ;;  %v1010_v53 = vpop.permute.xlu1 %1009  ;;  %1168 = vrot.lane.b32.xlu0 %v1144_v52, %s4017_s15  ;;  %v1012_v55 = vpop.permute.xlu0 %1011 }
 0x3df   :  { %v1032_v56 = vsel %vm76_vm0, %v1010_v53, %v5128_v39  ;;  %v1033_v57 = vsel %vm76_vm0, %v1012_v55, %v5131_v40 }
 0x3e0   :  { %v1145_v58 = vadd.s32 4, %v1032_v56  ;;  %v1146_v47 = vadd.s32 4, %v1033_v57 }
 0x3e2   :  { %1170 = vrot.lane.b32.xlu1 %v1145_v58, %s4017_s15  ;;  %v1014_v48 = vpop.permute.xlu1 %1013  ;;  %1172 = vrot.lane.b32.xlu0 %v1146_v47, %s4017_s15  ;;  %v1016_v61 = vpop.permute.xlu0 %1015 }
 0x3e3   :  { %v1034_v62 = vsel %vm76_vm0, %v1014_v48, %v5144_v41  ;;  %v1035_v63 = vsel %vm76_vm0, %v1016_v61, %v5147_v42 }
 0x3e4   :  { %v1147_v0 = vadd.s32 4, %v1034_v62  ;;  %v1148_v49 = vadd.s32 4, %v1035_v63 }
 0x3e6   :  { %1174 = vrot.lane.b32.xlu1 %v1147_v0, %s4017_s15  ;;  %v1018_v2 = vpop.permute.xlu1 %1017  ;;  %1176 = vrot.lane.b32.xlu0 %v1148_v49, %s4017_s15  ;;  %v1020_v3 = vpop.permute.xlu0 %1019 }
 0x3e7   :  { %v1036_v4 = vsel %vm76_vm0, %v1018_v2, %v5160_v43  ;;  %v1037_v7 = vsel %vm76_vm0, %v1020_v3, %v5163_v44 }
 0x3e8   :  { %v1149_v45 = vadd.s32 4, %v1036_v4  ;;  %v1150_v46 = vadd.s32 4, %v1037_v7 }
 0x3ea   :  { %1178 = vrot.lane.b32.xlu1 %v1149_v45, %s4017_s15  ;;  %v1022_v12 = vpop.permute.xlu1 %1021  ;;  %1180 = vrot.lane.b32.xlu0 %v1150_v46, %s4017_s15 }
 0x3eb   :  { %v1038_v15 = vsel %vm76_vm0, %v1022_v12, %v5173_v11 }
 0x3ec   :  { %v1151_v16 = vadd.s32 4, %v1038_v15 }
 0x3ee   :  { %1182 = vrot.lane.b32.xlu1 %v1151_v16, %s4017_s15 }
 0x420   :  { %v1057_v19 = vpop.permute.xlu0 %1056 }
 0x421   :  { %v1088_v60 = vsel %vm1039_vm1, %v1057_v19, 160 }
 0x422   :  { %vm1104_vm10 = vcmp.lt.s32.totalorder %v4925_v1, %v1088_v60 }
 0x423   :  { %v5374_v20 = vsel %vm1104_vm10, %v4925_v1, %v1088_v60 }
 0x424   :  { %v1059_v23 = vpop.permute.xlu1 %1058  ;;  %1232 = vrot.lane.b32.xlu0 %v5374_v20, %s4013_s21  ;;  %v1061_v24 = vpop.permute.xlu0 %1060 }
 0x425   :  { %v1089_v27 = vsel %vm1039_vm1, %v1059_v23, 160  ;;  %v1090_v28 = vsel %vm1039_vm1, %v1061_v24, 160 }
 0x426   :  { %vm1106_vm11 = vcmp.lt.s32.totalorder %v4936_v8, %v1089_v27  ;;  %vm1108_vm12 = vcmp.lt.s32.totalorder %v4939_v54, %v1090_v28 }
 0x427   :  { %v5385_v33 = vsel %vm1106_vm11, %v4936_v8, %v1089_v27  ;;  %v5388_v1 = vsel %vm1108_vm12, %v4939_v54, %v1090_v28 }
 0x428   :  { %1235 = vrot.lane.b32.xlu1 %v5385_v33, %s4013_s21  ;;  %v1063_v50 = vpop.permute.xlu1 %1062  ;;  %1238 = vrot.lane.b32.xlu0 %v5388_v1, %s4013_s21  ;;  %v1065_v52 = vpop.permute.xlu0 %1064 }
 0x429   :  { %v1091_v53 = vsel %vm1039_vm1, %v1063_v50, 160  ;;  %v1092_v55 = vsel %vm1039_vm1, %v1065_v52, 160 }
 0x42a   :  { %vm1110_vm13 = vcmp.lt.s32.totalorder %v4952_v59, %v1091_v53  ;;  %vm1112_vm14 = vcmp.lt.s32.totalorder %v4955_v5, %v1092_v55 }
 0x42b   :  { %v5401_v8 = vsel %vm1110_vm13, %v4952_v59, %v1091_v53  ;;  %v5404_v54 = vsel %vm1112_vm14, %v4955_v5, %v1092_v55 }
 0x42c   :  { %1241 = vrot.lane.b32.xlu1 %v5401_v8, %s4013_s21  ;;  %v1067_v56 = vpop.permute.xlu1 %1066  ;;  %1244 = vrot.lane.b32.xlu0 %v5404_v54, %s4013_s21  ;;  %v1069_v57 = vpop.permute.xlu0 %1068 }
 0x42d   :  { %v1093_v58 = vsel %vm1039_vm1, %v1067_v56, 160  ;;  %v1094_v47 = vsel %vm1039_vm1, %v1069_v57, 160 }
 0x42e   :  { %vm1114_vm15 = vcmp.lt.s32.totalorder %v4968_v6, %v1093_v58  ;;  %vm1116_vm2 = vcmp.lt.s32.totalorder %v4971_v9, %v1094_v47 }
 0x42f   :  { %v5417_v59 = vsel %vm1114_vm15, %v4968_v6, %v1093_v58  ;;  %v5420_v5 = vsel %vm1116_vm2, %v4971_v9, %v1094_v47 }
 0x430   :  { %1247 = vrot.lane.b32.xlu1 %v5417_v59, %s4013_s21  ;;  %v1071_v48 = vpop.permute.xlu1 %1070  ;;  %1250 = vrot.lane.b32.xlu0 %v5420_v5, %s4013_s21  ;;  %v1073_v61 = vpop.permute.xlu0 %1072 }
 0x431   :  { %v1095_v62 = vsel %vm1039_vm1, %v1071_v48, 160  ;;  %v1096_v63 = vsel %vm1039_vm1, %v1073_v61, 160 }
 0x432   :  { %vm1118_vm3 = vcmp.lt.s32.totalorder %v4984_v10, %v1095_v62  ;;  %vm1120_vm4 = vcmp.lt.s32.totalorder %v4987_v13, %v1096_v63 }
 0x433   :  { %v5433_v6 = vsel %vm1118_vm3, %v4984_v10, %v1095_v62  ;;  %v5436_v9 = vsel %vm1120_vm4, %v4987_v13, %v1096_v63 }
 0x434   :  { %1253 = vrot.lane.b32.xlu1 %v5433_v6, %s4013_s21  ;;  %v1075_v0 = vpop.permute.xlu1 %1074  ;;  %1256 = vrot.lane.b32.xlu0 %v5436_v9, %s4013_s21  ;;  %v1077_v49 = vpop.permute.xlu0 %1076 }
 0x435   :  { %v1097_v2 = vsel %vm1039_vm1, %v1075_v0, 160  ;;  %v1098_v3 = vsel %vm1039_vm1, %v1077_v49, 160 }
 0x436   :  { %vm1122_vm5 = vcmp.lt.s32.totalorder %v5000_v14, %v1097_v2  ;;  %vm1124_vm6 = vcmp.lt.s32.totalorder %v5003_v17, %v1098_v3 }
 0x437   :  { %v5449_v10 = vsel %vm1122_vm5, %v5000_v14, %v1097_v2  ;;  %v5452_v13 = vsel %vm1124_vm6, %v5003_v17, %v1098_v3 }
 0x438   :  { %1259 = vrot.lane.b32.xlu1 %v5449_v10, %s4013_s21  ;;  %v1079_v4 = vpop.permute.xlu1 %1078  ;;  %1262 = vrot.lane.b32.xlu0 %v5452_v13, %s4013_s21  ;;  %v1081_v7 = vpop.permute.xlu0 %1080 }
 0x439   :  { %v1099_v45 = vsel %vm1039_vm1, %v1079_v4, 160  ;;  %v1100_v46 = vsel %vm1039_vm1, %v1081_v7, 160 }
 0x43a   :  { %vm1126_vm7 = vcmp.lt.s32.totalorder %v5016_v18, %v1099_v45  ;;  %vm1128_vm8 = vcmp.lt.s32.totalorder %v5019_v21, %v1100_v46 }
 0x43b   :  { %v5465_v14 = vsel %vm1126_vm7, %v5016_v18, %v1099_v45  ;;  %v5468_v17 = vsel %vm1128_vm8, %v5019_v21, %v1100_v46 }
 0x43c   :  { %1265 = vrot.lane.b32.xlu1 %v5465_v14, %s4013_s21  ;;  %v1083_v12 = vpop.permute.xlu1 %1082  ;;  %1268 = vrot.lane.b32.xlu0 %v5468_v17, %s4013_s21  ;;  %v1085_v15 = vpop.permute.xlu0 %1084 }
 0x43d   :  { %v1101_v16 = vsel %vm1039_vm1, %v1083_v12, 160  ;;  %v1102_v19 = vsel %vm1039_vm1, %v1085_v15, 160 }
 0x43e   :  { %vm1130_vm9 = vcmp.lt.s32.totalorder %v5032_v22, %v1101_v16  ;;  %vm1132_vm10 = vcmp.lt.s32.totalorder %v5035_v25, %v1102_v19 }
 0x43f   :  { %v5481_v18 = vsel %vm1130_vm9, %v5032_v22, %v1101_v16  ;;  %v5484_v21 = vsel %vm1132_vm10, %v5035_v25, %v1102_v19 }
 0x440   :  { %1271 = vrot.lane.b32.xlu1 %v5481_v18, %s4013_s21  ;;  %v1087_v60 = vpop.permute.xlu1 %1086  ;;  %1274 = vrot.lane.b32.xlu0 %v5484_v21, %s4013_s21  ;;  %v1153_v23 = vpop.permute.xlu0 %1152 }
 0x441   :  { %v1103_v24 = vsel %vm1039_vm1, %v1087_v60, 160  ;;  %v1184_v27 = vsel %vm1039_vm1, %v1153_v23, 160 }
 0x442   :  { %vm1134_vm11 = vcmp.lt.s32.totalorder %v5048_v26, %v1103_v24  ;;  %vm1200_vm12 = vcmp.lt.s32.totalorder %v5051_v29, %v1184_v27 }
 0x443   :  { %v5497_v22 = vsel %vm1134_vm11, %v5048_v26, %v1103_v24  ;;  %v5500_v25 = vsel %vm1200_vm12, %v5051_v29, %v1184_v27 }
 0x444   :  { %1277 = vrot.lane.b32.xlu1 %v5497_v22, %s4013_s21  ;;  %v1155_v28 = vpop.permute.xlu1 %1154  ;;  %1328 = vrot.lane.b32.xlu0 %v5500_v25, %s4013_s21  ;;  %v1157_v50 = vpop.permute.xlu0 %1156 }
 0x445   :  { %v1185_v52 = vsel %vm1039_vm1, %v1155_v28, 160  ;;  %v1186_v53 = vsel %vm1039_vm1, %v1157_v50, 160 }
 0x446   :  { %vm1202_vm13 = vcmp.lt.s32.totalorder %v5064_v30, %v1185_v52  ;;  %vm1204_vm14 = vcmp.lt.s32.totalorder %v5067_v31, %v1186_v53 }
 0x447   :  { %v5513_v26 = vsel %vm1202_vm13, %v5064_v30, %v1185_v52  ;;  %v5516_v29 = vsel %vm1204_vm14, %v5067_v31, %v1186_v53 }
 0x448   :  { %1331 = vrot.lane.b32.xlu1 %v5513_v26, %s4013_s21  ;;  %v1159_v55 = vpop.permute.xlu1 %1158  ;;  %1334 = vrot.lane.b32.xlu0 %v5516_v29, %s4013_s21  ;;  %v1161_v56 = vpop.permute.xlu0 %1160 }
 0x449   :  { %v1187_v57 = vsel %vm1039_vm1, %v1159_v55, 160  ;;  %v1188_v58 = vsel %vm1039_vm1, %v1161_v56, 160 }
 0x44a   :  { %vm1206_vm15 = vcmp.lt.s32.totalorder %v5080_v32, %v1187_v57  ;;  %vm1208_vm2 = vcmp.lt.s32.totalorder %v5083_v34, %v1188_v58 }
 0x44b   :  { %v5529_v30 = vsel %vm1206_vm15, %v5080_v32, %v1187_v57  ;;  %v5532_v31 = vsel %vm1208_vm2, %v5083_v34, %v1188_v58 }
 0x44c   :  { %1337 = vrot.lane.b32.xlu1 %v5529_v30, %s4013_s21  ;;  %v1163_v47 = vpop.permute.xlu1 %1162  ;;  %1340 = vrot.lane.b32.xlu0 %v5532_v31, %s4013_s21  ;;  %v1165_v48 = vpop.permute.xlu0 %1164 }
 0x44d   :  { %v1189_v61 = vsel %vm1039_vm1, %v1163_v47, 160  ;;  %v1190_v62 = vsel %vm1039_vm1, %v1165_v48, 160 }
 0x44e   :  { %vm1210_vm3 = vcmp.lt.s32.totalorder %v5096_v35, %v1189_v61  ;;  %vm1212_vm4 = vcmp.lt.s32.totalorder %v5099_v36, %v1190_v62 }
 0x44f   :  { %v5545_v32 = vsel %vm1210_vm3, %v5096_v35, %v1189_v61  ;;  %v5548_v34 = vsel %vm1212_vm4, %v5099_v36, %v1190_v62 }
 0x450   :  { %1343 = vrot.lane.b32.xlu1 %v5545_v32, %s4013_s21  ;;  %v1167_v63 = vpop.permute.xlu1 %1166  ;;  %1346 = vrot.lane.b32.xlu0 %v5548_v34, %s4013_s21  ;;  %v1169_v0 = vpop.permute.xlu0 %1168 }
 0x451   :  { %v1191_v49 = vsel %vm1039_vm1, %v1167_v63, 160  ;;  %v1192_v2 = vsel %vm1039_vm1, %v1169_v0, 160 }
 0x452   :  { %vm1214_vm5 = vcmp.lt.s32.totalorder %v5112_v37, %v1191_v49  ;;  %vm1216_vm6 = vcmp.lt.s32.totalorder %v5115_v38, %v1192_v2 }
 0x453   :  { %v5561_v35 = vsel %vm1214_vm5, %v5112_v37, %v1191_v49  ;;  %v5564_v36 = vsel %vm1216_vm6, %v5115_v38, %v1192_v2 }
 0x454   :  { %1349 = vrot.lane.b32.xlu1 %v5561_v35, %s4013_s21  ;;  %v1171_v3 = vpop.permute.xlu1 %1170  ;;  %1352 = vrot.lane.b32.xlu0 %v5564_v36, %s4013_s21  ;;  %v1173_v4 = vpop.permute.xlu0 %1172 }
 0x455   :  { %v1193_v7 = vsel %vm1039_vm1, %v1171_v3, 160  ;;  %v1194_v45 = vsel %vm1039_vm1, %v1173_v4, 160 }
 0x456   :  { %vm1218_vm7 = vcmp.lt.s32.totalorder %v5128_v39, %v1193_v7  ;;  %vm1220_vm8 = vcmp.lt.s32.totalorder %v5131_v40, %v1194_v45 }
 0x457   :  { %v5577_v37 = vsel %vm1218_vm7, %v5128_v39, %v1193_v7  ;;  %v5580_v38 = vsel %vm1220_vm8, %v5131_v40, %v1194_v45 }
 0x458   :  { %1355 = vrot.lane.b32.xlu1 %v5577_v37, %s4013_s21  ;;  %v1175_v46 = vpop.permute.xlu1 %1174  ;;  %1358 = vrot.lane.b32.xlu0 %v5580_v38, %s4013_s21  ;;  %v1177_v12 = vpop.permute.xlu0 %1176 }
 0x459   :  { %v1195_v15 = vsel %vm1039_vm1, %v1175_v46, 160  ;;  %v1196_v16 = vsel %vm1039_vm1, %v1177_v12, 160 }
 0x45a   :  { %vm1222_vm9 = vcmp.lt.s32.totalorder %v5144_v41, %v1195_v15  ;;  %vm1224_vm10 = vcmp.lt.s32.totalorder %v5147_v42, %v1196_v16 }
 0x45b   :  { %v5593_v39 = vsel %vm1222_vm9, %v5144_v41, %v1195_v15  ;;  %v5596_v40 = vsel %vm1224_vm10, %v5147_v42, %v1196_v16 }
 0x45c   :  { %1361 = vrot.lane.b32.xlu1 %v5593_v39, %s4013_s21  ;;  %v1179_v19 = vpop.permute.xlu1 %1178  ;;  %1364 = vrot.lane.b32.xlu0 %v5596_v40, %s4013_s21  ;;  %v1181_v60 = vpop.permute.xlu0 %1180 }
 0x45d   :  { %v1197_v23 = vsel %vm1039_vm1, %v1179_v19, 160  ;;  %v1198_v24 = vsel %vm1039_vm1, %v1181_v60, 160 }
 0x45e   :  { %vm1226_vm11 = vcmp.lt.s32.totalorder %v5160_v43, %v1197_v23  ;;  %vm1228_vm12 = vcmp.lt.s32.totalorder %v5163_v44, %v1198_v24 }
 0x45f   :  { %v5609_v41 = vsel %vm1226_vm11, %v5160_v43, %v1197_v23  ;;  %v5612_v42 = vsel %vm1228_vm12, %v5163_v44, %v1198_v24 }
 0x460   :  { %1367 = vrot.lane.b32.xlu1 %v5609_v41, %s4013_s21  ;;  %v1183_v27 = vpop.permute.xlu1 %1182  ;;  %1370 = vrot.lane.b32.xlu0 %v5612_v42, %s4013_s21 }
 0x461   :  { %v1199_v28 = vsel %vm1039_vm1, %v1183_v27, 160  ;;  %vm1424_vm1 = vcmp.ge.s32.totalorder %v4469_v51, 8 }
 0x462   :  { %vm1230_vm13 = vcmp.lt.s32.totalorder %v5173_v11, %v1199_v28 }
 0x463   :  { %v5622_v50 = vsel %vm1230_vm13, %v5173_v11, %v1199_v28 }
 0x464   :  { %1373 = vrot.lane.b32.xlu1 %v5622_v50, %s4013_s21 }
 0x496   :  { %v1233_v43 = vpop.permute.xlu0 %1232 }
 0x497   :  { %v1234_v44 = vsel %vm76_vm0, %v1233_v43, %v5374_v20 }
 0x498   :  { %1280 = vrot.lane.b32.xlu0 %v1234_v44, %s4013_s21 }
 0x49a   :  { %v1236_v52 = vpop.permute.xlu1 %1235  ;;  %v1239_v53 = vpop.permute.xlu0 %1238 }
 0x49b   :  { %v1237_v55 = vsel %vm76_vm0, %v1236_v52, %v5385_v33  ;;  %v1240_v56 = vsel %vm76_vm0, %v1239_v53, %v5388_v1 }
 0x49c   :  { %1282 = vrot.lane.b32.xlu1 %v1237_v55, %s4013_s21  ;;  %1284 = vrot.lane.b32.xlu0 %v1240_v56, %s4013_s21 }
 0x49e   :  { %v1242_v11 = vpop.permute.xlu1 %1241  ;;  %v1245_v57 = vpop.permute.xlu0 %1244 }
 0x49f   :  { %v1243_v58 = vsel %vm76_vm0, %v1242_v11, %v5401_v8  ;;  %v1246_v47 = vsel %vm76_vm0, %v1245_v57, %v5404_v54 }
 0x4a0   :  { %1286 = vrot.lane.b32.xlu1 %v1243_v58, %s4013_s21  ;;  %1288 = vrot.lane.b32.xlu0 %v1246_v47, %s4013_s21 }
 0x4a2   :  { %v1248_v48 = vpop.permute.xlu1 %1247  ;;  %v1251_v61 = vpop.permute.xlu0 %1250 }
 0x4a3   :  { %v1249_v62 = vsel %vm76_vm0, %v1248_v48, %v5417_v59  ;;  %v1252_v63 = vsel %vm76_vm0, %v1251_v61, %v5420_v5 }
 0x4a4   :  { %1290 = vrot.lane.b32.xlu1 %v1249_v62, %s4013_s21  ;;  %1292 = vrot.lane.b32.xlu0 %v1252_v63, %s4013_s21 }
 0x4a6   :  { %v1254_v0 = vpop.permute.xlu1 %1253  ;;  %v1257_v49 = vpop.permute.xlu0 %1256 }
 0x4a7   :  { %v1255_v2 = vsel %vm76_vm0, %v1254_v0, %v5433_v6  ;;  %v1258_v3 = vsel %vm76_vm0, %v1257_v49, %v5436_v9 }
 0x4a8   :  { %1294 = vrot.lane.b32.xlu1 %v1255_v2, %s4013_s21  ;;  %1296 = vrot.lane.b32.xlu0 %v1258_v3, %s4013_s21 }
 0x4aa   :  { %v1260_v4 = vpop.permute.xlu1 %1259  ;;  %v1263_v7 = vpop.permute.xlu0 %1262 }
 0x4ab   :  { %v1261_v45 = vsel %vm76_vm0, %v1260_v4, %v5449_v10  ;;  %v1264_v46 = vsel %vm76_vm0, %v1263_v7, %v5452_v13 }
 0x4ac   :  { %1298 = vrot.lane.b32.xlu1 %v1261_v45, %s4013_s21  ;;  %1300 = vrot.lane.b32.xlu0 %v1264_v46, %s4013_s21 }
 0x4ae   :  { %v1266_v12 = vpop.permute.xlu1 %1265  ;;  %v1269_v15 = vpop.permute.xlu0 %1268 }
 0x4af   :  { %v1267_v16 = vsel %vm76_vm0, %v1266_v12, %v5465_v14  ;;  %v1270_v19 = vsel %vm76_vm0, %v1269_v15, %v5468_v17 }
 0x4b0   :  { %1302 = vrot.lane.b32.xlu1 %v1267_v16, %s4013_s21  ;;  %1304 = vrot.lane.b32.xlu0 %v1270_v19, %s4013_s21 }
 0x4b2   :  { %v1272_v60 = vpop.permute.xlu1 %1271  ;;  %v1275_v23 = vpop.permute.xlu0 %1274 }
 0x4b3   :  { %v1273_v24 = vsel %vm76_vm0, %v1272_v60, %v5481_v18  ;;  %v1276_v27 = vsel %vm76_vm0, %v1275_v23, %v5484_v21 }
 0x4b4   :  { %1306 = vrot.lane.b32.xlu1 %v1273_v24, %s4013_s21  ;;  %1308 = vrot.lane.b32.xlu0 %v1276_v27, %s4013_s21 }
 0x4b6   :  { %v1278_v28 = vpop.permute.xlu1 %1277  ;;  %v1329_v43 = vpop.permute.xlu0 %1328 }
 0x4b7   :  { %v1279_v44 = vsel %vm76_vm0, %v1278_v28, %v5497_v22  ;;  %v1330_v52 = vsel %vm76_vm0, %v1329_v43, %v5500_v25 }
 0x4b8   :  { %1310 = vrot.lane.b32.xlu1 %v1279_v44, %s4013_s21  ;;  %1376 = vrot.lane.b32.xlu0 %v1330_v52, %s4013_s21 }
 0x4ba   :  { %v1332_v53 = vpop.permute.xlu1 %1331  ;;  %v1335_v55 = vpop.permute.xlu0 %1334 }
 0x4bb   :  { %v1333_v56 = vsel %vm76_vm0, %v1332_v53, %v5513_v26  ;;  %v1336_v11 = vsel %vm76_vm0, %v1335_v55, %v5516_v29 }
 0x4bc   :  { %1378 = vrot.lane.b32.xlu1 %v1333_v56, %s4013_s21  ;;  %1380 = vrot.lane.b32.xlu0 %v1336_v11, %s4013_s21 }
 0x4be   :  { %v1338_v57 = vpop.permute.xlu1 %1337  ;;  %v1341_v58 = vpop.permute.xlu0 %1340 }
 0x4bf   :  { %v1339_v47 = vsel %vm76_vm0, %v1338_v57, %v5529_v30  ;;  %v1342_v48 = vsel %vm76_vm0, %v1341_v58, %v5532_v31 }
 0x4c0   :  { %1382 = vrot.lane.b32.xlu1 %v1339_v47, %s4013_s21  ;;  %1384 = vrot.lane.b32.xlu0 %v1342_v48, %s4013_s21 }
 0x4c2   :  { %v1344_v61 = vpop.permute.xlu1 %1343  ;;  %v1347_v62 = vpop.permute.xlu0 %1346 }
 0x4c3   :  { %v1345_v63 = vsel %vm76_vm0, %v1344_v61, %v5545_v32  ;;  %v1348_v0 = vsel %vm76_vm0, %v1347_v62, %v5548_v34 }
 0x4c4   :  { %1386 = vrot.lane.b32.xlu1 %v1345_v63, %s4013_s21  ;;  %1388 = vrot.lane.b32.xlu0 %v1348_v0, %s4013_s21 }
 0x4c6   :  { %v1350_v49 = vpop.permute.xlu1 %1349  ;;  %v1353_v2 = vpop.permute.xlu0 %1352 }
 0x4c7   :  { %v1351_v3 = vsel %vm76_vm0, %v1350_v49, %v5561_v35  ;;  %v1354_v4 = vsel %vm76_vm0, %v1353_v2, %v5564_v36 }
 0x4c8   :  { %1390 = vrot.lane.b32.xlu1 %v1351_v3, %s4013_s21  ;;  %1392 = vrot.lane.b32.xlu0 %v1354_v4, %s4013_s21 }
 0x4ca   :  { %v1356_v7 = vpop.permute.xlu1 %1355  ;;  %v1359_v45 = vpop.permute.xlu0 %1358 }
 0x4cb   :  { %v1357_v46 = vsel %vm76_vm0, %v1356_v7, %v5577_v37  ;;  %v1360_v12 = vsel %vm76_vm0, %v1359_v45, %v5580_v38 }
 0x4cc   :  { %1394 = vrot.lane.b32.xlu1 %v1357_v46, %s4013_s21  ;;  %1396 = vrot.lane.b32.xlu0 %v1360_v12, %s4013_s21 }
 0x4ce   :  { %v1362_v15 = vpop.permute.xlu1 %1361  ;;  %v1365_v16 = vpop.permute.xlu0 %1364 }
 0x4cf   :  { %v1363_v19 = vsel %vm76_vm0, %v1362_v15, %v5593_v39  ;;  %v1366_v60 = vsel %vm76_vm0, %v1365_v16, %v5596_v40 }
 0x4d0   :  { %1398 = vrot.lane.b32.xlu1 %v1363_v19, %s4013_s21  ;;  %1400 = vrot.lane.b32.xlu0 %v1366_v60, %s4013_s21 }
 0x4d2   :  { %v1368_v23 = vpop.permute.xlu1 %1367  ;;  %v1371_v24 = vpop.permute.xlu0 %1370 }
 0x4d3   :  { %v1369_v27 = vsel %vm76_vm0, %v1368_v23, %v5609_v41  ;;  %v1372_v28 = vsel %vm76_vm0, %v1371_v24, %v5612_v42 }
 0x4d4   :  { %1402 = vrot.lane.b32.xlu1 %v1369_v27, %s4013_s21  ;;  %1404 = vrot.lane.b32.xlu0 %v1372_v28, %s4013_s21 }
 0x4d6   :  { %v1374_v43 = vpop.permute.xlu1 %1373 }
 0x4d7   :  { %v1375_v44 = vsel %vm76_vm0, %v1374_v43, %v5622_v50 }
 0x4d8   :  { %1406 = vrot.lane.b32.xlu1 %v1375_v44, %s4013_s21 }
 0x50a   :  { %v1281_v52 = vpop.permute.xlu0 %1280 }
 0x50b   :  { %v1312_v53 = vsel %vm76_vm0, %v1281_v52, %v5374_v20 }
 0x50c   :  { %v1425_v55 = vadd.s32 8, %v1312_v53 }
 0x50e   :  { %v1283_v56 = vpop.permute.xlu1 %1282  ;;  %1441 = vrot.lane.b32.xlu0 %v1425_v55, %s4018_s16  ;;  %v1285_v11 = vpop.permute.xlu0 %1284 }
 0x50f   :  { %v1313_v57 = vsel %vm76_vm0, %v1283_v56, %v5385_v33  ;;  %v1314_v58 = vsel %vm76_vm0, %v1285_v11, %v5388_v1 }
 0x510   :  { %v1426_v47 = vadd.s32 8, %v1313_v57  ;;  %v1427_v48 = vadd.s32 8, %v1314_v58 }
 0x512   :  { %1443 = vrot.lane.b32.xlu1 %v1426_v47, %s4018_s16  ;;  %v1287_v61 = vpop.permute.xlu1 %1286  ;;  %1445 = vrot.lane.b32.xlu0 %v1427_v48, %s4018_s16  ;;  %v1289_v62 = vpop.permute.xlu0 %1288 }
 0x513   :  { %v1315_v63 = vsel %vm76_vm0, %v1287_v61, %v5401_v8  ;;  %v1316_v0 = vsel %vm76_vm0, %v1289_v62, %v5404_v54 }
 0x514   :  { %v1428_v49 = vadd.s32 8, %v1315_v63  ;;  %v1429_v2 = vadd.s32 8, %v1316_v0 }
 0x516   :  { %1447 = vrot.lane.b32.xlu1 %v1428_v49, %s4018_s16  ;;  %v1291_v3 = vpop.permute.xlu1 %1290  ;;  %1449 = vrot.lane.b32.xlu0 %v1429_v2, %s4018_s16  ;;  %v1293_v4 = vpop.permute.xlu0 %1292 }
 0x517   :  { %v1317_v7 = vsel %vm76_vm0, %v1291_v3, %v5417_v59  ;;  %v1318_v45 = vsel %vm76_vm0, %v1293_v4, %v5420_v5 }
 0x518   :  { %v1430_v46 = vadd.s32 8, %v1317_v7  ;;  %v1431_v12 = vadd.s32 8, %v1318_v45 }
 0x51a   :  { %1451 = vrot.lane.b32.xlu1 %v1430_v46, %s4018_s16  ;;  %v1295_v15 = vpop.permute.xlu1 %1294  ;;  %1453 = vrot.lane.b32.xlu0 %v1431_v12, %s4018_s16  ;;  %v1297_v16 = vpop.permute.xlu0 %1296 }
 0x51b   :  { %v1319_v19 = vsel %vm76_vm0, %v1295_v15, %v5433_v6  ;;  %v1320_v60 = vsel %vm76_vm0, %v1297_v16, %v5436_v9 }
 0x51c   :  { %v1432_v23 = vadd.s32 8, %v1319_v19  ;;  %v1433_v24 = vadd.s32 8, %v1320_v60 }
 0x51e   :  { %1455 = vrot.lane.b32.xlu1 %v1432_v23, %s4018_s16  ;;  %v1299_v27 = vpop.permute.xlu1 %1298  ;;  %1457 = vrot.lane.b32.xlu0 %v1433_v24, %s4018_s16  ;;  %v1301_v28 = vpop.permute.xlu0 %1300 }
 0x51f   :  { %v1321_v43 = vsel %vm76_vm0, %v1299_v27, %v5449_v10  ;;  %v1322_v44 = vsel %vm76_vm0, %v1301_v28, %v5452_v13 }
 0x520   :  { %v1434_v52 = vadd.s32 8, %v1321_v43  ;;  %v1435_v53 = vadd.s32 8, %v1322_v44 }
 0x522   :  { %1459 = vrot.lane.b32.xlu1 %v1434_v52, %s4018_s16  ;;  %v1303_v55 = vpop.permute.xlu1 %1302  ;;  %1461 = vrot.lane.b32.xlu0 %v1435_v53, %s4018_s16  ;;  %v1305_v56 = vpop.permute.xlu0 %1304 }
 0x523   :  { %v1323_v11 = vsel %vm76_vm0, %v1303_v55, %v5465_v14  ;;  %v1324_v57 = vsel %vm76_vm0, %v1305_v56, %v5468_v17 }
 0x524   :  { %v1436_v58 = vadd.s32 8, %v1323_v11  ;;  %v1437_v47 = vadd.s32 8, %v1324_v57 }
 0x526   :  { %1463 = vrot.lane.b32.xlu1 %v1436_v58, %s4018_s16  ;;  %v1307_v48 = vpop.permute.xlu1 %1306  ;;  %1465 = vrot.lane.b32.xlu0 %v1437_v47, %s4018_s16  ;;  %v1309_v61 = vpop.permute.xlu0 %1308 }
 0x527   :  { %v1325_v62 = vsel %vm76_vm0, %v1307_v48, %v5481_v18  ;;  %v1326_v63 = vsel %vm76_vm0, %v1309_v61, %v5484_v21 }
 0x528   :  { %v1438_v0 = vadd.s32 8, %v1325_v62  ;;  %v1439_v49 = vadd.s32 8, %v1326_v63 }
 0x52a   :  { %1467 = vrot.lane.b32.xlu1 %v1438_v0, %s4018_s16  ;;  %v1311_v2 = vpop.permute.xlu1 %1310  ;;  %1469 = vrot.lane.b32.xlu0 %v1439_v49, %s4018_s16  ;;  %v1377_v3 = vpop.permute.xlu0 %1376 }
 0x52b   :  { %v1327_v4 = vsel %vm76_vm0, %v1311_v2, %v5497_v22  ;;  %v1408_v7 = vsel %vm76_vm0, %v1377_v3, %v5500_v25 }
 0x52c   :  { %v1440_v45 = vadd.s32 8, %v1327_v4  ;;  %v1521_v46 = vadd.s32 8, %v1408_v7 }
 0x52e   :  { %1471 = vrot.lane.b32.xlu1 %v1440_v45, %s4018_s16  ;;  %v1379_v12 = vpop.permute.xlu1 %1378  ;;  %1537 = vrot.lane.b32.xlu0 %v1521_v46, %s4018_s16  ;;  %v1381_v15 = vpop.permute.xlu0 %1380 }
 0x52f   :  { %v1409_v16 = vsel %vm76_vm0, %v1379_v12, %v5513_v26  ;;  %v1410_v19 = vsel %vm76_vm0, %v1381_v15, %v5516_v29 }
 0x530   :  { %v1522_v60 = vadd.s32 8, %v1409_v16  ;;  %v1523_v23 = vadd.s32 8, %v1410_v19 }
 0x532   :  { %1539 = vrot.lane.b32.xlu1 %v1522_v60, %s4018_s16  ;;  %v1383_v24 = vpop.permute.xlu1 %1382  ;;  %1541 = vrot.lane.b32.xlu0 %v1523_v23, %s4018_s16  ;;  %v1385_v27 = vpop.permute.xlu0 %1384 }
 0x533   :  { %v1411_v28 = vsel %vm76_vm0, %v1383_v24, %v5529_v30  ;;  %v1412_v43 = vsel %vm76_vm0, %v1385_v27, %v5532_v31 }
 0x534   :  { %v1524_v44 = vadd.s32 8, %v1411_v28  ;;  %v1525_v52 = vadd.s32 8, %v1412_v43 }
 0x536   :  { %1543 = vrot.lane.b32.xlu1 %v1524_v44, %s4018_s16  ;;  %v1387_v53 = vpop.permute.xlu1 %1386  ;;  %1545 = vrot.lane.b32.xlu0 %v1525_v52, %s4018_s16  ;;  %v1389_v55 = vpop.permute.xlu0 %1388 }
 0x537   :  { %v1413_v56 = vsel %vm76_vm0, %v1387_v53, %v5545_v32  ;;  %v1414_v11 = vsel %vm76_vm0, %v1389_v55, %v5548_v34 }
 0x538   :  { %v1526_v57 = vadd.s32 8, %v1413_v56  ;;  %v1527_v58 = vadd.s32 8, %v1414_v11 }
 0x53a   :  { %1547 = vrot.lane.b32.xlu1 %v1526_v57, %s4018_s16  ;;  %v1391_v47 = vpop.permute.xlu1 %1390  ;;  %1549 = vrot.lane.b32.xlu0 %v1527_v58, %s4018_s16  ;;  %v1393_v48 = vpop.permute.xlu0 %1392 }
 0x53b   :  { %v1415_v61 = vsel %vm76_vm0, %v1391_v47, %v5561_v35  ;;  %v1416_v62 = vsel %vm76_vm0, %v1393_v48, %v5564_v36 }
 0x53c   :  { %v1528_v63 = vadd.s32 8, %v1415_v61  ;;  %v1529_v0 = vadd.s32 8, %v1416_v62 }
 0x53e   :  { %1551 = vrot.lane.b32.xlu1 %v1528_v63, %s4018_s16  ;;  %v1395_v49 = vpop.permute.xlu1 %1394  ;;  %1553 = vrot.lane.b32.xlu0 %v1529_v0, %s4018_s16  ;;  %v1397_v2 = vpop.permute.xlu0 %1396 }
 0x53f   :  { %v1417_v3 = vsel %vm76_vm0, %v1395_v49, %v5577_v37  ;;  %v1418_v4 = vsel %vm76_vm0, %v1397_v2, %v5580_v38 }
 0x540   :  { %v1530_v7 = vadd.s32 8, %v1417_v3  ;;  %v1531_v45 = vadd.s32 8, %v1418_v4 }
 0x542   :  { %1555 = vrot.lane.b32.xlu1 %v1530_v7, %s4018_s16  ;;  %v1399_v46 = vpop.permute.xlu1 %1398  ;;  %1557 = vrot.lane.b32.xlu0 %v1531_v45, %s4018_s16  ;;  %v1401_v12 = vpop.permute.xlu0 %1400 }
 0x543   :  { %v1419_v15 = vsel %vm76_vm0, %v1399_v46, %v5593_v39  ;;  %v1420_v16 = vsel %vm76_vm0, %v1401_v12, %v5596_v40 }
 0x544   :  { %v1532_v19 = vadd.s32 8, %v1419_v15  ;;  %v1533_v60 = vadd.s32 8, %v1420_v16 }
 0x546   :  { %1559 = vrot.lane.b32.xlu1 %v1532_v19, %s4018_s16  ;;  %v1403_v23 = vpop.permute.xlu1 %1402  ;;  %1561 = vrot.lane.b32.xlu0 %v1533_v60, %s4018_s16  ;;  %v1405_v24 = vpop.permute.xlu0 %1404 }
 0x547   :  { %v1421_v27 = vsel %vm76_vm0, %v1403_v23, %v5609_v41  ;;  %v1422_v28 = vsel %vm76_vm0, %v1405_v24, %v5612_v42 }
 0x548   :  { %v1534_v43 = vadd.s32 8, %v1421_v27  ;;  %v1535_v44 = vadd.s32 8, %v1422_v28 }
 0x54a   :  { %1563 = vrot.lane.b32.xlu1 %v1534_v43, %s4018_s16  ;;  %v1407_v52 = vpop.permute.xlu1 %1406  ;;  %1565 = vrot.lane.b32.xlu0 %v1535_v44, %s4018_s16 }
 0x54b   :  { %v1423_v53 = vsel %vm76_vm0, %v1407_v52, %v5622_v50 }
 0x54c   :  { %v1536_v55 = vadd.s32 8, %v1423_v53 }
 0x54e   :  { %1567 = vrot.lane.b32.xlu1 %v1536_v55, %s4018_s16 }
 0x580   :  { %v1442_v56 = vpop.permute.xlu0 %1441 }
 0x581   :  { %v1473_v11 = vsel %vm1424_vm1, %v1442_v56, 160 }
 0x582   :  { %vm1489_vm14 = vcmp.lt.s32.totalorder %v5374_v20, %v1473_v11 }
 0x583   :  { %v5823_v57 = vsel %vm1489_vm14, %v5374_v20, %v1473_v11 }
 0x584   :  { %v1444_v58 = vpop.permute.xlu1 %1443  ;;  %1617 = vrot.lane.b32.xlu0 %v5823_v57, %s4013_s21  ;;  %v1446_v47 = vpop.permute.xlu0 %1445 }
 0x585   :  { %v1474_v48 = vsel %vm1424_vm1, %v1444_v58, 160  ;;  %v1475_v61 = vsel %vm1424_vm1, %v1446_v47, 160 }
 0x586   :  { %vm1491_vm15 = vcmp.lt.s32.totalorder %v5385_v33, %v1474_v48  ;;  %vm1493_vm2 = vcmp.lt.s32.totalorder %v5388_v1, %v1475_v61 }
 0x587   :  { %v5834_v62 = vsel %vm1491_vm15, %v5385_v33, %v1474_v48  ;;  %v5837_v20 = vsel %vm1493_vm2, %v5388_v1, %v1475_v61 }
 0x588   :  { %1620 = vrot.lane.b32.xlu1 %v5834_v62, %s4013_s21  ;;  %v1448_v63 = vpop.permute.xlu1 %1447  ;;  %1623 = vrot.lane.b32.xlu0 %v5837_v20, %s4013_s21  ;;  %v1450_v0 = vpop.permute.xlu0 %1449 }
 0x589   :  { %v1476_v49 = vsel %vm1424_vm1, %v1448_v63, 160  ;;  %v1477_v2 = vsel %vm1424_vm1, %v1450_v0, 160 }
 0x58a   :  { %vm1495_vm3 = vcmp.lt.s32.totalorder %v5401_v8, %v1476_v49  ;;  %vm1497_vm4 = vcmp.lt.s32.totalorder %v5404_v54, %v1477_v2 }
 0x58b   :  { %v5850_v33 = vsel %vm1495_vm3, %v5401_v8, %v1476_v49  ;;  %v5853_v1 = vsel %vm1497_vm4, %v5404_v54, %v1477_v2 }
 0x58c   :  { %1626 = vrot.lane.b32.xlu1 %v5850_v33, %s4013_s21  ;;  %v1452_v3 = vpop.permute.xlu1 %1451  ;;  %1629 = vrot.lane.b32.xlu0 %v5853_v1, %s4013_s21  ;;  %v1454_v4 = vpop.permute.xlu0 %1453 }
 0x58d   :  { %v1478_v7 = vsel %vm1424_vm1, %v1452_v3, 160  ;;  %v1479_v45 = vsel %vm1424_vm1, %v1454_v4, 160 }
 0x58e   :  { %vm1499_vm5 = vcmp.lt.s32.totalorder %v5417_v59, %v1478_v7  ;;  %vm1501_vm6 = vcmp.lt.s32.totalorder %v5420_v5, %v1479_v45 }
 0x58f   :  { %v5866_v8 = vsel %vm1499_vm5, %v5417_v59, %v1478_v7  ;;  %v5869_v54 = vsel %vm1501_vm6, %v5420_v5, %v1479_v45 }
 0x590   :  { %1632 = vrot.lane.b32.xlu1 %v5866_v8, %s4013_s21  ;;  %v1456_v46 = vpop.permute.xlu1 %1455  ;;  %1635 = vrot.lane.b32.xlu0 %v5869_v54, %s4013_s21  ;;  %v1458_v12 = vpop.permute.xlu0 %1457 }
 0x591   :  { %v1480_v15 = vsel %vm1424_vm1, %v1456_v46, 160  ;;  %v1481_v16 = vsel %vm1424_vm1, %v1458_v12, 160 }
 0x592   :  { %vm1503_vm7 = vcmp.lt.s32.totalorder %v5433_v6, %v1480_v15  ;;  %vm1505_vm8 = vcmp.lt.s32.totalorder %v5436_v9, %v1481_v16 }
 0x593   :  { %v5882_v59 = vsel %vm1503_vm7, %v5433_v6, %v1480_v15  ;;  %v5885_v5 = vsel %vm1505_vm8, %v5436_v9, %v1481_v16 }
 0x594   :  { %1638 = vrot.lane.b32.xlu1 %v5882_v59, %s4013_s21  ;;  %v1460_v19 = vpop.permute.xlu1 %1459  ;;  %1641 = vrot.lane.b32.xlu0 %v5885_v5, %s4013_s21  ;;  %v1462_v60 = vpop.permute.xlu0 %1461 }
 0x595   :  { %v1482_v23 = vsel %vm1424_vm1, %v1460_v19, 160  ;;  %v1483_v24 = vsel %vm1424_vm1, %v1462_v60, 160 }
 0x596   :  { %vm1507_vm9 = vcmp.lt.s32.totalorder %v5449_v10, %v1482_v23  ;;  %vm1509_vm10 = vcmp.lt.s32.totalorder %v5452_v13, %v1483_v24 }
 0x597   :  { %v5898_v6 = vsel %vm1507_vm9, %v5449_v10, %v1482_v23  ;;  %v5901_v9 = vsel %vm1509_vm10, %v5452_v13, %v1483_v24 }
 0x598   :  { %1644 = vrot.lane.b32.xlu1 %v5898_v6, %s4013_s21  ;;  %v1464_v27 = vpop.permute.xlu1 %1463  ;;  %1647 = vrot.lane.b32.xlu0 %v5901_v9, %s4013_s21  ;;  %v1466_v28 = vpop.permute.xlu0 %1465 }
 0x599   :  { %v1484_v43 = vsel %vm1424_vm1, %v1464_v27, 160  ;;  %v1485_v44 = vsel %vm1424_vm1, %v1466_v28, 160 }
 0x59a   :  { %vm1511_vm11 = vcmp.lt.s32.totalorder %v5465_v14, %v1484_v43  ;;  %vm1513_vm12 = vcmp.lt.s32.totalorder %v5468_v17, %v1485_v44 }
 0x59b   :  { %v5914_v10 = vsel %vm1511_vm11, %v5465_v14, %v1484_v43  ;;  %v5917_v13 = vsel %vm1513_vm12, %v5468_v17, %v1485_v44 }
 0x59c   :  { %1650 = vrot.lane.b32.xlu1 %v5914_v10, %s4013_s21  ;;  %v1468_v52 = vpop.permute.xlu1 %1467  ;;  %1653 = vrot.lane.b32.xlu0 %v5917_v13, %s4013_s21  ;;  %v1470_v53 = vpop.permute.xlu0 %1469 }
 0x59d   :  { %v1486_v55 = vsel %vm1424_vm1, %v1468_v52, 160  ;;  %v1487_v56 = vsel %vm1424_vm1, %v1470_v53, 160 }
 0x59e   :  { %vm1515_vm13 = vcmp.lt.s32.totalorder %v5481_v18, %v1486_v55  ;;  %vm1517_vm14 = vcmp.lt.s32.totalorder %v5484_v21, %v1487_v56 }
 0x59f   :  { %v5930_v14 = vsel %vm1515_vm13, %v5481_v18, %v1486_v55  ;;  %v5933_v17 = vsel %vm1517_vm14, %v5484_v21, %v1487_v56 }
 0x5a0   :  { %1656 = vrot.lane.b32.xlu1 %v5930_v14, %s4013_s21  ;;  %v1472_v11 = vpop.permute.xlu1 %1471  ;;  %1659 = vrot.lane.b32.xlu0 %v5933_v17, %s4013_s21  ;;  %v1538_v58 = vpop.permute.xlu0 %1537 }
 0x5a1   :  { %v1488_v47 = vsel %vm1424_vm1, %v1472_v11, 160  ;;  %v1569_v48 = vsel %vm1424_vm1, %v1538_v58, 160 }
 0x5a2   :  { %vm1519_vm15 = vcmp.lt.s32.totalorder %v5497_v22, %v1488_v47  ;;  %vm1585_vm2 = vcmp.lt.s32.totalorder %v5500_v25, %v1569_v48 }
 0x5a3   :  { %v5946_v18 = vsel %vm1519_vm15, %v5497_v22, %v1488_v47  ;;  %v5949_v21 = vsel %vm1585_vm2, %v5500_v25, %v1569_v48 }
 0x5a4   :  { %1662 = vrot.lane.b32.xlu1 %v5946_v18, %s4013_s21  ;;  %v1540_v61 = vpop.permute.xlu1 %1539  ;;  %1713 = vrot.lane.b32.xlu0 %v5949_v21, %s4013_s21  ;;  %v1542_v63 = vpop.permute.xlu0 %1541 }
 0x5a5   :  { %v1570_v0 = vsel %vm1424_vm1, %v1540_v61, 160  ;;  %v1571_v49 = vsel %vm1424_vm1, %v1542_v63, 160 }
 0x5a6   :  { %vm1587_vm3 = vcmp.lt.s32.totalorder %v5513_v26, %v1570_v0  ;;  %vm1589_vm4 = vcmp.lt.s32.totalorder %v5516_v29, %v1571_v49 }
 0x5a7   :  { %v5962_v22 = vsel %vm1587_vm3, %v5513_v26, %v1570_v0  ;;  %v5965_v25 = vsel %vm1589_vm4, %v5516_v29, %v1571_v49 }
 0x5a8   :  { %1716 = vrot.lane.b32.xlu1 %v5962_v22, %s4013_s21  ;;  %v1544_v2 = vpop.permute.xlu1 %1543  ;;  %1719 = vrot.lane.b32.xlu0 %v5965_v25, %s4013_s21  ;;  %v1546_v3 = vpop.permute.xlu0 %1545 }
 0x5a9   :  { %v1572_v4 = vsel %vm1424_vm1, %v1544_v2, 160  ;;  %v1573_v7 = vsel %vm1424_vm1, %v1546_v3, 160 }
 0x5aa   :  { %vm1591_vm5 = vcmp.lt.s32.totalorder %v5529_v30, %v1572_v4  ;;  %vm1593_vm6 = vcmp.lt.s32.totalorder %v5532_v31, %v1573_v7 }
 0x5ab   :  { %v5978_v26 = vsel %vm1591_vm5, %v5529_v30, %v1572_v4  ;;  %v5981_v29 = vsel %vm1593_vm6, %v5532_v31, %v1573_v7 }
 0x5ac   :  { %1722 = vrot.lane.b32.xlu1 %v5978_v26, %s4013_s21  ;;  %v1548_v45 = vpop.permute.xlu1 %1547  ;;  %1725 = vrot.lane.b32.xlu0 %v5981_v29, %s4013_s21  ;;  %v1550_v46 = vpop.permute.xlu0 %1549 }
 0x5ad   :  { %v1574_v12 = vsel %vm1424_vm1, %v1548_v45, 160  ;;  %v1575_v15 = vsel %vm1424_vm1, %v1550_v46, 160 }
 0x5ae   :  { %vm1595_vm7 = vcmp.lt.s32.totalorder %v5545_v32, %v1574_v12  ;;  %vm1597_vm8 = vcmp.lt.s32.totalorder %v5548_v34, %v1575_v15 }
 0x5af   :  { %v5994_v30 = vsel %vm1595_vm7, %v5545_v32, %v1574_v12  ;;  %v5997_v31 = vsel %vm1597_vm8, %v5548_v34, %v1575_v15 }
 0x5b0   :  { %1728 = vrot.lane.b32.xlu1 %v5994_v30, %s4013_s21  ;;  %v1552_v16 = vpop.permute.xlu1 %1551  ;;  %1731 = vrot.lane.b32.xlu0 %v5997_v31, %s4013_s21  ;;  %v1554_v19 = vpop.permute.xlu0 %1553 }
 0x5b1   :  { %v1576_v60 = vsel %vm1424_vm1, %v1552_v16, 160  ;;  %v1577_v23 = vsel %vm1424_vm1, %v1554_v19, 160 }
 0x5b2   :  { %vm1599_vm9 = vcmp.lt.s32.totalorder %v5561_v35, %v1576_v60  ;;  %vm1601_vm10 = vcmp.lt.s32.totalorder %v5564_v36, %v1577_v23 }
 0x5b3   :  { %v6010_v32 = vsel %vm1599_vm9, %v5561_v35, %v1576_v60  ;;  %v6013_v34 = vsel %vm1601_vm10, %v5564_v36, %v1577_v23 }
 0x5b4   :  { %1734 = vrot.lane.b32.xlu1 %v6010_v32, %s4013_s21  ;;  %v1556_v24 = vpop.permute.xlu1 %1555  ;;  %1737 = vrot.lane.b32.xlu0 %v6013_v34, %s4013_s21  ;;  %v1558_v27 = vpop.permute.xlu0 %1557 }
 0x5b5   :  { %v1578_v28 = vsel %vm1424_vm1, %v1556_v24, 160  ;;  %v1579_v43 = vsel %vm1424_vm1, %v1558_v27, 160 }
 0x5b6   :  { %vm1603_vm11 = vcmp.lt.s32.totalorder %v5577_v37, %v1578_v28  ;;  %vm1605_vm12 = vcmp.lt.s32.totalorder %v5580_v38, %v1579_v43 }
 0x5b7   :  { %v6026_v35 = vsel %vm1603_vm11, %v5577_v37, %v1578_v28  ;;  %v6029_v36 = vsel %vm1605_vm12, %v5580_v38, %v1579_v43 }
 0x5b8   :  { %1740 = vrot.lane.b32.xlu1 %v6026_v35, %s4013_s21  ;;  %v1560_v44 = vpop.permute.xlu1 %1559  ;;  %1743 = vrot.lane.b32.xlu0 %v6029_v36, %s4013_s21  ;;  %v1562_v52 = vpop.permute.xlu0 %1561 }
 0x5b9   :  { %v1580_v53 = vsel %vm1424_vm1, %v1560_v44, 160  ;;  %v1581_v55 = vsel %vm1424_vm1, %v1562_v52, 160 }
 0x5ba   :  { %vm1607_vm13 = vcmp.lt.s32.totalorder %v5593_v39, %v1580_v53  ;;  %vm1609_vm14 = vcmp.lt.s32.totalorder %v5596_v40, %v1581_v55 }
 0x5bb   :  { %v6042_v37 = vsel %vm1607_vm13, %v5593_v39, %v1580_v53  ;;  %v6045_v38 = vsel %vm1609_vm14, %v5596_v40, %v1581_v55 }
 0x5bc   :  { %1746 = vrot.lane.b32.xlu1 %v6042_v37, %s4013_s21  ;;  %v1564_v56 = vpop.permute.xlu1 %1563  ;;  %1749 = vrot.lane.b32.xlu0 %v6045_v38, %s4013_s21  ;;  %v1566_v11 = vpop.permute.xlu0 %1565 }
 0x5bd   :  { %v1582_v58 = vsel %vm1424_vm1, %v1564_v56, 160  ;;  %v1583_v47 = vsel %vm1424_vm1, %v1566_v11, 160 }
 0x5be   :  { %vm1611_vm15 = vcmp.lt.s32.totalorder %v5609_v41, %v1582_v58  ;;  %vm1613_vm2 = vcmp.lt.s32.totalorder %v5612_v42, %v1583_v47 }
 0x5bf   :  { %v6058_v39 = vsel %vm1611_vm15, %v5609_v41, %v1582_v58  ;;  %v6061_v40 = vsel %vm1613_vm2, %v5612_v42, %v1583_v47 }
 0x5c0   :  { %1752 = vrot.lane.b32.xlu1 %v6058_v39, %s4013_s21  ;;  %v1568_v48 = vpop.permute.xlu1 %1567  ;;  %1755 = vrot.lane.b32.xlu0 %v6061_v40, %s4013_s21 }
 0x5c1   :  { %v1584_v61 = vsel %vm1424_vm1, %v1568_v48, 160  ;;  %vm1809_vm1 = vcmp.ge.s32.totalorder %v4469_v51, 16 }
 0x5c2   :  { %vm1615_vm3 = vcmp.lt.s32.totalorder %v5622_v50, %v1584_v61 }
 0x5c3   :  { %v6071_v63 = vsel %vm1615_vm3, %v5622_v50, %v1584_v61 }
 0x5c4   :  { %1758 = vrot.lane.b32.xlu1 %v6071_v63, %s4013_s21 }
 0x5f6   :  { %v1618_v41 = vpop.permute.xlu0 %1617 }
 0x5f7   :  { %v1619_v42 = vsel %vm76_vm0, %v1618_v41, %v5823_v57 }
 0x5f8   :  { %1665 = vrot.lane.b32.xlu0 %v1619_v42, %s4013_s21 }
 0x5fa   :  { %v1621_v0 = vpop.permute.xlu1 %1620  ;;  %v1624_v49 = vpop.permute.xlu0 %1623 }
 0x5fb   :  { %v1622_v2 = vsel %vm76_vm0, %v1621_v0, %v5834_v62  ;;  %v1625_v3 = vsel %vm76_vm0, %v1624_v49, %v5837_v20 }
 0x5fc   :  { %1667 = vrot.lane.b32.xlu1 %v1622_v2, %s4013_s21  ;;  %1669 = vrot.lane.b32.xlu0 %v1625_v3, %s4013_s21 }
 0x5fe   :  { %v1627_v50 = vpop.permute.xlu1 %1626  ;;  %v1630_v4 = vpop.permute.xlu0 %1629 }
 0x5ff   :  { %v1628_v7 = vsel %vm76_vm0, %v1627_v50, %v5850_v33  ;;  %v1631_v45 = vsel %vm76_vm0, %v1630_v4, %v5853_v1 }
 0x600   :  { %1671 = vrot.lane.b32.xlu1 %v1628_v7, %s4013_s21  ;;  %1673 = vrot.lane.b32.xlu0 %v1631_v45, %s4013_s21 }
 0x602   :  { %v1633_v46 = vpop.permute.xlu1 %1632  ;;  %v1636_v12 = vpop.permute.xlu0 %1635 }
 0x603   :  { %v1634_v15 = vsel %vm76_vm0, %v1633_v46, %v5866_v8  ;;  %v1637_v16 = vsel %vm76_vm0, %v1636_v12, %v5869_v54 }
 0x604   :  { %1675 = vrot.lane.b32.xlu1 %v1634_v15, %s4013_s21  ;;  %1677 = vrot.lane.b32.xlu0 %v1637_v16, %s4013_s21 }
 0x606   :  { %v1639_v19 = vpop.permute.xlu1 %1638  ;;  %v1642_v60 = vpop.permute.xlu0 %1641 }
 0x607   :  { %v1640_v23 = vsel %vm76_vm0, %v1639_v19, %v5882_v59  ;;  %v1643_v24 = vsel %vm76_vm0, %v1642_v60, %v5885_v5 }
 0x608   :  { %1679 = vrot.lane.b32.xlu1 %v1640_v23, %s4013_s21  ;;  %1681 = vrot.lane.b32.xlu0 %v1643_v24, %s4013_s21 }
 0x60a   :  { %v1645_v27 = vpop.permute.xlu1 %1644  ;;  %v1648_v28 = vpop.permute.xlu0 %1647 }
 0x60b   :  { %v1646_v43 = vsel %vm76_vm0, %v1645_v27, %v5898_v6  ;;  %v1649_v44 = vsel %vm76_vm0, %v1648_v28, %v5901_v9 }
 0x60c   :  { %1683 = vrot.lane.b32.xlu1 %v1646_v43, %s4013_s21  ;;  %1685 = vrot.lane.b32.xlu0 %v1649_v44, %s4013_s21 }
 0x60e   :  { %v1651_v52 = vpop.permute.xlu1 %1650  ;;  %v1654_v53 = vpop.permute.xlu0 %1653 }
 0x60f   :  { %v1652_v55 = vsel %vm76_vm0, %v1651_v52, %v5914_v10  ;;  %v1655_v56 = vsel %vm76_vm0, %v1654_v53, %v5917_v13 }
 0x610   :  { %1687 = vrot.lane.b32.xlu1 %v1652_v55, %s4013_s21  ;;  %1689 = vrot.lane.b32.xlu0 %v1655_v56, %s4013_s21 }
 0x612   :  { %v1657_v11 = vpop.permute.xlu1 %1656  ;;  %v1660_v58 = vpop.permute.xlu0 %1659 }
 0x613   :  { %v1658_v47 = vsel %vm76_vm0, %v1657_v11, %v5930_v14  ;;  %v1661_v48 = vsel %vm76_vm0, %v1660_v58, %v5933_v17 }
 0x614   :  { %1691 = vrot.lane.b32.xlu1 %v1658_v47, %s4013_s21  ;;  %1693 = vrot.lane.b32.xlu0 %v1661_v48, %s4013_s21 }
 0x616   :  { %v1663_v61 = vpop.permute.xlu1 %1662  ;;  %v1714_v41 = vpop.permute.xlu0 %1713 }
 0x617   :  { %v1664_v42 = vsel %vm76_vm0, %v1663_v61, %v5946_v18  ;;  %v1715_v0 = vsel %vm76_vm0, %v1714_v41, %v5949_v21 }
 0x618   :  { %1695 = vrot.lane.b32.xlu1 %v1664_v42, %s4013_s21  ;;  %1761 = vrot.lane.b32.xlu0 %v1715_v0, %s4013_s21 }
 0x61a   :  { %v1717_v49 = vpop.permute.xlu1 %1716  ;;  %v1720_v2 = vpop.permute.xlu0 %1719 }
 0x61b   :  { %v1718_v3 = vsel %vm76_vm0, %v1717_v49, %v5962_v22  ;;  %v1721_v50 = vsel %vm76_vm0, %v1720_v2, %v5965_v25 }
 0x61c   :  { %1763 = vrot.lane.b32.xlu1 %v1718_v3, %s4013_s21  ;;  %1765 = vrot.lane.b32.xlu0 %v1721_v50, %s4013_s21 }
 0x61e   :  { %v1723_v4 = vpop.permute.xlu1 %1722  ;;  %v1726_v7 = vpop.permute.xlu0 %1725 }
 0x61f   :  { %v1724_v45 = vsel %vm76_vm0, %v1723_v4, %v5978_v26  ;;  %v1727_v46 = vsel %vm76_vm0, %v1726_v7, %v5981_v29 }
 0x620   :  { %1767 = vrot.lane.b32.xlu1 %v1724_v45, %s4013_s21  ;;  %1769 = vrot.lane.b32.xlu0 %v1727_v46, %s4013_s21 }
 0x622   :  { %v1729_v12 = vpop.permute.xlu1 %1728  ;;  %v1732_v15 = vpop.permute.xlu0 %1731 }
 0x623   :  { %v1730_v16 = vsel %vm76_vm0, %v1729_v12, %v5994_v30  ;;  %v1733_v19 = vsel %vm76_vm0, %v1732_v15, %v5997_v31 }
 0x624   :  { %1771 = vrot.lane.b32.xlu1 %v1730_v16, %s4013_s21  ;;  %1773 = vrot.lane.b32.xlu0 %v1733_v19, %s4013_s21 }
 0x626   :  { %v1735_v60 = vpop.permute.xlu1 %1734  ;;  %v1738_v23 = vpop.permute.xlu0 %1737 }
 0x627   :  { %v1736_v24 = vsel %vm76_vm0, %v1735_v60, %v6010_v32  ;;  %v1739_v27 = vsel %vm76_vm0, %v1738_v23, %v6013_v34 }
 0x628   :  { %1775 = vrot.lane.b32.xlu1 %v1736_v24, %s4013_s21  ;;  %1777 = vrot.lane.b32.xlu0 %v1739_v27, %s4013_s21 }
 0x62a   :  { %v1741_v28 = vpop.permute.xlu1 %1740  ;;  %v1744_v43 = vpop.permute.xlu0 %1743 }
 0x62b   :  { %v1742_v44 = vsel %vm76_vm0, %v1741_v28, %v6026_v35  ;;  %v1745_v52 = vsel %vm76_vm0, %v1744_v43, %v6029_v36 }
 0x62c   :  { %1779 = vrot.lane.b32.xlu1 %v1742_v44, %s4013_s21  ;;  %1781 = vrot.lane.b32.xlu0 %v1745_v52, %s4013_s21 }
 0x62e   :  { %v1747_v53 = vpop.permute.xlu1 %1746  ;;  %v1750_v55 = vpop.permute.xlu0 %1749 }
 0x62f   :  { %v1748_v56 = vsel %vm76_vm0, %v1747_v53, %v6042_v37  ;;  %v1751_v11 = vsel %vm76_vm0, %v1750_v55, %v6045_v38 }
 0x630   :  { %1783 = vrot.lane.b32.xlu1 %v1748_v56, %s4013_s21  ;;  %1785 = vrot.lane.b32.xlu0 %v1751_v11, %s4013_s21 }
 0x632   :  { %v1753_v58 = vpop.permute.xlu1 %1752  ;;  %v1756_v47 = vpop.permute.xlu0 %1755 }
 0x633   :  { %v1754_v48 = vsel %vm76_vm0, %v1753_v58, %v6058_v39  ;;  %v1757_v61 = vsel %vm76_vm0, %v1756_v47, %v6061_v40 }
 0x634   :  { %1787 = vrot.lane.b32.xlu1 %v1754_v48, %s4013_s21  ;;  %1789 = vrot.lane.b32.xlu0 %v1757_v61, %s4013_s21 }
 0x636   :  { %v1759_v41 = vpop.permute.xlu1 %1758 }
 0x637   :  { %v1760_v42 = vsel %vm76_vm0, %v1759_v41, %v6071_v63 }
 0x638   :  { %1791 = vrot.lane.b32.xlu1 %v1760_v42, %s4013_s21 }
 0x66a   :  { %v1666_v0 = vpop.permute.xlu0 %1665 }
 0x66b   :  { %v1697_v49 = vsel %vm76_vm0, %v1666_v0, %v5823_v57 }
 0x66c   :  { %v1810_v2 = vadd.s32 16, %v1697_v49 }
 0x66e   :  { %v1668_v3 = vpop.permute.xlu1 %1667  ;;  %1826 = vrot.lane.b32.xlu0 %v1810_v2, %s4019_s17  ;;  %v1670_v50 = vpop.permute.xlu0 %1669 }
 0x66f   :  { %v1698_v4 = vsel %vm76_vm0, %v1668_v3, %v5834_v62  ;;  %v1699_v7 = vsel %vm76_vm0, %v1670_v50, %v5837_v20 }
 0x670   :  { %v1811_v45 = vadd.s32 16, %v1698_v4  ;;  %v1812_v46 = vadd.s32 16, %v1699_v7 }
 0x672   :  { %1828 = vrot.lane.b32.xlu1 %v1811_v45, %s4019_s17  ;;  %v1672_v12 = vpop.permute.xlu1 %1671  ;;  %1830 = vrot.lane.b32.xlu0 %v1812_v46, %s4019_s17  ;;  %v1674_v15 = vpop.permute.xlu0 %1673 }
 0x673   :  { %v1700_v16 = vsel %vm76_vm0, %v1672_v12, %v5850_v33  ;;  %v1701_v19 = vsel %vm76_vm0, %v1674_v15, %v5853_v1 }
 0x674   :  { %v1813_v60 = vadd.s32 16, %v1700_v16  ;;  %v1814_v23 = vadd.s32 16, %v1701_v19 }
 0x676   :  { %1832 = vrot.lane.b32.xlu1 %v1813_v60, %s4019_s17  ;;  %v1676_v24 = vpop.permute.xlu1 %1675  ;;  %1834 = vrot.lane.b32.xlu0 %v1814_v23, %s4019_s17  ;;  %v1678_v27 = vpop.permute.xlu0 %1677 }
 0x677   :  { %v1702_v28 = vsel %vm76_vm0, %v1676_v24, %v5866_v8  ;;  %v1703_v43 = vsel %vm76_vm0, %v1678_v27, %v5869_v54 }
 0x678   :  { %v1815_v44 = vadd.s32 16, %v1702_v28  ;;  %v1816_v52 = vadd.s32 16, %v1703_v43 }
 0x67a   :  { %1836 = vrot.lane.b32.xlu1 %v1815_v44, %s4019_s17  ;;  %v1680_v53 = vpop.permute.xlu1 %1679  ;;  %1838 = vrot.lane.b32.xlu0 %v1816_v52, %s4019_s17  ;;  %v1682_v55 = vpop.permute.xlu0 %1681 }
 0x67b   :  { %v1704_v56 = vsel %vm76_vm0, %v1680_v53, %v5882_v59  ;;  %v1705_v11 = vsel %vm76_vm0, %v1682_v55, %v5885_v5 }
 0x67c   :  { %v1817_v58 = vadd.s32 16, %v1704_v56  ;;  %v1818_v47 = vadd.s32 16, %v1705_v11 }
 0x67e   :  { %1840 = vrot.lane.b32.xlu1 %v1817_v58, %s4019_s17  ;;  %v1684_v48 = vpop.permute.xlu1 %1683  ;;  %1842 = vrot.lane.b32.xlu0 %v1818_v47, %s4019_s17  ;;  %v1686_v61 = vpop.permute.xlu0 %1685 }
 0x67f   :  { %v1706_v41 = vsel %vm76_vm0, %v1684_v48, %v5898_v6  ;;  %v1707_v42 = vsel %vm76_vm0, %v1686_v61, %v5901_v9 }
 0x680   :  { %v1819_v0 = vadd.s32 16, %v1706_v41  ;;  %v1820_v49 = vadd.s32 16, %v1707_v42 }
 0x682   :  { %1844 = vrot.lane.b32.xlu1 %v1819_v0, %s4019_s17  ;;  %v1688_v2 = vpop.permute.xlu1 %1687  ;;  %1846 = vrot.lane.b32.xlu0 %v1820_v49, %s4019_s17  ;;  %v1690_v3 = vpop.permute.xlu0 %1689 }
 0x683   :  { %v1708_v50 = vsel %vm76_vm0, %v1688_v2, %v5914_v10  ;;  %v1709_v4 = vsel %vm76_vm0, %v1690_v3, %v5917_v13 }
 0x684   :  { %v1821_v7 = vadd.s32 16, %v1708_v50  ;;  %v1822_v45 = vadd.s32 16, %v1709_v4 }
 0x686   :  { %1848 = vrot.lane.b32.xlu1 %v1821_v7, %s4019_s17  ;;  %v1692_v46 = vpop.permute.xlu1 %1691  ;;  %1850 = vrot.lane.b32.xlu0 %v1822_v45, %s4019_s17  ;;  %v1694_v12 = vpop.permute.xlu0 %1693 }
 0x687   :  { %v1710_v15 = vsel %vm76_vm0, %v1692_v46, %v5930_v14  ;;  %v1711_v16 = vsel %vm76_vm0, %v1694_v12, %v5933_v17 }
 0x688   :  { %v1823_v19 = vadd.s32 16, %v1710_v15  ;;  %v1824_v60 = vadd.s32 16, %v1711_v16 }
 0x68a   :  { %1852 = vrot.lane.b32.xlu1 %v1823_v19, %s4019_s17  ;;  %v1696_v23 = vpop.permute.xlu1 %1695  ;;  %1854 = vrot.lane.b32.xlu0 %v1824_v60, %s4019_s17  ;;  %v1762_v24 = vpop.permute.xlu0 %1761 }
 0x68b   :  { %v1712_v27 = vsel %vm76_vm0, %v1696_v23, %v5946_v18  ;;  %v1793_v28 = vsel %vm76_vm0, %v1762_v24, %v5949_v21 }
 0x68c   :  { %v1825_v43 = vadd.s32 16, %v1712_v27  ;;  %v1906_v44 = vadd.s32 16, %v1793_v28 }
 0x68e   :  { %1856 = vrot.lane.b32.xlu1 %v1825_v43, %s4019_s17  ;;  %v1764_v52 = vpop.permute.xlu1 %1763  ;;  %1922 = vrot.lane.b32.xlu0 %v1906_v44, %s4019_s17  ;;  %v1766_v53 = vpop.permute.xlu0 %1765 }
 0x68f   :  { %v1794_v55 = vsel %vm76_vm0, %v1764_v52, %v5962_v22  ;;  %v1795_v56 = vsel %vm76_vm0, %v1766_v53, %v5965_v25 }
 0x690   :  { %v1907_v11 = vadd.s32 16, %v1794_v55  ;;  %v1908_v58 = vadd.s32 16, %v1795_v56 }
 0x692   :  { %1924 = vrot.lane.b32.xlu1 %v1907_v11, %s4019_s17  ;;  %v1768_v47 = vpop.permute.xlu1 %1767  ;;  %1926 = vrot.lane.b32.xlu0 %v1908_v58, %s4019_s17  ;;  %v1770_v48 = vpop.permute.xlu0 %1769 }
 0x693   :  { %v1796_v61 = vsel %vm76_vm0, %v1768_v47, %v5978_v26  ;;  %v1797_v41 = vsel %vm76_vm0, %v1770_v48, %v5981_v29 }
 0x694   :  { %v1909_v42 = vadd.s32 16, %v1796_v61  ;;  %v1910_v0 = vadd.s32 16, %v1797_v41 }
 0x696   :  { %1928 = vrot.lane.b32.xlu1 %v1909_v42, %s4019_s17  ;;  %v1772_v49 = vpop.permute.xlu1 %1771  ;;  %1930 = vrot.lane.b32.xlu0 %v1910_v0, %s4019_s17  ;;  %v1774_v2 = vpop.permute.xlu0 %1773 }
 0x697   :  { %v1798_v3 = vsel %vm76_vm0, %v1772_v49, %v5994_v30  ;;  %v1799_v50 = vsel %vm76_vm0, %v1774_v2, %v5997_v31 }
 0x698   :  { %v1911_v4 = vadd.s32 16, %v1798_v3  ;;  %v1912_v7 = vadd.s32 16, %v1799_v50 }
 0x69a   :  { %1932 = vrot.lane.b32.xlu1 %v1911_v4, %s4019_s17  ;;  %v1776_v45 = vpop.permute.xlu1 %1775  ;;  %1934 = vrot.lane.b32.xlu0 %v1912_v7, %s4019_s17  ;;  %v1778_v46 = vpop.permute.xlu0 %1777 }
 0x69b   :  { %v1800_v12 = vsel %vm76_vm0, %v1776_v45, %v6010_v32  ;;  %v1801_v15 = vsel %vm76_vm0, %v1778_v46, %v6013_v34 }
 0x69c   :  { %v1913_v16 = vadd.s32 16, %v1800_v12  ;;  %v1914_v19 = vadd.s32 16, %v1801_v15 }
 0x69e   :  { %1936 = vrot.lane.b32.xlu1 %v1913_v16, %s4019_s17  ;;  %v1780_v60 = vpop.permute.xlu1 %1779  ;;  %1938 = vrot.lane.b32.xlu0 %v1914_v19, %s4019_s17  ;;  %v1782_v23 = vpop.permute.xlu0 %1781 }
 0x69f   :  { %v1802_v24 = vsel %vm76_vm0, %v1780_v60, %v6026_v35  ;;  %v1803_v27 = vsel %vm76_vm0, %v1782_v23, %v6029_v36 }
 0x6a0   :  { %v1915_v28 = vadd.s32 16, %v1802_v24  ;;  %v1916_v43 = vadd.s32 16, %v1803_v27 }
 0x6a2   :  { %1940 = vrot.lane.b32.xlu1 %v1915_v28, %s4019_s17  ;;  %v1784_v44 = vpop.permute.xlu1 %1783  ;;  %1942 = vrot.lane.b32.xlu0 %v1916_v43, %s4019_s17  ;;  %v1786_v52 = vpop.permute.xlu0 %1785 }
 0x6a3   :  { %v1804_v53 = vsel %vm76_vm0, %v1784_v44, %v6042_v37  ;;  %v1805_v55 = vsel %vm76_vm0, %v1786_v52, %v6045_v38 }
 0x6a4   :  { %v1917_v56 = vadd.s32 16, %v1804_v53  ;;  %v1918_v11 = vadd.s32 16, %v1805_v55 }
 0x6a6   :  { %1944 = vrot.lane.b32.xlu1 %v1917_v56, %s4019_s17  ;;  %v1788_v58 = vpop.permute.xlu1 %1787  ;;  %1946 = vrot.lane.b32.xlu0 %v1918_v11, %s4019_s17  ;;  %v1790_v47 = vpop.permute.xlu0 %1789 }
 0x6a7   :  { %v1806_v48 = vsel %vm76_vm0, %v1788_v58, %v6058_v39  ;;  %v1807_v61 = vsel %vm76_vm0, %v1790_v47, %v6061_v40 }
 0x6a8   :  { %v1919_v41 = vadd.s32 16, %v1806_v48  ;;  %v1920_v42 = vadd.s32 16, %v1807_v61 }
 0x6aa   :  { %1948 = vrot.lane.b32.xlu1 %v1919_v41, %s4019_s17  ;;  %v1792_v0 = vpop.permute.xlu1 %1791  ;;  %1950 = vrot.lane.b32.xlu0 %v1920_v42, %s4019_s17 }
 0x6ab   :  { %v1808_v49 = vsel %vm76_vm0, %v1792_v0, %v6071_v63 }
 0x6ac   :  { %v1921_v2 = vadd.s32 16, %v1808_v49 }
 0x6ae   :  { %1952 = vrot.lane.b32.xlu1 %v1921_v2, %s4019_s17 }
 0x6e0   :  { %v1827_v3 = vpop.permute.xlu0 %1826 }
 0x6e1   :  { %v1858_v50 = vsel %vm1809_vm1, %v1827_v3, 160 }
 0x6e2   :  { %vm1874_vm4 = vcmp.lt.s32.totalorder %v5823_v57, %v1858_v50 }
 0x6e3   :  { %v6272_v4 = vsel %vm1874_vm4, %v5823_v57, %v1858_v50 }
 0x6e4   :  { %v1829_v7 = vpop.permute.xlu1 %1828  ;;  %2002 = vrot.lane.b32.xlu0 %v6272_v4, %s4013_s21  ;;  %v1831_v45 = vpop.permute.xlu0 %1830 }
 0x6e5   :  { %v1859_v46 = vsel %vm1809_vm1, %v1829_v7, 160  ;;  %v1860_v12 = vsel %vm1809_vm1, %v1831_v45, 160 }
 0x6e6   :  { %vm1876_vm5 = vcmp.lt.s32.totalorder %v5834_v62, %v1859_v46  ;;  %vm1878_vm6 = vcmp.lt.s32.totalorder %v5837_v20, %v1860_v12 }
 0x6e7   :  { %v6283_v15 = vsel %vm1876_vm5, %v5834_v62, %v1859_v46  ;;  %v6286_v57 = vsel %vm1878_vm6, %v5837_v20, %v1860_v12 }
 0x6e8   :  { %2005 = vrot.lane.b32.xlu1 %v6283_v15, %s4013_s21  ;;  %v1833_v16 = vpop.permute.xlu1 %1832  ;;  %2008 = vrot.lane.b32.xlu0 %v6286_v57, %s4013_s21  ;;  %v1835_v19 = vpop.permute.xlu0 %1834 }
 0x6e9   :  { %v1861_v60 = vsel %vm1809_vm1, %v1833_v16, 160  ;;  %v1862_v23 = vsel %vm1809_vm1, %v1835_v19, 160 }
 0x6ea   :  { %vm1880_vm7 = vcmp.lt.s32.totalorder %v5850_v33, %v1861_v60  ;;  %vm1882_vm8 = vcmp.lt.s32.totalorder %v5853_v1, %v1862_v23 }
 0x6eb   :  { %v6299_v62 = vsel %vm1880_vm7, %v5850_v33, %v1861_v60  ;;  %v6302_v20 = vsel %vm1882_vm8, %v5853_v1, %v1862_v23 }
 0x6ec   :  { %2011 = vrot.lane.b32.xlu1 %v6299_v62, %s4013_s21  ;;  %v1837_v24 = vpop.permute.xlu1 %1836  ;;  %2014 = vrot.lane.b32.xlu0 %v6302_v20, %s4013_s21  ;;  %v1839_v27 = vpop.permute.xlu0 %1838 }
 0x6ed   :  { %v1863_v28 = vsel %vm1809_vm1, %v1837_v24, 160  ;;  %v1864_v43 = vsel %vm1809_vm1, %v1839_v27, 160 }
 0x6ee   :  { %vm1884_vm9 = vcmp.lt.s32.totalorder %v5866_v8, %v1863_v28  ;;  %vm1886_vm10 = vcmp.lt.s32.totalorder %v5869_v54, %v1864_v43 }
 0x6ef   :  { %v6315_v33 = vsel %vm1884_vm9, %v5866_v8, %v1863_v28  ;;  %v6318_v1 = vsel %vm1886_vm10, %v5869_v54, %v1864_v43 }
 0x6f0   :  { %2017 = vrot.lane.b32.xlu1 %v6315_v33, %s4013_s21  ;;  %v1841_v44 = vpop.permute.xlu1 %1840  ;;  %2020 = vrot.lane.b32.xlu0 %v6318_v1, %s4013_s21  ;;  %v1843_v52 = vpop.permute.xlu0 %1842 }
 0x6f1   :  { %v1865_v53 = vsel %vm1809_vm1, %v1841_v44, 160  ;;  %v1866_v55 = vsel %vm1809_vm1, %v1843_v52, 160 }
 0x6f2   :  { %vm1888_vm11 = vcmp.lt.s32.totalorder %v5882_v59, %v1865_v53  ;;  %vm1890_vm12 = vcmp.lt.s32.totalorder %v5885_v5, %v1866_v55 }
 0x6f3   :  { %v6331_v8 = vsel %vm1888_vm11, %v5882_v59, %v1865_v53  ;;  %v6334_v54 = vsel %vm1890_vm12, %v5885_v5, %v1866_v55 }
 0x6f4   :  { %2023 = vrot.lane.b32.xlu1 %v6331_v8, %s4013_s21  ;;  %v1845_v56 = vpop.permute.xlu1 %1844  ;;  %2026 = vrot.lane.b32.xlu0 %v6334_v54, %s4013_s21  ;;  %v1847_v11 = vpop.permute.xlu0 %1846 }
 0x6f5   :  { %v1867_v58 = vsel %vm1809_vm1, %v1845_v56, 160  ;;  %v1868_v47 = vsel %vm1809_vm1, %v1847_v11, 160 }
 0x6f6   :  { %vm1892_vm13 = vcmp.lt.s32.totalorder %v5898_v6, %v1867_v58  ;;  %vm1894_vm14 = vcmp.lt.s32.totalorder %v5901_v9, %v1868_v47 }
 0x6f7   :  { %v6347_v59 = vsel %vm1892_vm13, %v5898_v6, %v1867_v58  ;;  %v6350_v5 = vsel %vm1894_vm14, %v5901_v9, %v1868_v47 }
 0x6f8   :  { %2029 = vrot.lane.b32.xlu1 %v6347_v59, %s4013_s21  ;;  %v1849_v48 = vpop.permute.xlu1 %1848  ;;  %2032 = vrot.lane.b32.xlu0 %v6350_v5, %s4013_s21  ;;  %v1851_v61 = vpop.permute.xlu0 %1850 }
 0x6f9   :  { %v1869_v41 = vsel %vm1809_vm1, %v1849_v48, 160  ;;  %v1870_v42 = vsel %vm1809_vm1, %v1851_v61, 160 }
 0x6fa   :  { %vm1896_vm15 = vcmp.lt.s32.totalorder %v5914_v10, %v1869_v41  ;;  %vm1898_vm2 = vcmp.lt.s32.totalorder %v5917_v13, %v1870_v42 }
 0x6fb   :  { %v6363_v6 = vsel %vm1896_vm15, %v5914_v10, %v1869_v41  ;;  %v6366_v9 = vsel %vm1898_vm2, %v5917_v13, %v1870_v42 }
 0x6fc   :  { %2035 = vrot.lane.b32.xlu1 %v6363_v6, %s4013_s21  ;;  %v1853_v0 = vpop.permute.xlu1 %1852  ;;  %2038 = vrot.lane.b32.xlu0 %v6366_v9, %s4013_s21  ;;  %v1855_v49 = vpop.permute.xlu0 %1854 }
 0x6fd   :  { %v1871_v2 = vsel %vm1809_vm1, %v1853_v0, 160  ;;  %v1872_v3 = vsel %vm1809_vm1, %v1855_v49, 160 }
 0x6fe   :  { %vm1900_vm3 = vcmp.lt.s32.totalorder %v5930_v14, %v1871_v2  ;;  %vm1902_vm4 = vcmp.lt.s32.totalorder %v5933_v17, %v1872_v3 }
 0x6ff   :  { %v6379_v10 = vsel %vm1900_vm3, %v5930_v14, %v1871_v2  ;;  %v6382_v13 = vsel %vm1902_vm4, %v5933_v17, %v1872_v3 }
 0x700   :  { %2041 = vrot.lane.b32.xlu1 %v6379_v10, %s4013_s21  ;;  %v1857_v50 = vpop.permute.xlu1 %1856  ;;  %2044 = vrot.lane.b32.xlu0 %v6382_v13, %s4013_s21  ;;  %v1923_v7 = vpop.permute.xlu0 %1922 }
 0x701   :  { %v1873_v45 = vsel %vm1809_vm1, %v1857_v50, 160  ;;  %v1954_v46 = vsel %vm1809_vm1, %v1923_v7, 160 }
 0x702   :  { %vm1904_vm5 = vcmp.lt.s32.totalorder %v5946_v18, %v1873_v45  ;;  %vm1970_vm6 = vcmp.lt.s32.totalorder %v5949_v21, %v1954_v46 }
 0x703   :  { %v6394_v14 = vsel %vm1904_vm5, %v5946_v18, %v1873_v45  ;;  %v6405_v60 = vsel %vm1970_vm6, %v5949_v21, %v1954_v46 }
 0x704   :  { %2047 = vrot.lane.b32.xlu1 %v6394_v14, %s4013_s21  ;;  %v1925_v17 = vpop.permute.xlu1 %1924  ;;  %v1927_v12 = vpop.permute.xlu0 %1926 }
 0x705   :  { %v1955_v16 = vsel %vm1809_vm1, %v1925_v17, 160  ;;  %v1956_v19 = vsel %vm1809_vm1, %v1927_v12, 160 }
 0x706   :  { %vm1972_vm7 = vcmp.lt.s32.totalorder %v5962_v22, %v1955_v16  ;;  %vm1974_vm8 = vcmp.lt.s32.totalorder %v5965_v25, %v1956_v19 }
 0x707   :  { %v6408_v18 = vsel %vm1972_vm7, %v5962_v22, %v1955_v16  ;;  %v6421_v22 = vsel %vm1974_vm8, %v5965_v25, %v1956_v19 }
 0x708   :  { %v1929_v23 = vpop.permute.xlu1 %1928  ;;  %2101 = vrot.lane.b32.xlu0 %v6408_v18, %s4013_s21  ;;  %2098 = vrot.lane.b32.xlu1 %v6405_v60, %s4013_s21  ;;  %v1931_v24 = vpop.permute.xlu0 %1930 }
 0x709   :  { %v1957_v27 = vsel %vm1809_vm1, %v1929_v23, 160  ;;  %v1958_v21 = vsel %vm1809_vm1, %v1931_v24, 160 }
 0x70a   :  { %vm1976_vm9 = vcmp.lt.s32.totalorder %v5978_v26, %v1957_v27  ;;  %vm1978_vm10 = vcmp.lt.s32.totalorder %v5981_v29, %v1958_v21 }
 0x70b   :  { %v6424_v28 = vsel %vm1976_vm9, %v5978_v26, %v1957_v27  ;;  %v6437_v26 = vsel %vm1978_vm10, %v5981_v29, %v1958_v21 }
 0x70c   :  { %v1933_v43 = vpop.permute.xlu1 %1932  ;;  %2107 = vrot.lane.b32.xlu0 %v6424_v28, %s4013_s21  ;;  %2104 = vrot.lane.b32.xlu1 %v6421_v22, %s4013_s21  ;;  %v1935_v44 = vpop.permute.xlu0 %1934 }
 0x70d   :  { %v1959_v52 = vsel %vm1809_vm1, %v1933_v43, 160  ;;  %v1960_v25 = vsel %vm1809_vm1, %v1935_v44, 160 }
 0x70e   :  { %vm1980_vm11 = vcmp.lt.s32.totalorder %v5994_v30, %v1959_v52  ;;  %vm1982_vm12 = vcmp.lt.s32.totalorder %v5997_v31, %v1960_v25 }
 0x70f   :  { %v6440_v53 = vsel %vm1980_vm11, %v5994_v30, %v1959_v52  ;;  %v6453_v30 = vsel %vm1982_vm12, %v5997_v31, %v1960_v25 }
 0x710   :  { %v1937_v55 = vpop.permute.xlu1 %1936  ;;  %2113 = vrot.lane.b32.xlu0 %v6440_v53, %s4013_s21  ;;  %2110 = vrot.lane.b32.xlu1 %v6437_v26, %s4013_s21  ;;  %v1939_v56 = vpop.permute.xlu0 %1938 }
 0x711   :  { %v1961_v11 = vsel %vm1809_vm1, %v1937_v55, 160  ;;  %v1962_v29 = vsel %vm1809_vm1, %v1939_v56, 160 }
 0x712   :  { %vm1984_vm13 = vcmp.lt.s32.totalorder %v6010_v32, %v1961_v11  ;;  %vm1986_vm14 = vcmp.lt.s32.totalorder %v6013_v34, %v1962_v29 }
 0x713   :  { %v6456_v58 = vsel %vm1984_vm13, %v6010_v32, %v1961_v11  ;;  %v6469_v32 = vsel %vm1986_vm14, %v6013_v34, %v1962_v29 }
 0x714   :  { %v1941_v47 = vpop.permute.xlu1 %1940  ;;  %2119 = vrot.lane.b32.xlu0 %v6456_v58, %s4013_s21  ;;  %2116 = vrot.lane.b32.xlu1 %v6453_v30, %s4013_s21  ;;  %v1943_v48 = vpop.permute.xlu0 %1942 }
 0x715   :  { %v1963_v61 = vsel %vm1809_vm1, %v1941_v47, 160  ;;  %v1964_v31 = vsel %vm1809_vm1, %v1943_v48, 160 }
 0x716   :  { %vm1988_vm15 = vcmp.lt.s32.totalorder %v6026_v35, %v1963_v61  ;;  %vm1990_vm2 = vcmp.lt.s32.totalorder %v6029_v36, %v1964_v31 }
 0x717   :  { %v6472_v41 = vsel %vm1988_vm15, %v6026_v35, %v1963_v61  ;;  %v6485_v35 = vsel %vm1990_vm2, %v6029_v36, %v1964_v31 }
 0x718   :  { %v1945_v42 = vpop.permute.xlu1 %1944  ;;  %2125 = vrot.lane.b32.xlu0 %v6472_v41, %s4013_s21  ;;  %2122 = vrot.lane.b32.xlu1 %v6469_v32, %s4013_s21  ;;  %v1947_v0 = vpop.permute.xlu0 %1946 }
 0x719   :  { %v1965_v49 = vsel %vm1809_vm1, %v1945_v42, 160  ;;  %v1966_v34 = vsel %vm1809_vm1, %v1947_v0, 160 }
 0x71a   :  { %vm1992_vm3 = vcmp.lt.s32.totalorder %v6042_v37, %v1965_v49  ;;  %vm1994_vm4 = vcmp.lt.s32.totalorder %v6045_v38, %v1966_v34 }
 0x71b   :  { %v6488_v2 = vsel %vm1992_vm3, %v6042_v37, %v1965_v49  ;;  %v6501_v37 = vsel %vm1994_vm4, %v6045_v38, %v1966_v34 }
 0x71c   :  { %v1949_v3 = vpop.permute.xlu1 %1948  ;;  %2131 = vrot.lane.b32.xlu0 %v6488_v2, %s4013_s21  ;;  %2128 = vrot.lane.b32.xlu1 %v6485_v35, %s4013_s21  ;;  %v1951_v50 = vpop.permute.xlu0 %1950 }
 0x71d   :  { %v1967_v7 = vsel %vm1809_vm1, %v1949_v3, 160  ;;  %v1968_v36 = vsel %vm1809_vm1, %v1951_v50, 160 }
 0x71e   :  { %vm1996_vm5 = vcmp.lt.s32.totalorder %v6058_v39, %v1967_v7  ;;  %vm1998_vm6 = vcmp.lt.s32.totalorder %v6061_v40, %v1968_v36 }
 0x71f   :  { %v6504_v45 = vsel %vm1996_vm5, %v6058_v39, %v1967_v7  ;;  %v6515_v38 = vsel %vm1998_vm6, %v6061_v40, %v1968_v36 }
 0x720   :  { %v1953_v46 = vpop.permute.xlu1 %1952  ;;  %2137 = vrot.lane.b32.xlu0 %v6504_v45, %s4013_s21  ;;  %2134 = vrot.lane.b32.xlu1 %v6501_v37, %s4013_s21 }
 0x721   :  { %v1969_v17 = vsel %vm1809_vm1, %v1953_v46, 160  ;;  %vm2194_vm1 = vcmp.lt.s32.totalorder %v4469_v51, 31 }
 0x722   :  { %vm2000_vm7 = vcmp.lt.s32.totalorder %v6071_v63, %v1969_v17 }
 0x723   :  { %v6518_v39 = vsel %vm2000_vm7, %v6071_v63, %v1969_v17 }
 0x724   :  { %2143 = vrot.lane.b32.xlu0 %v6518_v39, %s4013_s21  ;;  %2140 = vrot.lane.b32.xlu1 %v6515_v38, %s4013_s21 }
 0x756   :  { %v2003_v12 = vpop.permute.xlu0 %2002 }
 0x757   :  { %v2004_v16 = vsel %vm76_vm0, %v2003_v12, %v6272_v4 }
 0x758   :  { %2050 = vrot.lane.b32.xlu0 %v2004_v16, %s4013_s21 }
 0x75a   :  { %v2006_v19 = vpop.permute.xlu1 %2005  ;;  %v2009_v23 = vpop.permute.xlu0 %2008 }
 0x75b   :  { %v2007_v40 = vsel %vm76_vm0, %v2006_v19, %v6283_v15  ;;  %v2010_v63 = vsel %vm76_vm0, %v2009_v23, %v6286_v57 }
 0x75c   :  { %2052 = vrot.lane.b32.xlu1 %v2007_v40, %s4013_s21  ;;  %2054 = vrot.lane.b32.xlu0 %v2010_v63, %s4013_s21 }
 0x75e   :  { %v2012_v24 = vpop.permute.xlu1 %2011  ;;  %v2015_v27 = vpop.permute.xlu0 %2014 }
 0x75f   :  { %v2013_v21 = vsel %vm76_vm0, %v2012_v24, %v6299_v62  ;;  %v2016_v43 = vsel %vm76_vm0, %v2015_v27, %v6302_v20 }
 0x760   :  { %2056 = vrot.lane.b32.xlu1 %v2013_v21, %s4013_s21  ;;  %2058 = vrot.lane.b32.xlu0 %v2016_v43, %s4013_s21 }
 0x762   :  { %v2018_v44 = vpop.permute.xlu1 %2017  ;;  %v2021_v52 = vpop.permute.xlu0 %2020 }
 0x763   :  { %v2019_v25 = vsel %vm76_vm0, %v2018_v44, %v6315_v33  ;;  %v2022_v55 = vsel %vm76_vm0, %v2021_v52, %v6318_v1 }
 0x764   :  { %2060 = vrot.lane.b32.xlu1 %v2019_v25, %s4013_s21  ;;  %2062 = vrot.lane.b32.xlu0 %v2022_v55, %s4013_s21 }
 0x766   :  { %v2024_v56 = vpop.permute.xlu1 %2023  ;;  %v2027_v11 = vpop.permute.xlu0 %2026 }
 0x767   :  { %v2025_v29 = vsel %vm76_vm0, %v2024_v56, %v6331_v8  ;;  %v2028_v47 = vsel %vm76_vm0, %v2027_v11, %v6334_v54 }
 0x768   :  { %2064 = vrot.lane.b32.xlu1 %v2025_v29, %s4013_s21  ;;  %2066 = vrot.lane.b32.xlu0 %v2028_v47, %s4013_s21 }
 0x76a   :  { %v2030_v48 = vpop.permute.xlu1 %2029  ;;  %v2033_v61 = vpop.permute.xlu0 %2032 }
 0x76b   :  { %v2031_v31 = vsel %vm76_vm0, %v2030_v48, %v6347_v59  ;;  %v2034_v42 = vsel %vm76_vm0, %v2033_v61, %v6350_v5 }
 0x76c   :  { %2068 = vrot.lane.b32.xlu1 %v2031_v31, %s4013_s21  ;;  %2070 = vrot.lane.b32.xlu0 %v2034_v42, %s4013_s21 }
 0x76e   :  { %v2036_v0 = vpop.permute.xlu1 %2035  ;;  %v2039_v49 = vpop.permute.xlu0 %2038 }
 0x76f   :  { %v2037_v34 = vsel %vm76_vm0, %v2036_v0, %v6363_v6  ;;  %v2040_v3 = vsel %vm76_vm0, %v2039_v49, %v6366_v9 }
 0x770   :  { %2072 = vrot.lane.b32.xlu1 %v2037_v34, %s4013_s21  ;;  %2074 = vrot.lane.b32.xlu0 %v2040_v3, %s4013_s21 }
 0x772   :  { %v2042_v50 = vpop.permute.xlu1 %2041  ;;  %v2045_v7 = vpop.permute.xlu0 %2044 }
 0x773   :  { %v2043_v36 = vsel %vm76_vm0, %v2042_v50, %v6379_v10  ;;  %v2046_v46 = vsel %vm76_vm0, %v2045_v7, %v6382_v13 }
 0x774   :  { %2076 = vrot.lane.b32.xlu1 %v2043_v36, %s4013_s21  ;;  %2078 = vrot.lane.b32.xlu0 %v2046_v46, %s4013_s21 }
 0x776   :  { %v2048_v17 = vpop.permute.xlu1 %2047 }
 0x777   :  { %v2049_v12 = vsel %vm76_vm0, %v2048_v17, %v6394_v14 }
 0x778   :  { %2080 = vrot.lane.b32.xlu1 %v2049_v12, %s4013_s21 }
 0x77a   :  { %v2099_v16 = vpop.permute.xlu1 %2098  ;;  %v2102_v19 = vpop.permute.xlu0 %2101 }
 0x77b   :  { %v2100_v23 = vsel %vm76_vm0, %v2099_v16, %v6405_v60  ;;  %v2103_v40 = vsel %vm76_vm0, %v2102_v19, %v6408_v18 }
 0x77c   :  { %2146 = vrot.lane.b32.xlu0 %v2100_v23, %s4013_s21  ;;  %2148 = vrot.lane.b32.xlu1 %v2103_v40, %s4013_s21 }
 0x77e   :  { %v2105_v63 = vpop.permute.xlu1 %2104  ;;  %v2108_v24 = vpop.permute.xlu0 %2107 }
 0x77f   :  { %v2106_v27 = vsel %vm76_vm0, %v2105_v63, %v6421_v22  ;;  %v2109_v21 = vsel %vm76_vm0, %v2108_v24, %v6424_v28 }
 0x780   :  { %2150 = vrot.lane.b32.xlu0 %v2106_v27, %s4013_s21  ;;  %2152 = vrot.lane.b32.xlu1 %v2109_v21, %s4013_s21 }
 0x782   :  { %v2111_v43 = vpop.permute.xlu1 %2110  ;;  %v2114_v44 = vpop.permute.xlu0 %2113 }
 0x783   :  { %v2112_v52 = vsel %vm76_vm0, %v2111_v43, %v6437_v26  ;;  %v2115_v25 = vsel %vm76_vm0, %v2114_v44, %v6440_v53 }
 0x784   :  { %2154 = vrot.lane.b32.xlu0 %v2112_v52, %s4013_s21  ;;  %2156 = vrot.lane.b32.xlu1 %v2115_v25, %s4013_s21 }
 0x786   :  { %v2117_v55 = vpop.permute.xlu1 %2116  ;;  %v2120_v56 = vpop.permute.xlu0 %2119 }
 0x787   :  { %v2118_v11 = vsel %vm76_vm0, %v2117_v55, %v6453_v30  ;;  %v2121_v29 = vsel %vm76_vm0, %v2120_v56, %v6456_v58 }
 0x788   :  { %2158 = vrot.lane.b32.xlu0 %v2118_v11, %s4013_s21  ;;  %2160 = vrot.lane.b32.xlu1 %v2121_v29, %s4013_s21 }
 0x78a   :  { %v2123_v47 = vpop.permute.xlu1 %2122  ;;  %v2126_v48 = vpop.permute.xlu0 %2125 }
 0x78b   :  { %v2124_v61 = vsel %vm76_vm0, %v2123_v47, %v6469_v32  ;;  %v2127_v31 = vsel %vm76_vm0, %v2126_v48, %v6472_v41 }
 0x78c   :  { %2162 = vrot.lane.b32.xlu0 %v2124_v61, %s4013_s21  ;;  %2164 = vrot.lane.b32.xlu1 %v2127_v31, %s4013_s21 }
 0x78e   :  { %v2129_v42 = vpop.permute.xlu1 %2128  ;;  %v2132_v0 = vpop.permute.xlu0 %2131 }
 0x78f   :  { %v2130_v49 = vsel %vm76_vm0, %v2129_v42, %v6485_v35  ;;  %v2133_v34 = vsel %vm76_vm0, %v2132_v0, %v6488_v2 }
 0x790   :  { %2166 = vrot.lane.b32.xlu0 %v2130_v49, %s4013_s21  ;;  %2168 = vrot.lane.b32.xlu1 %v2133_v34, %s4013_s21 }
 0x792   :  { %v2135_v3 = vpop.permute.xlu1 %2134  ;;  %v2138_v50 = vpop.permute.xlu0 %2137 }
 0x793   :  { %v2136_v7 = vsel %vm76_vm0, %v2135_v3, %v6501_v37  ;;  %v2139_v36 = vsel %vm76_vm0, %v2138_v50, %v6504_v45 }
 0x794   :  { %2170 = vrot.lane.b32.xlu0 %v2136_v7, %s4013_s21  ;;  %2172 = vrot.lane.b32.xlu1 %v2139_v36, %s4013_s21 }
 0x796   :  { %v2141_v46 = vpop.permute.xlu1 %2140  ;;  %v2144_v17 = vpop.permute.xlu0 %2143 }
 0x797   :  { %v2142_v12 = vsel %vm76_vm0, %v2141_v46, %v6515_v38  ;;  %v2145_v16 = vsel %vm76_vm0, %v2144_v17, %v6518_v39 }
 0x798   :  { %2174 = vrot.lane.b32.xlu0 %v2142_v12, %s4013_s21  ;;  %2176 = vrot.lane.b32.xlu1 %v2145_v16, %s4013_s21 }
 0x7ca   :  { %v2051_v19 = vpop.permute.xlu0 %2050 }
 0x7cb   :  { %v2082_v23 = vsel %vm76_vm0, %v2051_v19, %v6272_v4 }
 0x7cc   :  { %v2195_v40 = vadd.s32 1, %v2082_v23 }
 0x7ce   :  { %v2053_v63 = vpop.permute.xlu1 %2052  ;;  %2211 = vrot.lane.b32.xlu0 %v2195_v40, %s4020_s18  ;;  %v2055_v24 = vpop.permute.xlu0 %2054 }
 0x7cf   :  { %v2083_v27 = vsel %vm76_vm0, %v2053_v63, %v6283_v15  ;;  %v2084_v21 = vsel %vm76_vm0, %v2055_v24, %v6286_v57 }
 0x7d0   :  { %v2196_v43 = vadd.s32 1, %v2083_v27  ;;  %v2197_v44 = vadd.s32 1, %v2084_v21 }
 0x7d2   :  { %v2057_v52 = vpop.permute.xlu1 %2056  ;;  %2213 = vrot.lane.b32.xlu1 %v2196_v43, %s4020_s18  ;;  %2215 = vrot.lane.b32.xlu0 %v2197_v44, %s4020_s18  ;;  %v2059_v25 = vpop.permute.xlu0 %2058 }
 0x7d3   :  { %v2085_v55 = vsel %vm76_vm0, %v2057_v52, %v6299_v62  ;;  %v2086_v56 = vsel %vm76_vm0, %v2059_v25, %v6302_v20 }
 0x7d4   :  { %v2198_v11 = vadd.s32 1, %v2085_v55  ;;  %v2199_v29 = vadd.s32 1, %v2086_v56 }
 0x7d6   :  { %v2061_v47 = vpop.permute.xlu1 %2060  ;;  %2217 = vrot.lane.b32.xlu1 %v2198_v11, %s4020_s18  ;;  %2219 = vrot.lane.b32.xlu0 %v2199_v29, %s4020_s18  ;;  %v2063_v48 = vpop.permute.xlu0 %2062 }
 0x7d7   :  { %v2087_v61 = vsel %vm76_vm0, %v2061_v47, %v6315_v33  ;;  %v2088_v31 = vsel %vm76_vm0, %v2063_v48, %v6318_v1 }
 0x7d8   :  { %v2200_v42 = vadd.s32 1, %v2087_v61  ;;  %v2201_v0 = vadd.s32 1, %v2088_v31 }
 0x7da   :  { %v2065_v49 = vpop.permute.xlu1 %2064  ;;  %2221 = vrot.lane.b32.xlu1 %v2200_v42, %s4020_s18  ;;  %2223 = vrot.lane.b32.xlu0 %v2201_v0, %s4020_s18  ;;  %v2067_v34 = vpop.permute.xlu0 %2066 }
 0x7db   :  { %v2089_v3 = vsel %vm76_vm0, %v2065_v49, %v6331_v8  ;;  %v2090_v50 = vsel %vm76_vm0, %v2067_v34, %v6334_v54 }
 0x7dc   :  { %v2202_v7 = vadd.s32 1, %v2089_v3  ;;  %v2203_v36 = vadd.s32 1, %v2090_v50 }
 0x7de   :  { %v2069_v46 = vpop.permute.xlu1 %2068  ;;  %2225 = vrot.lane.b32.xlu1 %v2202_v7, %s4020_s18  ;;  %2227 = vrot.lane.b32.xlu0 %v2203_v36, %s4020_s18  ;;  %v2071_v17 = vpop.permute.xlu0 %2070 }
 0x7df   :  { %v2091_v12 = vsel %vm76_vm0, %v2069_v46, %v6347_v59  ;;  %v2092_v16 = vsel %vm76_vm0, %v2071_v17, %v6350_v5 }
 0x7e0   :  { %v2204_v19 = vadd.s32 1, %v2091_v12  ;;  %v2205_v23 = vadd.s32 1, %v2092_v16 }
 0x7e2   :  { %v2073_v40 = vpop.permute.xlu1 %2072  ;;  %2229 = vrot.lane.b32.xlu1 %v2204_v19, %s4020_s18  ;;  %2231 = vrot.lane.b32.xlu0 %v2205_v23, %s4020_s18  ;;  %v2075_v63 = vpop.permute.xlu0 %2074 }
 0x7e3   :  { %v2093_v24 = vsel %vm76_vm0, %v2073_v40, %v6363_v6  ;;  %v2094_v27 = vsel %vm76_vm0, %v2075_v63, %v6366_v9 }
 0x7e4   :  { %v2206_v21 = vadd.s32 1, %v2093_v24  ;;  %v2207_v43 = vadd.s32 1, %v2094_v27 }
 0x7e6   :  { %v2077_v44 = vpop.permute.xlu1 %2076  ;;  %2233 = vrot.lane.b32.xlu1 %v2206_v21, %s4020_s18  ;;  %2235 = vrot.lane.b32.xlu0 %v2207_v43, %s4020_s18  ;;  %v2079_v52 = vpop.permute.xlu0 %2078 }
 0x7e7   :  { %v2095_v25 = vsel %vm76_vm0, %v2077_v44, %v6379_v10  ;;  %v2096_v55 = vsel %vm76_vm0, %v2079_v52, %v6382_v13 }
 0x7e8   :  { %v2208_v56 = vadd.s32 1, %v2095_v25  ;;  %v2209_v11 = vadd.s32 1, %v2096_v55 }
 0x7ea   :  { %v2081_v29 = vpop.permute.xlu1 %2080  ;;  %2237 = vrot.lane.b32.xlu1 %v2208_v56, %s4020_s18  ;;  %2239 = vrot.lane.b32.xlu0 %v2209_v11, %s4020_s18 }
 0x7eb   :  { %v2097_v47 = vsel %vm76_vm0, %v2081_v29, %v6394_v14 }
 0x7ec   :  { %v2210_v48 = vadd.s32 1, %v2097_v47 }
 0x7ee   :  { %v2149_v61 = vpop.permute.xlu1 %2148  ;;  %2241 = vrot.lane.b32.xlu1 %v2210_v48, %s4020_s18  ;;  %v2147_v31 = vpop.permute.xlu0 %2146 }
 0x7ef   :  { %v2179_v42 = vsel %vm76_vm0, %v2149_v61, %v6408_v18  ;;  %v2178_v0 = vsel %vm76_vm0, %v2147_v31, %v6405_v60 }
 0x7f0   :  { %v2292_v49 = vadd.s32 1, %v2179_v42  ;;  %v2291_v34 = vadd.s32 1, %v2178_v0 }
 0x7f2   :  { %v2153_v3 = vpop.permute.xlu1 %2152  ;;  %2309 = vrot.lane.b32.xlu1 %v2292_v49, %s4020_s18  ;;  %2307 = vrot.lane.b32.xlu0 %v2291_v34, %s4020_s18  ;;  %v2151_v50 = vpop.permute.xlu0 %2150 }
 0x7f3   :  { %v2181_v7 = vsel %vm76_vm0, %v2153_v3, %v6424_v28  ;;  %v2180_v36 = vsel %vm76_vm0, %v2151_v50, %v6421_v22 }
 0x7f4   :  { %v2294_v46 = vadd.s32 1, %v2181_v7  ;;  %v2293_v17 = vadd.s32 1, %v2180_v36 }
 0x7f6   :  { %v2157_v12 = vpop.permute.xlu1 %2156  ;;  %2313 = vrot.lane.b32.xlu1 %v2294_v46, %s4020_s18  ;;  %2311 = vrot.lane.b32.xlu0 %v2293_v17, %s4020_s18  ;;  %v2155_v16 = vpop.permute.xlu0 %2154 }
 0x7f7   :  { %v2183_v19 = vsel %vm76_vm0, %v2157_v12, %v6440_v53  ;;  %v2182_v23 = vsel %vm76_vm0, %v2155_v16, %v6437_v26 }
 0x7f8   :  { %v2296_v40 = vadd.s32 1, %v2183_v19  ;;  %v2295_v63 = vadd.s32 1, %v2182_v23 }
 0x7fa   :  { %v2161_v24 = vpop.permute.xlu1 %2160  ;;  %2317 = vrot.lane.b32.xlu1 %v2296_v40, %s4020_s18  ;;  %2315 = vrot.lane.b32.xlu0 %v2295_v63, %s4020_s18  ;;  %v2159_v27 = vpop.permute.xlu0 %2158 }
 0x7fb   :  { %v2185_v21 = vsel %vm76_vm0, %v2161_v24, %v6456_v58  ;;  %v2184_v43 = vsel %vm76_vm0, %v2159_v27, %v6453_v30 }
 0x7fc   :  { %v2298_v44 = vadd.s32 1, %v2185_v21  ;;  %v2297_v52 = vadd.s32 1, %v2184_v43 }
 0x7fe   :  { %v2165_v25 = vpop.permute.xlu1 %2164  ;;  %2321 = vrot.lane.b32.xlu1 %v2298_v44, %s4020_s18  ;;  %2319 = vrot.lane.b32.xlu0 %v2297_v52, %s4020_s18  ;;  %v2163_v55 = vpop.permute.xlu0 %2162 }
 0x7ff   :  { %v2187_v56 = vsel %vm76_vm0, %v2165_v25, %v6472_v41  ;;  %v2186_v11 = vsel %vm76_vm0, %v2163_v55, %v6469_v32 }
 0x800   :  { %v2300_v29 = vadd.s32 1, %v2187_v56  ;;  %v2299_v47 = vadd.s32 1, %v2186_v11 }
 0x802   :  { %v2169_v48 = vpop.permute.xlu1 %2168  ;;  %2325 = vrot.lane.b32.xlu1 %v2300_v29, %s4020_s18  ;;  %2323 = vrot.lane.b32.xlu0 %v2299_v47, %s4020_s18  ;;  %v2167_v61 = vpop.permute.xlu0 %2166 }
 0x803   :  { %v2189_v31 = vsel %vm76_vm0, %v2169_v48, %v6488_v2  ;;  %v2188_v42 = vsel %vm76_vm0, %v2167_v61, %v6485_v35 }
 0x804   :  { %v2302_v0 = vadd.s32 1, %v2189_v31  ;;  %v2301_v49 = vadd.s32 1, %v2188_v42 }
 0x806   :  { %v2173_v34 = vpop.permute.xlu1 %2172  ;;  %2329 = vrot.lane.b32.xlu1 %v2302_v0, %s4020_s18  ;;  %2327 = vrot.lane.b32.xlu0 %v2301_v49, %s4020_s18  ;;  %v2171_v3 = vpop.permute.xlu0 %2170 }
 0x807   :  { %v2191_v50 = vsel %vm76_vm0, %v2173_v34, %v6504_v45  ;;  %v2190_v7 = vsel %vm76_vm0, %v2171_v3, %v6501_v37 }
 0x808   :  { %v2304_v36 = vadd.s32 1, %v2191_v50  ;;  %v2303_v46 = vadd.s32 1, %v2190_v7 }
 0x80a   :  { %2333 = vrot.lane.b32.xlu1 %v2304_v36, %s4020_s18  ;;  %v2177_v17 = vpop.permute.xlu1 %2176  ;;  %2331 = vrot.lane.b32.xlu0 %v2303_v46, %s4020_s18  ;;  %v2175_v12 = vpop.permute.xlu0 %2174 }
 0x80b   :  { %v2193_v16 = vsel %vm76_vm0, %v2177_v17, %v6518_v39  ;;  %v2192_v19 = vsel %vm76_vm0, %v2175_v12, %v6515_v38 }
 0x80c   :  { %v2306_v23 = vadd.s32 1, %v2193_v16  ;;  %v2305_v40 = vadd.s32 1, %v2192_v19 }
 0x80e   :  { %2337 = vrot.lane.b32.xlu1 %v2306_v23, %s4020_s18  ;;  %2335 = vrot.lane.b32.xlu0 %v2305_v40, %s4020_s18 }
 0x840   :  { %v2212_v63 = vpop.permute.xlu0 %2211 }
 0x841   :  { %v2243_v24 = vsel %vm2194_vm1, %v2212_v63, 160 }
 0x842   :  { %vm2259_vm8 = vcmp.lt.s32.totalorder %v6272_v4, %v2243_v24 }
 0x843   :  { %v6721_v27 = vsel %vm2259_vm8, %v6272_v4, %v2243_v24 }
 0x844   :  { %v2214_v21 = vpop.permute.xlu1 %2213  ;;  %2387 = vrot.lane.b32.xlu0 %v6721_v27, %s4013_s21  ;;  %v2216_v43 = vpop.permute.xlu0 %2215 }
 0x845   :  { %v2244_v44 = vsel %vm2194_vm1, %v2214_v21, 160  ;;  %v2245_v52 = vsel %vm2194_vm1, %v2216_v43, 160 }
 0x846   :  { %vm2261_vm9 = vcmp.lt.s32.totalorder %v6283_v15, %v2244_v44  ;;  %vm2263_vm10 = vcmp.lt.s32.totalorder %v6286_v57, %v2245_v52 }
 0x847   :  { %v6732_v25 = vsel %vm2261_vm9, %v6283_v15, %v2244_v44  ;;  %v6735_v4 = vsel %vm2263_vm10, %v6286_v57, %v2245_v52 }
 0x848   :  { %2390 = vrot.lane.b32.xlu1 %v6732_v25, %s4013_s21  ;;  %v2218_v55 = vpop.permute.xlu1 %2217  ;;  %2393 = vrot.lane.b32.xlu0 %v6735_v4, %s4013_s21  ;;  %v2220_v56 = vpop.permute.xlu0 %2219 }
 0x849   :  { %v2246_v11 = vsel %vm2194_vm1, %v2218_v55, 160  ;;  %v2247_v29 = vsel %vm2194_vm1, %v2220_v56, 160 }
 0x84a   :  { %vm2265_vm11 = vcmp.lt.s32.totalorder %v6299_v62, %v2246_v11  ;;  %vm2267_vm12 = vcmp.lt.s32.totalorder %v6302_v20, %v2247_v29 }
 0x84b   :  { %v6748_v15 = vsel %vm2265_vm11, %v6299_v62, %v2246_v11  ;;  %v6751_v57 = vsel %vm2267_vm12, %v6302_v20, %v2247_v29 }
 0x84c   :  { %2396 = vrot.lane.b32.xlu1 %v6748_v15, %s4013_s21  ;;  %v2222_v47 = vpop.permute.xlu1 %2221  ;;  %2399 = vrot.lane.b32.xlu0 %v6751_v57, %s4013_s21  ;;  %v2224_v48 = vpop.permute.xlu0 %2223 }
 0x84d   :  { %v2248_v61 = vsel %vm2194_vm1, %v2222_v47, 160  ;;  %v2249_v31 = vsel %vm2194_vm1, %v2224_v48, 160 }
 0x84e   :  { %vm2269_vm13 = vcmp.lt.s32.totalorder %v6315_v33, %v2248_v61  ;;  %vm2271_vm14 = vcmp.lt.s32.totalorder %v6318_v1, %v2249_v31 }
 0x84f   :  { %v6764_v62 = vsel %vm2269_vm13, %v6315_v33, %v2248_v61  ;;  %v6767_v20 = vsel %vm2271_vm14, %v6318_v1, %v2249_v31 }
 0x850   :  { %2402 = vrot.lane.b32.xlu1 %v6764_v62, %s4013_s21  ;;  %v2226_v42 = vpop.permute.xlu1 %2225  ;;  %2405 = vrot.lane.b32.xlu0 %v6767_v20, %s4013_s21  ;;  %v2228_v0 = vpop.permute.xlu0 %2227 }
 0x851   :  { %v2250_v49 = vsel %vm2194_vm1, %v2226_v42, 160  ;;  %v2251_v34 = vsel %vm2194_vm1, %v2228_v0, 160 }
 0x852   :  { %vm2273_vm15 = vcmp.lt.s32.totalorder %v6331_v8, %v2250_v49  ;;  %vm2275_vm2 = vcmp.lt.s32.totalorder %v6334_v54, %v2251_v34 }
 0x853   :  { %v6780_v33 = vsel %vm2273_vm15, %v6331_v8, %v2250_v49  ;;  %v6783_v1 = vsel %vm2275_vm2, %v6334_v54, %v2251_v34 }
 0x854   :  { %2408 = vrot.lane.b32.xlu1 %v6780_v33, %s4013_s21  ;;  %v2230_v3 = vpop.permute.xlu1 %2229  ;;  %2411 = vrot.lane.b32.xlu0 %v6783_v1, %s4013_s21  ;;  %v2232_v50 = vpop.permute.xlu0 %2231 }
 0x855   :  { %v2252_v7 = vsel %vm2194_vm1, %v2230_v3, 160  ;;  %v2253_v36 = vsel %vm2194_vm1, %v2232_v50, 160 }
 0x856   :  { %vm2277_vm3 = vcmp.lt.s32.totalorder %v6347_v59, %v2252_v7  ;;  %vm2279_vm4 = vcmp.lt.s32.totalorder %v6350_v5, %v2253_v36 }
 0x857   :  { %v6796_v8 = vsel %vm2277_vm3, %v6347_v59, %v2252_v7  ;;  %v6799_v54 = vsel %vm2279_vm4, %v6350_v5, %v2253_v36 }
 0x858   :  { %2414 = vrot.lane.b32.xlu1 %v6796_v8, %s4013_s21  ;;  %v2234_v46 = vpop.permute.xlu1 %2233  ;;  %2417 = vrot.lane.b32.xlu0 %v6799_v54, %s4013_s21  ;;  %v2236_v17 = vpop.permute.xlu0 %2235 }
 0x859   :  { %v2254_v12 = vsel %vm2194_vm1, %v2234_v46, 160  ;;  %v2255_v16 = vsel %vm2194_vm1, %v2236_v17, 160 }
 0x85a   :  { %vm2281_vm5 = vcmp.lt.s32.totalorder %v6363_v6, %v2254_v12  ;;  %vm2283_vm6 = vcmp.lt.s32.totalorder %v6366_v9, %v2255_v16 }
 0x85b   :  { %v6812_v59 = vsel %vm2281_vm5, %v6363_v6, %v2254_v12  ;;  %v6815_v5 = vsel %vm2283_vm6, %v6366_v9, %v2255_v16 }
 0x85c   :  { %2420 = vrot.lane.b32.xlu1 %v6812_v59, %s4013_s21  ;;  %v2238_v19 = vpop.permute.xlu1 %2237  ;;  %2423 = vrot.lane.b32.xlu0 %v6815_v5, %s4013_s21  ;;  %v2240_v23 = vpop.permute.xlu0 %2239 }
 0x85d   :  { %v2256_v40 = vsel %vm2194_vm1, %v2238_v19, 160  ;;  %v2257_v63 = vsel %vm2194_vm1, %v2240_v23, 160 }
 0x85e   :  { %vm2285_vm7 = vcmp.lt.s32.totalorder %v6379_v10, %v2256_v40  ;;  %vm2287_vm8 = vcmp.lt.s32.totalorder %v6382_v13, %v2257_v63 }
 0x85f   :  { %v6828_v6 = vsel %vm2285_vm7, %v6379_v10, %v2256_v40  ;;  %v6831_v9 = vsel %vm2287_vm8, %v6382_v13, %v2257_v63 }
 0x860   :  { %2426 = vrot.lane.b32.xlu1 %v6828_v6, %s4013_s21  ;;  %v2242_v24 = vpop.permute.xlu1 %2241  ;;  %2429 = vrot.lane.b32.xlu0 %v6831_v9, %s4013_s21 }
 0x861   :  { %v2258_v21 = vsel %vm2194_vm1, %v2242_v24, 160 }
 0x862   :  { %vm2289_vm9 = vcmp.lt.s32.totalorder %v6394_v14, %v2258_v21 }
 0x863   :  { %v6841_v43 = vsel %vm2289_vm9, %v6394_v14, %v2258_v21 }
 0x864   :  { %2432 = vrot.lane.b32.xlu1 %v6841_v43, %s4013_s21  ;;  %v2310_v10 = vpop.permute.xlu1 %2309  ;;  %v2308_v13 = vpop.permute.xlu0 %2307 }
 0x865   :  { %v2340_v44 = vsel %vm2194_vm1, %v2310_v10, 160  ;;  %v2339_v52 = vsel %vm2194_vm1, %v2308_v13, 160 }
 0x866   :  { %vm2357_vm10 = vcmp.lt.s32.totalorder %v6408_v18, %v2340_v44  ;;  %vm2355_vm11 = vcmp.lt.s32.totalorder %v6405_v60, %v2339_v52 }
 0x867   :  { %v6852_v55 = vsel %vm2357_vm10, %v6408_v18, %v2340_v44  ;;  %v6855_v14 = vsel %vm2355_vm11, %v6405_v60, %v2339_v52 }
 0x868   :  { %v2314_v56 = vpop.permute.xlu1 %2313  ;;  %2486 = vrot.lane.b32.xlu0 %v6852_v55, %s4013_s21  ;;  %2483 = vrot.lane.b32.xlu1 %v6855_v14, %s4013_s21  ;;  %v2312_v11 = vpop.permute.xlu0 %2311 }
 0x869   :  { %v2342_v29 = vsel %vm2194_vm1, %v2314_v56, 160  ;;  %v2341_v47 = vsel %vm2194_vm1, %v2312_v11, 160 }
 0x86a   :  { %vm2361_vm12 = vcmp.lt.s32.totalorder %v6424_v28, %v2342_v29  ;;  %vm2359_vm13 = vcmp.lt.s32.totalorder %v6421_v22, %v2341_v47 }
 0x86b   :  { %v6868_v60 = vsel %vm2361_vm12, %v6424_v28, %v2342_v29  ;;  %v6871_v18 = vsel %vm2359_vm13, %v6421_v22, %v2341_v47 }
 0x86c   :  { %v2318_v48 = vpop.permute.xlu1 %2317  ;;  %2492 = vrot.lane.b32.xlu0 %v6868_v60, %s4013_s21  ;;  %2489 = vrot.lane.b32.xlu1 %v6871_v18, %s4013_s21  ;;  %v2316_v61 = vpop.permute.xlu0 %2315 }
 0x86d   :  { %v2344_v31 = vsel %vm2194_vm1, %v2318_v48, 160  ;;  %v2343_v42 = vsel %vm2194_vm1, %v2316_v61, 160 }
 0x86e   :  { %vm2365_vm14 = vcmp.lt.s32.totalorder %v6440_v53, %v2344_v31  ;;  %vm2363_vm15 = vcmp.lt.s32.totalorder %v6437_v26, %v2343_v42 }
 0x86f   :  { %v6884_v22 = vsel %vm2365_vm14, %v6440_v53, %v2344_v31  ;;  %v6887_v28 = vsel %vm2363_vm15, %v6437_v26, %v2343_v42 }
 0x870   :  { %v2322_v0 = vpop.permute.xlu1 %2321  ;;  %2498 = vrot.lane.b32.xlu0 %v6884_v22, %s4013_s21  ;;  %2495 = vrot.lane.b32.xlu1 %v6887_v28, %s4013_s21  ;;  %v2320_v49 = vpop.permute.xlu0 %2319 }
 0x871   :  { %v2346_v34 = vsel %vm2194_vm1, %v2322_v0, 160  ;;  %v2345_v3 = vsel %vm2194_vm1, %v2320_v49, 160 }
 0x872   :  { %vm2369_vm2 = vcmp.lt.s32.totalorder %v6456_v58, %v2346_v34  ;;  %vm2367_vm3 = vcmp.lt.s32.totalorder %v6453_v30, %v2345_v3 }
 0x873   :  { %v6900_v26 = vsel %vm2369_vm2, %v6456_v58, %v2346_v34  ;;  %v6903_v53 = vsel %vm2367_vm3, %v6453_v30, %v2345_v3 }
 0x874   :  { %v2326_v50 = vpop.permute.xlu1 %2325  ;;  %2504 = vrot.lane.b32.xlu0 %v6900_v26, %s4013_s21  ;;  %2501 = vrot.lane.b32.xlu1 %v6903_v53, %s4013_s21  ;;  %v2324_v7 = vpop.permute.xlu0 %2323 }
 0x875   :  { %v2348_v36 = vsel %vm2194_vm1, %v2326_v50, 160  ;;  %v2347_v46 = vsel %vm2194_vm1, %v2324_v7, 160 }
 0x876   :  { %vm2373_vm4 = vcmp.lt.s32.totalorder %v6472_v41, %v2348_v36  ;;  %vm2371_vm5 = vcmp.lt.s32.totalorder %v6469_v32, %v2347_v46 }
 0x877   :  { %v6916_v30 = vsel %vm2373_vm4, %v6472_v41, %v2348_v36  ;;  %v6919_v58 = vsel %vm2371_vm5, %v6469_v32, %v2347_v46 }
 0x878   :  { %v2330_v17 = vpop.permute.xlu1 %2329  ;;  %2510 = vrot.lane.b32.xlu0 %v6916_v30, %s4013_s21  ;;  %2507 = vrot.lane.b32.xlu1 %v6919_v58, %s4013_s21  ;;  %v2328_v12 = vpop.permute.xlu0 %2327 }
 0x879   :  { %v2350_v16 = vsel %vm2194_vm1, %v2330_v17, 160  ;;  %v2349_v19 = vsel %vm2194_vm1, %v2328_v12, 160 }
 0x87a   :  { %vm2377_vm6 = vcmp.lt.s32.totalorder %v6488_v2, %v2350_v16  ;;  %vm2375_vm7 = vcmp.lt.s32.totalorder %v6485_v35, %v2349_v19 }
 0x87b   :  { %v6932_v32 = vsel %vm2377_vm6, %v6488_v2, %v2350_v16  ;;  %v6935_v41 = vsel %vm2375_vm7, %v6485_v35, %v2349_v19 }
 0x87c   :  { %v2334_v23 = vpop.permute.xlu1 %2333  ;;  %2516 = vrot.lane.b32.xlu0 %v6932_v32, %s4013_s21  ;;  %2513 = vrot.lane.b32.xlu1 %v6935_v41, %s4013_s21  ;;  %v2332_v40 = vpop.permute.xlu0 %2331 }
 0x87d   :  { %v2352_v63 = vsel %vm2194_vm1, %v2334_v23, 160  ;;  %v2351_v24 = vsel %vm2194_vm1, %v2332_v40, 160 }
 0x87e   :  { %vm2381_vm8 = vcmp.lt.s32.totalorder %v6504_v45, %v2352_v63  ;;  %vm2379_vm9 = vcmp.lt.s32.totalorder %v6501_v37, %v2351_v24 }
 0x87f   :  { %v6948_v35 = vsel %vm2381_vm8, %v6504_v45, %v2352_v63  ;;  %v6951_v2 = vsel %vm2379_vm9, %v6501_v37, %v2351_v24 }
 0x880   :  { %v2338_v21 = vpop.permute.xlu1 %2337  ;;  %2522 = vrot.lane.b32.xlu0 %v6948_v35, %s4013_s21  ;;  %2519 = vrot.lane.b32.xlu1 %v6951_v2, %s4013_s21  ;;  %v2336_v10 = vpop.permute.xlu0 %2335 }
 0x881   :  { %v2354_v13 = vsel %vm2194_vm1, %v2338_v21, 160  ;;  %v2353_v44 = vsel %vm2194_vm1, %v2336_v10, 160  ;;  %vm2579_vm1 = vcmp.lt.s32.totalorder %v4469_v51, 30 }
 0x882   :  { %vm2385_vm10 = vcmp.lt.s32.totalorder %v6518_v39, %v2354_v13  ;;  %vm2383_vm11 = vcmp.lt.s32.totalorder %v6515_v38, %v2353_v44 }
 0x883   :  { %v6964_v37 = vsel %vm2385_vm10, %v6518_v39, %v2354_v13  ;;  %v6967_v45 = vsel %vm2383_vm11, %v6515_v38, %v2353_v44 }
 0x884   :  { %2528 = vrot.lane.b32.xlu0 %v6964_v37, %s4013_s21  ;;  %2525 = vrot.lane.b32.xlu1 %v6967_v45, %s4013_s21 }
 0x8b6   :  { %v2388_v52 = vpop.permute.xlu0 %2387 }
 0x8b7   :  { %v2389_v56 = vsel %vm76_vm0, %v2388_v52, %v6721_v27 }
 0x8b8   :  { %2435 = vrot.lane.b32.xlu0 %v2389_v56, %s4013_s21 }
 0x8ba   :  { %v2391_v11 = vpop.permute.xlu1 %2390  ;;  %v2394_v29 = vpop.permute.xlu0 %2393 }
 0x8bb   :  { %v2392_v39 = vsel %vm76_vm0, %v2391_v11, %v6732_v25  ;;  %v2395_v38 = vsel %vm76_vm0, %v2394_v29, %v6735_v4 }
 0x8bc   :  { %2437 = vrot.lane.b32.xlu1 %v2392_v39, %s4013_s21  ;;  %2439 = vrot.lane.b32.xlu0 %v2395_v38, %s4013_s21 }
 0x8be   :  { %v2397_v47 = vpop.permute.xlu1 %2396  ;;  %v2400_v48 = vpop.permute.xlu0 %2399 }
 0x8bf   :  { %v2398_v61 = vsel %vm76_vm0, %v2397_v47, %v6748_v15  ;;  %v2401_v31 = vsel %vm76_vm0, %v2400_v48, %v6751_v57 }
 0x8c0   :  { %2441 = vrot.lane.b32.xlu1 %v2398_v61, %s4013_s21  ;;  %2443 = vrot.lane.b32.xlu0 %v2401_v31, %s4013_s21 }
 0x8c2   :  { %v2403_v42 = vpop.permute.xlu1 %2402  ;;  %v2406_v0 = vpop.permute.xlu0 %2405 }
 0x8c3   :  { %v2404_v49 = vsel %vm76_vm0, %v2403_v42, %v6764_v62  ;;  %v2407_v34 = vsel %vm76_vm0, %v2406_v0, %v6767_v20 }
 0x8c4   :  { %2445 = vrot.lane.b32.xlu1 %v2404_v49, %s4013_s21  ;;  %2447 = vrot.lane.b32.xlu0 %v2407_v34, %s4013_s21 }
 0x8c6   :  { %v2409_v3 = vpop.permute.xlu1 %2408  ;;  %v2412_v50 = vpop.permute.xlu0 %2411 }
 0x8c7   :  { %v2410_v7 = vsel %vm76_vm0, %v2409_v3, %v6780_v33  ;;  %v2413_v36 = vsel %vm76_vm0, %v2412_v50, %v6783_v1 }
 0x8c8   :  { %2449 = vrot.lane.b32.xlu1 %v2410_v7, %s4013_s21  ;;  %2451 = vrot.lane.b32.xlu0 %v2413_v36, %s4013_s21 }
 0x8ca   :  { %v2415_v46 = vpop.permute.xlu1 %2414  ;;  %v2418_v17 = vpop.permute.xlu0 %2417 }
 0x8cb   :  { %v2416_v12 = vsel %vm76_vm0, %v2415_v46, %v6796_v8  ;;  %v2419_v16 = vsel %vm76_vm0, %v2418_v17, %v6799_v54 }
 0x8cc   :  { %2453 = vrot.lane.b32.xlu1 %v2416_v12, %s4013_s21  ;;  %2455 = vrot.lane.b32.xlu0 %v2419_v16, %s4013_s21 }
 0x8ce   :  { %v2421_v19 = vpop.permute.xlu1 %2420  ;;  %v2424_v23 = vpop.permute.xlu0 %2423 }
 0x8cf   :  { %v2422_v40 = vsel %vm76_vm0, %v2421_v19, %v6812_v59  ;;  %v2425_v63 = vsel %vm76_vm0, %v2424_v23, %v6815_v5 }
 0x8d0   :  { %2457 = vrot.lane.b32.xlu1 %v2422_v40, %s4013_s21  ;;  %2459 = vrot.lane.b32.xlu0 %v2425_v63, %s4013_s21 }
 0x8d2   :  { %v2427_v24 = vpop.permute.xlu1 %2426  ;;  %v2430_v21 = vpop.permute.xlu0 %2429 }
 0x8d3   :  { %v2428_v10 = vsel %vm76_vm0, %v2427_v24, %v6828_v6  ;;  %v2431_v13 = vsel %vm76_vm0, %v2430_v21, %v6831_v9 }
 0x8d4   :  { %2461 = vrot.lane.b32.xlu1 %v2428_v10, %s4013_s21  ;;  %2463 = vrot.lane.b32.xlu0 %v2431_v13, %s4013_s21 }
 0x8d6   :  { %v2433_v44 = vpop.permute.xlu1 %2432 }
 0x8d7   :  { %v2434_v52 = vsel %vm76_vm0, %v2433_v44, %v6841_v43 }
 0x8d8   :  { %2465 = vrot.lane.b32.xlu1 %v2434_v52, %s4013_s21 }
 0x8da   :  { %v2484_v56 = vpop.permute.xlu1 %2483  ;;  %v2487_v11 = vpop.permute.xlu0 %2486 }
 0x8db   :  { %v2485_v29 = vsel %vm76_vm0, %v2484_v56, %v6855_v14  ;;  %v2488_v39 = vsel %vm76_vm0, %v2487_v11, %v6852_v55 }
 0x8dc   :  { %2531 = vrot.lane.b32.xlu0 %v2485_v29, %s4013_s21  ;;  %2533 = vrot.lane.b32.xlu1 %v2488_v39, %s4013_s21 }
 0x8de   :  { %v2490_v38 = vpop.permute.xlu1 %2489  ;;  %v2493_v47 = vpop.permute.xlu0 %2492 }
 0x8df   :  { %v2491_v48 = vsel %vm76_vm0, %v2490_v38, %v6871_v18  ;;  %v2494_v61 = vsel %vm76_vm0, %v2493_v47, %v6868_v60 }
 0x8e0   :  { %2535 = vrot.lane.b32.xlu0 %v2491_v48, %s4013_s21  ;;  %2537 = vrot.lane.b32.xlu1 %v2494_v61, %s4013_s21 }
 0x8e2   :  { %v2496_v31 = vpop.permute.xlu1 %2495  ;;  %v2499_v42 = vpop.permute.xlu0 %2498 }
 0x8e3   :  { %v2497_v0 = vsel %vm76_vm0, %v2496_v31, %v6887_v28  ;;  %v2500_v49 = vsel %vm76_vm0, %v2499_v42, %v6884_v22 }
 0x8e4   :  { %2539 = vrot.lane.b32.xlu0 %v2497_v0, %s4013_s21  ;;  %2541 = vrot.lane.b32.xlu1 %v2500_v49, %s4013_s21 }
 0x8e6   :  { %v2502_v34 = vpop.permute.xlu1 %2501  ;;  %v2505_v3 = vpop.permute.xlu0 %2504 }
 0x8e7   :  { %v2503_v50 = vsel %vm76_vm0, %v2502_v34, %v6903_v53  ;;  %v2506_v7 = vsel %vm76_vm0, %v2505_v3, %v6900_v26 }
 0x8e8   :  { %2543 = vrot.lane.b32.xlu0 %v2503_v50, %s4013_s21  ;;  %2545 = vrot.lane.b32.xlu1 %v2506_v7, %s4013_s21 }
 0x8ea   :  { %v2508_v36 = vpop.permute.xlu1 %2507  ;;  %v2511_v46 = vpop.permute.xlu0 %2510 }
 0x8eb   :  { %v2509_v17 = vsel %vm76_vm0, %v2508_v36, %v6919_v58  ;;  %v2512_v12 = vsel %vm76_vm0, %v2511_v46, %v6916_v30 }
 0x8ec   :  { %2547 = vrot.lane.b32.xlu0 %v2509_v17, %s4013_s21  ;;  %2549 = vrot.lane.b32.xlu1 %v2512_v12, %s4013_s21 }
 0x8ee   :  { %v2514_v16 = vpop.permute.xlu1 %2513  ;;  %v2517_v19 = vpop.permute.xlu0 %2516 }
 0x8ef   :  { %v2515_v23 = vsel %vm76_vm0, %v2514_v16, %v6935_v41  ;;  %v2518_v40 = vsel %vm76_vm0, %v2517_v19, %v6932_v32 }
 0x8f0   :  { %2551 = vrot.lane.b32.xlu0 %v2515_v23, %s4013_s21  ;;  %2553 = vrot.lane.b32.xlu1 %v2518_v40, %s4013_s21 }
 0x8f2   :  { %v2520_v63 = vpop.permute.xlu1 %2519  ;;  %v2523_v24 = vpop.permute.xlu0 %2522 }
 0x8f3   :  { %v2521_v21 = vsel %vm76_vm0, %v2520_v63, %v6951_v2  ;;  %v2524_v10 = vsel %vm76_vm0, %v2523_v24, %v6948_v35 }
 0x8f4   :  { %2555 = vrot.lane.b32.xlu0 %v2521_v21, %s4013_s21  ;;  %2557 = vrot.lane.b32.xlu1 %v2524_v10, %s4013_s21 }
 0x8f6   :  { %v2526_v13 = vpop.permute.xlu1 %2525  ;;  %v2529_v44 = vpop.permute.xlu0 %2528 }
 0x8f7   :  { %v2527_v52 = vsel %vm76_vm0, %v2526_v13, %v6967_v45  ;;  %v2530_v56 = vsel %vm76_vm0, %v2529_v44, %v6964_v37 }
 0x8f8   :  { %2559 = vrot.lane.b32.xlu0 %v2527_v52, %s4013_s21  ;;  %2561 = vrot.lane.b32.xlu1 %v2530_v56, %s4013_s21 }
 0x92a   :  { %v2436_v11 = vpop.permute.xlu0 %2435 }
 0x92b   :  { %v2467_v29 = vsel %vm76_vm0, %v2436_v11, %v6721_v27 }
 0x92c   :  { %v2580_v39 = vadd.s32 2, %v2467_v29 }
 0x92e   :  { %v2438_v38 = vpop.permute.xlu1 %2437  ;;  %2596 = vrot.lane.b32.xlu0 %v2580_v39, %s4021_s19  ;;  %v2440_v47 = vpop.permute.xlu0 %2439 }
 0x92f   :  { %v2468_v48 = vsel %vm76_vm0, %v2438_v38, %v6732_v25  ;;  %v2469_v61 = vsel %vm76_vm0, %v2440_v47, %v6735_v4 }
 0x930   :  { %v2581_v31 = vadd.s32 2, %v2468_v48  ;;  %v2582_v42 = vadd.s32 2, %v2469_v61 }
 0x932   :  { %v2442_v0 = vpop.permute.xlu1 %2441  ;;  %2598 = vrot.lane.b32.xlu1 %v2581_v31, %s4021_s19  ;;  %2600 = vrot.lane.b32.xlu0 %v2582_v42, %s4021_s19  ;;  %v2444_v49 = vpop.permute.xlu0 %2443 }
 0x933   :  { %v2470_v34 = vsel %vm76_vm0, %v2442_v0, %v6748_v15  ;;  %v2471_v3 = vsel %vm76_vm0, %v2444_v49, %v6751_v57 }
 0x934   :  { %v2583_v50 = vadd.s32 2, %v2470_v34  ;;  %v2584_v7 = vadd.s32 2, %v2471_v3 }
 0x936   :  { %v2446_v36 = vpop.permute.xlu1 %2445  ;;  %2602 = vrot.lane.b32.xlu1 %v2583_v50, %s4021_s19  ;;  %2604 = vrot.lane.b32.xlu0 %v2584_v7, %s4021_s19  ;;  %v2448_v46 = vpop.permute.xlu0 %2447 }
 0x937   :  { %v2472_v17 = vsel %vm76_vm0, %v2446_v36, %v6764_v62  ;;  %v2473_v12 = vsel %vm76_vm0, %v2448_v46, %v6767_v20 }
 0x938   :  { %v2585_v16 = vadd.s32 2, %v2472_v17  ;;  %v2586_v19 = vadd.s32 2, %v2473_v12 }
 0x93a   :  { %v2450_v23 = vpop.permute.xlu1 %2449  ;;  %2606 = vrot.lane.b32.xlu1 %v2585_v16, %s4021_s19  ;;  %2608 = vrot.lane.b32.xlu0 %v2586_v19, %s4021_s19  ;;  %v2452_v40 = vpop.permute.xlu0 %2451 }
 0x93b   :  { %v2474_v63 = vsel %vm76_vm0, %v2450_v23, %v6780_v33  ;;  %v2475_v24 = vsel %vm76_vm0, %v2452_v40, %v6783_v1 }
 0x93c   :  { %v2587_v21 = vadd.s32 2, %v2474_v63  ;;  %v2588_v10 = vadd.s32 2, %v2475_v24 }
 0x93e   :  { %v2454_v13 = vpop.permute.xlu1 %2453  ;;  %2610 = vrot.lane.b32.xlu1 %v2587_v21, %s4021_s19  ;;  %2612 = vrot.lane.b32.xlu0 %v2588_v10, %s4021_s19  ;;  %v2456_v44 = vpop.permute.xlu0 %2455 }
 0x93f   :  { %v2476_v52 = vsel %vm76_vm0, %v2454_v13, %v6796_v8  ;;  %v2477_v56 = vsel %vm76_vm0, %v2456_v44, %v6799_v54 }
 0x940   :  { %v2589_v11 = vadd.s32 2, %v2476_v52  ;;  %v2590_v29 = vadd.s32 2, %v2477_v56 }
 0x942   :  { %v2458_v39 = vpop.permute.xlu1 %2457  ;;  %2614 = vrot.lane.b32.xlu1 %v2589_v11, %s4021_s19  ;;  %2616 = vrot.lane.b32.xlu0 %v2590_v29, %s4021_s19  ;;  %v2460_v38 = vpop.permute.xlu0 %2459 }
 0x943   :  { %v2478_v47 = vsel %vm76_vm0, %v2458_v39, %v6812_v59  ;;  %v2479_v48 = vsel %vm76_vm0, %v2460_v38, %v6815_v5 }
 0x944   :  { %v2591_v61 = vadd.s32 2, %v2478_v47  ;;  %v2592_v31 = vadd.s32 2, %v2479_v48 }
 0x946   :  { %v2462_v42 = vpop.permute.xlu1 %2461  ;;  %2618 = vrot.lane.b32.xlu1 %v2591_v61, %s4021_s19  ;;  %2620 = vrot.lane.b32.xlu0 %v2592_v31, %s4021_s19  ;;  %v2464_v0 = vpop.permute.xlu0 %2463 }
 0x947   :  { %v2480_v49 = vsel %vm76_vm0, %v2462_v42, %v6828_v6  ;;  %v2481_v34 = vsel %vm76_vm0, %v2464_v0, %v6831_v9 }
 0x948   :  { %v2593_v3 = vadd.s32 2, %v2480_v49  ;;  %v2594_v50 = vadd.s32 2, %v2481_v34 }
 0x94a   :  { %v2466_v7 = vpop.permute.xlu1 %2465  ;;  %2622 = vrot.lane.b32.xlu1 %v2593_v3, %s4021_s19  ;;  %2624 = vrot.lane.b32.xlu0 %v2594_v50, %s4021_s19 }
 0x94b   :  { %v2482_v36 = vsel %vm76_vm0, %v2466_v7, %v6841_v43 }
 0x94c   :  { %v2595_v46 = vadd.s32 2, %v2482_v36 }
 0x94e   :  { %v2534_v17 = vpop.permute.xlu1 %2533  ;;  %2626 = vrot.lane.b32.xlu1 %v2595_v46, %s4021_s19  ;;  %v2532_v12 = vpop.permute.xlu0 %2531 }
 0x94f   :  { %v2564_v16 = vsel %vm76_vm0, %v2534_v17, %v6852_v55  ;;  %v2563_v19 = vsel %vm76_vm0, %v2532_v12, %v6855_v14 }
 0x950   :  { %v2677_v23 = vadd.s32 2, %v2564_v16  ;;  %v2676_v40 = vadd.s32 2, %v2563_v19 }
 0x952   :  { %v2538_v63 = vpop.permute.xlu1 %2537  ;;  %2694 = vrot.lane.b32.xlu1 %v2677_v23, %s4021_s19  ;;  %2692 = vrot.lane.b32.xlu0 %v2676_v40, %s4021_s19  ;;  %v2536_v24 = vpop.permute.xlu0 %2535 }
 0x953   :  { %v2566_v21 = vsel %vm76_vm0, %v2538_v63, %v6868_v60  ;;  %v2565_v10 = vsel %vm76_vm0, %v2536_v24, %v6871_v18 }
 0x954   :  { %v2679_v13 = vadd.s32 2, %v2566_v21  ;;  %v2678_v44 = vadd.s32 2, %v2565_v10 }
 0x956   :  { %v2542_v52 = vpop.permute.xlu1 %2541  ;;  %2698 = vrot.lane.b32.xlu1 %v2679_v13, %s4021_s19  ;;  %2696 = vrot.lane.b32.xlu0 %v2678_v44, %s4021_s19  ;;  %v2540_v56 = vpop.permute.xlu0 %2539 }
 0x957   :  { %v2568_v11 = vsel %vm76_vm0, %v2542_v52, %v6884_v22  ;;  %v2567_v29 = vsel %vm76_vm0, %v2540_v56, %v6887_v28 }
 0x958   :  { %v2681_v39 = vadd.s32 2, %v2568_v11  ;;  %v2680_v38 = vadd.s32 2, %v2567_v29 }
 0x95a   :  { %v2546_v47 = vpop.permute.xlu1 %2545  ;;  %2702 = vrot.lane.b32.xlu1 %v2681_v39, %s4021_s19  ;;  %2700 = vrot.lane.b32.xlu0 %v2680_v38, %s4021_s19  ;;  %v2544_v48 = vpop.permute.xlu0 %2543 }
 0x95b   :  { %v2570_v61 = vsel %vm76_vm0, %v2546_v47, %v6900_v26  ;;  %v2569_v31 = vsel %vm76_vm0, %v2544_v48, %v6903_v53 }
 0x95c   :  { %v2683_v42 = vadd.s32 2, %v2570_v61  ;;  %v2682_v0 = vadd.s32 2, %v2569_v31 }
 0x95e   :  { %v2550_v49 = vpop.permute.xlu1 %2549  ;;  %2706 = vrot.lane.b32.xlu1 %v2683_v42, %s4021_s19  ;;  %2704 = vrot.lane.b32.xlu0 %v2682_v0, %s4021_s19  ;;  %v2548_v34 = vpop.permute.xlu0 %2547 }
 0x95f   :  { %v2572_v3 = vsel %vm76_vm0, %v2550_v49, %v6916_v30  ;;  %v2571_v50 = vsel %vm76_vm0, %v2548_v34, %v6919_v58 }
 0x960   :  { %v2685_v7 = vadd.s32 2, %v2572_v3  ;;  %v2684_v36 = vadd.s32 2, %v2571_v50 }
 0x962   :  { %v2554_v46 = vpop.permute.xlu1 %2553  ;;  %2710 = vrot.lane.b32.xlu1 %v2685_v7, %s4021_s19  ;;  %2708 = vrot.lane.b32.xlu0 %v2684_v36, %s4021_s19  ;;  %v2552_v17 = vpop.permute.xlu0 %2551 }
 0x963   :  { %v2574_v12 = vsel %vm76_vm0, %v2554_v46, %v6932_v32  ;;  %v2573_v16 = vsel %vm76_vm0, %v2552_v17, %v6935_v41 }
 0x964   :  { %v2687_v19 = vadd.s32 2, %v2574_v12  ;;  %v2686_v23 = vadd.s32 2, %v2573_v16 }
 0x966   :  { %v2558_v40 = vpop.permute.xlu1 %2557  ;;  %2714 = vrot.lane.b32.xlu1 %v2687_v19, %s4021_s19  ;;  %2712 = vrot.lane.b32.xlu0 %v2686_v23, %s4021_s19  ;;  %v2556_v63 = vpop.permute.xlu0 %2555 }
 0x967   :  { %v2576_v24 = vsel %vm76_vm0, %v2558_v40, %v6948_v35  ;;  %v2575_v21 = vsel %vm76_vm0, %v2556_v63, %v6951_v2 }
 0x968   :  { %v2689_v10 = vadd.s32 2, %v2576_v24  ;;  %v2688_v13 = vadd.s32 2, %v2575_v21 }
 0x96a   :  { %2718 = vrot.lane.b32.xlu1 %v2689_v10, %s4021_s19  ;;  %v2562_v44 = vpop.permute.xlu1 %2561  ;;  %2716 = vrot.lane.b32.xlu0 %v2688_v13, %s4021_s19  ;;  %v2560_v52 = vpop.permute.xlu0 %2559 }
 0x96b   :  { %v2578_v56 = vsel %vm76_vm0, %v2562_v44, %v6964_v37  ;;  %v2577_v11 = vsel %vm76_vm0, %v2560_v52, %v6967_v45 }
 0x96c   :  { %v2691_v29 = vadd.s32 2, %v2578_v56  ;;  %v2690_v39 = vadd.s32 2, %v2577_v11 }
 0x96e   :  { %2722 = vrot.lane.b32.xlu1 %v2691_v29, %s4021_s19  ;;  %2720 = vrot.lane.b32.xlu0 %v2690_v39, %s4021_s19 }
 0x9a0   :  { %v2597_v38 = vpop.permute.xlu0 %2596 }
 0x9a1   :  { %v2628_v47 = vsel %vm2579_vm1, %v2597_v38, 160 }
 0x9a2   :  { %vm2644_vm12 = vcmp.lt.s32.totalorder %v6721_v27, %v2628_v47 }
 0x9a3   :  { %v7170_v48 = vsel %vm2644_vm12, %v6721_v27, %v2628_v47 }
 0x9a4   :  { %v2599_v61 = vpop.permute.xlu1 %2598  ;;  %2772 = vrot.lane.b32.xlu0 %v7170_v48, %s4013_s21  ;;  %v2601_v31 = vpop.permute.xlu0 %2600 }
 0x9a5   :  { %v2629_v42 = vsel %vm2579_vm1, %v2599_v61, 160  ;;  %v2630_v0 = vsel %vm2579_vm1, %v2601_v31, 160 }
 0x9a6   :  { %vm2646_vm13 = vcmp.lt.s32.totalorder %v6732_v25, %v2629_v42  ;;  %vm2648_vm14 = vcmp.lt.s32.totalorder %v6735_v4, %v2630_v0 }
 0x9a7   :  { %v7181_v49 = vsel %vm2646_vm13, %v6732_v25, %v2629_v42  ;;  %v7184_v27 = vsel %vm2648_vm14, %v6735_v4, %v2630_v0 }
 0x9a8   :  { %2775 = vrot.lane.b32.xlu1 %v7181_v49, %s4013_s21  ;;  %v2603_v34 = vpop.permute.xlu1 %2602  ;;  %2778 = vrot.lane.b32.xlu0 %v7184_v27, %s4013_s21  ;;  %v2605_v3 = vpop.permute.xlu0 %2604 }
 0x9a9   :  { %v2631_v50 = vsel %vm2579_vm1, %v2603_v34, 160  ;;  %v2632_v7 = vsel %vm2579_vm1, %v2605_v3, 160 }
 0x9aa   :  { %vm2650_vm15 = vcmp.lt.s32.totalorder %v6748_v15, %v2631_v50  ;;  %vm2652_vm2 = vcmp.lt.s32.totalorder %v6751_v57, %v2632_v7 }
 0x9ab   :  { %v7197_v25 = vsel %vm2650_vm15, %v6748_v15, %v2631_v50  ;;  %v7200_v4 = vsel %vm2652_vm2, %v6751_v57, %v2632_v7 }
 0x9ac   :  { %2781 = vrot.lane.b32.xlu1 %v7197_v25, %s4013_s21  ;;  %v2607_v36 = vpop.permute.xlu1 %2606  ;;  %2784 = vrot.lane.b32.xlu0 %v7200_v4, %s4013_s21  ;;  %v2609_v46 = vpop.permute.xlu0 %2608 }
 0x9ad   :  { %v2633_v17 = vsel %vm2579_vm1, %v2607_v36, 160  ;;  %v2634_v12 = vsel %vm2579_vm1, %v2609_v46, 160 }
 0x9ae   :  { %vm2654_vm3 = vcmp.lt.s32.totalorder %v6764_v62, %v2633_v17  ;;  %vm2656_vm4 = vcmp.lt.s32.totalorder %v6767_v20, %v2634_v12 }
 0x9af   :  { %v7213_v15 = vsel %vm2654_vm3, %v6764_v62, %v2633_v17  ;;  %v7216_v57 = vsel %vm2656_vm4, %v6767_v20, %v2634_v12 }
 0x9b0   :  { %2787 = vrot.lane.b32.xlu1 %v7213_v15, %s4013_s21  ;;  %v2611_v16 = vpop.permute.xlu1 %2610  ;;  %2790 = vrot.lane.b32.xlu0 %v7216_v57, %s4013_s21  ;;  %v2613_v19 = vpop.permute.xlu0 %2612 }
 0x9b1   :  { %v2635_v23 = vsel %vm2579_vm1, %v2611_v16, 160  ;;  %v2636_v40 = vsel %vm2579_vm1, %v2613_v19, 160 }
 0x9b2   :  { %vm2658_vm5 = vcmp.lt.s32.totalorder %v6780_v33, %v2635_v23  ;;  %vm2660_vm6 = vcmp.lt.s32.totalorder %v6783_v1, %v2636_v40 }
 0x9b3   :  { %v7229_v62 = vsel %vm2658_vm5, %v6780_v33, %v2635_v23  ;;  %v7232_v20 = vsel %vm2660_vm6, %v6783_v1, %v2636_v40 }
 0x9b4   :  { %2793 = vrot.lane.b32.xlu1 %v7229_v62, %s4013_s21  ;;  %v2615_v63 = vpop.permute.xlu1 %2614  ;;  %2796 = vrot.lane.b32.xlu0 %v7232_v20, %s4013_s21  ;;  %v2617_v24 = vpop.permute.xlu0 %2616 }
 0x9b5   :  { %v2637_v21 = vsel %vm2579_vm1, %v2615_v63, 160  ;;  %v2638_v10 = vsel %vm2579_vm1, %v2617_v24, 160 }
 0x9b6   :  { %vm2662_vm7 = vcmp.lt.s32.totalorder %v6796_v8, %v2637_v21  ;;  %vm2664_vm8 = vcmp.lt.s32.totalorder %v6799_v54, %v2638_v10 }
 0x9b7   :  { %v7245_v33 = vsel %vm2662_vm7, %v6796_v8, %v2637_v21  ;;  %v7248_v1 = vsel %vm2664_vm8, %v6799_v54, %v2638_v10 }
 0x9b8   :  { %2799 = vrot.lane.b32.xlu1 %v7245_v33, %s4013_s21  ;;  %v2619_v13 = vpop.permute.xlu1 %2618  ;;  %2802 = vrot.lane.b32.xlu0 %v7248_v1, %s4013_s21  ;;  %v2621_v44 = vpop.permute.xlu0 %2620 }
 0x9b9   :  { %v2639_v52 = vsel %vm2579_vm1, %v2619_v13, 160  ;;  %v2640_v56 = vsel %vm2579_vm1, %v2621_v44, 160 }
 0x9ba   :  { %vm2666_vm9 = vcmp.lt.s32.totalorder %v6812_v59, %v2639_v52  ;;  %vm2668_vm10 = vcmp.lt.s32.totalorder %v6815_v5, %v2640_v56 }
 0x9bb   :  { %v7261_v8 = vsel %vm2666_vm9, %v6812_v59, %v2639_v52  ;;  %v7264_v54 = vsel %vm2668_vm10, %v6815_v5, %v2640_v56 }
 0x9bc   :  { %2805 = vrot.lane.b32.xlu1 %v7261_v8, %s4013_s21  ;;  %v2623_v11 = vpop.permute.xlu1 %2622  ;;  %2808 = vrot.lane.b32.xlu0 %v7264_v54, %s4013_s21  ;;  %v2625_v29 = vpop.permute.xlu0 %2624 }
 0x9bd   :  { %v2641_v39 = vsel %vm2579_vm1, %v2623_v11, 160  ;;  %v2642_v38 = vsel %vm2579_vm1, %v2625_v29, 160 }
 0x9be   :  { %vm2670_vm11 = vcmp.lt.s32.totalorder %v6828_v6, %v2641_v39  ;;  %vm2672_vm12 = vcmp.lt.s32.totalorder %v6831_v9, %v2642_v38 }
 0x9bf   :  { %v7277_v59 = vsel %vm2670_vm11, %v6828_v6, %v2641_v39  ;;  %v7280_v5 = vsel %vm2672_vm12, %v6831_v9, %v2642_v38 }
 0x9c0   :  { %2811 = vrot.lane.b32.xlu1 %v7277_v59, %s4013_s21  ;;  %v2627_v47 = vpop.permute.xlu1 %2626  ;;  %2814 = vrot.lane.b32.xlu0 %v7280_v5, %s4013_s21 }
 0x9c1   :  { %v2643_v61 = vsel %vm2579_vm1, %v2627_v47, 160 }
 0x9c2   :  { %vm2674_vm13 = vcmp.lt.s32.totalorder %v6841_v43, %v2643_v61 }
 0x9c3   :  { %v7290_v31 = vsel %vm2674_vm13, %v6841_v43, %v2643_v61 }
 0x9c4   :  { %2817 = vrot.lane.b32.xlu1 %v7290_v31, %s4013_s21  ;;  %v2695_v6 = vpop.permute.xlu1 %2694  ;;  %v2693_v9 = vpop.permute.xlu0 %2692 }
 0x9c5   :  { %v2725_v42 = vsel %vm2579_vm1, %v2695_v6, 160  ;;  %v2724_v0 = vsel %vm2579_vm1, %v2693_v9, 160 }
 0x9c6   :  { %vm2742_vm14 = vcmp.lt.s32.totalorder %v6852_v55, %v2725_v42  ;;  %vm2740_vm15 = vcmp.lt.s32.totalorder %v6855_v14, %v2724_v0 }
 0x9c7   :  { %v7301_v34 = vsel %vm2742_vm14, %v6852_v55, %v2725_v42  ;;  %v7304_v43 = vsel %vm2740_vm15, %v6855_v14, %v2724_v0 }
 0x9c8   :  { %2871 = vrot.lane.b32.xlu1 %v7301_v34, %s4013_s21  ;;  %v2699_v3 = vpop.permute.xlu1 %2698  ;;  %2868 = vrot.lane.b32.xlu0 %v7304_v43, %s4013_s21  ;;  %v2697_v50 = vpop.permute.xlu0 %2696 }
 0x9c9   :  { %v2727_v7 = vsel %vm2579_vm1, %v2699_v3, 160  ;;  %v2726_v36 = vsel %vm2579_vm1, %v2697_v50, 160 }
 0x9ca   :  { %vm2746_vm2 = vcmp.lt.s32.totalorder %v6868_v60, %v2727_v7  ;;  %vm2744_vm3 = vcmp.lt.s32.totalorder %v6871_v18, %v2726_v36 }
 0x9cb   :  { %v7317_v55 = vsel %vm2746_vm2, %v6868_v60, %v2727_v7  ;;  %v7320_v14 = vsel %vm2744_vm3, %v6871_v18, %v2726_v36 }
 0x9cc   :  { %2877 = vrot.lane.b32.xlu1 %v7317_v55, %s4013_s21  ;;  %v2703_v46 = vpop.permute.xlu1 %2702  ;;  %2874 = vrot.lane.b32.xlu0 %v7320_v14, %s4013_s21  ;;  %v2701_v17 = vpop.permute.xlu0 %2700 }
 0x9cd   :  { %v2729_v12 = vsel %vm2579_vm1, %v2703_v46, 160  ;;  %v2728_v16 = vsel %vm2579_vm1, %v2701_v17, 160 }
 0x9ce   :  { %vm2750_vm4 = vcmp.lt.s32.totalorder %v6884_v22, %v2729_v12  ;;  %vm2748_vm5 = vcmp.lt.s32.totalorder %v6887_v28, %v2728_v16 }
 0x9cf   :  { %v7333_v60 = vsel %vm2750_vm4, %v6884_v22, %v2729_v12  ;;  %v7336_v18 = vsel %vm2748_vm5, %v6887_v28, %v2728_v16 }
 0x9d0   :  { %2883 = vrot.lane.b32.xlu1 %v7333_v60, %s4013_s21  ;;  %v2707_v19 = vpop.permute.xlu1 %2706  ;;  %2880 = vrot.lane.b32.xlu0 %v7336_v18, %s4013_s21  ;;  %v2705_v23 = vpop.permute.xlu0 %2704 }
 0x9d1   :  { %v2731_v40 = vsel %vm2579_vm1, %v2707_v19, 160  ;;  %v2730_v63 = vsel %vm2579_vm1, %v2705_v23, 160 }
 0x9d2   :  { %vm2754_vm6 = vcmp.lt.s32.totalorder %v6900_v26, %v2731_v40  ;;  %vm2752_vm7 = vcmp.lt.s32.totalorder %v6903_v53, %v2730_v63 }
 0x9d3   :  { %v7349_v22 = vsel %vm2754_vm6, %v6900_v26, %v2731_v40  ;;  %v7352_v28 = vsel %vm2752_vm7, %v6903_v53, %v2730_v63 }
 0x9d4   :  { %2889 = vrot.lane.b32.xlu1 %v7349_v22, %s4013_s21  ;;  %v2711_v24 = vpop.permute.xlu1 %2710  ;;  %2886 = vrot.lane.b32.xlu0 %v7352_v28, %s4013_s21  ;;  %v2709_v21 = vpop.permute.xlu0 %2708 }
 0x9d5   :  { %v2733_v10 = vsel %vm2579_vm1, %v2711_v24, 160  ;;  %v2732_v13 = vsel %vm2579_vm1, %v2709_v21, 160 }
 0x9d6   :  { %vm2758_vm8 = vcmp.lt.s32.totalorder %v6916_v30, %v2733_v10  ;;  %vm2756_vm9 = vcmp.lt.s32.totalorder %v6919_v58, %v2732_v13 }
 0x9d7   :  { %v7365_v26 = vsel %vm2758_vm8, %v6916_v30, %v2733_v10  ;;  %v7368_v53 = vsel %vm2756_vm9, %v6919_v58, %v2732_v13 }
 0x9d8   :  { %2895 = vrot.lane.b32.xlu1 %v7365_v26, %s4013_s21  ;;  %v2715_v44 = vpop.permute.xlu1 %2714  ;;  %2892 = vrot.lane.b32.xlu0 %v7368_v53, %s4013_s21  ;;  %v2713_v52 = vpop.permute.xlu0 %2712 }
 0x9d9   :  { %v2735_v56 = vsel %vm2579_vm1, %v2715_v44, 160  ;;  %v2734_v11 = vsel %vm2579_vm1, %v2713_v52, 160 }
 0x9da   :  { %vm2762_vm10 = vcmp.lt.s32.totalorder %v6932_v32, %v2735_v56  ;;  %vm2760_vm11 = vcmp.lt.s32.totalorder %v6935_v41, %v2734_v11 }
 0x9db   :  { %v7381_v30 = vsel %vm2762_vm10, %v6932_v32, %v2735_v56  ;;  %v7384_v58 = vsel %vm2760_vm11, %v6935_v41, %v2734_v11 }
 0x9dc   :  { %2901 = vrot.lane.b32.xlu1 %v7381_v30, %s4013_s21  ;;  %v2719_v29 = vpop.permute.xlu1 %2718  ;;  %2898 = vrot.lane.b32.xlu0 %v7384_v58, %s4013_s21  ;;  %v2717_v39 = vpop.permute.xlu0 %2716 }
 0x9dd   :  { %v2737_v38 = vsel %vm2579_vm1, %v2719_v29, 160  ;;  %v2736_v47 = vsel %vm2579_vm1, %v2717_v39, 160 }
 0x9de   :  { %vm2766_vm12 = vcmp.lt.s32.totalorder %v6948_v35, %v2737_v38  ;;  %vm2764_vm13 = vcmp.lt.s32.totalorder %v6951_v2, %v2736_v47 }
 0x9df   :  { %v7397_v32 = vsel %vm2766_vm12, %v6948_v35, %v2737_v38  ;;  %v7400_v41 = vsel %vm2764_vm13, %v6951_v2, %v2736_v47 }
 0x9e0   :  { %2907 = vrot.lane.b32.xlu1 %v7397_v32, %s4013_s21  ;;  %v2723_v61 = vpop.permute.xlu1 %2722  ;;  %2904 = vrot.lane.b32.xlu0 %v7400_v41, %s4013_s21  ;;  %v2721_v6 = vpop.permute.xlu0 %2720 }
 0x9e1   :  { %v2739_v9 = vsel %vm2579_vm1, %v2723_v61, 160  ;;  %v2738_v42 = vsel %vm2579_vm1, %v2721_v6, 160  ;;  %vm2964_vm1 = vcmp.lt.s32.totalorder %v4469_v51, 28 }
 0x9e2   :  { %vm2770_vm14 = vcmp.lt.s32.totalorder %v6964_v37, %v2739_v9  ;;  %vm2768_vm15 = vcmp.lt.s32.totalorder %v6967_v45, %v2738_v42 }
 0x9e3   :  { %v7413_v35 = vsel %vm2770_vm14, %v6964_v37, %v2739_v9  ;;  %v7416_v2 = vsel %vm2768_vm15, %v6967_v45, %v2738_v42 }
 0x9e4   :  { %2913 = vrot.lane.b32.xlu1 %v7413_v35, %s4013_s21  ;;  %2910 = vrot.lane.b32.xlu0 %v7416_v2, %s4013_s21 }
 0xa16   :  { %v2773_v0 = vpop.permute.xlu0 %2772 }
 0xa17   :  { %v2774_v3 = vsel %vm76_vm0, %v2773_v0, %v7170_v48 }
 0xa18   :  { %2820 = vrot.lane.b32.xlu0 %v2774_v3, %s4013_s21 }
 0xa1a   :  { %v2776_v50 = vpop.permute.xlu1 %2775  ;;  %v2779_v7 = vpop.permute.xlu0 %2778 }
 0xa1b   :  { %v2777_v37 = vsel %vm76_vm0, %v2776_v50, %v7181_v49  ;;  %v2780_v45 = vsel %vm76_vm0, %v2779_v7, %v7184_v27 }
 0xa1c   :  { %2822 = vrot.lane.b32.xlu1 %v2777_v37, %s4013_s21  ;;  %2824 = vrot.lane.b32.xlu0 %v2780_v45, %s4013_s21 }
 0xa1e   :  { %v2782_v36 = vpop.permute.xlu1 %2781  ;;  %v2785_v46 = vpop.permute.xlu0 %2784 }
 0xa1f   :  { %v2783_v17 = vsel %vm76_vm0, %v2782_v36, %v7197_v25  ;;  %v2786_v12 = vsel %vm76_vm0, %v2785_v46, %v7200_v4 }
 0xa20   :  { %2826 = vrot.lane.b32.xlu1 %v2783_v17, %s4013_s21  ;;  %2828 = vrot.lane.b32.xlu0 %v2786_v12, %s4013_s21 }
 0xa22   :  { %v2788_v16 = vpop.permute.xlu1 %2787  ;;  %v2791_v19 = vpop.permute.xlu0 %2790 }
 0xa23   :  { %v2789_v23 = vsel %vm76_vm0, %v2788_v16, %v7213_v15  ;;  %v2792_v40 = vsel %vm76_vm0, %v2791_v19, %v7216_v57 }
 0xa24   :  { %2830 = vrot.lane.b32.xlu1 %v2789_v23, %s4013_s21  ;;  %2832 = vrot.lane.b32.xlu0 %v2792_v40, %s4013_s21 }
 0xa26   :  { %v2794_v63 = vpop.permute.xlu1 %2793  ;;  %v2797_v24 = vpop.permute.xlu0 %2796 }
 0xa27   :  { %v2795_v21 = vsel %vm76_vm0, %v2794_v63, %v7229_v62  ;;  %v2798_v10 = vsel %vm76_vm0, %v2797_v24, %v7232_v20 }
 0xa28   :  { %2834 = vrot.lane.b32.xlu1 %v2795_v21, %s4013_s21  ;;  %2836 = vrot.lane.b32.xlu0 %v2798_v10, %s4013_s21 }
 0xa2a   :  { %v2800_v13 = vpop.permute.xlu1 %2799  ;;  %v2803_v44 = vpop.permute.xlu0 %2802 }
 0xa2b   :  { %v2801_v52 = vsel %vm76_vm0, %v2800_v13, %v7245_v33  ;;  %v2804_v56 = vsel %vm76_vm0, %v2803_v44, %v7248_v1 }
 0xa2c   :  { %2838 = vrot.lane.b32.xlu1 %v2801_v52, %s4013_s21  ;;  %2840 = vrot.lane.b32.xlu0 %v2804_v56, %s4013_s21 }
 0xa2e   :  { %v2806_v11 = vpop.permute.xlu1 %2805  ;;  %v2809_v29 = vpop.permute.xlu0 %2808 }
 0xa2f   :  { %v2807_v39 = vsel %vm76_vm0, %v2806_v11, %v7261_v8  ;;  %v2810_v38 = vsel %vm76_vm0, %v2809_v29, %v7264_v54 }
 0xa30   :  { %2842 = vrot.lane.b32.xlu1 %v2807_v39, %s4013_s21  ;;  %2844 = vrot.lane.b32.xlu0 %v2810_v38, %s4013_s21 }
 0xa32   :  { %v2812_v47 = vpop.permute.xlu1 %2811  ;;  %v2815_v61 = vpop.permute.xlu0 %2814 }
 0xa33   :  { %v2813_v6 = vsel %vm76_vm0, %v2812_v47, %v7277_v59  ;;  %v2816_v9 = vsel %vm76_vm0, %v2815_v61, %v7280_v5 }
 0xa34   :  { %2846 = vrot.lane.b32.xlu1 %v2813_v6, %s4013_s21  ;;  %2848 = vrot.lane.b32.xlu0 %v2816_v9, %s4013_s21 }
 0xa36   :  { %v2818_v42 = vpop.permute.xlu1 %2817 }
 0xa37   :  { %v2819_v0 = vsel %vm76_vm0, %v2818_v42, %v7290_v31 }
 0xa38   :  { %2850 = vrot.lane.b32.xlu1 %v2819_v0, %s4013_s21 }
 0xa3a   :  { %v2872_v3 = vpop.permute.xlu1 %2871  ;;  %v2869_v50 = vpop.permute.xlu0 %2868 }
 0xa3b   :  { %v2873_v7 = vsel %vm76_vm0, %v2872_v3, %v7301_v34  ;;  %v2870_v37 = vsel %vm76_vm0, %v2869_v50, %v7304_v43 }
 0xa3c   :  { %2918 = vrot.lane.b32.xlu1 %v2873_v7, %s4013_s21  ;;  %2916 = vrot.lane.b32.xlu0 %v2870_v37, %s4013_s21 }
 0xa3e   :  { %v2878_v45 = vpop.permute.xlu1 %2877  ;;  %v2875_v36 = vpop.permute.xlu0 %2874 }
 0xa3f   :  { %v2879_v46 = vsel %vm76_vm0, %v2878_v45, %v7317_v55  ;;  %v2876_v17 = vsel %vm76_vm0, %v2875_v36, %v7320_v14 }
 0xa40   :  { %2922 = vrot.lane.b32.xlu1 %v2879_v46, %s4013_s21  ;;  %2920 = vrot.lane.b32.xlu0 %v2876_v17, %s4013_s21 }
 0xa42   :  { %v2884_v12 = vpop.permute.xlu1 %2883  ;;  %v2881_v16 = vpop.permute.xlu0 %2880 }
 0xa43   :  { %v2885_v19 = vsel %vm76_vm0, %v2884_v12, %v7333_v60  ;;  %v2882_v23 = vsel %vm76_vm0, %v2881_v16, %v7336_v18 }
 0xa44   :  { %2926 = vrot.lane.b32.xlu1 %v2885_v19, %s4013_s21  ;;  %2924 = vrot.lane.b32.xlu0 %v2882_v23, %s4013_s21 }
 0xa46   :  { %v2890_v40 = vpop.permute.xlu1 %2889  ;;  %v2887_v63 = vpop.permute.xlu0 %2886 }
 0xa47   :  { %v2891_v24 = vsel %vm76_vm0, %v2890_v40, %v7349_v22  ;;  %v2888_v21 = vsel %vm76_vm0, %v2887_v63, %v7352_v28 }
 0xa48   :  { %2930 = vrot.lane.b32.xlu1 %v2891_v24, %s4013_s21  ;;  %2928 = vrot.lane.b32.xlu0 %v2888_v21, %s4013_s21 }
 0xa4a   :  { %v2896_v10 = vpop.permute.xlu1 %2895  ;;  %v2893_v13 = vpop.permute.xlu0 %2892 }
 0xa4b   :  { %v2897_v44 = vsel %vm76_vm0, %v2896_v10, %v7365_v26  ;;  %v2894_v52 = vsel %vm76_vm0, %v2893_v13, %v7368_v53 }
 0xa4c   :  { %2934 = vrot.lane.b32.xlu1 %v2897_v44, %s4013_s21  ;;  %2932 = vrot.lane.b32.xlu0 %v2894_v52, %s4013_s21 }
 0xa4e   :  { %v2902_v56 = vpop.permute.xlu1 %2901  ;;  %v2899_v11 = vpop.permute.xlu0 %2898 }
 0xa4f   :  { %v2903_v29 = vsel %vm76_vm0, %v2902_v56, %v7381_v30  ;;  %v2900_v39 = vsel %vm76_vm0, %v2899_v11, %v7384_v58 }
 0xa50   :  { %2938 = vrot.lane.b32.xlu1 %v2903_v29, %s4013_s21  ;;  %2936 = vrot.lane.b32.xlu0 %v2900_v39, %s4013_s21 }
 0xa52   :  { %v2908_v38 = vpop.permute.xlu1 %2907  ;;  %v2905_v47 = vpop.permute.xlu0 %2904 }
 0xa53   :  { %v2909_v61 = vsel %vm76_vm0, %v2908_v38, %v7397_v32  ;;  %v2906_v6 = vsel %vm76_vm0, %v2905_v47, %v7400_v41 }
 0xa54   :  { %2942 = vrot.lane.b32.xlu1 %v2909_v61, %s4013_s21  ;;  %2940 = vrot.lane.b32.xlu0 %v2906_v6, %s4013_s21 }
 0xa56   :  { %v2914_v9 = vpop.permute.xlu1 %2913  ;;  %v2911_v42 = vpop.permute.xlu0 %2910 }
 0xa57   :  { %v2915_v0 = vsel %vm76_vm0, %v2914_v9, %v7413_v35  ;;  %v2912_v3 = vsel %vm76_vm0, %v2911_v42, %v7416_v2 }
 0xa58   :  { %2946 = vrot.lane.b32.xlu1 %v2915_v0, %s4013_s21  ;;  %2944 = vrot.lane.b32.xlu0 %v2912_v3, %s4013_s21 }
 0xa8a   :  { %v2821_v50 = vpop.permute.xlu0 %2820 }
 0xa8b   :  { %v2852_v7 = vsel %vm76_vm0, %v2821_v50, %v7170_v48 }
 0xa8c   :  { %v2965_v37 = vadd.s32 4, %v2852_v7 }
 0xa8e   :  { %v2823_v45 = vpop.permute.xlu1 %2822  ;;  %2981 = vrot.lane.b32.xlu0 %v2965_v37, %s4022_s20  ;;  %v2825_v36 = vpop.permute.xlu0 %2824 }
 0xa8f   :  { %v2853_v46 = vsel %vm76_vm0, %v2823_v45, %v7181_v49  ;;  %v2854_v17 = vsel %vm76_vm0, %v2825_v36, %v7184_v27 }
 0xa90   :  { %v2966_v12 = vadd.s32 4, %v2853_v46  ;;  %v2967_v16 = vadd.s32 4, %v2854_v17 }
 0xa92   :  { %2983 = vrot.lane.b32.xlu1 %v2966_v12, %s4022_s20  ;;  %v2827_v19 = vpop.permute.xlu1 %2826  ;;  %2985 = vrot.lane.b32.xlu0 %v2967_v16, %s4022_s20  ;;  %v2829_v23 = vpop.permute.xlu0 %2828 }
 0xa93   :  { %v2855_v40 = vsel %vm76_vm0, %v2827_v19, %v7197_v25  ;;  %v2856_v63 = vsel %vm76_vm0, %v2829_v23, %v7200_v4 }
 0xa94   :  { %v2968_v24 = vadd.s32 4, %v2855_v40  ;;  %v2969_v21 = vadd.s32 4, %v2856_v63 }
 0xa96   :  { %2987 = vrot.lane.b32.xlu1 %v2968_v24, %s4022_s20  ;;  %v2831_v10 = vpop.permute.xlu1 %2830  ;;  %2989 = vrot.lane.b32.xlu0 %v2969_v21, %s4022_s20  ;;  %v2833_v13 = vpop.permute.xlu0 %2832 }
 0xa97   :  { %v2857_v44 = vsel %vm76_vm0, %v2831_v10, %v7213_v15  ;;  %v2858_v52 = vsel %vm76_vm0, %v2833_v13, %v7216_v57 }
 0xa98   :  { %v2970_v56 = vadd.s32 4, %v2857_v44  ;;  %v2971_v11 = vadd.s32 4, %v2858_v52 }
 0xa9a   :  { %2991 = vrot.lane.b32.xlu1 %v2970_v56, %s4022_s20  ;;  %v2835_v29 = vpop.permute.xlu1 %2834  ;;  %2993 = vrot.lane.b32.xlu0 %v2971_v11, %s4022_s20  ;;  %v2837_v39 = vpop.permute.xlu0 %2836 }
 0xa9b   :  { %v2859_v38 = vsel %vm76_vm0, %v2835_v29, %v7229_v62  ;;  %v2860_v47 = vsel %vm76_vm0, %v2837_v39, %v7232_v20 }
 0xa9c   :  { %v2972_v61 = vadd.s32 4, %v2859_v38  ;;  %v2973_v6 = vadd.s32 4, %v2860_v47 }
 0xa9e   :  { %2995 = vrot.lane.b32.xlu1 %v2972_v61, %s4022_s20  ;;  %v2839_v9 = vpop.permute.xlu1 %2838  ;;  %2997 = vrot.lane.b32.xlu0 %v2973_v6, %s4022_s20  ;;  %v2841_v42 = vpop.permute.xlu0 %2840 }
 0xa9f   :  { %v2861_v0 = vsel %vm76_vm0, %v2839_v9, %v7245_v33  ;;  %v2862_v3 = vsel %vm76_vm0, %v2841_v42, %v7248_v1 }
 0xaa0   :  { %v2974_v50 = vadd.s32 4, %v2861_v0  ;;  %v2975_v7 = vadd.s32 4, %v2862_v3 }
 0xaa2   :  { %2999 = vrot.lane.b32.xlu1 %v2974_v50, %s4022_s20  ;;  %v2843_v37 = vpop.permute.xlu1 %2842  ;;  %3001 = vrot.lane.b32.xlu0 %v2975_v7, %s4022_s20  ;;  %v2845_v45 = vpop.permute.xlu0 %2844 }
 0xaa3   :  { %v2863_v36 = vsel %vm76_vm0, %v2843_v37, %v7261_v8  ;;  %v2864_v46 = vsel %vm76_vm0, %v2845_v45, %v7264_v54 }
 0xaa4   :  { %v2976_v17 = vadd.s32 4, %v2863_v36  ;;  %v2977_v12 = vadd.s32 4, %v2864_v46 }
 0xaa6   :  { %3003 = vrot.lane.b32.xlu1 %v2976_v17, %s4022_s20  ;;  %v2847_v16 = vpop.permute.xlu1 %2846  ;;  %3005 = vrot.lane.b32.xlu0 %v2977_v12, %s4022_s20  ;;  %v2849_v19 = vpop.permute.xlu0 %2848 }
 0xaa7   :  { %v2865_v23 = vsel %vm76_vm0, %v2847_v16, %v7277_v59  ;;  %v2866_v40 = vsel %vm76_vm0, %v2849_v19, %v7280_v5 }
 0xaa8   :  { %v2978_v63 = vadd.s32 4, %v2865_v23  ;;  %v2979_v24 = vadd.s32 4, %v2866_v40 }
 0xaaa   :  { %3007 = vrot.lane.b32.xlu1 %v2978_v63, %s4022_s20  ;;  %v2851_v21 = vpop.permute.xlu1 %2850  ;;  %3009 = vrot.lane.b32.xlu0 %v2979_v24, %s4022_s20 }
 0xaab   :  { %v2867_v10 = vsel %vm76_vm0, %v2851_v21, %v7290_v31 }
 0xaac   :  { %v2980_v13 = vadd.s32 4, %v2867_v10 }
 0xaae   :  { %3011 = vrot.lane.b32.xlu1 %v2980_v13, %s4022_s20  ;;  %v2919_v44 = vpop.permute.xlu1 %2918  ;;  %v2917_v52 = vpop.permute.xlu0 %2916 }
 0xaaf   :  { %v2949_v56 = vsel %vm76_vm0, %v2919_v44, %v7301_v34  ;;  %v2948_v11 = vsel %vm76_vm0, %v2917_v52, %v7304_v43 }
 0xab0   :  { %v3062_v29 = vadd.s32 4, %v2949_v56  ;;  %v3061_v39 = vadd.s32 4, %v2948_v11 }
 0xab2   :  { %3079 = vrot.lane.b32.xlu1 %v3062_v29, %s4022_s20  ;;  %v2923_v38 = vpop.permute.xlu1 %2922  ;;  %3077 = vrot.lane.b32.xlu0 %v3061_v39, %s4022_s20  ;;  %v2921_v47 = vpop.permute.xlu0 %2920 }
 0xab3   :  { %v2951_v61 = vsel %vm76_vm0, %v2923_v38, %v7317_v55  ;;  %v2950_v6 = vsel %vm76_vm0, %v2921_v47, %v7320_v14 }
 0xab4   :  { %v3064_v9 = vadd.s32 4, %v2951_v61  ;;  %v3063_v42 = vadd.s32 4, %v2950_v6 }
 0xab6   :  { %3083 = vrot.lane.b32.xlu1 %v3064_v9, %s4022_s20  ;;  %v2927_v0 = vpop.permute.xlu1 %2926  ;;  %3081 = vrot.lane.b32.xlu0 %v3063_v42, %s4022_s20  ;;  %v2925_v3 = vpop.permute.xlu0 %2924 }
 0xab7   :  { %v2953_v50 = vsel %vm76_vm0, %v2927_v0, %v7333_v60  ;;  %v2952_v7 = vsel %vm76_vm0, %v2925_v3, %v7336_v18 }
 0xab8   :  { %v3066_v37 = vadd.s32 4, %v2953_v50  ;;  %v3065_v45 = vadd.s32 4, %v2952_v7 }
 0xaba   :  { %3087 = vrot.lane.b32.xlu1 %v3066_v37, %s4022_s20  ;;  %v2931_v36 = vpop.permute.xlu1 %2930  ;;  %3085 = vrot.lane.b32.xlu0 %v3065_v45, %s4022_s20  ;;  %v2929_v46 = vpop.permute.xlu0 %2928 }
 0xabb   :  { %v2955_v17 = vsel %vm76_vm0, %v2931_v36, %v7349_v22  ;;  %v2954_v12 = vsel %vm76_vm0, %v2929_v46, %v7352_v28 }
 0xabc   :  { %v3068_v16 = vadd.s32 4, %v2955_v17  ;;  %v3067_v19 = vadd.s32 4, %v2954_v12 }
 0xabe   :  { %3091 = vrot.lane.b32.xlu1 %v3068_v16, %s4022_s20  ;;  %v2935_v23 = vpop.permute.xlu1 %2934  ;;  %3089 = vrot.lane.b32.xlu0 %v3067_v19, %s4022_s20  ;;  %v2933_v40 = vpop.permute.xlu0 %2932 }
 0xabf   :  { %v2957_v63 = vsel %vm76_vm0, %v2935_v23, %v7365_v26  ;;  %v2956_v24 = vsel %vm76_vm0, %v2933_v40, %v7368_v53 }
 0xac0   :  { %v3070_v21 = vadd.s32 4, %v2957_v63  ;;  %v3069_v10 = vadd.s32 4, %v2956_v24 }
 0xac2   :  { %3095 = vrot.lane.b32.xlu1 %v3070_v21, %s4022_s20  ;;  %v2939_v13 = vpop.permute.xlu1 %2938  ;;  %3093 = vrot.lane.b32.xlu0 %v3069_v10, %s4022_s20  ;;  %v2937_v44 = vpop.permute.xlu0 %2936 }
 0xac3   :  { %v2959_v52 = vsel %vm76_vm0, %v2939_v13, %v7381_v30  ;;  %v2958_v56 = vsel %vm76_vm0, %v2937_v44, %v7384_v58 }
 0xac4   :  { %v3072_v11 = vadd.s32 4, %v2959_v52  ;;  %v3071_v29 = vadd.s32 4, %v2958_v56 }
 0xac6   :  { %3099 = vrot.lane.b32.xlu1 %v3072_v11, %s4022_s20  ;;  %v2943_v39 = vpop.permute.xlu1 %2942  ;;  %3097 = vrot.lane.b32.xlu0 %v3071_v29, %s4022_s20  ;;  %v2941_v38 = vpop.permute.xlu0 %2940 }
 0xac7   :  { %v2961_v47 = vsel %vm76_vm0, %v2943_v39, %v7397_v32  ;;  %v2960_v61 = vsel %vm76_vm0, %v2941_v38, %v7400_v41 }
 0xac8   :  { %v3074_v6 = vadd.s32 4, %v2961_v47  ;;  %v3073_v9 = vadd.s32 4, %v2960_v61 }
 0xaca   :  { %3103 = vrot.lane.b32.xlu1 %v3074_v6, %s4022_s20  ;;  %v2947_v42 = vpop.permute.xlu1 %2946  ;;  %3101 = vrot.lane.b32.xlu0 %v3073_v9, %s4022_s20  ;;  %v2945_v0 = vpop.permute.xlu0 %2944 }
 0xacb   :  { %v2963_v3 = vsel %vm76_vm0, %v2947_v42, %v7413_v35  ;;  %v2962_v50 = vsel %vm76_vm0, %v2945_v0, %v7416_v2 }
 0xacc   :  { %v3076_v7 = vadd.s32 4, %v2963_v3  ;;  %v3075_v37 = vadd.s32 4, %v2962_v50 }
 0xace   :  { %3107 = vrot.lane.b32.xlu1 %v3076_v7, %s4022_s20  ;;  %3105 = vrot.lane.b32.xlu0 %v3075_v37, %s4022_s20 }
 0xb00   :  { %v2982_v45 = vpop.permute.xlu0 %2981 }
 0xb01   :  { %v3013_v36 = vsel %vm2964_vm1, %v2982_v45, 160 }
 0xb02   :  { %vm3029_vm2 = vcmp.lt.s32.totalorder %v7170_v48, %v3013_v36 }
 0xb03   :  { %v7619_v46 = vsel %vm3029_vm2, %v7170_v48, %v3013_v36 }
 0xb04   :  { %v2984_v17 = vpop.permute.xlu1 %2983  ;;  %3157 = vrot.lane.b32.xlu0 %v7619_v46, %s4013_s21  ;;  %v2986_v12 = vpop.permute.xlu0 %2985 }
 0xb05   :  { %v3014_v16 = vsel %vm2964_vm1, %v2984_v17, 160  ;;  %v3015_v19 = vsel %vm2964_vm1, %v2986_v12, 160 }
 0xb06   :  { %vm3031_vm3 = vcmp.lt.s32.totalorder %v7181_v49, %v3014_v16  ;;  %vm3033_vm4 = vcmp.lt.s32.totalorder %v7184_v27, %v3015_v19 }
 0xb07   :  { %v7630_v23 = vsel %vm3031_vm3, %v7181_v49, %v3014_v16  ;;  %v7633_v48 = vsel %vm3033_vm4, %v7184_v27, %v3015_v19 }
 0xb08   :  { %3160 = vrot.lane.b32.xlu1 %v7630_v23, %s4013_s21  ;;  %v2988_v40 = vpop.permute.xlu1 %2987  ;;  %3163 = vrot.lane.b32.xlu0 %v7633_v48, %s4013_s21  ;;  %v2990_v63 = vpop.permute.xlu0 %2989 }
 0xb09   :  { %v3016_v24 = vsel %vm2964_vm1, %v2988_v40, 160  ;;  %v3017_v21 = vsel %vm2964_vm1, %v2990_v63, 160 }
 0xb0a   :  { %vm3035_vm5 = vcmp.lt.s32.totalorder %v7197_v25, %v3016_v24  ;;  %vm3037_vm6 = vcmp.lt.s32.totalorder %v7200_v4, %v3017_v21 }
 0xb0b   :  { %v7646_v49 = vsel %vm3035_vm5, %v7197_v25, %v3016_v24  ;;  %v7649_v27 = vsel %vm3037_vm6, %v7200_v4, %v3017_v21 }
 0xb0c   :  { %3166 = vrot.lane.b32.xlu1 %v7646_v49, %s4013_s21  ;;  %v2992_v10 = vpop.permute.xlu1 %2991  ;;  %3169 = vrot.lane.b32.xlu0 %v7649_v27, %s4013_s21  ;;  %v2994_v13 = vpop.permute.xlu0 %2993 }
 0xb0d   :  { %v3018_v44 = vsel %vm2964_vm1, %v2992_v10, 160  ;;  %v3019_v52 = vsel %vm2964_vm1, %v2994_v13, 160 }
 0xb0e   :  { %vm3039_vm7 = vcmp.lt.s32.totalorder %v7213_v15, %v3018_v44  ;;  %vm3041_vm8 = vcmp.lt.s32.totalorder %v7216_v57, %v3019_v52 }
 0xb0f   :  { %v7662_v25 = vsel %vm3039_vm7, %v7213_v15, %v3018_v44  ;;  %v7665_v4 = vsel %vm3041_vm8, %v7216_v57, %v3019_v52 }
 0xb10   :  { %3172 = vrot.lane.b32.xlu1 %v7662_v25, %s4013_s21  ;;  %v2996_v56 = vpop.permute.xlu1 %2995  ;;  %3175 = vrot.lane.b32.xlu0 %v7665_v4, %s4013_s21  ;;  %v2998_v11 = vpop.permute.xlu0 %2997 }
 0xb11   :  { %v3020_v29 = vsel %vm2964_vm1, %v2996_v56, 160  ;;  %v3021_v39 = vsel %vm2964_vm1, %v2998_v11, 160 }
 0xb12   :  { %vm3043_vm9 = vcmp.lt.s32.totalorder %v7229_v62, %v3020_v29  ;;  %vm3045_vm10 = vcmp.lt.s32.totalorder %v7232_v20, %v3021_v39 }
 0xb13   :  { %v7678_v15 = vsel %vm3043_vm9, %v7229_v62, %v3020_v29  ;;  %v7681_v57 = vsel %vm3045_vm10, %v7232_v20, %v3021_v39 }
 0xb14   :  { %3178 = vrot.lane.b32.xlu1 %v7678_v15, %s4013_s21  ;;  %v3000_v38 = vpop.permute.xlu1 %2999  ;;  %3181 = vrot.lane.b32.xlu0 %v7681_v57, %s4013_s21  ;;  %v3002_v47 = vpop.permute.xlu0 %3001 }
 0xb15   :  { %v3022_v61 = vsel %vm2964_vm1, %v3000_v38, 160  ;;  %v3023_v6 = vsel %vm2964_vm1, %v3002_v47, 160 }
 0xb16   :  { %vm3047_vm11 = vcmp.lt.s32.totalorder %v7245_v33, %v3022_v61  ;;  %vm3049_vm12 = vcmp.lt.s32.totalorder %v7248_v1, %v3023_v6 }
 0xb17   :  { %v7694_v62 = vsel %vm3047_vm11, %v7245_v33, %v3022_v61  ;;  %v7697_v20 = vsel %vm3049_vm12, %v7248_v1, %v3023_v6 }
 0xb18   :  { %3184 = vrot.lane.b32.xlu1 %v7694_v62, %s4013_s21  ;;  %v3004_v9 = vpop.permute.xlu1 %3003  ;;  %3187 = vrot.lane.b32.xlu0 %v7697_v20, %s4013_s21  ;;  %v3006_v42 = vpop.permute.xlu0 %3005 }
 0xb19   :  { %v3024_v0 = vsel %vm2964_vm1, %v3004_v9, 160  ;;  %v3025_v3 = vsel %vm2964_vm1, %v3006_v42, 160 }
 0xb1a   :  { %vm3051_vm13 = vcmp.lt.s32.totalorder %v7261_v8, %v3024_v0  ;;  %vm3053_vm14 = vcmp.lt.s32.totalorder %v7264_v54, %v3025_v3 }
 0xb1b   :  { %v7710_v33 = vsel %vm3051_vm13, %v7261_v8, %v3024_v0  ;;  %v7713_v1 = vsel %vm3053_vm14, %v7264_v54, %v3025_v3 }
 0xb1c   :  { %3190 = vrot.lane.b32.xlu1 %v7710_v33, %s4013_s21  ;;  %v3008_v50 = vpop.permute.xlu1 %3007  ;;  %3193 = vrot.lane.b32.xlu0 %v7713_v1, %s4013_s21  ;;  %v3010_v7 = vpop.permute.xlu0 %3009 }
 0xb1d   :  { %v3026_v37 = vsel %vm2964_vm1, %v3008_v50, 160  ;;  %v3027_v45 = vsel %vm2964_vm1, %v3010_v7, 160 }
 0xb1e   :  { %vm3055_vm15 = vcmp.lt.s32.totalorder %v7277_v59, %v3026_v37  ;;  %vm3057_vm2 = vcmp.lt.s32.totalorder %v7280_v5, %v3027_v45 }
 0xb1f   :  { %v7726_v8 = vsel %vm3055_vm15, %v7277_v59, %v3026_v37  ;;  %v7729_v54 = vsel %vm3057_vm2, %v7280_v5, %v3027_v45 }
 0xb20   :  { %3196 = vrot.lane.b32.xlu1 %v7726_v8, %s4013_s21  ;;  %v3012_v36 = vpop.permute.xlu1 %3011  ;;  %3199 = vrot.lane.b32.xlu0 %v7729_v54, %s4013_s21 }
 0xb21   :  { %v3028_v17 = vsel %vm2964_vm1, %v3012_v36, 160 }
 0xb22   :  { %vm3059_vm3 = vcmp.lt.s32.totalorder %v7290_v31, %v3028_v17 }
 0xb23   :  { %v7739_v12 = vsel %vm3059_vm3, %v7290_v31, %v3028_v17 }
 0xb24   :  { %3202 = vrot.lane.b32.xlu1 %v7739_v12, %s4013_s21  ;;  %v3080_v59 = vpop.permute.xlu1 %3079  ;;  %v3078_v5 = vpop.permute.xlu0 %3077 }
 0xb25   :  { %v3110_v16 = vsel %vm2964_vm1, %v3080_v59, 160  ;;  %v3109_v19 = vsel %vm2964_vm1, %v3078_v5, 160 }
 0xb26   :  { %vm3127_vm4 = vcmp.lt.s32.totalorder %v7301_v34, %v3110_v16  ;;  %vm3125_vm5 = vcmp.lt.s32.totalorder %v7304_v43, %v3109_v19 }
 0xb27   :  { %v7750_v40 = vsel %vm3127_vm4, %v7301_v34, %v3110_v16  ;;  %v7753_v31 = vsel %vm3125_vm5, %v7304_v43, %v3109_v19 }
 0xb28   :  { %3256 = vrot.lane.b32.xlu1 %v7750_v40, %s4013_s21  ;;  %v3084_v63 = vpop.permute.xlu1 %3083  ;;  %3253 = vrot.lane.b32.xlu0 %v7753_v31, %s4013_s21  ;;  %v3082_v24 = vpop.permute.xlu0 %3081 }
 0xb29   :  { %v3112_v21 = vsel %vm2964_vm1, %v3084_v63, 160  ;;  %v3111_v10 = vsel %vm2964_vm1, %v3082_v24, 160 }
 0xb2a   :  { %vm3131_vm6 = vcmp.lt.s32.totalorder %v7317_v55, %v3112_v21  ;;  %vm3129_vm7 = vcmp.lt.s32.totalorder %v7320_v14, %v3111_v10 }
 0xb2b   :  { %v7766_v34 = vsel %vm3131_vm6, %v7317_v55, %v3112_v21  ;;  %v7769_v43 = vsel %vm3129_vm7, %v7320_v14, %v3111_v10 }
 0xb2c   :  { %3262 = vrot.lane.b32.xlu1 %v7766_v34, %s4013_s21  ;;  %v3088_v13 = vpop.permute.xlu1 %3087  ;;  %3259 = vrot.lane.b32.xlu0 %v7769_v43, %s4013_s21  ;;  %v3086_v44 = vpop.permute.xlu0 %3085 }
 0xb2d   :  { %v3114_v52 = vsel %vm2964_vm1, %v3088_v13, 160  ;;  %v3113_v56 = vsel %vm2964_vm1, %v3086_v44, 160 }
 0xb2e   :  { %vm3135_vm8 = vcmp.lt.s32.totalorder %v7333_v60, %v3114_v52  ;;  %vm3133_vm9 = vcmp.lt.s32.totalorder %v7336_v18, %v3113_v56 }
 0xb2f   :  { %v7782_v55 = vsel %vm3135_vm8, %v7333_v60, %v3114_v52  ;;  %v7785_v14 = vsel %vm3133_vm9, %v7336_v18, %v3113_v56 }
 0xb30   :  { %3268 = vrot.lane.b32.xlu1 %v7782_v55, %s4013_s21  ;;  %v3092_v11 = vpop.permute.xlu1 %3091  ;;  %3265 = vrot.lane.b32.xlu0 %v7785_v14, %s4013_s21  ;;  %v3090_v29 = vpop.permute.xlu0 %3089 }
 0xb31   :  { %v3116_v39 = vsel %vm2964_vm1, %v3092_v11, 160  ;;  %v3115_v38 = vsel %vm2964_vm1, %v3090_v29, 160 }
 0xb32   :  { %vm3139_vm10 = vcmp.lt.s32.totalorder %v7349_v22, %v3116_v39  ;;  %vm3137_vm11 = vcmp.lt.s32.totalorder %v7352_v28, %v3115_v38 }
 0xb33   :  { %v7798_v60 = vsel %vm3139_vm10, %v7349_v22, %v3116_v39  ;;  %v7801_v18 = vsel %vm3137_vm11, %v7352_v28, %v3115_v38 }
 0xb34   :  { %3274 = vrot.lane.b32.xlu1 %v7798_v60, %s4013_s21  ;;  %v3096_v47 = vpop.permute.xlu1 %3095  ;;  %3271 = vrot.lane.b32.xlu0 %v7801_v18, %s4013_s21  ;;  %v3094_v61 = vpop.permute.xlu0 %3093 }
 0xb35   :  { %v3118_v6 = vsel %vm2964_vm1, %v3096_v47, 160  ;;  %v3117_v9 = vsel %vm2964_vm1, %v3094_v61, 160 }
 0xb36   :  { %vm3143_vm12 = vcmp.lt.s32.totalorder %v7365_v26, %v3118_v6  ;;  %vm3141_vm13 = vcmp.lt.s32.totalorder %v7368_v53, %v3117_v9 }
 0xb37   :  { %v7814_v22 = vsel %vm3143_vm12, %v7365_v26, %v3118_v6  ;;  %v7817_v28 = vsel %vm3141_vm13, %v7368_v53, %v3117_v9 }
 0xb38   :  { %3280 = vrot.lane.b32.xlu1 %v7814_v22, %s4013_s21  ;;  %v3100_v42 = vpop.permute.xlu1 %3099  ;;  %3277 = vrot.lane.b32.xlu0 %v7817_v28, %s4013_s21  ;;  %v3098_v0 = vpop.permute.xlu0 %3097 }
 0xb39   :  { %v3120_v3 = vsel %vm2964_vm1, %v3100_v42, 160  ;;  %v3119_v50 = vsel %vm2964_vm1, %v3098_v0, 160 }
 0xb3a   :  { %vm3147_vm14 = vcmp.lt.s32.totalorder %v7381_v30, %v3120_v3  ;;  %vm3145_vm15 = vcmp.lt.s32.totalorder %v7384_v58, %v3119_v50 }
 0xb3b   :  { %v7830_v26 = vsel %vm3147_vm14, %v7381_v30, %v3120_v3  ;;  %v7833_v53 = vsel %vm3145_vm15, %v7384_v58, %v3119_v50 }
 0xb3c   :  { %3286 = vrot.lane.b32.xlu1 %v7830_v26, %s4013_s21  ;;  %v3104_v7 = vpop.permute.xlu1 %3103  ;;  %3283 = vrot.lane.b32.xlu0 %v7833_v53, %s4013_s21  ;;  %v3102_v37 = vpop.permute.xlu0 %3101 }
 0xb3d   :  { %v3122_v45 = vsel %vm2964_vm1, %v3104_v7, 160  ;;  %v3121_v36 = vsel %vm2964_vm1, %v3102_v37, 160 }
 0xb3e   :  { %vm3151_vm2 = vcmp.lt.s32.totalorder %v7397_v32, %v3122_v45  ;;  %vm3149_vm3 = vcmp.lt.s32.totalorder %v7400_v41, %v3121_v36 }
 0xb3f   :  { %v7846_v30 = vsel %vm3151_vm2, %v7397_v32, %v3122_v45  ;;  %v7849_v58 = vsel %vm3149_vm3, %v7400_v41, %v3121_v36 }
 0xb40   :  { %3292 = vrot.lane.b32.xlu1 %v7846_v30, %s4013_s21  ;;  %v3108_v17 = vpop.permute.xlu1 %3107  ;;  %3289 = vrot.lane.b32.xlu0 %v7849_v58, %s4013_s21  ;;  %v3106_v59 = vpop.permute.xlu0 %3105 }
 0xb41   :  { %v3124_v5 = vsel %vm2964_vm1, %v3108_v17, 160  ;;  %v3123_v16 = vsel %vm2964_vm1, %v3106_v59, 160  ;;  %vm3349_vm1 = vcmp.lt.s32.totalorder %v4469_v51, 24 }
 0xb42   :  { %vm3155_vm4 = vcmp.lt.s32.totalorder %v7413_v35, %v3124_v5  ;;  %vm3153_vm5 = vcmp.lt.s32.totalorder %v7416_v2, %v3123_v16 }
 0xb43   :  { %v7862_v32 = vsel %vm3155_vm4, %v7413_v35, %v3124_v5  ;;  %v7865_v41 = vsel %vm3153_vm5, %v7416_v2, %v3123_v16 }
 0xb44   :  { %3298 = vrot.lane.b32.xlu1 %v7862_v32, %s4013_s21  ;;  %3295 = vrot.lane.b32.xlu0 %v7865_v41, %s4013_s21 }
 0xb76   :  { %v3158_v19 = vpop.permute.xlu0 %3157 }
 0xb77   :  { %v3159_v63 = vsel %vm76_vm0, %v3158_v19, %v7619_v46 }
 0xb78   :  { %3205 = vrot.lane.b32.xlu0 %v3159_v63, %s4013_s21 }
 0xb7a   :  { %v3161_v24 = vpop.permute.xlu1 %3160  ;;  %v3164_v21 = vpop.permute.xlu0 %3163 }
 0xb7b   :  { %v3162_v35 = vsel %vm76_vm0, %v3161_v24, %v7630_v23  ;;  %v3165_v2 = vsel %vm76_vm0, %v3164_v21, %v7633_v48 }
 0xb7c   :  { %3207 = vrot.lane.b32.xlu1 %v3162_v35, %s4013_s21  ;;  %3209 = vrot.lane.b32.xlu0 %v3165_v2, %s4013_s21 }
 0xb7e   :  { %v3167_v10 = vpop.permute.xlu1 %3166  ;;  %v3170_v13 = vpop.permute.xlu0 %3169 }
 0xb7f   :  { %v3168_v44 = vsel %vm76_vm0, %v3167_v10, %v7646_v49  ;;  %v3171_v52 = vsel %vm76_vm0, %v3170_v13, %v7649_v27 }
 0xb80   :  { %3211 = vrot.lane.b32.xlu1 %v3168_v44, %s4013_s21  ;;  %3213 = vrot.lane.b32.xlu0 %v3171_v52, %s4013_s21 }
 0xb82   :  { %v3173_v56 = vpop.permute.xlu1 %3172  ;;  %v3176_v11 = vpop.permute.xlu0 %3175 }
 0xb83   :  { %v3174_v29 = vsel %vm76_vm0, %v3173_v56, %v7662_v25  ;;  %v3177_v39 = vsel %vm76_vm0, %v3176_v11, %v7665_v4 }
 0xb84   :  { %3215 = vrot.lane.b32.xlu1 %v3174_v29, %s4013_s21  ;;  %3217 = vrot.lane.b32.xlu0 %v3177_v39, %s4013_s21 }
 0xb86   :  { %v3179_v38 = vpop.permute.xlu1 %3178  ;;  %v3182_v47 = vpop.permute.xlu0 %3181 }
 0xb87   :  { %v3180_v61 = vsel %vm76_vm0, %v3179_v38, %v7678_v15  ;;  %v3183_v6 = vsel %vm76_vm0, %v3182_v47, %v7681_v57 }
 0xb88   :  { %3219 = vrot.lane.b32.xlu1 %v3180_v61, %s4013_s21  ;;  %3221 = vrot.lane.b32.xlu0 %v3183_v6, %s4013_s21 }
 0xb8a   :  { %v3185_v9 = vpop.permute.xlu1 %3184  ;;  %v3188_v42 = vpop.permute.xlu0 %3187 }
 0xb8b   :  { %v3186_v0 = vsel %vm76_vm0, %v3185_v9, %v7694_v62  ;;  %v3189_v3 = vsel %vm76_vm0, %v3188_v42, %v7697_v20 }
 0xb8c   :  { %3223 = vrot.lane.b32.xlu1 %v3186_v0, %s4013_s21  ;;  %3225 = vrot.lane.b32.xlu0 %v3189_v3, %s4013_s21 }
 0xb8e   :  { %v3191_v50 = vpop.permute.xlu1 %3190  ;;  %v3194_v7 = vpop.permute.xlu0 %3193 }
 0xb8f   :  { %v3192_v37 = vsel %vm76_vm0, %v3191_v50, %v7710_v33  ;;  %v3195_v45 = vsel %vm76_vm0, %v3194_v7, %v7713_v1 }
 0xb90   :  { %3227 = vrot.lane.b32.xlu1 %v3192_v37, %s4013_s21  ;;  %3229 = vrot.lane.b32.xlu0 %v3195_v45, %s4013_s21 }
 0xb92   :  { %v3197_v36 = vpop.permute.xlu1 %3196  ;;  %v3200_v17 = vpop.permute.xlu0 %3199 }
 0xb93   :  { %v3198_v59 = vsel %vm76_vm0, %v3197_v36, %v7726_v8  ;;  %v3201_v5 = vsel %vm76_vm0, %v3200_v17, %v7729_v54 }
 0xb94   :  { %3231 = vrot.lane.b32.xlu1 %v3198_v59, %s4013_s21  ;;  %3233 = vrot.lane.b32.xlu0 %v3201_v5, %s4013_s21 }
 0xb96   :  { %v3203_v16 = vpop.permute.xlu1 %3202 }
 0xb97   :  { %v3204_v19 = vsel %vm76_vm0, %v3203_v16, %v7739_v12 }
 0xb98   :  { %3235 = vrot.lane.b32.xlu1 %v3204_v19, %s4013_s21 }
 0xb9a   :  { %v3257_v63 = vpop.permute.xlu1 %3256  ;;  %v3254_v24 = vpop.permute.xlu0 %3253 }
 0xb9b   :  { %v3258_v21 = vsel %vm76_vm0, %v3257_v63, %v7750_v40  ;;  %v3255_v35 = vsel %vm76_vm0, %v3254_v24, %v7753_v31 }
 0xb9c   :  { %3303 = vrot.lane.b32.xlu1 %v3258_v21, %s4013_s21  ;;  %3301 = vrot.lane.b32.xlu0 %v3255_v35, %s4013_s21 }
 0xb9e   :  { %v3263_v2 = vpop.permute.xlu1 %3262  ;;  %v3260_v10 = vpop.permute.xlu0 %3259 }
 0xb9f   :  { %v3264_v13 = vsel %vm76_vm0, %v3263_v2, %v7766_v34  ;;  %v3261_v44 = vsel %vm76_vm0, %v3260_v10, %v7769_v43 }
 0xba0   :  { %3307 = vrot.lane.b32.xlu1 %v3264_v13, %s4013_s21  ;;  %3305 = vrot.lane.b32.xlu0 %v3261_v44, %s4013_s21 }
 0xba2   :  { %v3269_v52 = vpop.permute.xlu1 %3268  ;;  %v3266_v56 = vpop.permute.xlu0 %3265 }
 0xba3   :  { %v3270_v11 = vsel %vm76_vm0, %v3269_v52, %v7782_v55  ;;  %v3267_v29 = vsel %vm76_vm0, %v3266_v56, %v7785_v14 }
 0xba4   :  { %3311 = vrot.lane.b32.xlu1 %v3270_v11, %s4013_s21  ;;  %3309 = vrot.lane.b32.xlu0 %v3267_v29, %s4013_s21 }
 0xba6   :  { %v3275_v39 = vpop.permute.xlu1 %3274  ;;  %v3272_v38 = vpop.permute.xlu0 %3271 }
 0xba7   :  { %v3276_v47 = vsel %vm76_vm0, %v3275_v39, %v7798_v60  ;;  %v3273_v61 = vsel %vm76_vm0, %v3272_v38, %v7801_v18 }
 0xba8   :  { %3315 = vrot.lane.b32.xlu1 %v3276_v47, %s4013_s21  ;;  %3313 = vrot.lane.b32.xlu0 %v3273_v61, %s4013_s21 }
 0xbaa   :  { %v3281_v6 = vpop.permute.xlu1 %3280  ;;  %v3278_v9 = vpop.permute.xlu0 %3277 }
 0xbab   :  { %v3282_v42 = vsel %vm76_vm0, %v3281_v6, %v7814_v22  ;;  %v3279_v0 = vsel %vm76_vm0, %v3278_v9, %v7817_v28 }
 0xbac   :  { %3319 = vrot.lane.b32.xlu1 %v3282_v42, %s4013_s21  ;;  %3317 = vrot.lane.b32.xlu0 %v3279_v0, %s4013_s21 }
 0xbae   :  { %v3287_v3 = vpop.permute.xlu1 %3286  ;;  %v3284_v50 = vpop.permute.xlu0 %3283 }
 0xbaf   :  { %v3288_v7 = vsel %vm76_vm0, %v3287_v3, %v7830_v26  ;;  %v3285_v37 = vsel %vm76_vm0, %v3284_v50, %v7833_v53 }
 0xbb0   :  { %3323 = vrot.lane.b32.xlu1 %v3288_v7, %s4013_s21  ;;  %3321 = vrot.lane.b32.xlu0 %v3285_v37, %s4013_s21 }
 0xbb2   :  { %v3293_v45 = vpop.permute.xlu1 %3292  ;;  %v3290_v36 = vpop.permute.xlu0 %3289 }
 0xbb3   :  { %v3294_v17 = vsel %vm76_vm0, %v3293_v45, %v7846_v30  ;;  %v3291_v59 = vsel %vm76_vm0, %v3290_v36, %v7849_v58 }
 0xbb4   :  { %3327 = vrot.lane.b32.xlu1 %v3294_v17, %s4013_s21  ;;  %3325 = vrot.lane.b32.xlu0 %v3291_v59, %s4013_s21 }
 0xbb6   :  { %v3299_v5 = vpop.permute.xlu1 %3298  ;;  %v3296_v16 = vpop.permute.xlu0 %3295 }
 0xbb7   :  { %v3300_v19 = vsel %vm76_vm0, %v3299_v5, %v7862_v32  ;;  %v3297_v63 = vsel %vm76_vm0, %v3296_v16, %v7865_v41 }
 0xbb8   :  { %3331 = vrot.lane.b32.xlu1 %v3300_v19, %s4013_s21  ;;  %3329 = vrot.lane.b32.xlu0 %v3297_v63, %s4013_s21 }
 0xbea   :  { %v3206_v24 = vpop.permute.xlu0 %3205 }
 0xbeb   :  { %v3237_v21 = vsel %vm76_vm0, %v3206_v24, %v7619_v46 }
 0xbec   :  { %v3350_v35 = vadd.s32 8, %v3237_v21 }
 0xbee   :  { %v3208_v2 = vpop.permute.xlu1 %3207  ;;  %3366 = vrot.lane.b32.xlu0 %v3350_v35, %s4023_s22  ;;  %v3210_v10 = vpop.permute.xlu0 %3209 }
 0xbef   :  { %v3238_v13 = vsel %vm76_vm0, %v3208_v2, %v7630_v23  ;;  %v3239_v44 = vsel %vm76_vm0, %v3210_v10, %v7633_v48 }
 0xbf0   :  { %v3351_v52 = vadd.s32 8, %v3238_v13  ;;  %v3352_v56 = vadd.s32 8, %v3239_v44 }
 0xbf2   :  { %3368 = vrot.lane.b32.xlu1 %v3351_v52, %s4023_s22  ;;  %v3212_v11 = vpop.permute.xlu1 %3211  ;;  %3370 = vrot.lane.b32.xlu0 %v3352_v56, %s4023_s22  ;;  %v3214_v29 = vpop.permute.xlu0 %3213 }
 0xbf3   :  { %v3240_v39 = vsel %vm76_vm0, %v3212_v11, %v7646_v49  ;;  %v3241_v38 = vsel %vm76_vm0, %v3214_v29, %v7649_v27 }
 0xbf4   :  { %v3353_v47 = vadd.s32 8, %v3240_v39  ;;  %v3354_v61 = vadd.s32 8, %v3241_v38 }
 0xbf6   :  { %3372 = vrot.lane.b32.xlu1 %v3353_v47, %s4023_s22  ;;  %v3216_v6 = vpop.permute.xlu1 %3215  ;;  %3374 = vrot.lane.b32.xlu0 %v3354_v61, %s4023_s22  ;;  %v3218_v9 = vpop.permute.xlu0 %3217 }
 0xbf7   :  { %v3242_v42 = vsel %vm76_vm0, %v3216_v6, %v7662_v25  ;;  %v3243_v0 = vsel %vm76_vm0, %v3218_v9, %v7665_v4 }
 0xbf8   :  { %v3355_v3 = vadd.s32 8, %v3242_v42  ;;  %v3356_v50 = vadd.s32 8, %v3243_v0 }
 0xbfa   :  { %3376 = vrot.lane.b32.xlu1 %v3355_v3, %s4023_s22  ;;  %v3220_v7 = vpop.permute.xlu1 %3219  ;;  %3378 = vrot.lane.b32.xlu0 %v3356_v50, %s4023_s22  ;;  %v3222_v37 = vpop.permute.xlu0 %3221 }
 0xbfb   :  { %v3244_v45 = vsel %vm76_vm0, %v3220_v7, %v7678_v15  ;;  %v3245_v36 = vsel %vm76_vm0, %v3222_v37, %v7681_v57 }
 0xbfc   :  { %v3357_v17 = vadd.s32 8, %v3244_v45  ;;  %v3358_v59 = vadd.s32 8, %v3245_v36 }
 0xbfe   :  { %3380 = vrot.lane.b32.xlu1 %v3357_v17, %s4023_s22  ;;  %v3224_v5 = vpop.permute.xlu1 %3223  ;;  %3382 = vrot.lane.b32.xlu0 %v3358_v59, %s4023_s22  ;;  %v3226_v16 = vpop.permute.xlu0 %3225 }
 0xbff   :  { %v3246_v19 = vsel %vm76_vm0, %v3224_v5, %v7694_v62  ;;  %v3247_v63 = vsel %vm76_vm0, %v3226_v16, %v7697_v20 }
 0xc00   :  { %v3359_v24 = vadd.s32 8, %v3246_v19  ;;  %v3360_v21 = vadd.s32 8, %v3247_v63 }
 0xc02   :  { %3384 = vrot.lane.b32.xlu1 %v3359_v24, %s4023_s22  ;;  %v3228_v35 = vpop.permute.xlu1 %3227  ;;  %3386 = vrot.lane.b32.xlu0 %v3360_v21, %s4023_s22  ;;  %v3230_v2 = vpop.permute.xlu0 %3229 }
 0xc03   :  { %v3248_v10 = vsel %vm76_vm0, %v3228_v35, %v7710_v33  ;;  %v3249_v13 = vsel %vm76_vm0, %v3230_v2, %v7713_v1 }
 0xc04   :  { %v3361_v44 = vadd.s32 8, %v3248_v10  ;;  %v3362_v52 = vadd.s32 8, %v3249_v13 }
 0xc06   :  { %3388 = vrot.lane.b32.xlu1 %v3361_v44, %s4023_s22  ;;  %v3232_v56 = vpop.permute.xlu1 %3231  ;;  %3390 = vrot.lane.b32.xlu0 %v3362_v52, %s4023_s22  ;;  %v3234_v11 = vpop.permute.xlu0 %3233 }
 0xc07   :  { %v3250_v29 = vsel %vm76_vm0, %v3232_v56, %v7726_v8  ;;  %v3251_v39 = vsel %vm76_vm0, %v3234_v11, %v7729_v54 }
 0xc08   :  { %v3363_v38 = vadd.s32 8, %v3250_v29  ;;  %v3364_v47 = vadd.s32 8, %v3251_v39 }
 0xc0a   :  { %3392 = vrot.lane.b32.xlu1 %v3363_v38, %s4023_s22  ;;  %v3236_v61 = vpop.permute.xlu1 %3235  ;;  %3394 = vrot.lane.b32.xlu0 %v3364_v47, %s4023_s22 }
 0xc0b   :  { %v3252_v6 = vsel %vm76_vm0, %v3236_v61, %v7739_v12 }
 0xc0c   :  { %v3365_v9 = vadd.s32 8, %v3252_v6 }
 0xc0e   :  { %3396 = vrot.lane.b32.xlu1 %v3365_v9, %s4023_s22  ;;  %v3304_v42 = vpop.permute.xlu1 %3303  ;;  %v3302_v0 = vpop.permute.xlu0 %3301 }
 0xc0f   :  { %v3334_v3 = vsel %vm76_vm0, %v3304_v42, %v7750_v40  ;;  %v3333_v50 = vsel %vm76_vm0, %v3302_v0, %v7753_v31 }
 0xc10   :  { %v3447_v7 = vadd.s32 8, %v3334_v3  ;;  %v3446_v37 = vadd.s32 8, %v3333_v50 }
 0xc12   :  { %3464 = vrot.lane.b32.xlu1 %v3447_v7, %s4023_s22  ;;  %v3308_v45 = vpop.permute.xlu1 %3307  ;;  %3462 = vrot.lane.b32.xlu0 %v3446_v37, %s4023_s22  ;;  %v3306_v36 = vpop.permute.xlu0 %3305 }
 0xc13   :  { %v3336_v17 = vsel %vm76_vm0, %v3308_v45, %v7766_v34  ;;  %v3335_v59 = vsel %vm76_vm0, %v3306_v36, %v7769_v43 }
 0xc14   :  { %v3449_v5 = vadd.s32 8, %v3336_v17  ;;  %v3448_v16 = vadd.s32 8, %v3335_v59 }
 0xc16   :  { %3468 = vrot.lane.b32.xlu1 %v3449_v5, %s4023_s22  ;;  %v3312_v19 = vpop.permute.xlu1 %3311  ;;  %3466 = vrot.lane.b32.xlu0 %v3448_v16, %s4023_s22  ;;  %v3310_v63 = vpop.permute.xlu0 %3309 }
 0xc17   :  { %v3338_v24 = vsel %vm76_vm0, %v3312_v19, %v7782_v55  ;;  %v3337_v21 = vsel %vm76_vm0, %v3310_v63, %v7785_v14 }
 0xc18   :  { %v3451_v35 = vadd.s32 8, %v3338_v24  ;;  %v3450_v2 = vadd.s32 8, %v3337_v21 }
 0xc1a   :  { %3472 = vrot.lane.b32.xlu1 %v3451_v35, %s4023_s22  ;;  %v3316_v10 = vpop.permute.xlu1 %3315  ;;  %3470 = vrot.lane.b32.xlu0 %v3450_v2, %s4023_s22  ;;  %v3314_v13 = vpop.permute.xlu0 %3313 }
 0xc1b   :  { %v3340_v44 = vsel %vm76_vm0, %v3316_v10, %v7798_v60  ;;  %v3339_v52 = vsel %vm76_vm0, %v3314_v13, %v7801_v18 }
 0xc1c   :  { %v3453_v56 = vadd.s32 8, %v3340_v44  ;;  %v3452_v11 = vadd.s32 8, %v3339_v52 }
 0xc1e   :  { %3476 = vrot.lane.b32.xlu1 %v3453_v56, %s4023_s22  ;;  %v3320_v29 = vpop.permute.xlu1 %3319  ;;  %3474 = vrot.lane.b32.xlu0 %v3452_v11, %s4023_s22  ;;  %v3318_v39 = vpop.permute.xlu0 %3317 }
 0xc1f   :  { %v3342_v38 = vsel %vm76_vm0, %v3320_v29, %v7814_v22  ;;  %v3341_v47 = vsel %vm76_vm0, %v3318_v39, %v7817_v28 }
 0xc20   :  { %v3455_v61 = vadd.s32 8, %v3342_v38  ;;  %v3454_v6 = vadd.s32 8, %v3341_v47 }
 0xc22   :  { %3480 = vrot.lane.b32.xlu1 %v3455_v61, %s4023_s22  ;;  %v3324_v9 = vpop.permute.xlu1 %3323  ;;  %3478 = vrot.lane.b32.xlu0 %v3454_v6, %s4023_s22  ;;  %v3322_v42 = vpop.permute.xlu0 %3321 }
 0xc23   :  { %v3344_v0 = vsel %vm76_vm0, %v3324_v9, %v7830_v26  ;;  %v3343_v3 = vsel %vm76_vm0, %v3322_v42, %v7833_v53 }
 0xc24   :  { %v3457_v50 = vadd.s32 8, %v3344_v0  ;;  %v3456_v7 = vadd.s32 8, %v3343_v3 }
 0xc26   :  { %3484 = vrot.lane.b32.xlu1 %v3457_v50, %s4023_s22  ;;  %v3328_v37 = vpop.permute.xlu1 %3327  ;;  %3482 = vrot.lane.b32.xlu0 %v3456_v7, %s4023_s22  ;;  %v3326_v45 = vpop.permute.xlu0 %3325 }
 0xc27   :  { %v3346_v36 = vsel %vm76_vm0, %v3328_v37, %v7846_v30  ;;  %v3345_v17 = vsel %vm76_vm0, %v3326_v45, %v7849_v58 }
 0xc28   :  { %v3459_v59 = vadd.s32 8, %v3346_v36  ;;  %v3458_v5 = vadd.s32 8, %v3345_v17 }
 0xc2a   :  { %3488 = vrot.lane.b32.xlu1 %v3459_v59, %s4023_s22  ;;  %v3332_v16 = vpop.permute.xlu1 %3331  ;;  %3486 = vrot.lane.b32.xlu0 %v3458_v5, %s4023_s22  ;;  %v3330_v19 = vpop.permute.xlu0 %3329 }
 0xc2b   :  { %v3348_v63 = vsel %vm76_vm0, %v3332_v16, %v7862_v32  ;;  %v3347_v24 = vsel %vm76_vm0, %v3330_v19, %v7865_v41 }
 0xc2c   :  { %v3461_v21 = vadd.s32 8, %v3348_v63  ;;  %v3460_v35 = vadd.s32 8, %v3347_v24 }
 0xc2e   :  { %3492 = vrot.lane.b32.xlu1 %v3461_v21, %s4023_s22  ;;  %3490 = vrot.lane.b32.xlu0 %v3460_v35, %s4023_s22 }
 0xc60   :  { %v3367_v2 = vpop.permute.xlu0 %3366 }
 0xc61   :  { %v3398_v10 = vsel %vm3349_vm1, %v3367_v2, 160 }
 0xc62   :  { %vm3414_vm6 = vcmp.lt.s32.totalorder %v7619_v46, %v3398_v10 }
 0xc63   :  { %v8068_v13 = vsel %vm3414_vm6, %v7619_v46, %v3398_v10 }
 0xc64   :  { %v3369_v44 = vpop.permute.xlu1 %3368  ;;  %3542 = vrot.lane.b32.xlu0 %v8068_v13, %s4013_s21  ;;  %v3371_v52 = vpop.permute.xlu0 %3370 }
 0xc65   :  { %v3399_v56 = vsel %vm3349_vm1, %v3369_v44, 160  ;;  %v3400_v11 = vsel %vm3349_vm1, %v3371_v52, 160 }
 0xc66   :  { %vm3416_vm7 = vcmp.lt.s32.totalorder %v7630_v23, %v3399_v56  ;;  %vm3418_vm8 = vcmp.lt.s32.totalorder %v7633_v48, %v3400_v11 }
 0xc67   :  { %v8079_v29 = vsel %vm3416_vm7, %v7630_v23, %v3399_v56  ;;  %v8082_v46 = vsel %vm3418_vm8, %v7633_v48, %v3400_v11 }
 0xc68   :  { %3545 = vrot.lane.b32.xlu1 %v8079_v29, %s4013_s21  ;;  %v3373_v39 = vpop.permute.xlu1 %3372  ;;  %3548 = vrot.lane.b32.xlu0 %v8082_v46, %s4013_s21  ;;  %v3375_v38 = vpop.permute.xlu0 %3374 }
 0xc69   :  { %v3401_v47 = vsel %vm3349_vm1, %v3373_v39, 160  ;;  %v3402_v61 = vsel %vm3349_vm1, %v3375_v38, 160 }
 0xc6a   :  { %vm3420_vm9 = vcmp.lt.s32.totalorder %v7646_v49, %v3401_v47  ;;  %vm3422_vm10 = vcmp.lt.s32.totalorder %v7649_v27, %v3402_v61 }
 0xc6b   :  { %v8095_v23 = vsel %vm3420_vm9, %v7646_v49, %v3401_v47  ;;  %v8098_v48 = vsel %vm3422_vm10, %v7649_v27, %v3402_v61 }
 0xc6c   :  { %3551 = vrot.lane.b32.xlu1 %v8095_v23, %s4013_s21  ;;  %v3377_v6 = vpop.permute.xlu1 %3376  ;;  %3554 = vrot.lane.b32.xlu0 %v8098_v48, %s4013_s21  ;;  %v3379_v9 = vpop.permute.xlu0 %3378 }
 0xc6d   :  { %v3403_v42 = vsel %vm3349_vm1, %v3377_v6, 160  ;;  %v3404_v0 = vsel %vm3349_vm1, %v3379_v9, 160 }
 0xc6e   :  { %vm3424_vm11 = vcmp.lt.s32.totalorder %v7662_v25, %v3403_v42  ;;  %vm3426_vm12 = vcmp.lt.s32.totalorder %v7665_v4, %v3404_v0 }
 0xc6f   :  { %v8111_v49 = vsel %vm3424_vm11, %v7662_v25, %v3403_v42  ;;  %v8114_v27 = vsel %vm3426_vm12, %v7665_v4, %v3404_v0 }
 0xc70   :  { %3557 = vrot.lane.b32.xlu1 %v8111_v49, %s4013_s21  ;;  %v3381_v3 = vpop.permute.xlu1 %3380  ;;  %3560 = vrot.lane.b32.xlu0 %v8114_v27, %s4013_s21  ;;  %v3383_v50 = vpop.permute.xlu0 %3382 }
 0xc71   :  { %v3405_v7 = vsel %vm3349_vm1, %v3381_v3, 160  ;;  %v3406_v37 = vsel %vm3349_vm1, %v3383_v50, 160 }
 0xc72   :  { %vm3428_vm13 = vcmp.lt.s32.totalorder %v7678_v15, %v3405_v7  ;;  %vm3430_vm14 = vcmp.lt.s32.totalorder %v7681_v57, %v3406_v37 }
 0xc73   :  { %v8127_v25 = vsel %vm3428_vm13, %v7678_v15, %v3405_v7  ;;  %v8130_v4 = vsel %vm3430_vm14, %v7681_v57, %v3406_v37 }
 0xc74   :  { %3563 = vrot.lane.b32.xlu1 %v8127_v25, %s4013_s21  ;;  %v3385_v45 = vpop.permute.xlu1 %3384  ;;  %3566 = vrot.lane.b32.xlu0 %v8130_v4, %s4013_s21  ;;  %v3387_v36 = vpop.permute.xlu0 %3386 }
 0xc75   :  { %v3407_v17 = vsel %vm3349_vm1, %v3385_v45, 160  ;;  %v3408_v59 = vsel %vm3349_vm1, %v3387_v36, 160 }
 0xc76   :  { %vm3432_vm15 = vcmp.lt.s32.totalorder %v7694_v62, %v3407_v17  ;;  %vm3434_vm2 = vcmp.lt.s32.totalorder %v7697_v20, %v3408_v59 }
 0xc77   :  { %v8143_v15 = vsel %vm3432_vm15, %v7694_v62, %v3407_v17  ;;  %v8146_v57 = vsel %vm3434_vm2, %v7697_v20, %v3408_v59 }
 0xc78   :  { %3569 = vrot.lane.b32.xlu1 %v8143_v15, %s4013_s21  ;;  %v3389_v5 = vpop.permute.xlu1 %3388  ;;  %3572 = vrot.lane.b32.xlu0 %v8146_v57, %s4013_s21  ;;  %v3391_v16 = vpop.permute.xlu0 %3390 }
 0xc79   :  { %v3409_v19 = vsel %vm3349_vm1, %v3389_v5, 160  ;;  %v3410_v63 = vsel %vm3349_vm1, %v3391_v16, 160 }
 0xc7a   :  { %vm3436_vm3 = vcmp.lt.s32.totalorder %v7710_v33, %v3409_v19  ;;  %vm3438_vm4 = vcmp.lt.s32.totalorder %v7713_v1, %v3410_v63 }
 0xc7b   :  { %v8159_v62 = vsel %vm3436_vm3, %v7710_v33, %v3409_v19  ;;  %v8162_v20 = vsel %vm3438_vm4, %v7713_v1, %v3410_v63 }
 0xc7c   :  { %3575 = vrot.lane.b32.xlu1 %v8159_v62, %s4013_s21  ;;  %v3393_v24 = vpop.permute.xlu1 %3392  ;;  %3578 = vrot.lane.b32.xlu0 %v8162_v20, %s4013_s21  ;;  %v3395_v21 = vpop.permute.xlu0 %3394 }
 0xc7d   :  { %v3411_v35 = vsel %vm3349_vm1, %v3393_v24, 160  ;;  %v3412_v2 = vsel %vm3349_vm1, %v3395_v21, 160 }
 0xc7e   :  { %vm3440_vm5 = vcmp.lt.s32.totalorder %v7726_v8, %v3411_v35  ;;  %vm3442_vm6 = vcmp.lt.s32.totalorder %v7729_v54, %v3412_v2 }
 0xc7f   :  { %v8175_v33 = vsel %vm3440_vm5, %v7726_v8, %v3411_v35  ;;  %v8178_v1 = vsel %vm3442_vm6, %v7729_v54, %v3412_v2 }
 0xc80   :  { %3581 = vrot.lane.b32.xlu1 %v8175_v33, %s4013_s21  ;;  %v3397_v10 = vpop.permute.xlu1 %3396  ;;  %3584 = vrot.lane.b32.xlu0 %v8178_v1, %s4013_s21 }
 0xc81   :  { %v3413_v44 = vsel %vm3349_vm1, %v3397_v10, 160 }
 0xc82   :  { %vm3444_vm7 = vcmp.lt.s32.totalorder %v7739_v12, %v3413_v44 }
 0xc83   :  { %v8188_v52 = vsel %vm3444_vm7, %v7739_v12, %v3413_v44 }
 0xc84   :  { %3587 = vrot.lane.b32.xlu1 %v8188_v52, %s4013_s21  ;;  %v3465_v8 = vpop.permute.xlu1 %3464  ;;  %v3463_v54 = vpop.permute.xlu0 %3462 }
 0xc85   :  { %v3495_v56 = vsel %vm3349_vm1, %v3465_v8, 160  ;;  %v3494_v11 = vsel %vm3349_vm1, %v3463_v54, 160 }
 0xc86   :  { %vm3512_vm8 = vcmp.lt.s32.totalorder %v7750_v40, %v3495_v56  ;;  %vm3510_vm9 = vcmp.lt.s32.totalorder %v7753_v31, %v3494_v11 }
 0xc87   :  { %v8199_v39 = vsel %vm3512_vm8, %v7750_v40, %v3495_v56  ;;  %v8202_v12 = vsel %vm3510_vm9, %v7753_v31, %v3494_v11 }
 0xc88   :  { %3641 = vrot.lane.b32.xlu1 %v8199_v39, %s4013_s21  ;;  %v3469_v38 = vpop.permute.xlu1 %3468  ;;  %3638 = vrot.lane.b32.xlu0 %v8202_v12, %s4013_s21  ;;  %v3467_v47 = vpop.permute.xlu0 %3466 }
 0xc89   :  { %v3497_v61 = vsel %vm3349_vm1, %v3469_v38, 160  ;;  %v3496_v6 = vsel %vm3349_vm1, %v3467_v47, 160 }
 0xc8a   :  { %vm3516_vm10 = vcmp.lt.s32.totalorder %v7766_v34, %v3497_v61  ;;  %vm3514_vm11 = vcmp.lt.s32.totalorder %v7769_v43, %v3496_v6 }
 0xc8b   :  { %v8215_v40 = vsel %vm3516_vm10, %v7766_v34, %v3497_v61  ;;  %v8218_v31 = vsel %vm3514_vm11, %v7769_v43, %v3496_v6  ;;  %vm3943_vm11 = vcmask 261120  }
 0xc8c   :  { %3647 = vrot.lane.b32.xlu1 %v8215_v40, %s4013_s21  ;;  %v3473_v9 = vpop.permute.xlu1 %3472  ;;  %3644 = vrot.lane.b32.xlu0 %v8218_v31, %s4013_s21  ;;  %v3471_v42 = vpop.permute.xlu0 %3470 }
 0xc8d   :  { %v3499_v0 = vsel %vm3349_vm1, %v3473_v9, 160  ;;  %v3498_v3 = vsel %vm3349_vm1, %v3471_v42, 160 }
 0xc8e   :  { %vm3520_vm12 = vcmp.lt.s32.totalorder %v7782_v55, %v3499_v0  ;;  %vm3518_vm13 = vcmp.lt.s32.totalorder %v7785_v14, %v3498_v3 }
 0xc8f   :  { %v8231_v34 = vsel %vm3520_vm12, %v7782_v55, %v3499_v0  ;;  %v8234_v43 = vsel %vm3518_vm13, %v7785_v14, %v3498_v3 }
 0xc90   :  { %3653 = vrot.lane.b32.xlu1 %v8231_v34, %s4013_s21  ;;  %v3477_v50 = vpop.permute.xlu1 %3476  ;;  %3650 = vrot.lane.b32.xlu0 %v8234_v43, %s4013_s21  ;;  %v3475_v7 = vpop.permute.xlu0 %3474 }
 0xc91   :  { %v3501_v37 = vsel %vm3349_vm1, %v3477_v50, 160  ;;  %v3500_v45 = vsel %vm3349_vm1, %v3475_v7, 160 }
 0xc92   :  { %vm3524_vm14 = vcmp.lt.s32.totalorder %v7798_v60, %v3501_v37  ;;  %vm3522_vm15 = vcmp.lt.s32.totalorder %v7801_v18, %v3500_v45 }
 0xc93   :  { %v8247_v55 = vsel %vm3524_vm14, %v7798_v60, %v3501_v37  ;;  %v8250_v14 = vsel %vm3522_vm15, %v7801_v18, %v3500_v45 }
 0xc94   :  { %3659 = vrot.lane.b32.xlu1 %v8247_v55, %s4013_s21  ;;  %v3481_v36 = vpop.permute.xlu1 %3480  ;;  %3656 = vrot.lane.b32.xlu0 %v8250_v14, %s4013_s21  ;;  %v3479_v17 = vpop.permute.xlu0 %3478 }
 0xc95   :  { %v3503_v59 = vsel %vm3349_vm1, %v3481_v36, 160  ;;  %v3502_v5 = vsel %vm3349_vm1, %v3479_v17, 160 }
 0xc96   :  { %vm3528_vm2 = vcmp.lt.s32.totalorder %v7814_v22, %v3503_v59  ;;  %vm3526_vm3 = vcmp.lt.s32.totalorder %v7817_v28, %v3502_v5 }
 0xc97   :  { %v8263_v60 = vsel %vm3528_vm2, %v7814_v22, %v3503_v59  ;;  %v8266_v18 = vsel %vm3526_vm3, %v7817_v28, %v3502_v5 }
 0xc98   :  { %3665 = vrot.lane.b32.xlu1 %v8263_v60, %s4013_s21  ;;  %v3485_v16 = vpop.permute.xlu1 %3484  ;;  %3662 = vrot.lane.b32.xlu0 %v8266_v18, %s4013_s21  ;;  %v3483_v19 = vpop.permute.xlu0 %3482 }
 0xc99   :  { %v3505_v63 = vsel %vm3349_vm1, %v3485_v16, 160  ;;  %v3504_v24 = vsel %vm3349_vm1, %v3483_v19, 160 }
 0xc9a   :  { %vm3532_vm4 = vcmp.lt.s32.totalorder %v7830_v26, %v3505_v63  ;;  %vm3530_vm5 = vcmp.lt.s32.totalorder %v7833_v53, %v3504_v24 }
 0xc9b   :  { %v8279_v22 = vsel %vm3532_vm4, %v7830_v26, %v3505_v63  ;;  %v8282_v28 = vsel %vm3530_vm5, %v7833_v53, %v3504_v24 }
 0xc9c   :  { %3671 = vrot.lane.b32.xlu1 %v8279_v22, %s4013_s21  ;;  %v3489_v21 = vpop.permute.xlu1 %3488  ;;  %3668 = vrot.lane.b32.xlu0 %v8282_v28, %s4013_s21  ;;  %v3487_v35 = vpop.permute.xlu0 %3486 }
 0xc9d   :  { %v3507_v2 = vsel %vm3349_vm1, %v3489_v21, 160  ;;  %v3506_v10 = vsel %vm3349_vm1, %v3487_v35, 160 }
 0xc9e   :  { %vm3536_vm6 = vcmp.lt.s32.totalorder %v7846_v30, %v3507_v2  ;;  %vm3534_vm7 = vcmp.lt.s32.totalorder %v7849_v58, %v3506_v10 }
 0xc9f   :  { %v8295_v26 = vsel %vm3536_vm6, %v7846_v30, %v3507_v2  ;;  %v8298_v53 = vsel %vm3534_vm7, %v7849_v58, %v3506_v10 }
 0xca0   :  { %3677 = vrot.lane.b32.xlu1 %v8295_v26, %s4013_s21  ;;  %v3493_v44 = vpop.permute.xlu1 %3492  ;;  %3674 = vrot.lane.b32.xlu0 %v8298_v53, %s4013_s21  ;;  %v3491_v8 = vpop.permute.xlu0 %3490 }
 0xca1   :  { %v3509_v54 = vsel %vm3349_vm1, %v3493_v44, 160  ;;  %v3508_v56 = vsel %vm3349_vm1, %v3491_v8, 160  ;;  %vm3734_vm1 = vcmp.lt.s32.totalorder %v4469_v51, 16 }
 0xca2   :  { %vm3540_vm8 = vcmp.lt.s32.totalorder %v7862_v32, %v3509_v54  ;;  %vm3538_vm9 = vcmp.lt.s32.totalorder %v7865_v41, %v3508_v56 }
 0xca3   :  { %v8311_v30 = vsel %vm3540_vm8, %v7862_v32, %v3509_v54  ;;  %v8314_v58 = vsel %vm3538_vm9, %v7865_v41, %v3508_v56 }
 0xca4   :  { %3683 = vrot.lane.b32.xlu1 %v8311_v30, %s4013_s21  ;;  %3680 = vrot.lane.b32.xlu0 %v8314_v58, %s4013_s21 }
 0xcd6   :  { %v3543_v11 = vpop.permute.xlu0 %3542 }
 0xcd7   :  { %v3544_v38 = vsel %vm76_vm0, %v3543_v11, %v8068_v13 }
 0xcd8   :  { %3590 = vrot.lane.b32.xlu0 %v3544_v38, %s4013_s21 }
 0xcda   :  { %v3546_v47 = vpop.permute.xlu1 %3545  ;;  %v3549_v61 = vpop.permute.xlu0 %3548 }
 0xcdb   :  { %v3547_v32 = vsel %vm76_vm0, %v3546_v47, %v8079_v29  ;;  %v3550_v41 = vsel %vm76_vm0, %v3549_v61, %v8082_v46 }
 0xcdc   :  { %3592 = vrot.lane.b32.xlu1 %v3547_v32, %s4013_s21  ;;  %3594 = vrot.lane.b32.xlu0 %v3550_v41, %s4013_s21 }
 0xcde   :  { %v3552_v6 = vpop.permute.xlu1 %3551  ;;  %v3555_v9 = vpop.permute.xlu0 %3554 }
 0xcdf   :  { %v3553_v42 = vsel %vm76_vm0, %v3552_v6, %v8095_v23  ;;  %v3556_v0 = vsel %vm76_vm0, %v3555_v9, %v8098_v48 }
 0xce0   :  { %3596 = vrot.lane.b32.xlu1 %v3553_v42, %s4013_s21  ;;  %3598 = vrot.lane.b32.xlu0 %v3556_v0, %s4013_s21 }
 0xce2   :  { %v3558_v3 = vpop.permute.xlu1 %3557  ;;  %v3561_v50 = vpop.permute.xlu0 %3560 }
 0xce3   :  { %v3559_v7 = vsel %vm76_vm0, %v3558_v3, %v8111_v49  ;;  %v3562_v37 = vsel %vm76_vm0, %v3561_v50, %v8114_v27 }
 0xce4   :  { %3600 = vrot.lane.b32.xlu1 %v3559_v7, %s4013_s21  ;;  %3602 = vrot.lane.b32.xlu0 %v3562_v37, %s4013_s21 }
 0xce6   :  { %v3564_v45 = vpop.permute.xlu1 %3563  ;;  %v3567_v36 = vpop.permute.xlu0 %3566 }
 0xce7   :  { %v3565_v17 = vsel %vm76_vm0, %v3564_v45, %v8127_v25  ;;  %v3568_v59 = vsel %vm76_vm0, %v3567_v36, %v8130_v4 }
 0xce8   :  { %3604 = vrot.lane.b32.xlu1 %v3565_v17, %s4013_s21  ;;  %3606 = vrot.lane.b32.xlu0 %v3568_v59, %s4013_s21 }
 0xcea   :  { %v3570_v5 = vpop.permute.xlu1 %3569  ;;  %v3573_v16 = vpop.permute.xlu0 %3572 }
 0xceb   :  { %v3571_v19 = vsel %vm76_vm0, %v3570_v5, %v8143_v15  ;;  %v3574_v63 = vsel %vm76_vm0, %v3573_v16, %v8146_v57 }
 0xcec   :  { %3608 = vrot.lane.b32.xlu1 %v3571_v19, %s4013_s21  ;;  %3610 = vrot.lane.b32.xlu0 %v3574_v63, %s4013_s21 }
 0xcee   :  { %v3576_v24 = vpop.permute.xlu1 %3575  ;;  %v3579_v21 = vpop.permute.xlu0 %3578 }
 0xcef   :  { %v3577_v35 = vsel %vm76_vm0, %v3576_v24, %v8159_v62  ;;  %v3580_v2 = vsel %vm76_vm0, %v3579_v21, %v8162_v20 }
 0xcf0   :  { %3612 = vrot.lane.b32.xlu1 %v3577_v35, %s4013_s21  ;;  %3614 = vrot.lane.b32.xlu0 %v3580_v2, %s4013_s21 }
 0xcf2   :  { %v3582_v10 = vpop.permute.xlu1 %3581  ;;  %v3585_v44 = vpop.permute.xlu0 %3584 }
 0xcf3   :  { %v3583_v8 = vsel %vm76_vm0, %v3582_v10, %v8175_v33  ;;  %v3586_v54 = vsel %vm76_vm0, %v3585_v44, %v8178_v1 }
 0xcf4   :  { %3616 = vrot.lane.b32.xlu1 %v3583_v8, %s4013_s21  ;;  %3618 = vrot.lane.b32.xlu0 %v3586_v54, %s4013_s21 }
 0xcf6   :  { %v3588_v56 = vpop.permute.xlu1 %3587 }
 0xcf7   :  { %v3589_v11 = vsel %vm76_vm0, %v3588_v56, %v8188_v52 }
 0xcf8   :  { %3620 = vrot.lane.b32.xlu1 %v3589_v11, %s4013_s21 }
 0xcfa   :  { %v3642_v38 = vpop.permute.xlu1 %3641  ;;  %v3639_v47 = vpop.permute.xlu0 %3638 }
 0xcfb   :  { %v3643_v61 = vsel %vm76_vm0, %v3642_v38, %v8199_v39  ;;  %v3640_v32 = vsel %vm76_vm0, %v3639_v47, %v8202_v12 }
 0xcfc   :  { %3688 = vrot.lane.b32.xlu1 %v3643_v61, %s4013_s21  ;;  %3686 = vrot.lane.b32.xlu0 %v3640_v32, %s4013_s21 }
 0xcfe   :  { %v3648_v41 = vpop.permute.xlu1 %3647  ;;  %v3645_v6 = vpop.permute.xlu0 %3644 }
 0xcff   :  { %v3649_v9 = vsel %vm76_vm0, %v3648_v41, %v8215_v40  ;;  %v3646_v42 = vsel %vm76_vm0, %v3645_v6, %v8218_v31 }
 0xd00   :  { %3692 = vrot.lane.b32.xlu1 %v3649_v9, %s4013_s21  ;;  %3690 = vrot.lane.b32.xlu0 %v3646_v42, %s4013_s21 }
 0xd02   :  { %v3654_v0 = vpop.permute.xlu1 %3653  ;;  %v3651_v3 = vpop.permute.xlu0 %3650 }
 0xd03   :  { %v3655_v50 = vsel %vm76_vm0, %v3654_v0, %v8231_v34  ;;  %v3652_v7 = vsel %vm76_vm0, %v3651_v3, %v8234_v43 }
 0xd04   :  { %3696 = vrot.lane.b32.xlu1 %v3655_v50, %s4013_s21  ;;  %3694 = vrot.lane.b32.xlu0 %v3652_v7, %s4013_s21 }
 0xd06   :  { %v3660_v37 = vpop.permute.xlu1 %3659  ;;  %v3657_v45 = vpop.permute.xlu0 %3656 }
 0xd07   :  { %v3661_v36 = vsel %vm76_vm0, %v3660_v37, %v8247_v55  ;;  %v3658_v17 = vsel %vm76_vm0, %v3657_v45, %v8250_v14 }
 0xd08   :  { %3700 = vrot.lane.b32.xlu1 %v3661_v36, %s4013_s21  ;;  %3698 = vrot.lane.b32.xlu0 %v3658_v17, %s4013_s21 }
 0xd0a   :  { %v3666_v59 = vpop.permute.xlu1 %3665  ;;  %v3663_v5 = vpop.permute.xlu0 %3662 }
 0xd0b   :  { %v3667_v16 = vsel %vm76_vm0, %v3666_v59, %v8263_v60  ;;  %v3664_v19 = vsel %vm76_vm0, %v3663_v5, %v8266_v18 }
 0xd0c   :  { %3704 = vrot.lane.b32.xlu1 %v3667_v16, %s4013_s21  ;;  %3702 = vrot.lane.b32.xlu0 %v3664_v19, %s4013_s21 }
 0xd0e   :  { %v3672_v63 = vpop.permute.xlu1 %3671  ;;  %v3669_v24 = vpop.permute.xlu0 %3668 }
 0xd0f   :  { %v3673_v21 = vsel %vm76_vm0, %v3672_v63, %v8279_v22  ;;  %v3670_v35 = vsel %vm76_vm0, %v3669_v24, %v8282_v28 }
 0xd10   :  { %3708 = vrot.lane.b32.xlu1 %v3673_v21, %s4013_s21  ;;  %3706 = vrot.lane.b32.xlu0 %v3670_v35, %s4013_s21 }
 0xd12   :  { %v3678_v2 = vpop.permute.xlu1 %3677  ;;  %v3675_v10 = vpop.permute.xlu0 %3674 }
 0xd13   :  { %v3679_v44 = vsel %vm76_vm0, %v3678_v2, %v8295_v26  ;;  %v3676_v8 = vsel %vm76_vm0, %v3675_v10, %v8298_v53 }
 0xd14   :  { %3712 = vrot.lane.b32.xlu1 %v3679_v44, %s4013_s21  ;;  %3710 = vrot.lane.b32.xlu0 %v3676_v8, %s4013_s21 }
 0xd16   :  { %v3684_v54 = vpop.permute.xlu1 %3683  ;;  %v3681_v56 = vpop.permute.xlu0 %3680 }
 0xd17   :  { %v3685_v11 = vsel %vm76_vm0, %v3684_v54, %v8311_v30  ;;  %v3682_v38 = vsel %vm76_vm0, %v3681_v56, %v8314_v58 }
 0xd18   :  { %3716 = vrot.lane.b32.xlu1 %v3685_v11, %s4013_s21  ;;  %3714 = vrot.lane.b32.xlu0 %v3682_v38, %s4013_s21 }
 0xd4a   :  { %v3591_v47 = vpop.permute.xlu0 %3590 }
 0xd4b   :  { %v3622_v61 = vsel %vm76_vm0, %v3591_v47, %v8068_v13 }
 0xd4c   :  { %v3735_v32 = vadd.s32 16, %v3622_v61 }
 0xd4e   :  { %v3593_v41 = vpop.permute.xlu1 %3592  ;;  %3751 = vrot.lane.b32.xlu0 %v3735_v32, %s4019_s17  ;;  %v3595_v6 = vpop.permute.xlu0 %3594 }
 0xd4f   :  { %v3623_v9 = vsel %vm76_vm0, %v3593_v41, %v8079_v29  ;;  %v3624_v42 = vsel %vm76_vm0, %v3595_v6, %v8082_v46 }
 0xd50   :  { %v3736_v0 = vadd.s32 16, %v3623_v9  ;;  %v3737_v3 = vadd.s32 16, %v3624_v42 }
 0xd52   :  { %3753 = vrot.lane.b32.xlu1 %v3736_v0, %s4019_s17  ;;  %v3597_v50 = vpop.permute.xlu1 %3596  ;;  %3755 = vrot.lane.b32.xlu0 %v3737_v3, %s4019_s17  ;;  %v3599_v7 = vpop.permute.xlu0 %3598 }
 0xd53   :  { %v3625_v37 = vsel %vm76_vm0, %v3597_v50, %v8095_v23  ;;  %v3626_v45 = vsel %vm76_vm0, %v3599_v7, %v8098_v48 }
 0xd54   :  { %v3738_v36 = vadd.s32 16, %v3625_v37  ;;  %v3739_v17 = vadd.s32 16, %v3626_v45 }
 0xd56   :  { %3757 = vrot.lane.b32.xlu1 %v3738_v36, %s4019_s17  ;;  %v3601_v59 = vpop.permute.xlu1 %3600  ;;  %3759 = vrot.lane.b32.xlu0 %v3739_v17, %s4019_s17  ;;  %v3603_v5 = vpop.permute.xlu0 %3602 }
 0xd57   :  { %v3627_v16 = vsel %vm76_vm0, %v3601_v59, %v8111_v49  ;;  %v3628_v19 = vsel %vm76_vm0, %v3603_v5, %v8114_v27 }
 0xd58   :  { %v3740_v63 = vadd.s32 16, %v3627_v16  ;;  %v3741_v24 = vadd.s32 16, %v3628_v19 }
 0xd5a   :  { %3761 = vrot.lane.b32.xlu1 %v3740_v63, %s4019_s17  ;;  %v3605_v21 = vpop.permute.xlu1 %3604  ;;  %3763 = vrot.lane.b32.xlu0 %v3741_v24, %s4019_s17  ;;  %v3607_v35 = vpop.permute.xlu0 %3606 }
 0xd5b   :  { %v3629_v2 = vsel %vm76_vm0, %v3605_v21, %v8127_v25  ;;  %v3630_v10 = vsel %vm76_vm0, %v3607_v35, %v8130_v4 }
 0xd5c   :  { %v3742_v44 = vadd.s32 16, %v3629_v2  ;;  %v3743_v8 = vadd.s32 16, %v3630_v10 }
 0xd5e   :  { %3765 = vrot.lane.b32.xlu1 %v3742_v44, %s4019_s17  ;;  %v3609_v54 = vpop.permute.xlu1 %3608  ;;  %3767 = vrot.lane.b32.xlu0 %v3743_v8, %s4019_s17  ;;  %v3611_v56 = vpop.permute.xlu0 %3610 }
 0xd5f   :  { %v3631_v11 = vsel %vm76_vm0, %v3609_v54, %v8143_v15  ;;  %v3632_v38 = vsel %vm76_vm0, %v3611_v56, %v8146_v57 }
 0xd60   :  { %v3744_v47 = vadd.s32 16, %v3631_v11  ;;  %v3745_v61 = vadd.s32 16, %v3632_v38 }
 0xd62   :  { %3769 = vrot.lane.b32.xlu1 %v3744_v47, %s4019_s17  ;;  %v3613_v32 = vpop.permute.xlu1 %3612  ;;  %3771 = vrot.lane.b32.xlu0 %v3745_v61, %s4019_s17  ;;  %v3615_v41 = vpop.permute.xlu0 %3614 }
 0xd63   :  { %v3633_v6 = vsel %vm76_vm0, %v3613_v32, %v8159_v62  ;;  %v3634_v9 = vsel %vm76_vm0, %v3615_v41, %v8162_v20 }
 0xd64   :  { %v3746_v42 = vadd.s32 16, %v3633_v6  ;;  %v3747_v0 = vadd.s32 16, %v3634_v9 }
 0xd66   :  { %3773 = vrot.lane.b32.xlu1 %v3746_v42, %s4019_s17  ;;  %v3617_v3 = vpop.permute.xlu1 %3616  ;;  %3775 = vrot.lane.b32.xlu0 %v3747_v0, %s4019_s17  ;;  %v3619_v50 = vpop.permute.xlu0 %3618 }
 0xd67   :  { %v3635_v7 = vsel %vm76_vm0, %v3617_v3, %v8175_v33  ;;  %v3636_v37 = vsel %vm76_vm0, %v3619_v50, %v8178_v1 }
 0xd68   :  { %v3748_v45 = vadd.s32 16, %v3635_v7  ;;  %v3749_v36 = vadd.s32 16, %v3636_v37 }
 0xd6a   :  { %3777 = vrot.lane.b32.xlu1 %v3748_v45, %s4019_s17  ;;  %v3621_v17 = vpop.permute.xlu1 %3620  ;;  %3779 = vrot.lane.b32.xlu0 %v3749_v36, %s4019_s17 }
 0xd6b   :  { %v3637_v59 = vsel %vm76_vm0, %v3621_v17, %v8188_v52 }
 0xd6c   :  { %v3750_v5 = vadd.s32 16, %v3637_v59 }
 0xd6e   :  { %3781 = vrot.lane.b32.xlu1 %v3750_v5, %s4019_s17  ;;  %v3689_v16 = vpop.permute.xlu1 %3688  ;;  %v3687_v19 = vpop.permute.xlu0 %3686 }
 0xd6f   :  { %v3719_v63 = vsel %vm76_vm0, %v3689_v16, %v8199_v39  ;;  %v3718_v24 = vsel %vm76_vm0, %v3687_v19, %v8202_v12 }
 0xd70   :  { %v3832_v21 = vadd.s32 16, %v3719_v63  ;;  %v3831_v35 = vadd.s32 16, %v3718_v24 }
 0xd72   :  { %3849 = vrot.lane.b32.xlu1 %v3832_v21, %s4019_s17  ;;  %v3693_v2 = vpop.permute.xlu1 %3692  ;;  %3847 = vrot.lane.b32.xlu0 %v3831_v35, %s4019_s17  ;;  %v3691_v10 = vpop.permute.xlu0 %3690 }
 0xd73   :  { %v3721_v44 = vsel %vm76_vm0, %v3693_v2, %v8215_v40  ;;  %v3720_v8 = vsel %vm76_vm0, %v3691_v10, %v8218_v31 }
 0xd74   :  { %v3834_v54 = vadd.s32 16, %v3721_v44  ;;  %v3833_v56 = vadd.s32 16, %v3720_v8 }
 0xd76   :  { %3853 = vrot.lane.b32.xlu1 %v3834_v54, %s4019_s17  ;;  %v3697_v11 = vpop.permute.xlu1 %3696  ;;  %3851 = vrot.lane.b32.xlu0 %v3833_v56, %s4019_s17  ;;  %v3695_v38 = vpop.permute.xlu0 %3694 }
 0xd77   :  { %v3723_v47 = vsel %vm76_vm0, %v3697_v11, %v8231_v34  ;;  %v3722_v61 = vsel %vm76_vm0, %v3695_v38, %v8234_v43 }
 0xd78   :  { %v3836_v32 = vadd.s32 16, %v3723_v47  ;;  %v3835_v41 = vadd.s32 16, %v3722_v61 }
 0xd7a   :  { %3857 = vrot.lane.b32.xlu1 %v3836_v32, %s4019_s17  ;;  %v3701_v6 = vpop.permute.xlu1 %3700  ;;  %3855 = vrot.lane.b32.xlu0 %v3835_v41, %s4019_s17  ;;  %v3699_v9 = vpop.permute.xlu0 %3698 }
 0xd7b   :  { %v3725_v42 = vsel %vm76_vm0, %v3701_v6, %v8247_v55  ;;  %v3724_v0 = vsel %vm76_vm0, %v3699_v9, %v8250_v14 }
 0xd7c   :  { %v3838_v3 = vadd.s32 16, %v3725_v42  ;;  %v3837_v50 = vadd.s32 16, %v3724_v0 }
 0xd7e   :  { %3861 = vrot.lane.b32.xlu1 %v3838_v3, %s4019_s17  ;;  %v3705_v7 = vpop.permute.xlu1 %3704  ;;  %3859 = vrot.lane.b32.xlu0 %v3837_v50, %s4019_s17  ;;  %v3703_v37 = vpop.permute.xlu0 %3702 }
 0xd7f   :  { %v3727_v45 = vsel %vm76_vm0, %v3705_v7, %v8263_v60  ;;  %v3726_v36 = vsel %vm76_vm0, %v3703_v37, %v8266_v18 }
 0xd80   :  { %v3840_v17 = vadd.s32 16, %v3727_v45  ;;  %v3839_v59 = vadd.s32 16, %v3726_v36 }
 0xd82   :  { %3865 = vrot.lane.b32.xlu1 %v3840_v17, %s4019_s17  ;;  %v3709_v5 = vpop.permute.xlu1 %3708  ;;  %3863 = vrot.lane.b32.xlu0 %v3839_v59, %s4019_s17  ;;  %v3707_v16 = vpop.permute.xlu0 %3706 }
 0xd83   :  { %v3729_v19 = vsel %vm76_vm0, %v3709_v5, %v8279_v22  ;;  %v3728_v63 = vsel %vm76_vm0, %v3707_v16, %v8282_v28 }
 0xd84   :  { %v3842_v24 = vadd.s32 16, %v3729_v19  ;;  %v3841_v21 = vadd.s32 16, %v3728_v63 }
 0xd86   :  { %3869 = vrot.lane.b32.xlu1 %v3842_v24, %s4019_s17  ;;  %v3713_v35 = vpop.permute.xlu1 %3712  ;;  %3867 = vrot.lane.b32.xlu0 %v3841_v21, %s4019_s17  ;;  %v3711_v2 = vpop.permute.xlu0 %3710 }
 0xd87   :  { %v3731_v10 = vsel %vm76_vm0, %v3713_v35, %v8295_v26  ;;  %v3730_v44 = vsel %vm76_vm0, %v3711_v2, %v8298_v53 }
 0xd88   :  { %v3844_v8 = vadd.s32 16, %v3731_v10  ;;  %v3843_v54 = vadd.s32 16, %v3730_v44 }
 0xd8a   :  { %3873 = vrot.lane.b32.xlu1 %v3844_v8, %s4019_s17  ;;  %v3717_v56 = vpop.permute.xlu1 %3716  ;;  %3871 = vrot.lane.b32.xlu0 %v3843_v54, %s4019_s17  ;;  %v3715_v11 = vpop.permute.xlu0 %3714 }
 0xd8b   :  { %v3733_v38 = vsel %vm76_vm0, %v3717_v56, %v8311_v30  ;;  %v3732_v47 = vsel %vm76_vm0, %v3715_v11, %v8314_v58 }
 0xd8c   :  { %v3846_v61 = vadd.s32 16, %v3733_v38  ;;  %v3845_v32 = vadd.s32 16, %v3732_v47 }
 0xd8e   :  { %3877 = vrot.lane.b32.xlu1 %v3846_v61, %s4019_s17  ;;  %3875 = vrot.lane.b32.xlu0 %v3845_v32, %s4019_s17 }
 0xdc0   :  { %v3752_v41 = vpop.permute.xlu0 %3751 }
 0xdc1   :  { %v3783_v6 = vsel %vm3734_vm1, %v3752_v41, 160 }
 0xdc2   :  { %vm3799_vm10 = vcmp.lt.s32.totalorder %v8068_v13, %v3783_v6 }
 0xdc3   :  { %v3800_v9 = vsel %vm3799_vm10, %v8068_v13, %v3783_v6 }
 0xdc4   :  { %v3927_v42 = vmul.u32 %v3800_v9, %v3800_v9  ;;  %v3754_v0 = vpop.permute.xlu1 %3753  ;;  %v3756_v3 = vpop.permute.xlu0 %3755 }
 0xdc5   :  { %v3784_v50 = vsel %vm3734_vm1, %v3754_v0, 160  ;;  %v3785_v7 = vsel %vm3734_vm1, %v3756_v3, 160 }
 0xdc6   :  { %3944 = vst.msk [vmem:[%s8770_s1] sm:$0xff] %vm3943_vm11, %v3927_v42  ;;  %vm3801_vm0 = vcmp.lt.s32.totalorder %v8079_v29, %v3784_v50  ;;  %vm3803_vm12 = vcmp.lt.s32.totalorder %v8082_v46, %v3785_v7 }
 0xdc7   :  { %v3802_v13 = vsel %vm3801_vm0, %v8079_v29, %v3784_v50  ;;  %v3804_v37 = vsel %vm3803_vm12, %v8082_v46, %v3785_v7 }
 0xdc8   :  { %v3928_v45 = vmul.u32 %v3802_v13, %v3802_v13  ;;  %v3929_v36 = vmul.u32 %v3804_v37, %v3804_v37  ;;  %v3758_v17 = vpop.permute.xlu1 %3757  ;;  %v3760_v59 = vpop.permute.xlu0 %3759 }
 0xdc9   :  { %v3786_v5 = vsel %vm3734_vm1, %v3758_v17, 160  ;;  %v3787_v16 = vsel %vm3734_vm1, %v3760_v59, 160 }
 0xdca   :  { %3945 = vst.msk [vmem:[%s8770_s1 + $0x8] sm:$0xff] %vm3943_vm11, %v3928_v45  ;;  %3946 = vst.msk [vmem:[%s8770_s1 + $0x10] sm:$0xff] %vm3943_vm11, %v3929_v36  ;;  %vm3805_vm13 = vcmp.lt.s32.totalorder %v8095_v23, %v3786_v5  ;;  %vm3807_vm14 = vcmp.lt.s32.totalorder %v8098_v48, %v3787_v16 }
 0xdcb   :  { %v3806_v29 = vsel %vm3805_vm13, %v8095_v23, %v3786_v5  ;;  %v3808_v46 = vsel %vm3807_vm14, %v8098_v48, %v3787_v16 }
 0xdcc   :  { %v3930_v19 = vmul.u32 %v3806_v29, %v3806_v29  ;;  %v3931_v63 = vmul.u32 %v3808_v46, %v3808_v46  ;;  %v3762_v24 = vpop.permute.xlu1 %3761  ;;  %v3764_v21 = vpop.permute.xlu0 %3763 }
 0xdcd   :  { %v3788_v35 = vsel %vm3734_vm1, %v3762_v24, 160  ;;  %v3789_v2 = vsel %vm3734_vm1, %v3764_v21, 160 }
 0xdce   :  { %3947 = vst.msk [vmem:[%s8770_s1 + $0x18] sm:$0xff] %vm3943_vm11, %v3930_v19  ;;  %3948 = vst.msk [vmem:[%s8770_s1 + $0x20] sm:$0xff] %vm3943_vm11, %v3931_v63  ;;  %vm3809_vm15 = vcmp.lt.s32.totalorder %v8111_v49, %v3788_v35  ;;  %vm3811_vm2 = vcmp.lt.s32.totalorder %v8114_v27, %v3789_v2 }
 0xdcf   :  { %v3810_v23 = vsel %vm3809_vm15, %v8111_v49, %v3788_v35  ;;  %v3812_v48 = vsel %vm3811_vm2, %v8114_v27, %v3789_v2 }
 0xdd0   :  { %v3932_v10 = vmul.u32 %v3810_v23, %v3810_v23  ;;  %v3933_v44 = vmul.u32 %v3812_v48, %v3812_v48  ;;  %v3766_v8 = vpop.permute.xlu1 %3765  ;;  %v3768_v54 = vpop.permute.xlu0 %3767 }
 0xdd1   :  { %v3790_v56 = vsel %vm3734_vm1, %v3766_v8, 160  ;;  %v3791_v11 = vsel %vm3734_vm1, %v3768_v54, 160 }
 0xdd2   :  { %3949 = vst.msk [vmem:[%s8770_s1 + $0x28] sm:$0xff] %vm3943_vm11, %v3932_v10  ;;  %3950 = vst.msk [vmem:[%s8770_s1 + $0x30] sm:$0xff] %vm3943_vm11, %v3933_v44  ;;  %vm3813_vm3 = vcmp.lt.s32.totalorder %v8127_v25, %v3790_v56  ;;  %vm3815_vm4 = vcmp.lt.s32.totalorder %v8130_v4, %v3791_v11 }
 0xdd3   :  { %v3814_v49 = vsel %vm3813_vm3, %v8127_v25, %v3790_v56  ;;  %v3816_v27 = vsel %vm3815_vm4, %v8130_v4, %v3791_v11 }
 0xdd4   :  { %v3934_v38 = vmul.u32 %v3814_v49, %v3814_v49  ;;  %v3935_v47 = vmul.u32 %v3816_v27, %v3816_v27  ;;  %v3770_v61 = vpop.permute.xlu1 %3769  ;;  %v3772_v32 = vpop.permute.xlu0 %3771 }
 0xdd5   :  { %v3792_v41 = vsel %vm3734_vm1, %v3770_v61, 160  ;;  %v3793_v6 = vsel %vm3734_vm1, %v3772_v32, 160 }
 0xdd6   :  { %3951 = vst.msk [vmem:[%s8770_s1 + $0x38] sm:$0xff] %vm3943_vm11, %v3934_v38  ;;  %3952 = vst.msk [vmem:[%s8770_s1 + $0x40] sm:$0xff] %vm3943_vm11, %v3935_v47  ;;  %vm3817_vm5 = vcmp.lt.s32.totalorder %v8143_v15, %v3792_v41  ;;  %vm3819_vm6 = vcmp.lt.s32.totalorder %v8146_v57, %v3793_v6 }
 0xdd7   :  { %v3818_v25 = vsel %vm3817_vm5, %v8143_v15, %v3792_v41  ;;  %v3820_v4 = vsel %vm3819_vm6, %v8146_v57, %v3793_v6 }
 0xdd8   :  { %v3936_v9 = vmul.u32 %v3818_v25, %v3818_v25  ;;  %v3937_v42 = vmul.u32 %v3820_v4, %v3820_v4  ;;  %v3774_v0 = vpop.permute.xlu1 %3773  ;;  %v3776_v3 = vpop.permute.xlu0 %3775 }
 0xdd9   :  { %v3794_v50 = vsel %vm3734_vm1, %v3774_v0, 160  ;;  %v3795_v7 = vsel %vm3734_vm1, %v3776_v3, 160 }
 0xdda   :  { %3953 = vst.msk [vmem:[%s8770_s1 + $0x48] sm:$0xff] %vm3943_vm11, %v3936_v9  ;;  %3954 = vst.msk [vmem:[%s8770_s1 + $0x50] sm:$0xff] %vm3943_vm11, %v3937_v42  ;;  %vm3821_vm7 = vcmp.lt.s32.totalorder %v8159_v62, %v3794_v50  ;;  %vm3823_vm8 = vcmp.lt.s32.totalorder %v8162_v20, %v3795_v7 }
 0xddb   :  { %v3822_v15 = vsel %vm3821_vm7, %v8159_v62, %v3794_v50  ;;  %v3824_v57 = vsel %vm3823_vm8, %v8162_v20, %v3795_v7 }
 0xddc   :  { %v3938_v13 = vmul.u32 %v3822_v15, %v3822_v15  ;;  %v3939_v37 = vmul.u32 %v3824_v57, %v3824_v57  ;;  %v3778_v45 = vpop.permute.xlu1 %3777  ;;  %v3780_v36 = vpop.permute.xlu0 %3779 }
 0xddd   :  { %v3796_v17 = vsel %vm3734_vm1, %v3778_v45, 160  ;;  %v3797_v59 = vsel %vm3734_vm1, %v3780_v36, 160 }
 0xdde   :  { %3955 = vst.msk [vmem:[%s8770_s1 + $0x58] sm:$0xff] %vm3943_vm11, %v3938_v13  ;;  %3956 = vst.msk [vmem:[%s8770_s1 + $0x60] sm:$0xff] %vm3943_vm11, %v3939_v37  ;;  %vm3825_vm9 = vcmp.lt.s32.totalorder %v8175_v33, %v3796_v17  ;;  %vm3827_vm10 = vcmp.lt.s32.totalorder %v8178_v1, %v3797_v59 }
 0xddf   :  { %v3826_v62 = vsel %vm3825_vm9, %v8175_v33, %v3796_v17  ;;  %v3828_v20 = vsel %vm3827_vm10, %v8178_v1, %v3797_v59 }
 0xde0   :  { %v3940_v5 = vmul.u32 %v3826_v62, %v3826_v62  ;;  %v3941_v16 = vmul.u32 %v3828_v20, %v3828_v20  ;;  %v3782_v29 = vpop.permute.xlu1 %3781 }
 0xde1   :  { %v3798_v46 = vsel %vm3734_vm1, %v3782_v29, 160 }
 0xde2   :  { %3957 = vst.msk [vmem:[%s8770_s1 + $0x68] sm:$0xff] %vm3943_vm11, %v3940_v5  ;;  %3958 = vst.msk [vmem:[%s8770_s1 + $0x70] sm:$0xff] %vm3943_vm11, %v3941_v16  ;;  %vm3829_vm0 = vcmp.lt.s32.totalorder %v8188_v52, %v3798_v46 }
 0xde3   :  { %v3830_v33 = vsel %vm3829_vm0, %v8188_v52, %v3798_v46 }
 0xde4   :  { %v3942_v1 = vmul.u32 %v3830_v33, %v3830_v33  ;;  %v3850_v19 = vpop.permute.xlu1 %3849  ;;  %v3848_v63 = vpop.permute.xlu0 %3847 }
 0xde5   :  { %v3880_v24 = vsel %vm3734_vm1, %v3850_v19, 160  ;;  %v3879_v21 = vsel %vm3734_vm1, %v3848_v63, 160 }
 0xde6   :  { %3959 = vst.msk [vmem:[%s8770_s1 + $0x78] sm:$0xff] %vm3943_vm11, %v3942_v1  ;;  %vm3897_vm12 = vcmp.lt.s32.totalorder %v8199_v39, %v3880_v24  ;;  %vm3895_vm13 = vcmp.lt.s32.totalorder %v8202_v12, %v3879_v21 }
 0xde7   :  { %v3898_v52 = vsel %vm3897_vm12, %v8199_v39, %v3880_v24  ;;  %v3896_v35 = vsel %vm3895_vm13, %v8202_v12, %v3879_v21 }
 0xde8   :  { %v3961_v2 = vmul.u32 %v3898_v52, %v3898_v52  ;;  %v3960_v23 = vmul.u32 %v3896_v35, %v3896_v35  ;;  %v3854_v48 = vpop.permute.xlu1 %3853  ;;  %v3852_v10 = vpop.permute.xlu0 %3851 }
 0xde9   :  { %v3882_v44 = vsel %vm3734_vm1, %v3854_v48, 160  ;;  %v3881_v8 = vsel %vm3734_vm1, %v3852_v10, 160 }
 0xdea   :  { %3977 = vst.msk [vmem:[%s8771_s2 + $0x8] sm:$0xff] %vm3943_vm11, %v3961_v2  ;;  %3976 = vst.msk [vmem:[%s8771_s2] sm:$0xff] %vm3943_vm11, %v3960_v23  ;;  %vm3901_vm14 = vcmp.lt.s32.totalorder %v8215_v40, %v3882_v44  ;;  %vm3899_vm15 = vcmp.lt.s32.totalorder %v8218_v31, %v3881_v8 }
 0xdeb   :  { %v3902_v39 = vsel %vm3901_vm14, %v8215_v40, %v3882_v44  ;;  %v3900_v12 = vsel %vm3899_vm15, %v8218_v31, %v3881_v8 }
 0xdec   :  { %v3963_v54 = vmul.u32 %v3902_v39, %v3902_v39  ;;  %v3962_v56 = vmul.u32 %v3900_v12, %v3900_v12  ;;  %v3858_v11 = vpop.permute.xlu1 %3857  ;;  %v3856_v49 = vpop.permute.xlu0 %3855 }
 0xded   :  { %v3884_v27 = vsel %vm3734_vm1, %v3858_v11, 160  ;;  %v3883_v38 = vsel %vm3734_vm1, %v3856_v49, 160 }
 0xdee   :  { %3979 = vst.msk [vmem:[%s8771_s2 + $0x18] sm:$0xff] %vm3943_vm11, %v3963_v54  ;;  %3978 = vst.msk [vmem:[%s8771_s2 + $0x10] sm:$0xff] %vm3943_vm11, %v3962_v56  ;;  %vm3905_vm2 = vcmp.lt.s32.totalorder %v8231_v34, %v3884_v27  ;;  %vm3903_vm3 = vcmp.lt.s32.totalorder %v8234_v43, %v3883_v38 }
 0xdef   :  { %v3906_v40 = vsel %vm3905_vm2, %v8231_v34, %v3884_v27  ;;  %v3904_v31 = vsel %vm3903_vm3, %v8234_v43, %v3883_v38 }
 0xdf0   :  { %v3965_v47 = vmul.u32 %v3906_v40, %v3906_v40  ;;  %v3964_v61 = vmul.u32 %v3904_v31, %v3904_v31  ;;  %v3862_v32 = vpop.permute.xlu1 %3861  ;;  %v3860_v41 = vpop.permute.xlu0 %3859 }
 0xdf1   :  { %v3886_v6 = vsel %vm3734_vm1, %v3862_v32, 160  ;;  %v3885_v25 = vsel %vm3734_vm1, %v3860_v41, 160 }
 0xdf2   :  { %3981 = vst.msk [vmem:[%s8771_s2 + $0x28] sm:$0xff] %vm3943_vm11, %v3965_v47  ;;  %3980 = vst.msk [vmem:[%s8771_s2 + $0x20] sm:$0xff] %vm3943_vm11, %v3964_v61  ;;  %vm3909_vm4 = vcmp.lt.s32.totalorder %v8247_v55, %v3886_v6  ;;  %vm3907_vm5 = vcmp.lt.s32.totalorder %v8250_v14, %v3885_v25 }
 0xdf3   :  { %v3910_v34 = vsel %vm3909_vm4, %v8247_v55, %v3886_v6  ;;  %v3908_v43 = vsel %vm3907_vm5, %v8250_v14, %v3885_v25 }
 0xdf4   :  { %v3967_v4 = vmul.u32 %v3910_v34, %v3910_v34  ;;  %v3966_v9 = vmul.u32 %v3908_v43, %v3908_v43  ;;  %v3866_v42 = vpop.permute.xlu1 %3865  ;;  %v3864_v0 = vpop.permute.xlu0 %3863 }
 0xdf5   :  { %v3888_v3 = vsel %vm3734_vm1, %v3866_v42, 160  ;;  %v3887_v50 = vsel %vm3734_vm1, %v3864_v0, 160 }
 0xdf6   :  { %3983 = vst.msk [vmem:[%s8771_s2 + $0x38] sm:$0xff] %vm3943_vm11, %v3967_v4  ;;  %3982 = vst.msk [vmem:[%s8771_s2 + $0x30] sm:$0xff] %vm3943_vm11, %v3966_v9  ;;  %vm3913_vm6 = vcmp.lt.s32.totalorder %v8263_v60, %v3888_v3  ;;  %vm3911_vm7 = vcmp.lt.s32.totalorder %v8266_v18, %v3887_v50 }
 0xdf7   :  { %v3914_v55 = vsel %vm3913_vm6, %v8263_v60, %v3888_v3  ;;  %v3912_v14 = vsel %vm3911_vm7, %v8266_v18, %v3887_v50 }
 0xdf8   :  { %v3969_v7 = vmul.u32 %v3914_v55, %v3914_v55  ;;  %v3968_v15 = vmul.u32 %v3912_v14, %v3912_v14  ;;  %v3870_v57 = vpop.permute.xlu1 %3869  ;;  %v3868_v13 = vpop.permute.xlu0 %3867 }
 0xdf9   :  { %v3890_v37 = vsel %vm3734_vm1, %v3870_v57, 160  ;;  %v3889_v45 = vsel %vm3734_vm1, %v3868_v13, 160 }
 0xdfa   :  { %3985 = vst.msk [vmem:[%s8771_s2 + $0x48] sm:$0xff] %vm3943_vm11, %v3969_v7  ;;  %3984 = vst.msk [vmem:[%s8771_s2 + $0x40] sm:$0xff] %vm3943_vm11, %v3968_v15  ;;  %vm3917_vm8 = vcmp.lt.s32.totalorder %v8279_v22, %v3890_v37  ;;  %vm3915_vm9 = vcmp.lt.s32.totalorder %v8282_v28, %v3889_v45 }
 0xdfb   :  { %v3918_v60 = vsel %vm3917_vm8, %v8279_v22, %v3890_v37  ;;  %v3916_v18 = vsel %vm3915_vm9, %v8282_v28, %v3889_v45 }
 0xdfc   :  { %v3971_v36 = vmul.u32 %v3918_v60, %v3918_v60  ;;  %v3970_v17 = vmul.u32 %v3916_v18, %v3916_v18  ;;  %v3874_v59 = vpop.permute.xlu1 %3873  ;;  %v3872_v62 = vpop.permute.xlu0 %3871 }
 0xdfd   :  { %v3892_v20 = vsel %vm3734_vm1, %v3874_v59, 160  ;;  %v3891_v5 = vsel %vm3734_vm1, %v3872_v62, 160 }
 0xdfe   :  { %3987 = vst.msk [vmem:[%s8771_s2 + $0x58] sm:$0xff] %vm3943_vm11, %v3971_v36  ;;  %3986 = vst.msk [vmem:[%s8771_s2 + $0x50] sm:$0xff] %vm3943_vm11, %v3970_v17  ;;  %vm3921_vm10 = vcmp.lt.s32.totalorder %v8295_v26, %v3892_v20  ;;  %vm3919_vm0 = vcmp.lt.s32.totalorder %v8298_v53, %v3891_v5 }
 0xdff   :  { %v3922_v22 = vsel %vm3921_vm10, %v8295_v26, %v3892_v20  ;;  %v3920_v28 = vsel %vm3919_vm0, %v8298_v53, %v3891_v5 }
 0xe00   :  { %v3973_v16 = vmul.u32 %v3922_v22, %v3922_v22  ;;  %v3972_v29 = vmul.u32 %v3920_v28, %v3920_v28  ;;  %v3878_v46 = vpop.permute.xlu1 %3877  ;;  %v3876_v33 = vpop.permute.xlu0 %3875 }
 0xe01   :  { %v3894_v1 = vsel %vm3734_vm1, %v3878_v46, 160  ;;  %v3893_v19 = vsel %vm3734_vm1, %v3876_v33, 160 }
 0xe02   :  { %3989 = vst.msk [vmem:[%s8771_s2 + $0x68] sm:$0xff] %vm3943_vm11, %v3973_v16  ;;  %3988 = vst.msk [vmem:[%s8771_s2 + $0x60] sm:$0xff] %vm3943_vm11, %v3972_v29  ;;  %vm3925_vm12 = vcmp.lt.s32.totalorder %v8311_v30, %v3894_v1  ;;  %vm3923_vm13 = vcmp.lt.s32.totalorder %v8314_v58, %v3893_v19 }
 0xe03   :  { %v3926_v26 = vsel %vm3925_vm12, %v8311_v30, %v3894_v1  ;;  %v3924_v53 = vsel %vm3923_vm13, %v8314_v58, %v3893_v19 }
 0xe04   :  { %v3975_v51 = vmul.u32 %v3926_v26, %v3926_v26  ;;  %v3974_v63 = vmul.u32 %v3924_v53, %v3924_v53 }
 0xe06   :  { %3991 = vst.msk [vmem:[%s8771_s2 + $0x78] sm:$0xff] %vm3943_vm11, %v3975_v51  ;;  %3990 = vst.msk [vmem:[%s8771_s2 + $0x70] sm:$0xff] %vm3943_vm11, %v3974_v63 }

</bundles_post_ra>
